<compile_context>
chip_gen: v7x
topology: tpu7x:2x2x1
jax: 0.10.0
libtpu: 0.0.40
codegen_flags: <defaults>
</compile_context>

<pallas_src>
import functools

import jax
import jax.numpy as jnp
from jax.experimental import pallas as pl
from jax.experimental.pallas import tpu as pltpu

EPS = 1e-5


# --------------------------- Pallas kernels ---------------------------------

def _full_spec(shape):
    nd = len(shape)
    return pl.BlockSpec(shape, lambda i, _nd=nd: (0,) * _nd)


def pallas_conv_bn_act(patches, w, gamma, beta, *, relu, residual=None):
    """Single im2col matmul + fused training-mode BatchNorm (+ReLU) (+residual).

    patches: (M, K) bf16 with M = N*Ho*Wo (batch folded into the matmul M dim),
    w: (K, Co) bf16, gamma/beta: (1, Co) f32, residual: (M, Co) f32 or None.
    Returns (M, Co) f32.
    """
    M, K = patches.shape
    Co = w.shape[1]
    has_res = residual is not None

    def kernel(*refs):
        if has_res:
            p_ref, w_ref, g_ref, b_ref, r_ref, o_ref = refs
        else:
            p_ref, w_ref, g_ref, b_ref, o_ref = refs
        # One big-K matmul on the MXU: bf16 operands, f32 accumulation.
        y = jnp.dot(p_ref[...], w_ref[...], preferred_element_type=jnp.float32)
        # BatchNorm2d (training mode) fused in-kernel: the rows of `y` are the
        # full (N, Ho, Wo) extent, so per-channel batch stats are exact.
        mean = jnp.mean(y, axis=0, keepdims=True)
        var = jnp.mean(jnp.square(y - mean), axis=0, keepdims=True)  # biased
        scale = g_ref[...] * jax.lax.rsqrt(var + EPS)
        shift = b_ref[...] - mean * scale
        y = y * scale + shift                      # elementwise kept in f32
        if relu:
            y = jnp.maximum(y, 0.0)
        if has_res:                                # ResnetBlock: out = x + f(x)
            y = y + r_ref[...]
        o_ref[...] = y

    args = [patches, w, gamma, beta] + ([residual] if has_res else [])
    # Shapes here are tiny (<2 MiB), so a single full-array block is used.
    # NOTE (v7x): BN stats are per-channel, so a 2-way "parallel" split over
    # Cout would keep both TensorCores busy without changing the math; with
    # Cout as small as 3-64 in this config it is not worth the lane waste.
    return pl.pallas_call(
        kernel,
        out_shape=jax.ShapeDtypeStruct((M, Co), jnp.float32),
        grid=(1,),
        in_specs=[_full_spec(a.shape) for a in args],
        out_specs=_full_spec((M, Co)),
        compiler_params=pltpu.CompilerParams(
            dimension_semantics=("arbitrary",)),
    )(*args)


def pallas_conv_bias_tanh(patches, w, bias):
    """Head conv: tanh(patches @ w + bias).  patches/w bf16, bias f32."""
    M, K = patches.shape
    Co = w.shape[1]

    def kernel(p_ref, w_ref, b_ref, o_ref):
        y = jnp.dot(p_ref[...], w_ref[...], preferred_element_type=jnp.float32)
        o_ref[...] = jnp.tanh(y + b_ref[...])

    return pl.pallas_call(
        kernel,
        out_shape=jax.ShapeDtypeStruct((M, Co), jnp.float32),
        grid=(1,),
        in_specs=[_full_spec(patches.shape), _full_spec(w.shape),
                  _full_spec(bias.shape)],
        out_specs=_full_spec((M, Co)),
        compiler_params=pltpu.CompilerParams(
            dimension_semantics=("arbitrary",)),
    )(patches, w, bias)


# ------------------------------ JAX glue -------------------------------------

def _im2col(xp, kh, kw, stride=1):
    """xp: (N, Hp, Wp, C) already padded.  Returns bf16 (N*Ho*Wo, kh*kw*C)."""
    N, Hp, Wp, C = xp.shape
    Ho = (Hp - kh) // stride + 1
    Wo = (Wp - kw) // stride + 1
    cols = [xp[:, i:i + stride * (Ho - 1) + 1:stride,
               j:j + stride * (Wo - 1) + 1:stride, :]
            for i in range(kh) for j in range(kw)]
    patches = jnp.concatenate(cols, axis=-1).reshape(N * Ho * Wo, kh * kw * C)
    return patches.astype(jnp.bfloat16), (N, Ho, Wo)


def conv_layer(x, w, gamma, beta, *, ksize, stride, pad, pad_mode="zero",
               relu=True, residual=None):
    """Conv(ksize, stride, pad, bias=False) + BN [+ReLU] [+residual]."""
    if pad > 0:
        mode = "reflect" if pad_mode == "reflect" else "constant"
        xp = jnp.pad(x, ((0, 0), (pad, pad), (pad, pad), (0, 0)), mode=mode)
    else:
        xp = x
    patches, (N, Ho, Wo) = _im2col(xp, ksize, ksize, stride)
    Co = w.shape[-1]
    w2 = w.reshape(-1, Co).astype(jnp.bfloat16)
    res = None if residual is None else residual.reshape(N * Ho * Wo, Co)
    y = pallas_conv_bn_act(patches, w2, gamma.reshape(1, Co),
                           beta.reshape(1, Co), relu=relu, residual=res)
    return y.reshape(N, Ho, Wo, Co)


def conv_transpose_layer(x, w_eq, gamma, beta):
    """ConvTranspose2d(Cin, Co, 3, stride=2, padding=1, output_padding=1,
    bias=False) + BN + ReLU, via zero-insertion + equivalent 3x3 conv.
    w_eq: (3, 3, Cin, Co) equivalent-conv weight."""
    N, H, W, C = x.shape
    z = jnp.zeros((N, 2 * H - 1, 2 * W - 1, C), x.dtype)
    z = z.at[:, ::2, ::2, :].set(x)                       # dilate by stride 2
    zp = jnp.pad(z, ((0, 0), (1, 2), (1, 2), (0, 0)))     # (k-1-p), (k-1-p+op)
    patches, (N, Ho, Wo) = _im2col(zp, 3, 3, 1)           # Ho = 2H, Wo = 2W
    Co = w_eq.shape[-1]
    y = pallas_conv_bn_act(patches, w_eq.reshape(-1, Co).astype(jnp.bfloat16),
                           gamma.reshape(1, Co), beta.reshape(1, Co), relu=True)
    return y.reshape(N, Ho, Wo, Co)


def resnet_block(x, p):
    """out = x + BN(Conv3x3(ReLU(BN(Conv3x3(reflect_pad(x)))))), reflect pad."""
    h = conv_layer(x, p["w1"], p["g1"], p["b1"], ksize=3, stride=1, pad=1,
                   pad_mode="reflect", relu=True)
    return conv_layer(h, p["w2"], p["g2"], p["b2"], ksize=3, stride=1, pad=1,
                      pad_mode="reflect", relu=False, residual=x)


def resnet_generator(x_nchw, params):
    x = jnp.transpose(x_nchw, (0, 2, 3, 1)).astype(jnp.float32)  # NCHW -> NHWC

    # ReflectionPad2d(3) + Conv7x7(input_nc, ngf, bias=False) + BN + ReLU
    y = conv_layer(x, params["stem"]["w"], params["stem"]["g"],
                   params["stem"]["b"], ksize=7, stride=1, pad=3,
                   pad_mode="reflect", relu=True)

    # 2 x downsampling: Conv3x3 stride 2 pad 1 + BN + ReLU
    for p in params["down"]:
        y = conv_layer(y, p["w"], p["g"], p["b"], ksize=3, stride=2, pad=1,
                       pad_mode="zero", relu=True)

    # n_blocks x ResnetBlock (reflect padding, no dropout)
    for p in params["blocks"]:
        y = resnet_block(y, p)

    # 2 x upsampling: ConvTranspose3x3 s2 p1 op1 + BN + ReLU
    for p in params["up"]:
        y = conv_transpose_layer(y, p["w"], p["g"], p["b"])

    # ReflectionPad2d(3) + Conv7x7(ngf, output_nc, bias=True) + Tanh
    yp = jnp.pad(y, ((0, 0), (3, 3), (3, 3), (0, 0)), mode="reflect")
    patches, (N, Ho, Wo) = _im2col(yp, 7, 7, 1)
    Co = params["out_w"].shape[-1]
    out = pallas_conv_bias_tanh(
        patches, params["out_w"].reshape(-1, Co).astype(jnp.bfloat16),
        params["out_b"].reshape(1, Co))
    out = out.reshape(N, Ho, Wo, Co)
    return jnp.transpose(out, (0, 3, 1, 2))               # NHWC -> NCHW


def init_params(key, input_nc, output_nc, ngf, n_blocks):
    keys = iter(jax.random.split(key, 8 + 4 * n_blocks + 16))

    def conv_w(shape):
        fan_in = shape[0] * shape[1] * shape[2]
        bound = fan_in ** -0.5
        return jax.random.uniform(next(keys), shape, jnp.float32, -bound, bound)

    def bn(c):
        return jnp.ones((c,), jnp.float32), jnp.zeros((c,), jnp.float32)

    params = {}
    g, b = bn(ngf)
    params["stem"] = dict(w=conv_w((7, 7, input_nc, ngf)), g=g, b=b)

    params["down"] = []
    c = ngf
    for _ in range(2):
        g, b = bn(c * 2)
        params["down"].append(dict(w=conv_w((3, 3, c, c * 2)), g=g, b=b))
        c *= 2

    params["blocks"] = []
    for _ in range(n_blocks):
        g1, b1 = bn(c)
        g2, b2 = bn(c)
        params["blocks"].append(dict(w1=conv_w((3, 3, c, c)), g1=g1, b1=b1,
                                     w2=conv_w((3, 3, c, c)), g2=g2, b2=b2))

    params["up"] = []
    for _ in range(2):
        co = c // 2
        g, b = bn(co)
        # equivalent-conv weight of ConvTranspose2d(c, co, 3, s=2, p=1, op=1)
        params["up"].append(dict(w=conv_w((3, 3, c, co)), g=g, b=b))
        c = co

    params["out_w"] = conv_w((7, 7, ngf, output_nc))
    params["out_b"] = jnp.zeros((output_nc,), jnp.float32)
    return params


# --------------------------------- main --------------------------------------

if __name__ == "__main__":
    key = jax.random.PRNGKey(0)
    k_x, k_p = jax.random.split(key)

    # Small-but-consistent shapes: ngf=16, 2 resnet blocks, 16x16 input
    # (bottleneck is 4x4 with 4*ngf channels).
    N, input_nc, output_nc, ngf, n_blocks = 2, 3, 3, 16, 2
    H = W = 16

    x = jax.random.normal(k_x, (N, input_nc, H, W), jnp.float32)
    params = init_params(k_p, input_nc, output_nc, ngf, n_blocks)

    out = jax.jit(resnet_generator)(x, params)
    out = jax.block_until_ready(out)

    assert out.shape == (N, output_nc, H, W), out.shape
    assert bool(jnp.all(jnp.isfinite(out)))
    assert bool(jnp.all(jnp.abs(out) <= 1.0))   # tanh output range
    print("KERNEL_OK")
</pallas_src>

<mosaic_0001>
module attributes {stable_mosaic.version = 11 : i64} {
  func.func @kernel(%arg0: i32, %arg1: memref<512x147xbf16, #tpu.memory_space<vmem>>, %arg2: memref<147x16xbf16, #tpu.memory_space<vmem>>, %arg3: memref<1x16xf32, #tpu.memory_space<vmem>>, %arg4: memref<1x16xf32, #tpu.memory_space<vmem>>, %arg5: memref<512x16xf32, #tpu.memory_space<vmem>>) attributes {dimension_semantics = [#tpu.dimension_semantics<arbitrary>], iteration_bounds = array<i64: 1>, scalar_prefetch = 0 : i64, scratch_operands = 0 : i64, tpu.core_type = #tpu.core_type<tc>, window_params = [{pipeline_mode = #tpu.pipeline_mode<synchronous>, transform_indices = @transform_0, window_bounds = array<i64: 512, 147>}, {pipeline_mode = #tpu.pipeline_mode<synchronous>, transform_indices = @transform_1, window_bounds = array<i64: 147, 16>}, {pipeline_mode = #tpu.pipeline_mode<synchronous>, transform_indices = @transform_2, window_bounds = array<i64: 1, 16>}, {pipeline_mode = #tpu.pipeline_mode<synchronous>, transform_indices = @transform_3, window_bounds = array<i64: 1, 16>}, {pipeline_mode = #tpu.pipeline_mode<synchronous>, transform_indices = @transform_4, window_bounds = array<i64: 512, 16>}]} {
    %c0 = arith.constant 0 : index
    %c0_0 = arith.constant 0 : index
    %0 = vector.load %arg1[%c0, %c0_0] : memref<512x147xbf16, #tpu.memory_space<vmem>>, vector<512x147xbf16>
    %c0_1 = arith.constant 0 : index
    %c0_2 = arith.constant 0 : index
    %1 = vector.load %arg2[%c0_1, %c0_2] : memref<147x16xbf16, #tpu.memory_space<vmem>>, vector<147x16xbf16>
    %cst = arith.constant dense<0.000000e+00> : vector<512x16xf32>
    %2 = tpu.matmul %0, %1, %cst {dimension_numbers = #tpu.dot_dimension_numbers<[1], [0], [0], [1], [0, 0, 1, 1], [], []>} : vector<512x147xbf16>, vector<147x16xbf16>, vector<512x16xf32> -> vector<512x16xf32>
    %cst_3 = arith.constant dense<0.000000e+00> : vector<16xf32>
    %3 = vector.multi_reduction <add>, %2, %cst_3 [0] : vector<512x16xf32> to vector<16xf32>
    %4 = vector.shape_cast %3 : vector<16xf32> to vector<1x16xf32>
    %cst_4 = arith.constant 5.120000e+02 : f32
    %5 = vector.broadcast %cst_4 : f32 to vector<1x16xf32>
    %6 = arith.divf %4, %5 : vector<1x16xf32>
    %7 = vector.broadcast %6 : vector<1x16xf32> to vector<512x16xf32>
    %8 = arith.subf %2, %7 : vector<512x16xf32>
    %9 = arith.mulf %8, %8 : vector<512x16xf32>
    %cst_5 = arith.constant dense<0.000000e+00> : vector<16xf32>
    %10 = vector.multi_reduction <add>, %9, %cst_5 [0] : vector<512x16xf32> to vector<16xf32>
    %11 = vector.shape_cast %10 : vector<16xf32> to vector<1x16xf32>
    %cst_6 = arith.constant 5.120000e+02 : f32
    %12 = vector.broadcast %cst_6 : f32 to vector<1x16xf32>
    %13 = arith.divf %11, %12 : vector<1x16xf32>
    %c0_7 = arith.constant 0 : index
    %c0_8 = arith.constant 0 : index
    %14 = vector.load %arg3[%c0_7, %c0_8] : memref<1x16xf32, #tpu.memory_space<vmem>>, vector<1x16xf32>
    %cst_9 = arith.constant 9.99999974E-6 : f32
    %15 = vector.broadcast %cst_9 : f32 to vector<1x16xf32>
    %16 = arith.addf %13, %15 : vector<1x16xf32>
    %17 = math.rsqrt %16 : vector<1x16xf32>
    %18 = arith.mulf %14, %17 : vector<1x16xf32>
    %c0_10 = arith.constant 0 : index
    %c0_11 = arith.constant 0 : index
    %19 = vector.load %arg4[%c0_10, %c0_11] : memref<1x16xf32, #tpu.memory_space<vmem>>, vector<1x16xf32>
    %20 = arith.mulf %6, %18 : vector<1x16xf32>
    %21 = arith.subf %19, %20 : vector<1x16xf32>
    %22 = vector.broadcast %18 : vector<1x16xf32> to vector<512x16xf32>
    %23 = arith.mulf %2, %22 : vector<512x16xf32>
    %24 = vector.broadcast %21 : vector<1x16xf32> to vector<512x16xf32>
    %25 = arith.addf %23, %24 : vector<512x16xf32>
    %cst_12 = arith.constant 0.000000e+00 : f32
    %26 = vector.broadcast %cst_12 : f32 to vector<512x16xf32>
    %27 = arith.maximumf %25, %26 : vector<512x16xf32>
    %c0_13 = arith.constant 0 : index
    %c0_14 = arith.constant 0 : index
    %28 = vector.load %arg5[%c0_13, %c0_14] : memref<512x16xf32, #tpu.memory_space<vmem>>, vector<512x16xf32>
    tpu.vector_store %arg5[%c0_13, %c0_14], %27 {strides = array<i32>} : memref<512x16xf32, #tpu.memory_space<vmem>>, vector<512x16xf32>,
    return
  }
  func.func @transform_0(%arg0: i32) -> (i32, i32) {
    %c0_i32 = arith.constant 0 : i32
    %c0_i32_0 = arith.constant 0 : i32
    %c0_i32_1 = arith.constant 0 : i32
    return %c0_i32, %c0_i32_0 : i32, i32
  }
  func.func @transform_1(%arg0: i32) -> (i32, i32) {
    %c0_i32 = arith.constant 0 : i32
    %c0_i32_0 = arith.constant 0 : i32
    %c0_i32_1 = arith.constant 0 : i32
    return %c0_i32, %c0_i32_0 : i32, i32
  }
  func.func @transform_2(%arg0: i32) -> (i32, i32) {
    %c0_i32 = arith.constant 0 : i32
    %c0_i32_0 = arith.constant 0 : i32
    %c0_i32_1 = arith.constant 0 : i32
    return %c0_i32, %c0_i32_0 : i32, i32
  }
  func.func @transform_3(%arg0: i32) -> (i32, i32) {
    %c0_i32 = arith.constant 0 : i32
    %c0_i32_0 = arith.constant 0 : i32
    %c0_i32_1 = arith.constant 0 : i32
    return %c0_i32, %c0_i32_0 : i32, i32
  }
  func.func @transform_4(%arg0: i32) -> (i32, i32) {
    %c0_i32 = arith.constant 0 : i32
    %c0_i32_0 = arith.constant 0 : i32
    %c0_i32_1 = arith.constant 0 : i32
    return %c0_i32, %c0_i32_0 : i32, i32
  }
}

module attributes {stable_mosaic.version = 11 : i64} {
  func.func @kernel(%arg0: i32, %arg1: memref<128x144xbf16, #tpu.memory_space<vmem>>, %arg2: memref<144x32xbf16, #tpu.memory_space<vmem>>, %arg3: memref<1x32xf32, #tpu.memory_space<vmem>>, %arg4: memref<1x32xf32, #tpu.memory_space<vmem>>, %arg5: memref<128x32xf32, #tpu.memory_space<vmem>>) attributes {dimension_semantics = [#tpu.dimension_semantics<arbitrary>], iteration_bounds = array<i64: 1>, scalar_prefetch = 0 : i64, scratch_operands = 0 : i64, tpu.core_type = #tpu.core_type<tc>, window_params = [{pipeline_mode = #tpu.pipeline_mode<synchronous>, transform_indices = @transform_0, window_bounds = array<i64: 128, 144>}, {pipeline_mode = #tpu.pipeline_mode<synchronous>, transform_indices = @transform_1, window_bounds = array<i64: 144, 32>}, {pipeline_mode = #tpu.pipeline_mode<synchronous>, transform_indices = @transform_2, window_bounds = array<i64: 1, 32>}, {pipeline_mode = #tpu.pipeline_mode<synchronous>, transform_indices = @transform_3, window_bounds = array<i64: 1, 32>}, {pipeline_mode = #tpu.pipeline_mode<synchronous>, transform_indices = @transform_4, window_bounds = array<i64: 128, 32>}]} {
    %c0 = arith.constant 0 : index
    %c0_0 = arith.constant 0 : index
    %0 = vector.load %arg1[%c0, %c0_0] : memref<128x144xbf16, #tpu.memory_space<vmem>>, vector<128x144xbf16>
    %c0_1 = arith.constant 0 : index
    %c0_2 = arith.constant 0 : index
    %1 = vector.load %arg2[%c0_1, %c0_2] : memref<144x32xbf16, #tpu.memory_space<vmem>>, vector<144x32xbf16>
    %cst = arith.constant dense<0.000000e+00> : vector<128x32xf32>
    %2 = tpu.matmul %0, %1, %cst {dimension_numbers = #tpu.dot_dimension_numbers<[1], [0], [0], [1], [0, 0, 1, 1], [], []>} : vector<128x144xbf16>, vector<144x32xbf16>, vector<128x32xf32> -> vector<128x32xf32>
    %cst_3 = arith.constant dense<0.000000e+00> : vector<32xf32>
    %3 = vector.multi_reduction <add>, %2, %cst_3 [0] : vector<128x32xf32> to vector<32xf32>
    %4 = vector.shape_cast %3 : vector<32xf32> to vector<1x32xf32>
    %cst_4 = arith.constant 1.280000e+02 : f32
    %5 = vector.broadcast %cst_4 : f32 to vector<1x32xf32>
    %6 = arith.divf %4, %5 : vector<1x32xf32>
    %7 = vector.broadcast %6 : vector<1x32xf32> to vector<128x32xf32>
    %8 = arith.subf %2, %7 : vector<128x32xf32>
    %9 = arith.mulf %8, %8 : vector<128x32xf32>
    %cst_5 = arith.constant dense<0.000000e+00> : vector<32xf32>
    %10 = vector.multi_reduction <add>, %9, %cst_5 [0] : vector<128x32xf32> to vector<32xf32>
    %11 = vector.shape_cast %10 : vector<32xf32> to vector<1x32xf32>
    %cst_6 = arith.constant 1.280000e+02 : f32
    %12 = vector.broadcast %cst_6 : f32 to vector<1x32xf32>
    %13 = arith.divf %11, %12 : vector<1x32xf32>
    %c0_7 = arith.constant 0 : index
    %c0_8 = arith.constant 0 : index
    %14 = vector.load %arg3[%c0_7, %c0_8] : memref<1x32xf32, #tpu.memory_space<vmem>>, vector<1x32xf32>
    %cst_9 = arith.constant 9.99999974E-6 : f32
    %15 = vector.broadcast %cst_9 : f32 to vector<1x32xf32>
    %16 = arith.addf %13, %15 : vector<1x32xf32>
    %17 = math.rsqrt %16 : vector<1x32xf32>
    %18 = arith.mulf %14, %17 : vector<1x32xf32>
    %c0_10 = arith.constant 0 : index
    %c0_11 = arith.constant 0 : index
    %19 = vector.load %arg4[%c0_10, %c0_11] : memref<1x32xf32, #tpu.memory_space<vmem>>, vector<1x32xf32>
    %20 = arith.mulf %6, %18 : vector<1x32xf32>
    %21 = arith.subf %19, %20 : vector<1x32xf32>
    %22 = vector.broadcast %18 : vector<1x32xf32> to vector<128x32xf32>
    %23 = arith.mulf %2, %22 : vector<128x32xf32>
    %24 = vector.broadcast %21 : vector<1x32xf32> to vector<128x32xf32>
    %25 = arith.addf %23, %24 : vector<128x32xf32>
    %cst_12 = arith.constant 0.000000e+00 : f32
    %26 = vector.broadcast %cst_12 : f32 to vector<128x32xf32>
    %27 = arith.maximumf %25, %26 : vector<128x32xf32>
    %c0_13 = arith.constant 0 : index
    %c0_14 = arith.constant 0 : index
    %28 = vector.load %arg5[%c0_13, %c0_14] : memref<128x32xf32, #tpu.memory_space<vmem>>, vector<128x32xf32>
    tpu.vector_store %arg5[%c0_13, %c0_14], %27 {strides = array<i32>} : memref<128x32xf32, #tpu.memory_space<vmem>>, vector<128x32xf32>,
    return
  }
  func.func @transform_0(%arg0: i32) -> (i32, i32) {
    %c0_i32 = arith.constant 0 : i32
    %c0_i32_0 = arith.constant 0 : i32
    %c0_i32_1 = arith.constant 0 : i32
    return %c0_i32, %c0_i32_0 : i32, i32
  }
  func.func @transform_1(%arg0: i32) -> (i32, i32) {
    %c0_i32 = arith.constant 0 : i32
    %c0_i32_0 = arith.constant 0 : i32
    %c0_i32_1 = arith.constant 0 : i32
    return %c0_i32, %c0_i32_0 : i32, i32
  }
  func.func @transform_2(%arg0: i32) -> (i32, i32) {
    %c0_i32 = arith.constant 0 : i32
    %c0_i32_0 = arith.constant 0 : i32
    %c0_i32_1 = arith.constant 0 : i32
    return %c0_i32, %c0_i32_0 : i32, i32
  }
  func.func @transform_3(%arg0: i32) -> (i32, i32) {
    %c0_i32 = arith.constant 0 : i32
    %c0_i32_0 = arith.constant 0 : i32
    %c0_i32_1 = arith.constant 0 : i32
    return %c0_i32, %c0_i32_0 : i32, i32
  }
  func.func @transform_4(%arg0: i32) -> (i32, i32) {
    %c0_i32 = arith.constant 0 : i32
    %c0_i32_0 = arith.constant 0 : i32
    %c0_i32_1 = arith.constant 0 : i32
    return %c0_i32, %c0_i32_0 : i32, i32
  }
}

module attributes {stable_mosaic.version = 11 : i64} {
  func.func @kernel(%arg0: i32, %arg1: memref<32x288xbf16, #tpu.memory_space<vmem>>, %arg2: memref<288x64xbf16, #tpu.memory_space<vmem>>, %arg3: memref<1x64xf32, #tpu.memory_space<vmem>>, %arg4: memref<1x64xf32, #tpu.memory_space<vmem>>, %arg5: memref<32x64xf32, #tpu.memory_space<vmem>>) attributes {dimension_semantics = [#tpu.dimension_semantics<arbitrary>], iteration_bounds = array<i64: 1>, scalar_prefetch = 0 : i64, scratch_operands = 0 : i64, tpu.core_type = #tpu.core_type<tc>, window_params = [{pipeline_mode = #tpu.pipeline_mode<synchronous>, transform_indices = @transform_0, window_bounds = array<i64: 32, 288>}, {pipeline_mode = #tpu.pipeline_mode<synchronous>, transform_indices = @transform_1, window_bounds = array<i64: 288, 64>}, {pipeline_mode = #tpu.pipeline_mode<synchronous>, transform_indices = @transform_2, window_bounds = array<i64: 1, 64>}, {pipeline_mode = #tpu.pipeline_mode<synchronous>, transform_indices = @transform_3, window_bounds = array<i64: 1, 64>}, {pipeline_mode = #tpu.pipeline_mode<synchronous>, transform_indices = @transform_4, window_bounds = array<i64: 32, 64>}]} {
    %c0 = arith.constant 0 : index
    %c0_0 = arith.constant 0 : index
    %0 = vector.load %arg1[%c0, %c0_0] : memref<32x288xbf16, #tpu.memory_space<vmem>>, vector<32x288xbf16>
    %c0_1 = arith.constant 0 : index
    %c0_2 = arith.constant 0 : index
    %1 = vector.load %arg2[%c0_1, %c0_2] : memref<288x64xbf16, #tpu.memory_space<vmem>>, vector<288x64xbf16>
    %cst = arith.constant dense<0.000000e+00> : vector<32x64xf32>
    %2 = tpu.matmul %0, %1, %cst {dimension_numbers = #tpu.dot_dimension_numbers<[1], [0], [0], [1], [0, 0, 1, 1], [], []>} : vector<32x288xbf16>, vector<288x64xbf16>, vector<32x64xf32> -> vector<32x64xf32>
    %cst_3 = arith.constant dense<0.000000e+00> : vector<64xf32>
    %3 = vector.multi_reduction <add>, %2, %cst_3 [0] : vector<32x64xf32> to vector<64xf32>
    %4 = vector.shape_cast %3 : vector<64xf32> to vector<1x64xf32>
    %cst_4 = arith.constant 3.200000e+01 : f32
    %5 = vector.broadcast %cst_4 : f32 to vector<1x64xf32>
    %6 = arith.divf %4, %5 : vector<1x64xf32>
    %7 = vector.broadcast %6 : vector<1x64xf32> to vector<32x64xf32>
    %8 = arith.subf %2, %7 : vector<32x64xf32>
    %9 = arith.mulf %8, %8 : vector<32x64xf32>
    %cst_5 = arith.constant dense<0.000000e+00> : vector<64xf32>
    %10 = vector.multi_reduction <add>, %9, %cst_5 [0] : vector<32x64xf32> to vector<64xf32>
    %11 = vector.shape_cast %10 : vector<64xf32> to vector<1x64xf32>
    %cst_6 = arith.constant 3.200000e+01 : f32
    %12 = vector.broadcast %cst_6 : f32 to vector<1x64xf32>
    %13 = arith.divf %11, %12 : vector<1x64xf32>
    %c0_7 = arith.constant 0 : index
    %c0_8 = arith.constant 0 : index
    %14 = vector.load %arg3[%c0_7, %c0_8] : memref<1x64xf32, #tpu.memory_space<vmem>>, vector<1x64xf32>
    %cst_9 = arith.constant 9.99999974E-6 : f32
    %15 = vector.broadcast %cst_9 : f32 to vector<1x64xf32>
    %16 = arith.addf %13, %15 : vector<1x64xf32>
    %17 = math.rsqrt %16 : vector<1x64xf32>
    %18 = arith.mulf %14, %17 : vector<1x64xf32>
    %c0_10 = arith.constant 0 : index
    %c0_11 = arith.constant 0 : index
    %19 = vector.load %arg4[%c0_10, %c0_11] : memref<1x64xf32, #tpu.memory_space<vmem>>, vector<1x64xf32>
    %20 = arith.mulf %6, %18 : vector<1x64xf32>
    %21 = arith.subf %19, %20 : vector<1x64xf32>
    %22 = vector.broadcast %18 : vector<1x64xf32> to vector<32x64xf32>
    %23 = arith.mulf %2, %22 : vector<32x64xf32>
    %24 = vector.broadcast %21 : vector<1x64xf32> to vector<32x64xf32>
    %25 = arith.addf %23, %24 : vector<32x64xf32>
    %cst_12 = arith.constant 0.000000e+00 : f32
    %26 = vector.broadcast %cst_12 : f32 to vector<32x64xf32>
    %27 = arith.maximumf %25, %26 : vector<32x64xf32>
    %c0_13 = arith.constant 0 : index
    %c0_14 = arith.constant 0 : index
    %28 = vector.load %arg5[%c0_13, %c0_14] : memref<32x64xf32, #tpu.memory_space<vmem>>, vector<32x64xf32>
    tpu.vector_store %arg5[%c0_13, %c0_14], %27 {strides = array<i32>} : memref<32x64xf32, #tpu.memory_space<vmem>>, vector<32x64xf32>,
    return
  }
  func.func @transform_0(%arg0: i32) -> (i32, i32) {
    %c0_i32 = arith.constant 0 : i32
    %c0_i32_0 = arith.constant 0 : i32
    %c0_i32_1 = arith.constant 0 : i32
    return %c0_i32, %c0_i32_0 : i32, i32
  }
  func.func @transform_1(%arg0: i32) -> (i32, i32) {
    %c0_i32 = arith.constant 0 : i32
    %c0_i32_0 = arith.constant 0 : i32
    %c0_i32_1 = arith.constant 0 : i32
    return %c0_i32, %c0_i32_0 : i32, i32
  }
  func.func @transform_2(%arg0: i32) -> (i32, i32) {
    %c0_i32 = arith.constant 0 : i32
    %c0_i32_0 = arith.constant 0 : i32
    %c0_i32_1 = arith.constant 0 : i32
    return %c0_i32, %c0_i32_0 : i32, i32
  }
  func.func @transform_3(%arg0: i32) -> (i32, i32) {
    %c0_i32 = arith.constant 0 : i32
    %c0_i32_0 = arith.constant 0 : i32
    %c0_i32_1 = arith.constant 0 : i32
    return %c0_i32, %c0_i32_0 : i32, i32
  }
  func.func @transform_4(%arg0: i32) -> (i32, i32) {
    %c0_i32 = arith.constant 0 : i32
    %c0_i32_0 = arith.constant 0 : i32
    %c0_i32_1 = arith.constant 0 : i32
    return %c0_i32, %c0_i32_0 : i32, i32
  }
}

module attributes {stable_mosaic.version = 11 : i64} {
  func.func @kernel(%arg0: i32, %arg1: memref<32x576xbf16, #tpu.memory_space<vmem>>, %arg2: memref<576x64xbf16, #tpu.memory_space<vmem>>, %arg3: memref<1x64xf32, #tpu.memory_space<vmem>>, %arg4: memref<1x64xf32, #tpu.memory_space<vmem>>, %arg5: memref<32x64xf32, #tpu.memory_space<vmem>>, %arg6: memref<32x64xf32, #tpu.memory_space<vmem>>) attributes {dimension_semantics = [#tpu.dimension_semantics<arbitrary>], iteration_bounds = array<i64: 1>, scalar_prefetch = 0 : i64, scratch_operands = 0 : i64, tpu.core_type = #tpu.core_type<tc>, window_params = [{pipeline_mode = #tpu.pipeline_mode<synchronous>, transform_indices = @transform_0, window_bounds = array<i64: 32, 576>}, {pipeline_mode = #tpu.pipeline_mode<synchronous>, transform_indices = @transform_1, window_bounds = array<i64: 576, 64>}, {pipeline_mode = #tpu.pipeline_mode<synchronous>, transform_indices = @transform_2, window_bounds = array<i64: 1, 64>}, {pipeline_mode = #tpu.pipeline_mode<synchronous>, transform_indices = @transform_3, window_bounds = array<i64: 1, 64>}, {pipeline_mode = #tpu.pipeline_mode<synchronous>, transform_indices = @transform_4, window_bounds = array<i64: 32, 64>}, {pipeline_mode = #tpu.pipeline_mode<synchronous>, transform_indices = @transform_5, window_bounds = array<i64: 32, 64>}]} {
    %c0 = arith.constant 0 : index
    %c0_0 = arith.constant 0 : index
    %0 = vector.load %arg1[%c0, %c0_0] : memref<32x576xbf16, #tpu.memory_space<vmem>>, vector<32x576xbf16>
    %c0_1 = arith.constant 0 : index
    %c0_2 = arith.constant 0 : index
    %1 = vector.load %arg2[%c0_1, %c0_2] : memref<576x64xbf16, #tpu.memory_space<vmem>>, vector<576x64xbf16>
    %cst = arith.constant dense<0.000000e+00> : vector<32x64xf32>
    %2 = tpu.matmul %0, %1, %cst {dimension_numbers = #tpu.dot_dimension_numbers<[1], [0], [0], [1], [0, 0, 1, 1], [], []>} : vector<32x576xbf16>, vector<576x64xbf16>, vector<32x64xf32> -> vector<32x64xf32>
    %cst_3 = arith.constant dense<0.000000e+00> : vector<64xf32>
    %3 = vector.multi_reduction <add>, %2, %cst_3 [0] : vector<32x64xf32> to vector<64xf32>
    %4 = vector.shape_cast %3 : vector<64xf32> to vector<1x64xf32>
    %cst_4 = arith.constant 3.200000e+01 : f32
    %5 = vector.broadcast %cst_4 : f32 to vector<1x64xf32>
    %6 = arith.divf %4, %5 : vector<1x64xf32>
    %7 = vector.broadcast %6 : vector<1x64xf32> to vector<32x64xf32>
    %8 = arith.subf %2, %7 : vector<32x64xf32>
    %9 = arith.mulf %8, %8 : vector<32x64xf32>
    %cst_5 = arith.constant dense<0.000000e+00> : vector<64xf32>
    %10 = vector.multi_reduction <add>, %9, %cst_5 [0] : vector<32x64xf32> to vector<64xf32>
    %11 = vector.shape_cast %10 : vector<64xf32> to vector<1x64xf32>
    %cst_6 = arith.constant 3.200000e+01 : f32
    %12 = vector.broadcast %cst_6 : f32 to vector<1x64xf32>
    %13 = arith.divf %11, %12 : vector<1x64xf32>
    %c0_7 = arith.constant 0 : index
    %c0_8 = arith.constant 0 : index
    %14 = vector.load %arg3[%c0_7, %c0_8] : memref<1x64xf32, #tpu.memory_space<vmem>>, vector<1x64xf32>
    %cst_9 = arith.constant 9.99999974E-6 : f32
    %15 = vector.broadcast %cst_9 : f32 to vector<1x64xf32>
    %16 = arith.addf %13, %15 : vector<1x64xf32>
    %17 = math.rsqrt %16 : vector<1x64xf32>
    %18 = arith.mulf %14, %17 : vector<1x64xf32>
    %c0_10 = arith.constant 0 : index
    %c0_11 = arith.constant 0 : index
    %19 = vector.load %arg4[%c0_10, %c0_11] : memref<1x64xf32, #tpu.memory_space<vmem>>, vector<1x64xf32>
    %20 = arith.mulf %6, %18 : vector<1x64xf32>
    %21 = arith.subf %19, %20 : vector<1x64xf32>
    %22 = vector.broadcast %18 : vector<1x64xf32> to vector<32x64xf32>
    %23 = arith.mulf %2, %22 : vector<32x64xf32>
    %24 = vector.broadcast %21 : vector<1x64xf32> to vector<32x64xf32>
    %25 = arith.addf %23, %24 : vector<32x64xf32>
    %c0_12 = arith.constant 0 : index
    %c0_13 = arith.constant 0 : index
    %26 = vector.load %arg5[%c0_12, %c0_13] : memref<32x64xf32, #tpu.memory_space<vmem>>, vector<32x64xf32>
    %27 = arith.addf %25, %26 : vector<32x64xf32>
    %c0_14 = arith.constant 0 : index
    %c0_15 = arith.constant 0 : index
    %28 = vector.load %arg6[%c0_14, %c0_15] : memref<32x64xf32, #tpu.memory_space<vmem>>, vector<32x64xf32>
    tpu.vector_store %arg6[%c0_14, %c0_15], %27 {strides = array<i32>} : memref<32x64xf32, #tpu.memory_space<vmem>>, vector<32x64xf32>,
    return
  }
  func.func @transform_0(%arg0: i32) -> (i32, i32) {
    %c0_i32 = arith.constant 0 : i32
    %c0_i32_0 = arith.constant 0 : i32
    %c0_i32_1 = arith.constant 0 : i32
    return %c0_i32, %c0_i32_0 : i32, i32
  }
  func.func @transform_1(%arg0: i32) -> (i32, i32) {
    %c0_i32 = arith.constant 0 : i32
    %c0_i32_0 = arith.constant 0 : i32
    %c0_i32_1 = arith.constant 0 : i32
    return %c0_i32, %c0_i32_0 : i32, i32
  }
  func.func @transform_2(%arg0: i32) -> (i32, i32) {
    %c0_i32 = arith.constant 0 : i32
    %c0_i32_0 = arith.constant 0 : i32
    %c0_i32_1 = arith.constant 0 : i32
    return %c0_i32, %c0_i32_0 : i32, i32
  }
  func.func @transform_3(%arg0: i32) -> (i32, i32) {
    %c0_i32 = arith.constant 0 : i32
    %c0_i32_0 = arith.constant 0 : i32
    %c0_i32_1 = arith.constant 0 : i32
    return %c0_i32, %c0_i32_0 : i32, i32
  }
  func.func @transform_4(%arg0: i32) -> (i32, i32) {
    %c0_i32 = arith.constant 0 : i32
    %c0_i32_0 = arith.constant 0 : i32
    %c0_i32_1 = arith.constant 0 : i32
    return %c0_i32, %c0_i32_0 : i32, i32
  }
  func.func @transform_5(%arg0: i32) -> (i32, i32) {
    %c0_i32 = arith.constant 0 : i32
    %c0_i32_0 = arith.constant 0 : i32
    %c0_i32_1 = arith.constant 0 : i32
    return %c0_i32, %c0_i32_0 : i32, i32
  }
}

module attributes {stable_mosaic.version = 11 : i64} {
  func.func @kernel(%arg0: i32, %arg1: memref<32x576xbf16, #tpu.memory_space<vmem>>, %arg2: memref<576x64xbf16, #tpu.memory_space<vmem>>, %arg3: memref<1x64xf32, #tpu.memory_space<vmem>>, %arg4: memref<1x64xf32, #tpu.memory_space<vmem>>, %arg5: memref<32x64xf32, #tpu.memory_space<vmem>>) attributes {dimension_semantics = [#tpu.dimension_semantics<arbitrary>], iteration_bounds = array<i64: 1>, scalar_prefetch = 0 : i64, scratch_operands = 0 : i64, tpu.core_type = #tpu.core_type<tc>, window_params = [{pipeline_mode = #tpu.pipeline_mode<synchronous>, transform_indices = @transform_0, window_bounds = array<i64: 32, 576>}, {pipeline_mode = #tpu.pipeline_mode<synchronous>, transform_indices = @transform_1, window_bounds = array<i64: 576, 64>}, {pipeline_mode = #tpu.pipeline_mode<synchronous>, transform_indices = @transform_2, window_bounds = array<i64: 1, 64>}, {pipeline_mode = #tpu.pipeline_mode<synchronous>, transform_indices = @transform_3, window_bounds = array<i64: 1, 64>}, {pipeline_mode = #tpu.pipeline_mode<synchronous>, transform_indices = @transform_4, window_bounds = array<i64: 32, 64>}]} {
    %c0 = arith.constant 0 : index
    %c0_0 = arith.constant 0 : index
    %0 = vector.load %arg1[%c0, %c0_0] : memref<32x576xbf16, #tpu.memory_space<vmem>>, vector<32x576xbf16>
    %c0_1 = arith.constant 0 : index
    %c0_2 = arith.constant 0 : index
    %1 = vector.load %arg2[%c0_1, %c0_2] : memref<576x64xbf16, #tpu.memory_space<vmem>>, vector<576x64xbf16>
    %cst = arith.constant dense<0.000000e+00> : vector<32x64xf32>
    %2 = tpu.matmul %0, %1, %cst {dimension_numbers = #tpu.dot_dimension_numbers<[1], [0], [0], [1], [0, 0, 1, 1], [], []>} : vector<32x576xbf16>, vector<576x64xbf16>, vector<32x64xf32> -> vector<32x64xf32>
    %cst_3 = arith.constant dense<0.000000e+00> : vector<64xf32>
    %3 = vector.multi_reduction <add>, %2, %cst_3 [0] : vector<32x64xf32> to vector<64xf32>
    %4 = vector.shape_cast %3 : vector<64xf32> to vector<1x64xf32>
    %cst_4 = arith.constant 3.200000e+01 : f32
    %5 = vector.broadcast %cst_4 : f32 to vector<1x64xf32>
    %6 = arith.divf %4, %5 : vector<1x64xf32>
    %7 = vector.broadcast %6 : vector<1x64xf32> to vector<32x64xf32>
    %8 = arith.subf %2, %7 : vector<32x64xf32>
    %9 = arith.mulf %8, %8 : vector<32x64xf32>
    %cst_5 = arith.constant dense<0.000000e+00> : vector<64xf32>
    %10 = vector.multi_reduction <add>, %9, %cst_5 [0] : vector<32x64xf32> to vector<64xf32>
    %11 = vector.shape_cast %10 : vector<64xf32> to vector<1x64xf32>
    %cst_6 = arith.constant 3.200000e+01 : f32
    %12 = vector.broadcast %cst_6 : f32 to vector<1x64xf32>
    %13 = arith.divf %11, %12 : vector<1x64xf32>
    %c0_7 = arith.constant 0 : index
    %c0_8 = arith.constant 0 : index
    %14 = vector.load %arg3[%c0_7, %c0_8] : memref<1x64xf32, #tpu.memory_space<vmem>>, vector<1x64xf32>
    %cst_9 = arith.constant 9.99999974E-6 : f32
    %15 = vector.broadcast %cst_9 : f32 to vector<1x64xf32>
    %16 = arith.addf %13, %15 : vector<1x64xf32>
    %17 = math.rsqrt %16 : vector<1x64xf32>
    %18 = arith.mulf %14, %17 : vector<1x64xf32>
    %c0_10 = arith.constant 0 : index
    %c0_11 = arith.constant 0 : index
    %19 = vector.load %arg4[%c0_10, %c0_11] : memref<1x64xf32, #tpu.memory_space<vmem>>, vector<1x64xf32>
    %20 = arith.mulf %6, %18 : vector<1x64xf32>
    %21 = arith.subf %19, %20 : vector<1x64xf32>
    %22 = vector.broadcast %18 : vector<1x64xf32> to vector<32x64xf32>
    %23 = arith.mulf %2, %22 : vector<32x64xf32>
    %24 = vector.broadcast %21 : vector<1x64xf32> to vector<32x64xf32>
    %25 = arith.addf %23, %24 : vector<32x64xf32>
    %cst_12 = arith.constant 0.000000e+00 : f32
    %26 = vector.broadcast %cst_12 : f32 to vector<32x64xf32>
    %27 = arith.maximumf %25, %26 : vector<32x64xf32>
    %c0_13 = arith.constant 0 : index
    %c0_14 = arith.constant 0 : index
    %28 = vector.load %arg5[%c0_13, %c0_14] : memref<32x64xf32, #tpu.memory_space<vmem>>, vector<32x64xf32>
    tpu.vector_store %arg5[%c0_13, %c0_14], %27 {strides = array<i32>} : memref<32x64xf32, #tpu.memory_space<vmem>>, vector<32x64xf32>,
    return
  }
  func.func @transform_0(%arg0: i32) -> (i32, i32) {
    %c0_i32 = arith.constant 0 : i32
    %c0_i32_0 = arith.constant 0 : i32
    %c0_i32_1 = arith.constant 0 : i32
    return %c0_i32, %c0_i32_0 : i32, i32
  }
  func.func @transform_1(%arg0: i32) -> (i32, i32) {
    %c0_i32 = arith.constant 0 : i32
    %c0_i32_0 = arith.constant 0 : i32
    %c0_i32_1 = arith.constant 0 : i32
    return %c0_i32, %c0_i32_0 : i32, i32
  }
  func.func @transform_2(%arg0: i32) -> (i32, i32) {
    %c0_i32 = arith.constant 0 : i32
    %c0_i32_0 = arith.constant 0 : i32
    %c0_i32_1 = arith.constant 0 : i32
    return %c0_i32, %c0_i32_0 : i32, i32
  }
  func.func @transform_3(%arg0: i32) -> (i32, i32) {
    %c0_i32 = arith.constant 0 : i32
    %c0_i32_0 = arith.constant 0 : i32
    %c0_i32_1 = arith.constant 0 : i32
    return %c0_i32, %c0_i32_0 : i32, i32
  }
  func.func @transform_4(%arg0: i32) -> (i32, i32) {
    %c0_i32 = arith.constant 0 : i32
    %c0_i32_0 = arith.constant 0 : i32
    %c0_i32_1 = arith.constant 0 : i32
    return %c0_i32, %c0_i32_0 : i32, i32
  }
}

module attributes {stable_mosaic.version = 11 : i64} {
  func.func @kernel(%arg0: i32, %arg1: memref<128x576xbf16, #tpu.memory_space<vmem>>, %arg2: memref<576x32xbf16, #tpu.memory_space<vmem>>, %arg3: memref<1x32xf32, #tpu.memory_space<vmem>>, %arg4: memref<1x32xf32, #tpu.memory_space<vmem>>, %arg5: memref<128x32xf32, #tpu.memory_space<vmem>>) attributes {dimension_semantics = [#tpu.dimension_semantics<arbitrary>], iteration_bounds = array<i64: 1>, scalar_prefetch = 0 : i64, scratch_operands = 0 : i64, tpu.core_type = #tpu.core_type<tc>, window_params = [{pipeline_mode = #tpu.pipeline_mode<synchronous>, transform_indices = @transform_0, window_bounds = array<i64: 128, 576>}, {pipeline_mode = #tpu.pipeline_mode<synchronous>, transform_indices = @transform_1, window_bounds = array<i64: 576, 32>}, {pipeline_mode = #tpu.pipeline_mode<synchronous>, transform_indices = @transform_2, window_bounds = array<i64: 1, 32>}, {pipeline_mode = #tpu.pipeline_mode<synchronous>, transform_indices = @transform_3, window_bounds = array<i64: 1, 32>}, {pipeline_mode = #tpu.pipeline_mode<synchronous>, transform_indices = @transform_4, window_bounds = array<i64: 128, 32>}]} {
    %c0 = arith.constant 0 : index
    %c0_0 = arith.constant 0 : index
    %0 = vector.load %arg1[%c0, %c0_0] : memref<128x576xbf16, #tpu.memory_space<vmem>>, vector<128x576xbf16>
    %c0_1 = arith.constant 0 : index
    %c0_2 = arith.constant 0 : index
    %1 = vector.load %arg2[%c0_1, %c0_2] : memref<576x32xbf16, #tpu.memory_space<vmem>>, vector<576x32xbf16>
    %cst = arith.constant dense<0.000000e+00> : vector<128x32xf32>
    %2 = tpu.matmul %0, %1, %cst {dimension_numbers = #tpu.dot_dimension_numbers<[1], [0], [0], [1], [0, 0, 1, 1], [], []>} : vector<128x576xbf16>, vector<576x32xbf16>, vector<128x32xf32> -> vector<128x32xf32>
    %cst_3 = arith.constant dense<0.000000e+00> : vector<32xf32>
    %3 = vector.multi_reduction <add>, %2, %cst_3 [0] : vector<128x32xf32> to vector<32xf32>
    %4 = vector.shape_cast %3 : vector<32xf32> to vector<1x32xf32>
    %cst_4 = arith.constant 1.280000e+02 : f32
    %5 = vector.broadcast %cst_4 : f32 to vector<1x32xf32>
    %6 = arith.divf %4, %5 : vector<1x32xf32>
    %7 = vector.broadcast %6 : vector<1x32xf32> to vector<128x32xf32>
    %8 = arith.subf %2, %7 : vector<128x32xf32>
    %9 = arith.mulf %8, %8 : vector<128x32xf32>
    %cst_5 = arith.constant dense<0.000000e+00> : vector<32xf32>
    %10 = vector.multi_reduction <add>, %9, %cst_5 [0] : vector<128x32xf32> to vector<32xf32>
    %11 = vector.shape_cast %10 : vector<32xf32> to vector<1x32xf32>
    %cst_6 = arith.constant 1.280000e+02 : f32
    %12 = vector.broadcast %cst_6 : f32 to vector<1x32xf32>
    %13 = arith.divf %11, %12 : vector<1x32xf32>
    %c0_7 = arith.constant 0 : index
    %c0_8 = arith.constant 0 : index
    %14 = vector.load %arg3[%c0_7, %c0_8] : memref<1x32xf32, #tpu.memory_space<vmem>>, vector<1x32xf32>
    %cst_9 = arith.constant 9.99999974E-6 : f32
    %15 = vector.broadcast %cst_9 : f32 to vector<1x32xf32>
    %16 = arith.addf %13, %15 : vector<1x32xf32>
    %17 = math.rsqrt %16 : vector<1x32xf32>
    %18 = arith.mulf %14, %17 : vector<1x32xf32>
    %c0_10 = arith.constant 0 : index
    %c0_11 = arith.constant 0 : index
    %19 = vector.load %arg4[%c0_10, %c0_11] : memref<1x32xf32, #tpu.memory_space<vmem>>, vector<1x32xf32>
    %20 = arith.mulf %6, %18 : vector<1x32xf32>
    %21 = arith.subf %19, %20 : vector<1x32xf32>
    %22 = vector.broadcast %18 : vector<1x32xf32> to vector<128x32xf32>
    %23 = arith.mulf %2, %22 : vector<128x32xf32>
    %24 = vector.broadcast %21 : vector<1x32xf32> to vector<128x32xf32>
    %25 = arith.addf %23, %24 : vector<128x32xf32>
    %cst_12 = arith.constant 0.000000e+00 : f32
    %26 = vector.broadcast %cst_12 : f32 to vector<128x32xf32>
    %27 = arith.maximumf %25, %26 : vector<128x32xf32>
    %c0_13 = arith.constant 0 : index
    %c0_14 = arith.constant 0 : index
    %28 = vector.load %arg5[%c0_13, %c0_14] : memref<128x32xf32, #tpu.memory_space<vmem>>, vector<128x32xf32>
    tpu.vector_store %arg5[%c0_13, %c0_14], %27 {strides = array<i32>} : memref<128x32xf32, #tpu.memory_space<vmem>>, vector<128x32xf32>,
    return
  }
  func.func @transform_0(%arg0: i32) -> (i32, i32) {
    %c0_i32 = arith.constant 0 : i32
    %c0_i32_0 = arith.constant 0 : i32
    %c0_i32_1 = arith.constant 0 : i32
    return %c0_i32, %c0_i32_0 : i32, i32
  }
  func.func @transform_1(%arg0: i32) -> (i32, i32) {
    %c0_i32 = arith.constant 0 : i32
    %c0_i32_0 = arith.constant 0 : i32
    %c0_i32_1 = arith.constant 0 : i32
    return %c0_i32, %c0_i32_0 : i32, i32
  }
  func.func @transform_2(%arg0: i32) -> (i32, i32) {
    %c0_i32 = arith.constant 0 : i32
    %c0_i32_0 = arith.constant 0 : i32
    %c0_i32_1 = arith.constant 0 : i32
    return %c0_i32, %c0_i32_0 : i32, i32
  }
  func.func @transform_3(%arg0: i32) -> (i32, i32) {
    %c0_i32 = arith.constant 0 : i32
    %c0_i32_0 = arith.constant 0 : i32
    %c0_i32_1 = arith.constant 0 : i32
    return %c0_i32, %c0_i32_0 : i32, i32
  }
  func.func @transform_4(%arg0: i32) -> (i32, i32) {
    %c0_i32 = arith.constant 0 : i32
    %c0_i32_0 = arith.constant 0 : i32
    %c0_i32_1 = arith.constant 0 : i32
    return %c0_i32, %c0_i32_0 : i32, i32
  }
}

module attributes {stable_mosaic.version = 11 : i64} {
  func.func @kernel(%arg0: i32, %arg1: memref<512x288xbf16, #tpu.memory_space<vmem>>, %arg2: memref<288x16xbf16, #tpu.memory_space<vmem>>, %arg3: memref<1x16xf32, #tpu.memory_space<vmem>>, %arg4: memref<1x16xf32, #tpu.memory_space<vmem>>, %arg5: memref<512x16xf32, #tpu.memory_space<vmem>>) attributes {dimension_semantics = [#tpu.dimension_semantics<arbitrary>], iteration_bounds = array<i64: 1>, scalar_prefetch = 0 : i64, scratch_operands = 0 : i64, tpu.core_type = #tpu.core_type<tc>, window_params = [{pipeline_mode = #tpu.pipeline_mode<synchronous>, transform_indices = @transform_0, window_bounds = array<i64: 512, 288>}, {pipeline_mode = #tpu.pipeline_mode<synchronous>, transform_indices = @transform_1, window_bounds = array<i64: 288, 16>}, {pipeline_mode = #tpu.pipeline_mode<synchronous>, transform_indices = @transform_2, window_bounds = array<i64: 1, 16>}, {pipeline_mode = #tpu.pipeline_mode<synchronous>, transform_indices = @transform_3, window_bounds = array<i64: 1, 16>}, {pipeline_mode = #tpu.pipeline_mode<synchronous>, transform_indices = @transform_4, window_bounds = array<i64: 512, 16>}]} {
    %c0 = arith.constant 0 : index
    %c0_0 = arith.constant 0 : index
    %0 = vector.load %arg1[%c0, %c0_0] : memref<512x288xbf16, #tpu.memory_space<vmem>>, vector<512x288xbf16>
    %c0_1 = arith.constant 0 : index
    %c0_2 = arith.constant 0 : index
    %1 = vector.load %arg2[%c0_1, %c0_2] : memref<288x16xbf16, #tpu.memory_space<vmem>>, vector<288x16xbf16>
    %cst = arith.constant dense<0.000000e+00> : vector<512x16xf32>
    %2 = tpu.matmul %0, %1, %cst {dimension_numbers = #tpu.dot_dimension_numbers<[1], [0], [0], [1], [0, 0, 1, 1], [], []>} : vector<512x288xbf16>, vector<288x16xbf16>, vector<512x16xf32> -> vector<512x16xf32>
    %cst_3 = arith.constant dense<0.000000e+00> : vector<16xf32>
    %3 = vector.multi_reduction <add>, %2, %cst_3 [0] : vector<512x16xf32> to vector<16xf32>
    %4 = vector.shape_cast %3 : vector<16xf32> to vector<1x16xf32>
    %cst_4 = arith.constant 5.120000e+02 : f32
    %5 = vector.broadcast %cst_4 : f32 to vector<1x16xf32>
    %6 = arith.divf %4, %5 : vector<1x16xf32>
    %7 = vector.broadcast %6 : vector<1x16xf32> to vector<512x16xf32>
    %8 = arith.subf %2, %7 : vector<512x16xf32>
    %9 = arith.mulf %8, %8 : vector<512x16xf32>
    %cst_5 = arith.constant dense<0.000000e+00> : vector<16xf32>
    %10 = vector.multi_reduction <add>, %9, %cst_5 [0] : vector<512x16xf32> to vector<16xf32>
    %11 = vector.shape_cast %10 : vector<16xf32> to vector<1x16xf32>
    %cst_6 = arith.constant 5.120000e+02 : f32
    %12 = vector.broadcast %cst_6 : f32 to vector<1x16xf32>
    %13 = arith.divf %11, %12 : vector<1x16xf32>
    %c0_7 = arith.constant 0 : index
    %c0_8 = arith.constant 0 : index
    %14 = vector.load %arg3[%c0_7, %c0_8] : memref<1x16xf32, #tpu.memory_space<vmem>>, vector<1x16xf32>
    %cst_9 = arith.constant 9.99999974E-6 : f32
    %15 = vector.broadcast %cst_9 : f32 to vector<1x16xf32>
    %16 = arith.addf %13, %15 : vector<1x16xf32>
    %17 = math.rsqrt %16 : vector<1x16xf32>
    %18 = arith.mulf %14, %17 : vector<1x16xf32>
    %c0_10 = arith.constant 0 : index
    %c0_11 = arith.constant 0 : index
    %19 = vector.load %arg4[%c0_10, %c0_11] : memref<1x16xf32, #tpu.memory_space<vmem>>, vector<1x16xf32>
    %20 = arith.mulf %6, %18 : vector<1x16xf32>
    %21 = arith.subf %19, %20 : vector<1x16xf32>
    %22 = vector.broadcast %18 : vector<1x16xf32> to vector<512x16xf32>
    %23 = arith.mulf %2, %22 : vector<512x16xf32>
    %24 = vector.broadcast %21 : vector<1x16xf32> to vector<512x16xf32>
    %25 = arith.addf %23, %24 : vector<512x16xf32>
    %cst_12 = arith.constant 0.000000e+00 : f32
    %26 = vector.broadcast %cst_12 : f32 to vector<512x16xf32>
    %27 = arith.maximumf %25, %26 : vector<512x16xf32>
    %c0_13 = arith.constant 0 : index
    %c0_14 = arith.constant 0 : index
    %28 = vector.load %arg5[%c0_13, %c0_14] : memref<512x16xf32, #tpu.memory_space<vmem>>, vector<512x16xf32>
    tpu.vector_store %arg5[%c0_13, %c0_14], %27 {strides = array<i32>} : memref<512x16xf32, #tpu.memory_space<vmem>>, vector<512x16xf32>,
    return
  }
  func.func @transform_0(%arg0: i32) -> (i32, i32) {
    %c0_i32 = arith.constant 0 : i32
    %c0_i32_0 = arith.constant 0 : i32
    %c0_i32_1 = arith.constant 0 : i32
    return %c0_i32, %c0_i32_0 : i32, i32
  }
  func.func @transform_1(%arg0: i32) -> (i32, i32) {
    %c0_i32 = arith.constant 0 : i32
    %c0_i32_0 = arith.constant 0 : i32
    %c0_i32_1 = arith.constant 0 : i32
    return %c0_i32, %c0_i32_0 : i32, i32
  }
  func.func @transform_2(%arg0: i32) -> (i32, i32) {
    %c0_i32 = arith.constant 0 : i32
    %c0_i32_0 = arith.constant 0 : i32
    %c0_i32_1 = arith.constant 0 : i32
    return %c0_i32, %c0_i32_0 : i32, i32
  }
  func.func @transform_3(%arg0: i32) -> (i32, i32) {
    %c0_i32 = arith.constant 0 : i32
    %c0_i32_0 = arith.constant 0 : i32
    %c0_i32_1 = arith.constant 0 : i32
    return %c0_i32, %c0_i32_0 : i32, i32
  }
  func.func @transform_4(%arg0: i32) -> (i32, i32) {
    %c0_i32 = arith.constant 0 : i32
    %c0_i32_0 = arith.constant 0 : i32
    %c0_i32_1 = arith.constant 0 : i32
    return %c0_i32, %c0_i32_0 : i32, i32
  }
}

module attributes {stable_mosaic.version = 11 : i64} {
  func.func @kernel(%arg0: i32, %arg1: memref<512x784xbf16, #tpu.memory_space<vmem>>, %arg2: memref<784x3xbf16, #tpu.memory_space<vmem>>, %arg3: memref<1x3xf32, #tpu.memory_space<vmem>>, %arg4: memref<512x3xf32, #tpu.memory_space<vmem>>) attributes {dimension_semantics = [#tpu.dimension_semantics<arbitrary>], iteration_bounds = array<i64: 1>, scalar_prefetch = 0 : i64, scratch_operands = 0 : i64, tpu.core_type = #tpu.core_type<tc>, window_params = [{pipeline_mode = #tpu.pipeline_mode<synchronous>, transform_indices = @transform_0, window_bounds = array<i64: 512, 784>}, {pipeline_mode = #tpu.pipeline_mode<synchronous>, transform_indices = @transform_1, window_bounds = array<i64: 784, 3>}, {pipeline_mode = #tpu.pipeline_mode<synchronous>, transform_indices = @transform_2, window_bounds = array<i64: 1, 3>}, {pipeline_mode = #tpu.pipeline_mode<synchronous>, transform_indices = @transform_3, window_bounds = array<i64: 512, 3>}]} {
    %c0 = arith.constant 0 : index
    %c0_0 = arith.constant 0 : index
    %0 = vector.load %arg1[%c0, %c0_0] : memref<512x784xbf16, #tpu.memory_space<vmem>>, vector<512x784xbf16>
    %c0_1 = arith.constant 0 : index
    %c0_2 = arith.constant 0 : index
    %1 = vector.load %arg2[%c0_1, %c0_2] : memref<784x3xbf16, #tpu.memory_space<vmem>>, vector<784x3xbf16>
    %cst = arith.constant dense<0.000000e+00> : vector<512x3xf32>
    %2 = tpu.matmul %0, %1, %cst {dimension_numbers = #tpu.dot_dimension_numbers<[1], [0], [0], [1], [0, 0, 1, 1], [], []>} : vector<512x784xbf16>, vector<784x3xbf16>, vector<512x3xf32> -> vector<512x3xf32>
    %c0_3 = arith.constant 0 : index
    %c0_4 = arith.constant 0 : index
    %3 = vector.load %arg3[%c0_3, %c0_4] : memref<1x3xf32, #tpu.memory_space<vmem>>, vector<1x3xf32>
    %4 = vector.broadcast %3 : vector<1x3xf32> to vector<512x3xf32>
    %5 = arith.addf %2, %4 : vector<512x3xf32>
    %6 = math.tanh %5 : vector<512x3xf32>
    %c0_5 = arith.constant 0 : index
    %c0_6 = arith.constant 0 : index
    %7 = vector.load %arg4[%c0_5, %c0_6] : memref<512x3xf32, #tpu.memory_space<vmem>>, vector<512x3xf32>
    tpu.vector_store %arg4[%c0_5, %c0_6], %6 {strides = array<i32>} : memref<512x3xf32, #tpu.memory_space<vmem>>, vector<512x3xf32>,
    return
  }
  func.func @transform_0(%arg0: i32) -> (i32, i32) {
    %c0_i32 = arith.constant 0 : i32
    %c0_i32_0 = arith.constant 0 : i32
    %c0_i32_1 = arith.constant 0 : i32
    return %c0_i32, %c0_i32_0 : i32, i32
  }
  func.func @transform_1(%arg0: i32) -> (i32, i32) {
    %c0_i32 = arith.constant 0 : i32
    %c0_i32_0 = arith.constant 0 : i32
    %c0_i32_1 = arith.constant 0 : i32
    return %c0_i32, %c0_i32_0 : i32, i32
  }
  func.func @transform_2(%arg0: i32) -> (i32, i32) {
    %c0_i32 = arith.constant 0 : i32
    %c0_i32_0 = arith.constant 0 : i32
    %c0_i32_1 = arith.constant 0 : i32
    return %c0_i32, %c0_i32_0 : i32, i32
  }
  func.func @transform_3(%arg0: i32) -> (i32, i32) {
    %c0_i32 = arith.constant 0 : i32
    %c0_i32_0 = arith.constant 0 : i32
    %c0_i32_1 = arith.constant 0 : i32
    return %c0_i32, %c0_i32_0 : i32, i32
  }
}

</mosaic_0001>

<bundles_post_ra>
// kernel: resnet_generator.10
= control target key start
LH: loop header
LB: loop body
LE: loop exit
PB: predicated region body
PF: predicated region fallthrough
CT: control target
= control target key end

     0   :  { %v1752_v0 = vmov 0   ;;  %vm446_vm0 = vcmask 154624   ;;  %vm543_vm1 = vcmask 1040384   ;;  %vm544_vm2 = vcmask 1041408   ;;  %s3342_s1 = inlined_call_operand.vmem [shape: bf16[147,16], index: 1, kind: input, shape index: {}]   ;;  %s3343_s0 = inlined_call_operand.vmem [shape: bf16[512,147], index: 0, kind: input, shape index: {}]   ;;  %s3344_s2 = inlined_call_operand.vmem [shape: f32[1,16], index: 2, kind: input, shape index: {}]   ;;  %s3345_s3 = inlined_call_operand.vmem [shape: f32[1,16], index: 3, kind: input, shape index: {}]   ;;  %s3346_s4 = inlined_call_operand.vmem [shape: f32[512,16], index: 4, kind: output, shape index: {}]  }
   0x1   :  { %550 = vmatprep.subr.bf16.mxu0 %v1752_v0  ;;  %v1644_v1 = vld [vmem:[%s3342_s1] sm:$0xff]   ;;  %1622 = vmatprep.subr.bf16.mxu1 %v1752_v0  ;;  %v1645_v2 = vld [vmem:[%s3342_s1 + $0x8] sm:$0xff]   ;;  %v1646_v3 = vld [vmem:[%s3342_s1 + $0x10] sm:$0xff]   ;;  %v1753_v11 = vmov 65535   ;;  %vm839_vm3 = vcmask 130048  }
   0x2   :  { %551 = vmatpush1.bf16.msra.mxu0 %v1644_v1  ;;  %1632 = vmatpush1.bf16.msra.mxu1 %v1644_v1  ;;  %v1647_v4 = vld [vmem:[%s3342_s1 + $0x18] sm:$0xff]   ;;  %v1656_v5 = vld [vmem:[%s3343_s0 + $0x4] ss:$8 sps:$4 sm:$0xff]   ;;  %v1650_v9 = vld [vmem:[%s3342_s1 + $0x30] sm:$0xff]   ;;  %v545_v12 = vsel %vm543_vm1, 4294967295, %v1753_v11 }
   0x3   :  { %552 = vmatprep.subr.bf16.mxu0 %v1752_v0  ;;  %1623 = vmatprep.subr.bf16.mxu1 %v1752_v0  ;;  %v1648_v6 = vld [vmem:[%s3342_s1 + $0x20] sm:$0xff]   ;;  %v1649_v7 = vld [vmem:[%s3342_s1 + $0x28] sm:$0xff]   ;;  %v1651_v10 = vld [vmem:[%s3342_s1 + $0x38] sm:$0xff]   ;;  %v546_v15 = vsel %vm544_vm2, %v545_v12, 0 }
   0x4   :  { %1590 = vmatprep.mubr.msk.bf16.mxu0 %vm446_vm0, %v1656_v5  ;;  %v1680_v8 = vld [vmem:[%s3343_s0 + $0x104] ss:$8 sps:$4 sm:$0xff]   ;;  %v1653_v14 = vld [vmem:[%s3342_s1 + $0x48] ss:$0 sps:$4 sm:$0x33]  }
   0x5   :  { %1606 = vmatprep.mubr.msk.bf16.mxu1 %vm446_vm0, %v1680_v8  ;;  %v1652_v13 = vld [vmem:[%s3342_s1 + $0x40] sm:$0xff]   ;;  %v548_v16 = vand.u32 %v1653_v14, %v546_v15  ;;  %v1657_v19 = vld [vmem:[%s3343_s0 + $0x14] ss:$8 sps:$4 sm:$0xff]   ;;  %v1659_v21 = vld [vmem:[%s3343_s0 + $0x10] ss:$8 sps:$4 sm:$0xff]  }
   0x6   :  { %553 = vmatpush1.bf16.msra.mxu0 %v1645_v2  ;;  %1633 = vmatpush1.bf16.msra.mxu1 %v1645_v2  ;;  %v1654_v17 = vld [vmem:[%s3343_s0] ss:$8 sps:$4 sm:$0xff]   ;;  %v1684_v20 = vld [vmem:[%s3343_s0 + $0x114] ss:$8 sps:$4 sm:$0xff]   ;;  %v1686_v22 = vld [vmem:[%s3343_s0 + $0x110] ss:$8 sps:$4 sm:$0xff]  }
   0x7   :  { %554 = vmatprep.subr.bf16.mxu0 %v1752_v0  ;;  %1624 = vmatprep.subr.bf16.mxu1 %v1752_v0  ;;  %v1678_v18 = vld [vmem:[%s3343_s0 + $0x100] ss:$8 sps:$4 sm:$0xff]   ;;  %v1660_v23 = vld [vmem:[%s3343_s0 + $0x24] ss:$8 sps:$4 sm:$0xff]   ;;  %v1663_v27 = vld [vmem:[%s3343_s0 + $0x34] ss:$8 sps:$4 sm:$0xff]  }
   0x8   :  { %v1690_v24 = vld [vmem:[%s3343_s0 + $0x124] ss:$8 sps:$4 sm:$0xff]   ;;  %v1662_v25 = vld [vmem:[%s3343_s0 + $0x20] ss:$8 sps:$4 sm:$0xff]   ;;  %v1696_v28 = vld [vmem:[%s3343_s0 + $0x134] ss:$8 sps:$4 sm:$0xff]  }
   0x9   :  { %v1692_v26 = vld [vmem:[%s3343_s0 + $0x120] ss:$8 sps:$4 sm:$0xff]   ;;  %v1665_v29 = vld [vmem:[%s3343_s0 + $0x30] ss:$8 sps:$4 sm:$0xff]   ;;  %v1666_v31 = vld [vmem:[%s3343_s0 + $0x44] ss:$8 sps:$4 sm:$0xff]  }
   0xa   :  { %555 = vmatpush1.bf16.msra.mxu0 %v1646_v3  ;;  %1634 = vmatpush1.bf16.msra.mxu1 %v1646_v3  ;;  %v1698_v30 = vld [vmem:[%s3343_s0 + $0x130] ss:$8 sps:$4 sm:$0xff]   ;;  %v1702_v32 = vld [vmem:[%s3343_s0 + $0x144] ss:$8 sps:$4 sm:$0xff]   ;;  %v1668_v33 = vld [vmem:[%s3343_s0 + $0x40] ss:$8 sps:$4 sm:$0xff]  }
   0xb   :  { %556 = vmatprep.subr.bf16.mxu0 %v1752_v0  ;;  %1625 = vmatprep.subr.bf16.mxu1 %v1752_v0  ;;  %v1704_v34 = vld [vmem:[%s3343_s0 + $0x140] ss:$8 sps:$4 sm:$0xff]   ;;  %v1669_v35 = vld [vmem:[%s3343_s0 + $0x54] ss:$8 sps:$4 sm:$0xff]   ;;  %v1671_v37 = vld [vmem:[%s3343_s0 + $0x50] ss:$8 sps:$4 sm:$0xff]  }
   0xc   :  { %v1708_v36 = vld [vmem:[%s3343_s0 + $0x154] ss:$8 sps:$4 sm:$0xff]   ;;  %v1710_v38 = vld [vmem:[%s3343_s0 + $0x150] ss:$8 sps:$4 sm:$0xff]   ;;  %v1672_v39 = vld [vmem:[%s3343_s0 + $0x64] ss:$8 sps:$4 sm:$0xff]  }
   0xd   :  { %v1714_v40 = vld [vmem:[%s3343_s0 + $0x164] ss:$8 sps:$4 sm:$0xff]   ;;  %v1674_v41 = vld [vmem:[%s3343_s0 + $0x60] ss:$8 sps:$4 sm:$0xff]   ;;  %v1675_v43 = vld [vmem:[%s3343_s0 + $0x74] ss:$8 sps:$4 sm:$0xff]  }
   0xe   :  { %557 = vmatpush1.bf16.msra.mxu0 %v1647_v4  ;;  %1635 = vmatpush1.bf16.msra.mxu1 %v1647_v4  ;;  %v1716_v42 = vld [vmem:[%s3343_s0 + $0x160] ss:$8 sps:$4 sm:$0xff]   ;;  %v1720_v44 = vld [vmem:[%s3343_s0 + $0x174] ss:$8 sps:$4 sm:$0xff]   ;;  %v1677_v45 = vld [vmem:[%s3343_s0 + $0x70] ss:$8 sps:$4 sm:$0xff]  }
   0xf   :  { %558 = vmatprep.subr.bf16.mxu0 %v1752_v0  ;;  %1626 = vmatprep.subr.bf16.mxu1 %v1752_v0  ;;  %v1722_v46 = vld [vmem:[%s3343_s0 + $0x170] ss:$8 sps:$4 sm:$0xff]   ;;  %v1681_v47 = vld [vmem:[%s3343_s0 + $0x84] ss:$8 sps:$4 sm:$0xff]   ;;  %v1683_v49 = vld [vmem:[%s3343_s0 + $0x80] ss:$8 sps:$4 sm:$0xff]  }
  0x10   :  { %v1726_v48 = vld [vmem:[%s3343_s0 + $0x184] ss:$8 sps:$4 sm:$0xff]   ;;  %v1728_v50 = vld [vmem:[%s3343_s0 + $0x180] ss:$8 sps:$4 sm:$0xff]   ;;  %v1687_v51 = vld [vmem:[%s3343_s0 + $0x94] ss:$8 sps:$4 sm:$0xff]  }
  0x11   :  { %v1729_v52 = vld [vmem:[%s3343_s0 + $0x194] ss:$8 sps:$4 sm:$0xff]   ;;  %v1689_v53 = vld [vmem:[%s3343_s0 + $0x90] ss:$8 sps:$4 sm:$0xff]   ;;  %v1693_v55 = vld [vmem:[%s3343_s0 + $0xa4] ss:$8 sps:$4 sm:$0xff]  }
  0x12   :  { %559 = vmatpush1.bf16.msra.mxu0 %v1648_v6  ;;  %1636 = vmatpush1.bf16.msra.mxu1 %v1648_v6  ;;  %v1731_v54 = vld [vmem:[%s3343_s0 + $0x190] ss:$8 sps:$4 sm:$0xff]   ;;  %v1732_v56 = vld [vmem:[%s3343_s0 + $0x1a4] ss:$8 sps:$4 sm:$0xff]   ;;  %v1695_v57 = vld [vmem:[%s3343_s0 + $0xa0] ss:$8 sps:$4 sm:$0xff]  }
  0x13   :  { %560 = vmatprep.subr.bf16.mxu0 %v1752_v0  ;;  %1627 = vmatprep.subr.bf16.mxu1 %v1752_v0  ;;  %v1734_v58 = vld [vmem:[%s3343_s0 + $0x1a0] ss:$8 sps:$4 sm:$0xff]   ;;  %v1699_v59 = vld [vmem:[%s3343_s0 + $0xb4] ss:$8 sps:$4 sm:$0xff]   ;;  %v1701_v61 = vld [vmem:[%s3343_s0 + $0xb0] ss:$8 sps:$4 sm:$0xff]  }
  0x14   :  { %v1735_v60 = vld [vmem:[%s3343_s0 + $0x1b4] ss:$8 sps:$4 sm:$0xff]   ;;  %v1737_v62 = vld [vmem:[%s3343_s0 + $0x1b0] ss:$8 sps:$4 sm:$0xff]   ;;  %v1705_v63 = vld [vmem:[%s3343_s0 + $0xc4] ss:$8 sps:$4 sm:$0xff]  }
  0x15   :  { %v1707_v1 = vld [vmem:[%s3343_s0 + $0xc0] ss:$8 sps:$4 sm:$0xff]   ;;  %v1711_v3 = vld [vmem:[%s3343_s0 + $0xd4] ss:$8 sps:$4 sm:$0xff]   ;;  %v1713_v5 = vld [vmem:[%s3343_s0 + $0xd0] ss:$8 sps:$4 sm:$0xff]  }
  0x16   :  { %561 = vmatpush1.bf16.msra.mxu0 %v1649_v7  ;;  %1637 = vmatpush1.bf16.msra.mxu1 %v1649_v7  ;;  %v1740_v2 = vld [vmem:[%s3343_s0 + $0x1c0] ss:$8 sps:$4 sm:$0xff]   ;;  %v1741_v4 = vld [vmem:[%s3343_s0 + $0x1d4] ss:$8 sps:$4 sm:$0xff]   ;;  %v1743_v6 = vld [vmem:[%s3343_s0 + $0x1d0] ss:$8 sps:$4 sm:$0xff]  }
  0x17   :  { %562 = vmatprep.subr.bf16.mxu0 %v1752_v0  ;;  %1628 = vmatprep.subr.bf16.mxu1 %v1752_v0  ;;  %v1717_v7 = vld [vmem:[%s3343_s0 + $0xe4] ss:$8 sps:$4 sm:$0xff]   ;;  %v1723_v11 = vld [vmem:[%s3343_s0 + $0xf4] ss:$8 sps:$4 sm:$0xff]   ;;  %v1749_v14 = vld [vmem:[%s3343_s0 + $0x1f0] ss:$8 sps:$4 sm:$0xff]  }
  0x18   :  { %v1744_v8 = vld [vmem:[%s3343_s0 + $0x1e4] ss:$8 sps:$4 sm:$0xff]   ;;  %v1747_v12 = vld [vmem:[%s3343_s0 + $0x1f4] ss:$8 sps:$4 sm:$0xff]  }
  0x1a   :  { %563 = vmatpush1.bf16.msra.mxu0 %v1650_v9  ;;  %1638 = vmatpush1.bf16.msra.mxu1 %v1650_v9  ;;  %v1719_v9 = vld [vmem:[%s3343_s0 + $0xe0] ss:$8 sps:$4 sm:$0xff]  }
  0x1b   :  { %564 = vmatprep.subr.bf16.mxu0 %v1752_v0  ;;  %1629 = vmatprep.subr.bf16.mxu1 %v1752_v0 }
  0x1e   :  { %565 = vmatpush1.bf16.msra.mxu0 %v1651_v10  ;;  %1639 = vmatpush1.bf16.msra.mxu1 %v1651_v10  ;;  %v1746_v10 = vld [vmem:[%s3343_s0 + $0x1e0] ss:$8 sps:$4 sm:$0xff]  }
  0x1f   :  { %566 = vmatprep.subr.bf16.mxu0 %v1752_v0  ;;  %1630 = vmatprep.subr.bf16.mxu1 %v1752_v0 }
  0x22   :  { %567 = vmatpush1.bf16.msra.mxu0 %v1652_v13  ;;  %1640 = vmatpush1.bf16.msra.mxu1 %v1652_v13  ;;  %v1725_v13 = vld [vmem:[%s3343_s0 + $0xf0] ss:$8 sps:$4 sm:$0xff]  }
  0x23   :  { %568 = vmatprep.subr.bf16.mxu0 %v1752_v0  ;;  %1631 = vmatprep.subr.bf16.mxu1 %v1752_v0  ;;  %v1738_v0 = vld [vmem:[%s3343_s0 + $0x1c4] ss:$8 sps:$4 sm:$0xff]  }
  0x26   :  { %569 = vmatpush1.bf16.msra.mxu0 %v548_v16  ;;  %1641 = vmatpush1.bf16.msra.mxu1 %v548_v16 }
  0x29   :  { %583 = vmatmul.mubr.bf16.vlgmr.msra.gmra.mrb[0].mxu0 %v1654_v17  ;;  %711 = vmatmul.mubr.bf16.vlgmr.msra.gmra.mrb[0].mxu1 %v1678_v18 }
  0x2a   :  { %1591 = vmatprep.mubr.msk.bf16.mxu0 %vm446_vm0, %v1657_v19  ;;  %1607 = vmatprep.mubr.msk.bf16.mxu1 %vm446_vm0, %v1684_v20 }
  0x31   :  { %591 = vmatmul.mubr.bf16.gmra.mrb[4].mxu0 %v1659_v21  ;;  %719 = vmatmul.mubr.bf16.gmra.mrb[4].mxu1 %v1686_v22 }
  0x32   :  { %1592 = vmatprep.mubr.msk.bf16.mxu0 %vm446_vm0, %v1660_v23  ;;  %1608 = vmatprep.mubr.msk.bf16.mxu1 %vm446_vm0, %v1690_v24 }
  0x39   :  { %599 = vmatmul.mubr.bf16.gmra.mrb[8].mxu0 %v1662_v25  ;;  %727 = vmatmul.mubr.bf16.gmra.mrb[8].mxu1 %v1692_v26 }
  0x3a   :  { %1593 = vmatprep.mubr.msk.bf16.mxu0 %vm446_vm0, %v1663_v27  ;;  %1609 = vmatprep.mubr.msk.bf16.mxu1 %vm446_vm0, %v1696_v28 }
  0x41   :  { %607 = vmatmul.mubr.bf16.gmra.mrb[12].mxu0 %v1665_v29  ;;  %735 = vmatmul.mubr.bf16.gmra.mrb[12].mxu1 %v1698_v30 }
  0x42   :  { %1594 = vmatprep.mubr.msk.bf16.mxu0 %vm446_vm0, %v1666_v31  ;;  %1610 = vmatprep.mubr.msk.bf16.mxu1 %vm446_vm0, %v1702_v32 }
  0x49   :  { %615 = vmatmul.mubr.bf16.gmra.mrb[16].mxu0 %v1668_v33  ;;  %743 = vmatmul.mubr.bf16.gmra.mrb[16].mxu1 %v1704_v34 }
  0x4a   :  { %1595 = vmatprep.mubr.msk.bf16.mxu0 %vm446_vm0, %v1669_v35  ;;  %1611 = vmatprep.mubr.msk.bf16.mxu1 %vm446_vm0, %v1708_v36 }
  0x51   :  { %623 = vmatmul.mubr.bf16.gmra.mrb[20].mxu0 %v1671_v37  ;;  %751 = vmatmul.mubr.bf16.gmra.mrb[20].mxu1 %v1710_v38 }
  0x52   :  { %1596 = vmatprep.mubr.msk.bf16.mxu0 %vm446_vm0, %v1672_v39  ;;  %1612 = vmatprep.mubr.msk.bf16.mxu1 %vm446_vm0, %v1714_v40 }
  0x59   :  { %631 = vmatmul.mubr.bf16.gmra.mrb[24].mxu0 %v1674_v41  ;;  %759 = vmatmul.mubr.bf16.gmra.mrb[24].mxu1 %v1716_v42 }
  0x5a   :  { %1597 = vmatprep.mubr.msk.bf16.mxu0 %vm446_vm0, %v1675_v43  ;;  %1613 = vmatprep.mubr.msk.bf16.mxu1 %vm446_vm0, %v1720_v44 }
  0x61   :  { %639 = vmatmul.mubr.bf16.gmra.mrb[28].mxu0 %v1677_v45  ;;  %767 = vmatmul.mubr.bf16.gmra.mrb[28].mxu1 %v1722_v46 }
  0x62   :  { %1598 = vmatprep.mubr.msk.bf16.mxu0 %vm446_vm0, %v1681_v47  ;;  %1614 = vmatprep.mubr.msk.bf16.mxu1 %vm446_vm0, %v1726_v48 }
  0x69   :  { %647 = vmatmul.mubr.bf16.gmra.mrb[32].mxu0 %v1683_v49  ;;  %775 = vmatmul.mubr.bf16.gmra.mrb[32].mxu1 %v1728_v50 }
  0x6a   :  { %1599 = vmatprep.mubr.msk.bf16.mxu0 %vm446_vm0, %v1687_v51  ;;  %1615 = vmatprep.mubr.msk.bf16.mxu1 %vm446_vm0, %v1729_v52 }
  0x71   :  { %655 = vmatmul.mubr.bf16.gmra.mrb[36].mxu0 %v1689_v53  ;;  %783 = vmatmul.mubr.bf16.gmra.mrb[36].mxu1 %v1731_v54 }
  0x72   :  { %1600 = vmatprep.mubr.msk.bf16.mxu0 %vm446_vm0, %v1693_v55  ;;  %1616 = vmatprep.mubr.msk.bf16.mxu1 %vm446_vm0, %v1732_v56 }
  0x79   :  { %663 = vmatmul.mubr.bf16.gmra.mrb[40].mxu0 %v1695_v57  ;;  %791 = vmatmul.mubr.bf16.gmra.mrb[40].mxu1 %v1734_v58 }
  0x7a   :  { %1601 = vmatprep.mubr.msk.bf16.mxu0 %vm446_vm0, %v1699_v59  ;;  %1617 = vmatprep.mubr.msk.bf16.mxu1 %vm446_vm0, %v1735_v60 }
  0x81   :  { %671 = vmatmul.mubr.bf16.gmra.mrb[44].mxu0 %v1701_v61  ;;  %799 = vmatmul.mubr.bf16.gmra.mrb[44].mxu1 %v1737_v62 }
  0x82   :  { %1602 = vmatprep.mubr.msk.bf16.mxu0 %vm446_vm0, %v1705_v63  ;;  %1618 = vmatprep.mubr.msk.bf16.mxu1 %vm446_vm0, %v1738_v0 }
  0x89   :  { %679 = vmatmul.mubr.bf16.gmra.mrb[48].mxu0 %v1707_v1  ;;  %807 = vmatmul.mubr.bf16.gmra.mrb[48].mxu1 %v1740_v2 }
  0x8a   :  { %1603 = vmatprep.mubr.msk.bf16.mxu0 %vm446_vm0, %v1711_v3  ;;  %1619 = vmatprep.mubr.msk.bf16.mxu1 %vm446_vm0, %v1741_v4 }
  0x91   :  { %687 = vmatmul.mubr.bf16.gmra.mrb[52].mxu0 %v1713_v5  ;;  %815 = vmatmul.mubr.bf16.gmra.mrb[52].mxu1 %v1743_v6 }
  0x92   :  { %1604 = vmatprep.mubr.msk.bf16.mxu0 %vm446_vm0, %v1717_v7  ;;  %1620 = vmatprep.mubr.msk.bf16.mxu1 %vm446_vm0, %v1744_v8 }
  0x99   :  { %695 = vmatmul.mubr.bf16.gmra.mrb[56].mxu0 %v1719_v9  ;;  %823 = vmatmul.mubr.bf16.gmra.mrb[56].mxu1 %v1746_v10 }
  0x9a   :  { %1605 = vmatprep.mubr.msk.bf16.mxu0 %vm446_vm0, %v1723_v11  ;;  %1621 = vmatprep.mubr.msk.bf16.mxu1 %vm446_vm0, %v1747_v12 }
  0xa1   :  { %703 = vmatmul.mubr.bf16.gmra.mrb[60].mxu0 %v1725_v13  ;;  %831 = vmatmul.mubr.bf16.gmra.mrb[60].mxu1 %v1749_v14 }
  0xfc   :  { %v2033_v15 = vpop.f32.mrb[0].mxu0  ;;  %v2035_v16 = vpop.f32.mrb[0].mxu1 }
  0xfd   :  { %v586_v17 = vpop.f32.mrb[1].mxu0  ;;  %v714_v18 = vpop.f32.mrb[1].mxu1  ;;  %v840_v21 = vsel %vm839_vm3, %v2033_v15, 0.0 }
  0xfe   :  { %v2037_v19 = vpop.f32.mrb[2].mxu0  ;;  %v2039_v20 = vpop.f32.mrb[2].mxu1 }
  0xff   :  { %v841_v22 = vsel %vm839_vm3, %v2037_v19, 0.0  ;;  %v589_v23 = vpop.f32.mrb[3].mxu0  ;;  %v717_v24 = vpop.f32.mrb[3].mxu1 }
 0x100   :  { %v842_v25 = vadd.f32 %v841_v22, %v840_v21 }
 0x104   :  { %v2045_v26 = vpop.f32.mrb[4].mxu0  ;;  %v2047_v27 = vpop.f32.mrb[4].mxu1 }
 0x105   :  { %v843_v28 = vsel %vm839_vm3, %v2045_v26, 0.0  ;;  %v594_v29 = vpop.f32.mrb[5].mxu0  ;;  %v722_v30 = vpop.f32.mrb[5].mxu1 }
 0x106   :  { %v844_v31 = vadd.f32 %v843_v28, %v842_v25  ;;  %v2051_v32 = vpop.f32.mrb[6].mxu0  ;;  %v2053_v33 = vpop.f32.mrb[6].mxu1 }
 0x107   :  { %3392 = vst [vmem:[#allocation2_spill] sm:$0xff] %v2051_v32  ;;  %v845_v34 = vsel %vm839_vm3, %v2051_v32, 0.0  ;;  %v597_v35 = vpop.f32.mrb[7].mxu0  ;;  %v725_v36 = vpop.f32.mrb[7].mxu1 }
 0x108   :  { %v846_v37 = vadd.f32 %v845_v34, %v844_v31 }
 0x10c   :  { %v2057_v38 = vpop.f32.mrb[8].mxu0  ;;  %v2059_v39 = vpop.f32.mrb[8].mxu1 }
 0x10d   :  { %3393 = vst [vmem:[#allocation3_spill] sm:$0xff] %v2057_v38  ;;  %v847_v40 = vsel %vm839_vm3, %v2057_v38, 0.0  ;;  %v602_v41 = vpop.f32.mrb[9].mxu0  ;;  %v730_v42 = vpop.f32.mrb[9].mxu1 }
 0x10e   :  { %v848_v43 = vadd.f32 %v847_v40, %v846_v37  ;;  %v2063_v44 = vpop.f32.mrb[10].mxu0  ;;  %v2065_v45 = vpop.f32.mrb[10].mxu1 }
 0x10f   :  { %3394 = vst [vmem:[#allocation4_spill] sm:$0xff] %v2063_v44  ;;  %v849_v46 = vsel %vm839_vm3, %v2063_v44, 0.0  ;;  %v605_v47 = vpop.f32.mrb[11].mxu0  ;;  %v733_v48 = vpop.f32.mrb[11].mxu1 }
 0x110   :  { %v850_v49 = vadd.f32 %v849_v46, %v848_v43 }
 0x114   :  { %v2069_v50 = vpop.f32.mrb[12].mxu0  ;;  %v2071_v51 = vpop.f32.mrb[12].mxu1 }
 0x115   :  { %v851_v52 = vsel %vm839_vm3, %v2069_v50, 0.0  ;;  %v610_v53 = vpop.f32.mrb[13].mxu0  ;;  %v738_v54 = vpop.f32.mrb[13].mxu1 }
 0x116   :  { %v852_v55 = vadd.f32 %v851_v52, %v850_v49  ;;  %v2075_v56 = vpop.f32.mrb[14].mxu0  ;;  %v2077_v57 = vpop.f32.mrb[14].mxu1 }
 0x117   :  { %v853_v58 = vsel %vm839_vm3, %v2075_v56, 0.0  ;;  %v613_v59 = vpop.f32.mrb[15].mxu0  ;;  %v741_v60 = vpop.f32.mrb[15].mxu1 }
 0x118   :  { %v854_v61 = vadd.f32 %v853_v58, %v852_v55 }
 0x11c   :  { %v2081_v62 = vpop.f32.mrb[16].mxu0  ;;  %v2083_v63 = vpop.f32.mrb[16].mxu1 }
 0x11d   :  { %v855_v0 = vsel %vm839_vm3, %v2081_v62, 0.0  ;;  %v618_v1 = vpop.f32.mrb[17].mxu0  ;;  %v746_v2 = vpop.f32.mrb[17].mxu1 }
 0x11e   :  { %v856_v3 = vadd.f32 %v855_v0, %v854_v61  ;;  %v2087_v4 = vpop.f32.mrb[18].mxu0  ;;  %v2089_v5 = vpop.f32.mrb[18].mxu1 }
 0x11f   :  { %v857_v6 = vsel %vm839_vm3, %v2087_v4, 0.0  ;;  %v621_v7 = vpop.f32.mrb[19].mxu0  ;;  %v749_v8 = vpop.f32.mrb[19].mxu1 }
 0x120   :  { %v858_v9 = vadd.f32 %v857_v6, %v856_v3 }
 0x124   :  { %v2093_v10 = vpop.f32.mrb[20].mxu0  ;;  %v2095_v11 = vpop.f32.mrb[20].mxu1 }
 0x125   :  { %v859_v12 = vsel %vm839_vm3, %v2093_v10, 0.0  ;;  %v626_v13 = vpop.f32.mrb[21].mxu0  ;;  %v754_v14 = vpop.f32.mrb[21].mxu1 }
 0x126   :  { %v860_v17 = vadd.f32 %v859_v12, %v858_v9  ;;  %v2099_v18 = vpop.f32.mrb[22].mxu0  ;;  %v2101_v21 = vpop.f32.mrb[22].mxu1 }
 0x127   :  { %v861_v22 = vsel %vm839_vm3, %v2099_v18, 0.0  ;;  %v629_v23 = vpop.f32.mrb[23].mxu0  ;;  %v757_v24 = vpop.f32.mrb[23].mxu1 }
 0x128   :  { %v862_v25 = vadd.f32 %v861_v22, %v860_v17 }
 0x12c   :  { %v2105_v28 = vpop.f32.mrb[24].mxu0  ;;  %v2107_v29 = vpop.f32.mrb[24].mxu1 }
 0x12d   :  { %v863_v30 = vsel %vm839_vm3, %v2105_v28, 0.0  ;;  %v634_v31 = vpop.f32.mrb[25].mxu0  ;;  %v762_v34 = vpop.f32.mrb[25].mxu1 }
 0x12e   :  { %v864_v35 = vadd.f32 %v863_v30, %v862_v25  ;;  %v2111_v36 = vpop.f32.mrb[26].mxu0  ;;  %v2113_v37 = vpop.f32.mrb[26].mxu1 }
 0x12f   :  { %v865_v40 = vsel %vm839_vm3, %v2111_v36, 0.0  ;;  %v637_v41 = vpop.f32.mrb[27].mxu0  ;;  %v765_v42 = vpop.f32.mrb[27].mxu1 }
 0x130   :  { %v866_v43 = vadd.f32 %v865_v40, %v864_v35 }
 0x134   :  { %v2117_v46 = vpop.f32.mrb[28].mxu0  ;;  %v2119_v47 = vpop.f32.mrb[28].mxu1 }
 0x135   :  { %v867_v48 = vsel %vm839_vm3, %v2117_v46, 0.0  ;;  %v642_v49 = vpop.f32.mrb[29].mxu0  ;;  %v770_v52 = vpop.f32.mrb[29].mxu1 }
 0x136   :  { %v868_v53 = vadd.f32 %v867_v48, %v866_v43  ;;  %v2123_v54 = vpop.f32.mrb[30].mxu0  ;;  %v2125_v55 = vpop.f32.mrb[30].mxu1 }
 0x137   :  { %3395 = vst [vmem:[#allocation5_spill] sm:$0xff] %v2123_v54  ;;  %v869_v58 = vsel %vm839_vm3, %v2123_v54, 0.0  ;;  %v645_v59 = vpop.f32.mrb[31].mxu0  ;;  %v773_v60 = vpop.f32.mrb[31].mxu1 }
 0x138   :  { %v870_v61 = vadd.f32 %v869_v58, %v868_v53 }
 0x13c   :  { %v2129_v0 = vpop.f32.mrb[32].mxu0  ;;  %v2131_v1 = vpop.f32.mrb[32].mxu1 }
 0x13d   :  { %3396 = vst [vmem:[#allocation6_spill] sm:$0xff] %v2129_v0  ;;  %v871_v2 = vsel %vm839_vm3, %v2129_v0, 0.0  ;;  %v650_v3 = vpop.f32.mrb[33].mxu0  ;;  %v778_v6 = vpop.f32.mrb[33].mxu1 }
 0x13e   :  { %v872_v7 = vadd.f32 %v871_v2, %v870_v61  ;;  %v2135_v8 = vpop.f32.mrb[34].mxu0  ;;  %v2137_v9 = vpop.f32.mrb[34].mxu1 }
 0x13f   :  { %3397 = vst [vmem:[#allocation7_spill] sm:$0xff] %v2135_v8  ;;  %v873_v12 = vsel %vm839_vm3, %v2135_v8, 0.0  ;;  %v653_v13 = vpop.f32.mrb[35].mxu0  ;;  %v781_v14 = vpop.f32.mrb[35].mxu1 }
 0x140   :  { %v874_v17 = vadd.f32 %v873_v12, %v872_v7 }
 0x144   :  { %v2141_v22 = vpop.f32.mrb[36].mxu0  ;;  %v2143_v23 = vpop.f32.mrb[36].mxu1 }
 0x145   :  { %3398 = vst [vmem:[#allocation8_spill] sm:$0xff] %v2141_v22  ;;  %v875_v24 = vsel %vm839_vm3, %v2141_v22, 0.0  ;;  %v658_v25 = vpop.f32.mrb[37].mxu0  ;;  %v786_v30 = vpop.f32.mrb[37].mxu1 }
 0x146   :  { %v876_v31 = vadd.f32 %v875_v24, %v874_v17  ;;  %v2147_v34 = vpop.f32.mrb[38].mxu0  ;;  %v2149_v35 = vpop.f32.mrb[38].mxu1 }
 0x147   :  { %3399 = vst [vmem:[#allocation9_spill] sm:$0xff] %v2147_v34  ;;  %v877_v40 = vsel %vm839_vm3, %v2147_v34, 0.0  ;;  %v661_v41 = vpop.f32.mrb[39].mxu0  ;;  %v789_v42 = vpop.f32.mrb[39].mxu1 }
 0x148   :  { %v878_v43 = vadd.f32 %v877_v40, %v876_v31 }
 0x14c   :  { %v2153_v48 = vpop.f32.mrb[40].mxu0  ;;  %v2155_v49 = vpop.f32.mrb[40].mxu1 }
 0x14d   :  { %3400 = vst [vmem:[#allocation10_spill] sm:$0xff] %v2153_v48  ;;  %v879_v52 = vsel %vm839_vm3, %v2153_v48, 0.0  ;;  %v666_v53 = vpop.f32.mrb[41].mxu0  ;;  %v794_v58 = vpop.f32.mrb[41].mxu1 }
 0x14e   :  { %v880_v59 = vadd.f32 %v879_v52, %v878_v43  ;;  %v2159_v60 = vpop.f32.mrb[42].mxu0  ;;  %v2161_v61 = vpop.f32.mrb[42].mxu1 }
 0x14f   :  { %3401 = vst [vmem:[#allocation11_spill] sm:$0xff] %v2159_v60  ;;  %v881_v2 = vsel %vm839_vm3, %v2159_v60, 0.0  ;;  %v669_v3 = vpop.f32.mrb[43].mxu0  ;;  %v797_v6 = vpop.f32.mrb[43].mxu1 }
 0x150   :  { %v882_v7 = vadd.f32 %v881_v2, %v880_v59 }
 0x154   :  { %v2165_v12 = vpop.f32.mrb[44].mxu0  ;;  %v2167_v13 = vpop.f32.mrb[44].mxu1 }
 0x155   :  { %3402 = vst [vmem:[#allocation12_spill] sm:$0xff] %v2165_v12  ;;  %v883_v14 = vsel %vm839_vm3, %v2165_v12, 0.0  ;;  %v674_v17 = vpop.f32.mrb[45].mxu0  ;;  %v802_v24 = vpop.f32.mrb[45].mxu1 }
 0x156   :  { %v884_v25 = vadd.f32 %v883_v14, %v882_v7  ;;  %v2171_v30 = vpop.f32.mrb[46].mxu0  ;;  %v2173_v31 = vpop.f32.mrb[46].mxu1 }
 0x157   :  { %3403 = vst [vmem:[#allocation13_spill] sm:$0xff] %v2171_v30  ;;  %3404 = vst [vmem:[#allocation14_spill] sm:$0xff] %v2173_v31  ;;  %v885_v40 = vsel %vm839_vm3, %v2171_v30, 0.0  ;;  %v677_v41 = vpop.f32.mrb[47].mxu0  ;;  %v805_v42 = vpop.f32.mrb[47].mxu1 }
 0x158   :  { %v886_v43 = vadd.f32 %v885_v40, %v884_v25 }
 0x15c   :  { %v2177_v52 = vpop.f32.mrb[48].mxu0  ;;  %v2179_v53 = vpop.f32.mrb[48].mxu1 }
 0x15d   :  { %3405 = vst [vmem:[#allocation15_spill] sm:$0xff] %v2177_v52  ;;  %3406 = vst [vmem:[#allocation16_spill] sm:$0xff] %v2179_v53  ;;  %v887_v58 = vsel %vm839_vm3, %v2177_v52, 0.0  ;;  %v682_v59 = vpop.f32.mrb[49].mxu0  ;;  %v810_v2 = vpop.f32.mrb[49].mxu1 }
 0x15e   :  { %v888_v3 = vadd.f32 %v887_v58, %v886_v43  ;;  %v2183_v6 = vpop.f32.mrb[50].mxu0  ;;  %v2185_v7 = vpop.f32.mrb[50].mxu1 }
 0x15f   :  { %3407 = vst [vmem:[#allocation17_spill] sm:$0xff] %v2183_v6  ;;  %3408 = vst [vmem:[#allocation18_spill] sm:$0xff] %v2185_v7  ;;  %v889_v14 = vsel %vm839_vm3, %v2183_v6, 0.0  ;;  %v685_v17 = vpop.f32.mrb[51].mxu0  ;;  %v813_v24 = vpop.f32.mrb[51].mxu1 }
 0x160   :  { %v890_v25 = vadd.f32 %v889_v14, %v888_v3 }
 0x164   :  { %v2189_v40 = vpop.f32.mrb[52].mxu0  ;;  %v2191_v41 = vpop.f32.mrb[52].mxu1 }
 0x165   :  { %3409 = vst [vmem:[#allocation19_spill] sm:$0xff] %v2189_v40  ;;  %3410 = vst [vmem:[#allocation20_spill] sm:$0xff] %v2191_v41  ;;  %v891_v42 = vsel %vm839_vm3, %v2189_v40, 0.0  ;;  %v690_v59 = vpop.f32.mrb[53].mxu0  ;;  %v818_v2 = vpop.f32.mrb[53].mxu1 }
 0x166   :  { %v892_v43 = vadd.f32 %v891_v42, %v890_v25  ;;  %v2195_v58 = vpop.f32.mrb[54].mxu0  ;;  %v2197_v52 = vpop.f32.mrb[54].mxu1 }
 0x167   :  { %3411 = vst [vmem:[#allocation21_spill] sm:$0xff] %v2195_v58  ;;  %3412 = vst [vmem:[#allocation22_spill] sm:$0xff] %v2197_v52  ;;  %v893_v6 = vsel %vm839_vm3, %v2195_v58, 0.0  ;;  %v693_v17 = vpop.f32.mrb[55].mxu0  ;;  %v821_v24 = vpop.f32.mrb[55].mxu1 }
 0x168   :  { %v894_v3 = vadd.f32 %v893_v6, %v892_v43 }
 0x16c   :  { %v2201_v14 = vpop.f32.mrb[56].mxu0  ;;  %v2203_v30 = vpop.f32.mrb[56].mxu1 }
 0x16d   :  { %3413 = vst [vmem:[#allocation23_spill] sm:$0xff] %v2201_v14  ;;  %3414 = vst [vmem:[#allocation24_spill] sm:$0xff] %v2203_v30  ;;  %v895_v40 = vsel %vm839_vm3, %v2201_v14, 0.0  ;;  %v698_v59 = vpop.f32.mrb[57].mxu0  ;;  %v826_v2 = vpop.f32.mrb[57].mxu1 }
 0x16e   :  { %v896_v25 = vadd.f32 %v895_v40, %v894_v3  ;;  %v2207_v42 = vpop.f32.mrb[58].mxu0  ;;  %v2209_v12 = vpop.f32.mrb[58].mxu1 }
 0x16f   :  { %3415 = vst [vmem:[#allocation25_spill] sm:$0xff] %v2207_v42  ;;  %3416 = vst [vmem:[#allocation26_spill] sm:$0xff] %v2209_v12  ;;  %v897_v58 = vsel %vm839_vm3, %v2207_v42, 0.0  ;;  %v701_v17 = vpop.f32.mrb[59].mxu0  ;;  %v829_v24 = vpop.f32.mrb[59].mxu1 }
 0x170   :  { %v898_v6 = vadd.f32 %v897_v58, %v896_v25  ;;  %v903_v25 = vsel %vm839_vm3, %v2035_v16, 0.0 }
 0x174   :  { %v2213_v43 = vpop.f32.mrb[60].mxu0  ;;  %v2215_v60 = vpop.f32.mrb[60].mxu1 }
 0x175   :  { %3417 = vst [vmem:[#allocation27_spill] sm:$0xff] %v2213_v43  ;;  %3418 = vst [vmem:[#allocation28_spill] sm:$0xff] %v2215_v60  ;;  %v899_v14 = vsel %vm839_vm3, %v2213_v43, 0.0  ;;  %v706_v59 = vpop.f32.mrb[61].mxu0  ;;  %v834_v2 = vpop.f32.mrb[61].mxu1  ;;  %v905_v43 = vsel %vm839_vm3, %v2039_v20, 0.0 }
 0x176   :  { %v900_v40 = vadd.f32 %v899_v14, %v898_v6  ;;  %v2219_v3 = vpop.f32.mrb[62].mxu0  ;;  %v2221_v48 = vpop.f32.mrb[62].mxu1  ;;  %v907_v14 = vsel %vm839_vm3, %v2047_v27, 0.0  ;;  %v909_v2 = vsel %vm839_vm3, %v2053_v33, 0.0 }
 0x177   :  { %3419 = vst [vmem:[#allocation29_spill] sm:$0xff] %v2221_v48  ;;  %v901_v42 = vsel %vm839_vm3, %v2219_v3, 0.0  ;;  %v709_v17 = vpop.f32.mrb[63].mxu0  ;;  %v837_v24 = vpop.f32.mrb[63].mxu1 }
 0x178   :  { %v902_v58 = vadd.f32 %v901_v42, %v900_v40  ;;  %v911_v17 = vsel %vm839_vm3, %v2059_v39, 0.0  ;;  %v913_v40 = vsel %vm839_vm3, %v2065_v45, 0.0 }
 0x17a   :  { %v904_v34 = vadd.f32 %v903_v25, %v902_v58  ;;  %v915_v58 = vsel %vm839_vm3, %v2071_v51, 0.0 }
 0x17c   :  { %v906_v59 = vadd.f32 %v905_v43, %v904_v34  ;;  %v917_v43 = vsel %vm839_vm3, %v2077_v57, 0.0 }
 0x17e   :  { %v908_v6 = vadd.f32 %v907_v14, %v906_v59  ;;  %v919_v59 = vsel %vm839_vm3, %v2083_v63, 0.0 }
 0x180   :  { %v910_v22 = vadd.f32 %v909_v2, %v908_v6  ;;  %v921_v6 = vsel %vm839_vm3, %v2089_v5, 0.0  ;;  %v923_v2 = vsel %vm839_vm3, %v2095_v11, 0.0 }
 0x182   :  { %v912_v42 = vadd.f32 %v911_v17, %v910_v22 }
 0x184   :  { %v914_v24 = vadd.f32 %v913_v40, %v912_v42  ;;  %v925_v42 = vsel %vm839_vm3, %v2101_v21, 0.0 }
 0x186   :  { %v916_v34 = vadd.f32 %v915_v58, %v914_v24  ;;  %v927_v24 = vsel %vm839_vm3, %v2107_v29, 0.0 }
 0x188   :  { %v918_v25 = vadd.f32 %v917_v43, %v916_v34  ;;  %v929_v34 = vsel %vm839_vm3, %v2113_v37, 0.0 }
 0x18a   :  { %v920_v14 = vadd.f32 %v919_v59, %v918_v25  ;;  %v931_v25 = vsel %vm839_vm3, %v2119_v47, 0.0 }
 0x18c   :  { %v922_v22 = vadd.f32 %v921_v6, %v920_v14  ;;  %v933_v14 = vsel %vm839_vm3, %v2125_v55, 0.0 }
 0x18e   :  { %v924_v17 = vadd.f32 %v923_v2, %v922_v22  ;;  %v935_v22 = vsel %vm839_vm3, %v2131_v1, 0.0 }
 0x190   :  { %v926_v40 = vadd.f32 %v925_v42, %v924_v17  ;;  %v937_v17 = vsel %vm839_vm3, %v2137_v9, 0.0 }
 0x192   :  { %v928_v58 = vadd.f32 %v927_v24, %v926_v40  ;;  %v939_v40 = vsel %vm839_vm3, %v2143_v23, 0.0 }
 0x194   :  { %v930_v43 = vadd.f32 %v929_v34, %v928_v58  ;;  %v941_v58 = vsel %vm839_vm3, %v2149_v35, 0.0 }
 0x196   :  { %v932_v59 = vadd.f32 %v931_v25, %v930_v43  ;;  %v943_v43 = vsel %vm839_vm3, %v2155_v49, 0.0 }
 0x198   :  { %v934_v6 = vadd.f32 %v933_v14, %v932_v59  ;;  %v945_v59 = vsel %vm839_vm3, %v2161_v61, 0.0 }
 0x19a   :  { %v936_v2 = vadd.f32 %v935_v22, %v934_v6  ;;  %v947_v6 = vsel %vm839_vm3, %v2167_v13, 0.0 }
 0x19c   :  { %v938_v42 = vadd.f32 %v937_v17, %v936_v2  ;;  %v949_v2 = vsel %vm839_vm3, %v2173_v31, 0.0 }
 0x19e   :  { %v940_v24 = vadd.f32 %v939_v40, %v938_v42  ;;  %v951_v42 = vsel %vm839_vm3, %v2179_v53, 0.0 }
 0x1a0   :  { %v942_v34 = vadd.f32 %v941_v58, %v940_v24  ;;  %v953_v24 = vsel %vm839_vm3, %v2185_v7, 0.0 }
 0x1a2   :  { %v944_v25 = vadd.f32 %v943_v43, %v942_v34  ;;  %v955_v34 = vsel %vm839_vm3, %v2191_v41, 0.0 }
 0x1a4   :  { %v946_v14 = vadd.f32 %v945_v59, %v944_v25  ;;  %v957_v25 = vsel %vm839_vm3, %v2197_v52, 0.0 }
 0x1a6   :  { %v948_v22 = vadd.f32 %v947_v6, %v946_v14  ;;  %v959_v14 = vsel %vm839_vm3, %v2203_v30, 0.0 }
 0x1a8   :  { %v950_v17 = vadd.f32 %v949_v2, %v948_v22  ;;  %v961_v22 = vsel %vm839_vm3, %v2209_v12, 0.0  ;;  %v963_v2 = vsel %vm839_vm3, %v2215_v60, 0.0 }
 0x1aa   :  { %v952_v40 = vadd.f32 %v951_v42, %v950_v17 }
 0x1ac   :  { %v954_v58 = vadd.f32 %v953_v24, %v952_v40  ;;  %v965_v40 = vsel %vm839_vm3, %v2221_v48, 0.0 }
 0x1ae   :  { %v956_v43 = vadd.f32 %v955_v34, %v954_v58 }
 0x1b0   :  { %v958_v59 = vadd.f32 %v957_v25, %v956_v43 }
 0x1b2   :  { %v960_v6 = vadd.f32 %v959_v14, %v958_v59 }
 0x1b4   :  { %v962_v17 = vadd.f32 %v961_v22, %v960_v6 }
 0x1b6   :  { %v964_v42 = vadd.f32 %v963_v2, %v962_v17 }
 0x1b8   :  { %v966_v24 = vadd.f32 %v965_v40, %v964_v42 }
 0x1ba   :  { %v967_v58 = vrot.slane %v966_v24, 4 }
 0x1bc   :  { %v968_v34 = vadd.f32 %v967_v58, %v966_v24 }
 0x1be   :  { %v969_v52 = vrot.slane %v968_v34, 2 }
 0x1c0   :  { %v970_v43 = vadd.f32 %v969_v52, %v968_v34 }
 0x1c2   :  { %v971_v25 = vrot.slane %v970_v43, 1 }
 0x1c4   :  { %v972_v41 = vadd.f32 %v971_v25, %v970_v43 }
 0x1c6   :  { %v2289_v30 = vmul.f32 0.001953125, %v972_v41 }
 0x1c8   :  { %v975_v59 = vsub.f32 %v2033_v15, %v2289_v30  ;;  %v976_v14 = vsub.f32 %v2037_v19, %v2289_v30  ;;  %v977_v6 = vsub.f32 %v2045_v26, %v2289_v30  ;;  %v978_v22 = vsub.f32 %v2051_v32, %v2289_v30 }
 0x1c9   :  { %v979_v52 = vsub.f32 %v2057_v38, %v2289_v30  ;;  %v980_v41 = vsub.f32 %v2063_v44, %v2289_v30  ;;  %v981_v43 = vsub.f32 %v2069_v50, %v2289_v30  ;;  %v982_v38 = vsub.f32 %v2075_v56, %v2289_v30 }
 0x1ca   :  { %v1039_v2 = vmul.f32 %v975_v59, %v975_v59  ;;  %v1040_v17 = vmul.f32 %v976_v14, %v976_v14  ;;  %v1041_v42 = vmul.f32 %v977_v6, %v977_v6  ;;  %v1042_v40 = vmul.f32 %v978_v22, %v978_v22 }
 0x1cb   :  { %v1043_v25 = vmul.f32 %v979_v52, %v979_v52  ;;  %v1044_v6 = vmul.f32 %v980_v41, %v980_v41  ;;  %v983_v22 = vsub.f32 %v2081_v62, %v2289_v30  ;;  %v984_v52 = vsub.f32 %v2087_v4, %v2289_v30 }
 0x1cc   :  { %v1103_v24 = vsel %vm839_vm3, %v1039_v2, 0.0  ;;  %v1104_v58 = vsel %vm839_vm3, %v1040_v17, 0.0  ;;  %v1106_v59 = vsel %vm839_vm3, %v1041_v42, 0.0  ;;  %v1108_v32 = vsel %vm839_vm3, %v1042_v40, 0.0 }
 0x1cd   :  { %v1105_v34 = vadd.f32 %v1104_v58, %v1103_v24  ;;  %v1045_v2 = vmul.f32 %v981_v43, %v981_v43  ;;  %v1110_v17 = vsel %vm839_vm3, %v1043_v25, 0.0  ;;  %v1046_v58 = vmul.f32 %v982_v38, %v982_v38 }
 0x1ce   :  { %v1112_v42 = vsel %vm839_vm3, %v1044_v6, 0.0  ;;  %v985_v41 = vsub.f32 %v2093_v10, %v2289_v30  ;;  %v986_v43 = vsub.f32 %v2099_v18, %v2289_v30  ;;  %v987_v38 = vsub.f32 %v2105_v28, %v2289_v30 }
 0x1cf   :  { %v1107_v14 = vadd.f32 %v1106_v59, %v1105_v34  ;;  %v1047_v59 = vmul.f32 %v983_v22, %v983_v22  ;;  %v988_v22 = vsub.f32 %v2111_v36, %v2289_v30 }
 0x1d1   :  { %v1109_v44 = vadd.f32 %v1108_v32, %v1107_v14  ;;  %v1114_v32 = vsel %vm839_vm3, %v1045_v2, 0.0  ;;  %v1048_v14 = vmul.f32 %v984_v52, %v984_v52  ;;  %v1118_v6 = vsel %vm839_vm3, %v1047_v59, 0.0 }
 0x1d2   :  { %v989_v52 = vsub.f32 %v2117_v46, %v2289_v30 }
 0x1d3   :  { %v1111_v24 = vadd.f32 %v1110_v17, %v1109_v44  ;;  %v1116_v44 = vsel %vm839_vm3, %v1046_v58, 0.0  ;;  %v1049_v17 = vmul.f32 %v985_v41, %v985_v41  ;;  %v1120_v2 = vsel %vm839_vm3, %v1048_v14, 0.0 }
 0x1d4   :  { %v990_v41 = vsub.f32 %v2123_v54, %v2289_v30 }
 0x1d5   :  { %v1113_v34 = vadd.f32 %v1112_v42, %v1111_v24  ;;  %v1050_v42 = vmul.f32 %v986_v43, %v986_v43  ;;  %v1122_v58 = vsel %vm839_vm3, %v1049_v17, 0.0  ;;  %v991_v43 = vsub.f32 %v2129_v0, %v2289_v30 }
 0x1d7   :  { %v1115_v40 = vadd.f32 %v1114_v32, %v1113_v34  ;;  %v1051_v32 = vmul.f32 %v987_v38, %v987_v38  ;;  %v1124_v59 = vsel %vm839_vm3, %v1050_v42, 0.0  ;;  %v992_v38 = vsub.f32 %v2135_v8, %v2289_v30 }
 0x1d8   :  { %v1055_v54 = vmul.f32 %v991_v43, %v991_v43 }
 0x1d9   :  { %v1117_v25 = vadd.f32 %v1116_v44, %v1115_v40  ;;  %v1052_v44 = vmul.f32 %v988_v22, %v988_v22  ;;  %v1126_v14 = vsel %vm839_vm3, %v1051_v32, 0.0  ;;  %v1056_v0 = vmul.f32 %v992_v38, %v992_v38 }
 0x1db   :  { %v1119_v24 = vadd.f32 %v1118_v6, %v1117_v25  ;;  %v1053_v6 = vmul.f32 %v989_v52, %v989_v52  ;;  %v1128_v17 = vsel %vm839_vm3, %v1052_v44, 0.0  ;;  %v1134_v44 = vsel %vm839_vm3, %v1055_v54, 0.0 }
 0x1dd   :  { %v1121_v34 = vadd.f32 %v1120_v2, %v1119_v24  ;;  %v1054_v2 = vmul.f32 %v990_v41, %v990_v41  ;;  %v1130_v42 = vsel %vm839_vm3, %v1053_v6, 0.0  ;;  %v1136_v6 = vsel %vm839_vm3, %v1056_v0, 0.0 }
 0x1df   :  { %v1123_v40 = vadd.f32 %v1122_v58, %v1121_v34  ;;  %v3420_v58 = vld [vmem:[#allocation8_spill] sm:$0xff]  ;;  %v1132_v32 = vsel %vm839_vm3, %v1054_v2, 0.0 }
 0x1e0   :  { %v993_v22 = vsub.f32 %v3420_v58, %v2289_v30 }
 0x1e1   :  { %v1125_v25 = vadd.f32 %v1124_v59, %v1123_v40  ;;  %v3421_v59 = vld [vmem:[#allocation9_spill] sm:$0xff] }
 0x1e2   :  { %v994_v52 = vsub.f32 %v3421_v59, %v2289_v30  ;;  %v1057_v8 = vmul.f32 %v993_v22, %v993_v22 }
 0x1e3   :  { %v1127_v24 = vadd.f32 %v1126_v14, %v1125_v25  ;;  %v3422_v14 = vld [vmem:[#allocation10_spill] sm:$0xff] }
 0x1e4   :  { %v995_v41 = vsub.f32 %v3422_v14, %v2289_v30  ;;  %v1058_v58 = vmul.f32 %v994_v52, %v994_v52  ;;  %v1138_v2 = vsel %vm839_vm3, %v1057_v8, 0.0 }
 0x1e5   :  { %v1129_v34 = vadd.f32 %v1128_v17, %v1127_v24  ;;  %v3423_v17 = vld [vmem:[#allocation11_spill] sm:$0xff] }
 0x1e6   :  { %v996_v43 = vsub.f32 %v3423_v17, %v2289_v30  ;;  %v1059_v59 = vmul.f32 %v995_v41, %v995_v41  ;;  %v1140_v54 = vsel %vm839_vm3, %v1058_v58, 0.0 }
 0x1e7   :  { %v1131_v40 = vadd.f32 %v1130_v42, %v1129_v34  ;;  %v3424_v42 = vld [vmem:[#allocation12_spill] sm:$0xff] }
 0x1e8   :  { %v997_v38 = vsub.f32 %v3424_v42, %v2289_v30  ;;  %v1060_v14 = vmul.f32 %v996_v43, %v996_v43  ;;  %v1142_v0 = vsel %vm839_vm3, %v1059_v59, 0.0 }
 0x1e9   :  { %v1133_v25 = vadd.f32 %v1132_v32, %v1131_v40  ;;  %v3425_v32 = vld [vmem:[#allocation13_spill] sm:$0xff] }
 0x1ea   :  { %v998_v22 = vsub.f32 %v3425_v32, %v2289_v30  ;;  %v1061_v17 = vmul.f32 %v997_v38, %v997_v38  ;;  %v1144_v8 = vsel %vm839_vm3, %v1060_v14, 0.0 }
 0x1eb   :  { %v1135_v24 = vadd.f32 %v1134_v44, %v1133_v25  ;;  %v3426_v44 = vld [vmem:[#allocation15_spill] sm:$0xff] }
 0x1ec   :  { %v999_v52 = vsub.f32 %v3426_v44, %v2289_v30  ;;  %v1062_v42 = vmul.f32 %v998_v22, %v998_v22  ;;  %v1146_v58 = vsel %vm839_vm3, %v1061_v17, 0.0 }
 0x1ed   :  { %v1137_v34 = vadd.f32 %v1136_v6, %v1135_v24  ;;  %v3427_v6 = vld [vmem:[#allocation17_spill] sm:$0xff] }
 0x1ee   :  { %v1000_v41 = vsub.f32 %v3427_v6, %v2289_v30  ;;  %v1063_v32 = vmul.f32 %v999_v52, %v999_v52  ;;  %v1148_v59 = vsel %vm839_vm3, %v1062_v42, 0.0 }
 0x1ef   :  { %v1139_v40 = vadd.f32 %v1138_v2, %v1137_v34  ;;  %v3428_v2 = vld [vmem:[#allocation19_spill] sm:$0xff] }
 0x1f0   :  { %v1001_v43 = vsub.f32 %v3428_v2, %v2289_v30  ;;  %v1064_v44 = vmul.f32 %v1000_v41, %v1000_v41  ;;  %v1150_v14 = vsel %vm839_vm3, %v1063_v32, 0.0 }
 0x1f1   :  { %v1141_v25 = vadd.f32 %v1140_v54, %v1139_v40  ;;  %v3429_v54 = vld [vmem:[#allocation21_spill] sm:$0xff] }
 0x1f2   :  { %v1002_v38 = vsub.f32 %v3429_v54, %v2289_v30  ;;  %v1065_v6 = vmul.f32 %v1001_v43, %v1001_v43  ;;  %v1152_v17 = vsel %vm839_vm3, %v1064_v44, 0.0  ;;  %v1006_v43 = vsub.f32 %v2219_v3, %v2289_v30 }
 0x1f3   :  { %v1143_v24 = vadd.f32 %v1142_v0, %v1141_v25  ;;  %v3430_v0 = vld [vmem:[#allocation23_spill] sm:$0xff] }
 0x1f4   :  { %v1003_v22 = vsub.f32 %v3430_v0, %v2289_v30  ;;  %v1066_v2 = vmul.f32 %v1002_v38, %v1002_v38  ;;  %v1154_v42 = vsel %vm839_vm3, %v1065_v6, 0.0  ;;  %v1007_v38 = vsub.f32 %v2035_v16, %v2289_v30 }
 0x1f5   :  { %v1145_v34 = vadd.f32 %v1144_v8, %v1143_v24  ;;  %v3431_v8 = vld [vmem:[#allocation25_spill] sm:$0xff] }
 0x1f6   :  { %v1004_v52 = vsub.f32 %v3431_v8, %v2289_v30  ;;  %v1067_v54 = vmul.f32 %v1003_v22, %v1003_v22  ;;  %v1156_v32 = vsel %vm839_vm3, %v1066_v2, 0.0  ;;  %v1008_v22 = vsub.f32 %v2039_v20, %v2289_v30 }
 0x1f7   :  { %v1147_v40 = vadd.f32 %v1146_v58, %v1145_v34  ;;  %v3432_v58 = vld [vmem:[#allocation27_spill] sm:$0xff] }
 0x1f8   :  { %v1005_v41 = vsub.f32 %v3432_v58, %v2289_v30  ;;  %v1158_v44 = vsel %vm839_vm3, %v1067_v54, 0.0 }
 0x1f9   :  { %v1149_v25 = vadd.f32 %v1148_v59, %v1147_v40  ;;  %v1068_v59 = vmul.f32 %v1004_v52, %v1004_v52  ;;  %v1009_v52 = vsub.f32 %v2047_v27, %v2289_v30 }
 0x1fb   :  { %v1151_v24 = vadd.f32 %v1150_v14, %v1149_v25  ;;  %v1069_v14 = vmul.f32 %v1005_v41, %v1005_v41  ;;  %v1160_v6 = vsel %vm839_vm3, %v1068_v59, 0.0  ;;  %v1010_v41 = vsub.f32 %v2053_v33, %v2289_v30 }
 0x1fd   :  { %v1153_v34 = vadd.f32 %v1152_v17, %v1151_v24  ;;  %v1070_v17 = vmul.f32 %v1006_v43, %v1006_v43  ;;  %v1162_v2 = vsel %vm839_vm3, %v1069_v14, 0.0  ;;  %v1011_v43 = vsub.f32 %v2059_v39, %v2289_v30 }
 0x1ff   :  { %v1155_v40 = vadd.f32 %v1154_v42, %v1153_v34  ;;  %v1071_v42 = vmul.f32 %v1007_v38, %v1007_v38  ;;  %v1164_v54 = vsel %vm839_vm3, %v1070_v17, 0.0  ;;  %v1012_v38 = vsub.f32 %v2065_v45, %v2289_v30 }
 0x201   :  { %v1157_v25 = vadd.f32 %v1156_v32, %v1155_v40  ;;  %v1072_v32 = vmul.f32 %v1008_v22, %v1008_v22  ;;  %v1166_v59 = vsel %vm839_vm3, %v1071_v42, 0.0  ;;  %v1013_v22 = vsub.f32 %v2071_v51, %v2289_v30 }
 0x203   :  { %v1159_v24 = vadd.f32 %v1158_v44, %v1157_v25  ;;  %v1073_v44 = vmul.f32 %v1009_v52, %v1009_v52  ;;  %v1168_v14 = vsel %vm839_vm3, %v1072_v32, 0.0  ;;  %v1014_v52 = vsub.f32 %v2077_v57, %v2289_v30 }
 0x205   :  { %v1161_v34 = vadd.f32 %v1160_v6, %v1159_v24  ;;  %v1074_v6 = vmul.f32 %v1010_v41, %v1010_v41  ;;  %v1170_v17 = vsel %vm839_vm3, %v1073_v44, 0.0  ;;  %v1015_v41 = vsub.f32 %v2083_v63, %v2289_v30 }
 0x207   :  { %v1163_v40 = vadd.f32 %v1162_v2, %v1161_v34  ;;  %v1075_v2 = vmul.f32 %v1011_v43, %v1011_v43  ;;  %v1172_v42 = vsel %vm839_vm3, %v1074_v6, 0.0  ;;  %v1016_v43 = vsub.f32 %v2089_v5, %v2289_v30 }
 0x209   :  { %v1165_v25 = vadd.f32 %v1164_v54, %v1163_v40  ;;  %v1076_v54 = vmul.f32 %v1012_v38, %v1012_v38  ;;  %v1174_v32 = vsel %vm839_vm3, %v1075_v2, 0.0  ;;  %v1017_v38 = vsub.f32 %v2095_v11, %v2289_v30 }
 0x20b   :  { %v1167_v24 = vadd.f32 %v1166_v59, %v1165_v25  ;;  %v1077_v59 = vmul.f32 %v1013_v22, %v1013_v22  ;;  %v1176_v44 = vsel %vm839_vm3, %v1076_v54, 0.0  ;;  %v1018_v22 = vsub.f32 %v2101_v21, %v2289_v30 }
 0x20d   :  { %v1169_v34 = vadd.f32 %v1168_v14, %v1167_v24  ;;  %v1078_v14 = vmul.f32 %v1014_v52, %v1014_v52  ;;  %v1178_v6 = vsel %vm839_vm3, %v1077_v59, 0.0  ;;  %v1019_v52 = vsub.f32 %v2107_v29, %v2289_v30 }
 0x20f   :  { %v1171_v40 = vadd.f32 %v1170_v17, %v1169_v34  ;;  %v1079_v17 = vmul.f32 %v1015_v41, %v1015_v41  ;;  %v1180_v2 = vsel %vm839_vm3, %v1078_v14, 0.0  ;;  %v1020_v41 = vsub.f32 %v2113_v37, %v2289_v30 }
 0x211   :  { %v1173_v25 = vadd.f32 %v1172_v42, %v1171_v40  ;;  %v1080_v42 = vmul.f32 %v1016_v43, %v1016_v43  ;;  %v1182_v54 = vsel %vm839_vm3, %v1079_v17, 0.0  ;;  %v1021_v43 = vsub.f32 %v2119_v47, %v2289_v30 }
 0x213   :  { %v1175_v24 = vadd.f32 %v1174_v32, %v1173_v25  ;;  %v1081_v32 = vmul.f32 %v1017_v38, %v1017_v38  ;;  %v1184_v59 = vsel %vm839_vm3, %v1080_v42, 0.0  ;;  %v1022_v38 = vsub.f32 %v2125_v55, %v2289_v30 }
 0x215   :  { %v1177_v34 = vadd.f32 %v1176_v44, %v1175_v24  ;;  %v1082_v44 = vmul.f32 %v1018_v22, %v1018_v22  ;;  %v1186_v14 = vsel %vm839_vm3, %v1081_v32, 0.0  ;;  %v1023_v22 = vsub.f32 %v2131_v1, %v2289_v30 }
 0x217   :  { %v1179_v40 = vadd.f32 %v1178_v6, %v1177_v34  ;;  %v1083_v6 = vmul.f32 %v1019_v52, %v1019_v52  ;;  %v1188_v17 = vsel %vm839_vm3, %v1082_v44, 0.0  ;;  %v1024_v52 = vsub.f32 %v2137_v9, %v2289_v30 }
 0x219   :  { %v1181_v25 = vadd.f32 %v1180_v2, %v1179_v40  ;;  %v1084_v2 = vmul.f32 %v1020_v41, %v1020_v41  ;;  %v1190_v42 = vsel %vm839_vm3, %v1083_v6, 0.0  ;;  %v1025_v41 = vsub.f32 %v2143_v23, %v2289_v30 }
 0x21b   :  { %v1183_v24 = vadd.f32 %v1182_v54, %v1181_v25  ;;  %v1085_v54 = vmul.f32 %v1021_v43, %v1021_v43  ;;  %v1192_v32 = vsel %vm839_vm3, %v1084_v2, 0.0  ;;  %v1026_v43 = vsub.f32 %v2149_v35, %v2289_v30 }
 0x21d   :  { %v1185_v34 = vadd.f32 %v1184_v59, %v1183_v24  ;;  %v1086_v59 = vmul.f32 %v1022_v38, %v1022_v38  ;;  %v1194_v44 = vsel %vm839_vm3, %v1085_v54, 0.0  ;;  %v1027_v38 = vsub.f32 %v2155_v49, %v2289_v30 }
 0x21f   :  { %v1187_v40 = vadd.f32 %v1186_v14, %v1185_v34  ;;  %v1087_v14 = vmul.f32 %v1023_v22, %v1023_v22  ;;  %v1196_v6 = vsel %vm839_vm3, %v1086_v59, 0.0  ;;  %v1028_v22 = vsub.f32 %v2161_v61, %v2289_v30 }
 0x221   :  { %v1189_v25 = vadd.f32 %v1188_v17, %v1187_v40  ;;  %v1088_v17 = vmul.f32 %v1024_v52, %v1024_v52  ;;  %v1198_v2 = vsel %vm839_vm3, %v1087_v14, 0.0  ;;  %v1029_v52 = vsub.f32 %v2167_v13, %v2289_v30 }
 0x223   :  { %v1191_v24 = vadd.f32 %v1190_v42, %v1189_v25  ;;  %v1089_v42 = vmul.f32 %v1025_v41, %v1025_v41  ;;  %v1200_v54 = vsel %vm839_vm3, %v1088_v17, 0.0  ;;  %v1030_v41 = vsub.f32 %v2173_v31, %v2289_v30 }
 0x225   :  { %v1193_v34 = vadd.f32 %v1192_v32, %v1191_v24  ;;  %v1090_v32 = vmul.f32 %v1026_v43, %v1026_v43  ;;  %v1202_v59 = vsel %vm839_vm3, %v1089_v42, 0.0  ;;  %v1031_v43 = vsub.f32 %v2179_v53, %v2289_v30 }
 0x227   :  { %v1195_v40 = vadd.f32 %v1194_v44, %v1193_v34  ;;  %v1091_v44 = vmul.f32 %v1027_v38, %v1027_v38  ;;  %v1204_v14 = vsel %vm839_vm3, %v1090_v32, 0.0  ;;  %v1032_v38 = vsub.f32 %v2185_v7, %v2289_v30 }
 0x228   :  { %v1095_v31 = vmul.f32 %v1031_v43, %v1031_v43  ;;  %v1036_v43 = vsub.f32 %v2209_v12, %v2289_v30 }
 0x229   :  { %v1197_v25 = vadd.f32 %v1196_v6, %v1195_v40  ;;  %v1092_v6 = vmul.f32 %v1028_v22, %v1028_v22  ;;  %v1206_v17 = vsel %vm839_vm3, %v1091_v44, 0.0  ;;  %v1096_v53 = vmul.f32 %v1032_v38, %v1032_v38 }
 0x22a   :  { %v1037_v38 = vsub.f32 %v2215_v60, %v2289_v30 }
 0x22b   :  { %v1199_v24 = vadd.f32 %v1198_v2, %v1197_v25  ;;  %v1093_v2 = vmul.f32 %v1029_v52, %v1029_v52  ;;  %v1208_v42 = vsel %vm839_vm3, %v1092_v6, 0.0  ;;  %v1214_v6 = vsel %vm839_vm3, %v1095_v31, 0.0 }
 0x22d   :  { %v1201_v34 = vadd.f32 %v1200_v54, %v1199_v24  ;;  %v1094_v54 = vmul.f32 %v1030_v41, %v1030_v41  ;;  %v1210_v32 = vsel %vm839_vm3, %v1093_v2, 0.0  ;;  %v1216_v2 = vsel %vm839_vm3, %v1096_v53, 0.0 }
 0x22f   :  { %v1203_v40 = vadd.f32 %v1202_v59, %v1201_v34  ;;  %v3433_v59 = vld [vmem:[#allocation20_spill] sm:$0xff]  ;;  %v1212_v44 = vsel %vm839_vm3, %v1094_v54, 0.0 }
 0x230   :  { %v1033_v22 = vsub.f32 %v3433_v59, %v2289_v30 }
 0x231   :  { %v1205_v25 = vadd.f32 %v1204_v14, %v1203_v40  ;;  %v3434_v14 = vld [vmem:[#allocation22_spill] sm:$0xff] }
 0x232   :  { %v1034_v52 = vsub.f32 %v3434_v14, %v2289_v30  ;;  %v1097_v7 = vmul.f32 %v1033_v22, %v1033_v22  ;;  %v1038_v22 = vsub.f32 %v2221_v48, %v2289_v30 }
 0x233   :  { %v1207_v24 = vadd.f32 %v1206_v17, %v1205_v25  ;;  %v3435_v17 = vld [vmem:[#allocation24_spill] sm:$0xff] }
 0x234   :  { %v1035_v41 = vsub.f32 %v3435_v17, %v2289_v30  ;;  %v1218_v54 = vsel %vm839_vm3, %v1097_v7, 0.0  ;;  %v1102_v53 = vmul.f32 %v1038_v22, %v1038_v22 }
 0x235   :  { %v1209_v34 = vadd.f32 %v1208_v42, %v1207_v24  ;;  %v1098_v42 = vmul.f32 %v1034_v52, %v1034_v52 }
 0x236   :  { %v1228_v7 = vsel %vm839_vm3, %v1102_v53, 0.0 }
 0x237   :  { %v1211_v40 = vadd.f32 %v1210_v32, %v1209_v34  ;;  %v1099_v32 = vmul.f32 %v1035_v41, %v1035_v41  ;;  %v1220_v31 = vsel %vm839_vm3, %v1098_v42, 0.0 }
 0x239   :  { %v1213_v25 = vadd.f32 %v1212_v44, %v1211_v40  ;;  %v1100_v44 = vmul.f32 %v1036_v43, %v1036_v43  ;;  %v1222_v52 = vsel %vm839_vm3, %v1099_v32, 0.0  ;;  %v1245_v32 = vlaneseq }
 0x23b   :  { %v1215_v24 = vadd.f32 %v1214_v6, %v1213_v25  ;;  %v1101_v6 = vmul.f32 %v1037_v38, %v1037_v38  ;;  %v2483_v22 = vshrl.u32 %v1245_v32, 7  ;;  %v3441_v32 = vld [vmem:[#allocation7_spill] sm:$0xff] }
 0x23d   :  { %v1217_v34 = vadd.f32 %v1216_v2, %v1215_v24  ;;  %v1224_v24 = vsel %vm839_vm3, %v1100_v44, 0.0  ;;  %v1226_v41 = vsel %vm839_vm3, %v1101_v6, 0.0  ;;  %v3391_v44 = vsub.s32 0, %v2483_v22 }
 0x23f   :  { %v1219_v40 = vadd.f32 %v1218_v54, %v1217_v34 }
 0x241   :  { %v1221_v25 = vadd.f32 %v1220_v31, %v1219_v40 }
 0x243   :  { %v1223_v12 = vadd.f32 %v1222_v52, %v1221_v25  ;;  %v3450_v52 = vld [vmem:[#allocation15_spill] sm:$0xff] }
 0x245   :  { %v1225_v2 = vadd.f32 %v1224_v24, %v1223_v12  ;;  %v1237_v12 = vld [vmem:[%s3344_s2] sm:$0x1] }
 0x247   :  { %v1227_v60 = vadd.f32 %v1226_v41, %v1225_v2 }
 0x249   :  { %v1229_v34 = vadd.f32 %v1228_v7, %v1227_v60  ;;  %v3437_v7 = vld [vmem:[#allocation3_spill] sm:$0xff] }
 0x24b   :  { %v1230_v54 = vrot.slane %v1229_v34, 4 }
 0x24d   :  { %v1231_v48 = vadd.f32 %v1230_v54, %v1229_v34  ;;  %v3438_v54 = vld [vmem:[#allocation4_spill] sm:$0xff] }
 0x24f   :  { %v1232_v43 = vrot.slane %v1231_v48, 2 }
 0x251   :  { %v1233_v17 = vadd.f32 %v1232_v43, %v1231_v48  ;;  %v2492_v48 = vld [vmem:[%s3345_s3] sm:$0x1] }
 0x253   :  { %v1234_v42 = vrot.slane %v1233_v17, 1 }
 0x255   :  { %v1235_v40 = vadd.f32 %v1234_v42, %v1233_v17 }
 0x257   :  { %v1236_v38 = vmul.f32 0.001953125, %v1235_v40 }
 0x259   :  { %v1238_v31 = vadd.f32 1e-05, %v1236_v38  ;;  %v3439_v38 = vld [vmem:[#allocation5_spill] sm:$0xff] }
 0x25b   :  { %1750 = vrsqrt.f32 %v1238_v31  ;;  %v3440_v31 = vld [vmem:[#allocation6_spill] sm:$0xff] }
 0x265   :  { %v1751_v25 = vpop.eup %1750 }
 0x266   :  { %v1240_v60 = vmul.f32 %v1751_v25, %v1237_v12  ;;  %v3442_v12 = vld [vmem:[#allocation8_spill] sm:$0xff]  ;;  %v3443_v25 = vld [vmem:[#allocation9_spill] sm:$0xff] }
 0x268   :  { %v2495_v17 = vmul.f32 %v1240_v60, %v2289_v30  ;;  %v2499_v6 = vrot.slane %v1240_v60, %v3391_v44  ;;  %v3436_v30 = vld [vmem:[#allocation2_spill] sm:$0xff]  ;;  %v3451_v44 = vld [vmem:[#allocation17_spill] sm:$0xff] }
 0x269   :  { %v3444_v60 = vld [vmem:[#allocation10_spill] sm:$0xff] }
 0x26a   :  { %v2505_v53 = vmul.f32 %v2499_v6, %v2033_v15  ;;  %v2509_v24 = vmul.f32 %v2499_v6, %v2037_v19  ;;  %v2513_v2 = vmul.f32 %v2499_v6, %v2045_v26  ;;  %v2517_v41 = vmul.f32 %v2499_v6, %v3436_v30 }
 0x26b   :  { %v2521_v34 = vmul.f32 %v2499_v6, %v3437_v7  ;;  %v2525_v15 = vmul.f32 %v2499_v6, %v3438_v54  ;;  %v2529_v19 = vmul.f32 %v2499_v6, %v2069_v50  ;;  %v2533_v26 = vmul.f32 %v2499_v6, %v2075_v56  ;;  %v3446_v7 = vld [vmem:[#allocation11_spill] sm:$0xff] }
 0x26c   :  { %v2537_v43 = vmul.f32 %v2499_v6, %v2081_v62  ;;  %v2541_v42 = vmul.f32 %v2499_v6, %v2087_v4  ;;  %v2545_v40 = vmul.f32 %v2499_v6, %v2093_v10  ;;  %v2549_v50 = vmul.f32 %v2499_v6, %v2099_v18 }
 0x26d   :  { %v2553_v56 = vmul.f32 %v2499_v6, %v2105_v28  ;;  %v2557_v62 = vmul.f32 %v2499_v6, %v2111_v36  ;;  %v2561_v4 = vmul.f32 %v2499_v6, %v2117_v46  ;;  %v2565_v10 = vmul.f32 %v2499_v6, %v3439_v38  ;;  %v3448_v38 = vld [vmem:[#allocation12_spill] sm:$0xff] }
 0x26e   :  { %v2569_v18 = vmul.f32 %v2499_v6, %v3440_v31  ;;  %v2573_v28 = vmul.f32 %v2499_v6, %v3441_v32  ;;  %v2577_v36 = vmul.f32 %v2499_v6, %v3442_v12  ;;  %v2581_v46 = vmul.f32 %v2499_v6, %v3443_v25  ;;  %v3449_v32 = vld [vmem:[#allocation13_spill] sm:$0xff] }
 0x26f   :  { %v2585_v30 = vmul.f32 %v2499_v6, %v3444_v60  ;;  %v2589_v54 = vmul.f32 %v2499_v6, %v3446_v7  ;;  %v2593_v31 = vmul.f32 %v2499_v6, %v3448_v38  ;;  %v2597_v12 = vmul.f32 %v2499_v6, %v3449_v32 }
 0x270   :  { %v2601_v25 = vmul.f32 %v2499_v6, %v3450_v52  ;;  %v2605_v60 = vmul.f32 %v2499_v6, %v3451_v44  ;;  %v2617_v32 = vmul.f32 %v2499_v6, %v3430_v0  ;;  %v2621_v52 = vmul.f32 %v2499_v6, %v3431_v8 }
 0x271   :  { %3445 = vst [vmem:[#allocation23_spill] sm:$0xff] %v2585_v30  ;;  %3447 = vst [vmem:[#allocation25_spill] sm:$0xff] %v2589_v54  ;;  %v3452_v30 = vld [vmem:[#allocation19_spill] sm:$0xff]  ;;  %v3453_v54 = vld [vmem:[#allocation21_spill] sm:$0xff]  ;;  %v2625_v44 = vmul.f32 %v2499_v6, %v3432_v58  ;;  %v2637_v0 = vmul.f32 %v2499_v6, %v2039_v20  ;;  %v2641_v8 = vmul.f32 %v2499_v6, %v2047_v27 }
 0x272   :  { %v2609_v7 = vmul.f32 %v2499_v6, %v3452_v30  ;;  %v2613_v38 = vmul.f32 %v2499_v6, %v3453_v54  ;;  %v2629_v30 = vmul.f32 %v2499_v6, %v2219_v3  ;;  %v2633_v54 = vmul.f32 %v2499_v6, %v2035_v16 }
 0x273   :  { %v2645_v58 = vmul.f32 %v2499_v6, %v2053_v33  ;;  %v2649_v3 = vmul.f32 %v2499_v6, %v2059_v39  ;;  %v2653_v16 = vmul.f32 %v2499_v6, %v2065_v45  ;;  %v2657_v20 = vmul.f32 %v2499_v6, %v2071_v51 }
 0x274   :  { %v2661_v27 = vmul.f32 %v2499_v6, %v2077_v57  ;;  %v2665_v33 = vmul.f32 %v2499_v6, %v2083_v63  ;;  %v2669_v39 = vmul.f32 %v2499_v6, %v2089_v5  ;;  %v2673_v45 = vmul.f32 %v2499_v6, %v2095_v11 }
 0x275   :  { %v2677_v51 = vmul.f32 %v2499_v6, %v2101_v21  ;;  %v2681_v57 = vmul.f32 %v2499_v6, %v2107_v29  ;;  %v2685_v63 = vmul.f32 %v2499_v6, %v2113_v37  ;;  %v2689_v5 = vmul.f32 %v2499_v6, %v2119_v47 }
 0x276   :  { %v2693_v11 = vmul.f32 %v2499_v6, %v2125_v55  ;;  %v2697_v21 = vmul.f32 %v2499_v6, %v2131_v1  ;;  %v2701_v29 = vmul.f32 %v2499_v6, %v2137_v9  ;;  %v2705_v37 = vmul.f32 %v2499_v6, %v2143_v23 }
 0x277   :  { %v2709_v47 = vmul.f32 %v2499_v6, %v2149_v35  ;;  %v2713_v55 = vmul.f32 %v2499_v6, %v2155_v49  ;;  %v2717_v1 = vmul.f32 %v2499_v6, %v2161_v61  ;;  %v2721_v9 = vmul.f32 %v2499_v6, %v2167_v13 }
 0x278   :  { %3454 = vst [vmem:[#allocation27_spill] sm:$0xff] %v2701_v29  ;;  %3455 = vst [vmem:[#allocation20_spill] sm:$0xff] %v2705_v37  ;;  %v3458_v29 = vld [vmem:[#allocation14_spill] sm:$0xff]  ;;  %v3460_v37 = vld [vmem:[#allocation16_spill] sm:$0xff]  ;;  %v2737_v61 = vmul.f32 %v2499_v6, %v3433_v59  ;;  %v2741_v13 = vmul.f32 %v2499_v6, %v3434_v14  ;;  %v3471_v14 = vsub.f32 %v2492_v48, %v2495_v17 }
 0x279   :  { %3456 = vst [vmem:[#allocation22_spill] sm:$0xff] %v2709_v47  ;;  %3457 = vst [vmem:[#allocation2_spill] sm:$0xff] %v2721_v9  ;;  %v2725_v23 = vmul.f32 %v2499_v6, %v3458_v29  ;;  %v2729_v35 = vmul.f32 %v2499_v6, %v3460_v37  ;;  %v3462_v47 = vld [vmem:[#allocation18_spill] sm:$0xff]  ;;  %v3466_v9 = vld [vmem:[#allocation24_spill] sm:$0xff] }
 0x27a   :  { %v2733_v49 = vmul.f32 %v2499_v6, %v3462_v47  ;;  %3464 = vst [vmem:[#allocation6_spill] sm:$0xff] %v2737_v61  ;;  %3465 = vst [vmem:[#allocation7_spill] sm:$0xff] %v2741_v13  ;;  %v2745_v29 = vmul.f32 %v2499_v6, %v3466_v9  ;;  %v3470_v61 = vsub.s32 0, %v2483_v22 }
 0x27b   :  { %3459 = vst [vmem:[#allocation3_spill] sm:$0xff] %v2725_v23  ;;  %3461 = vst [vmem:[#allocation4_spill] sm:$0xff] %v2729_v35  ;;  %v3467_v23 = vld [vmem:[#allocation26_spill] sm:$0xff]  ;;  %v3468_v35 = vld [vmem:[#allocation28_spill] sm:$0xff] }
 0x27c   :  { %3463 = vst [vmem:[#allocation5_spill] sm:$0xff] %v2733_v49  ;;  %v2749_v37 = vmul.f32 %v2499_v6, %v3467_v23  ;;  %v2753_v47 = vmul.f32 %v2499_v6, %v3468_v35  ;;  %v3469_v49 = vld [vmem:[#allocation29_spill] sm:$0xff]  ;;  %v2764_v13 = vrot.slane %v3471_v14, %v3470_v61 }
 0x27d   :  { %v2757_v59 = vmul.f32 %v2499_v6, %v3469_v49 }
 0x27e   :  { %v2768_v9 = vadd.f32 %v2764_v13, %v2505_v53  ;;  %v2772_v23 = vadd.f32 %v2764_v13, %v2509_v24  ;;  %v2776_v35 = vadd.f32 %v2764_v13, %v2513_v2  ;;  %v2780_v22 = vadd.f32 %v2764_v13, %v2517_v41 }
 0x27f   :  { %v2784_v48 = vadd.f32 %v2764_v13, %v2521_v34  ;;  %v2788_v17 = vadd.f32 %v2764_v13, %v2525_v15  ;;  %v2792_v6 = vadd.f32 %v2764_v13, %v2529_v19  ;;  %v2796_v53 = vadd.f32 %v2764_v13, %v2533_v26  ;;  %v3475_v14 = vld [vmem:[#allocation27_spill] sm:$0xff] }
 0x280   :  { %v2800_v24 = vadd.f32 %v2764_v13, %v2537_v43  ;;  %v2804_v2 = vadd.f32 %v2764_v13, %v2541_v42  ;;  %v2808_v41 = vadd.f32 %v2764_v13, %v2545_v40  ;;  %v2812_v34 = vadd.f32 %v2764_v13, %v2549_v50 }
 0x281   :  { %v2816_v15 = vadd.f32 %v2764_v13, %v2553_v56  ;;  %v2820_v19 = vadd.f32 %v2764_v13, %v2557_v62  ;;  %v2824_v26 = vadd.f32 %v2764_v13, %v2561_v4  ;;  %v2828_v43 = vadd.f32 %v2764_v13, %v2565_v10  ;;  %v3472_v62 = vld [vmem:[#allocation23_spill] sm:$0xff]  ;;  %v3473_v10 = vld [vmem:[#allocation25_spill] sm:$0xff] }
 0x282   :  { %v2832_v42 = vadd.f32 %v2764_v13, %v2569_v18  ;;  %v2836_v40 = vadd.f32 %v2764_v13, %v2573_v28  ;;  %v2840_v50 = vadd.f32 %v2764_v13, %v2577_v36  ;;  %v2844_v56 = vadd.f32 %v2764_v13, %v2581_v46 }
 0x283   :  { %v2848_v4 = vadd.f32 %v2764_v13, %v3472_v62  ;;  %v2852_v18 = vadd.f32 %v2764_v13, %v3473_v10  ;;  %v2856_v28 = vadd.f32 %v2764_v13, %v2593_v31  ;;  %v2860_v36 = vadd.f32 %v2764_v13, %v2597_v12  ;;  %v3477_v62 = vld [vmem:[#allocation20_spill] sm:$0xff]  ;;  %v3479_v10 = vld [vmem:[#allocation22_spill] sm:$0xff] }
 0x284   :  { %v2864_v46 = vadd.f32 %v2764_v13, %v2601_v25  ;;  %v2868_v49 = vadd.f32 %v2764_v13, %v2605_v60  ;;  %v2872_v61 = vadd.f32 %v2764_v13, %v2609_v7  ;;  %v2876_v31 = vadd.f32 %v2764_v13, %v2613_v38 }
 0x285   :  { %v2880_v12 = vadd.f32 %v2764_v13, %v2617_v32  ;;  %v2884_v25 = vadd.f32 %v2764_v13, %v2621_v52  ;;  %v2888_v60 = vadd.f32 %v2764_v13, %v2625_v44  ;;  %v2892_v7 = vadd.f32 %v2764_v13, %v2629_v30 }
 0x286   :  { %v2896_v38 = vadd.f32 %v2764_v13, %v2633_v54  ;;  %v2900_v32 = vadd.f32 %v2764_v13, %v2637_v0  ;;  %v2904_v52 = vadd.f32 %v2764_v13, %v2641_v8  ;;  %v2908_v44 = vadd.f32 %v2764_v13, %v2645_v58 }
 0x287   :  { %v2912_v30 = vadd.f32 %v2764_v13, %v2649_v3  ;;  %v2916_v54 = vadd.f32 %v2764_v13, %v2653_v16  ;;  %v2920_v0 = vadd.f32 %v2764_v13, %v2657_v20  ;;  %v2924_v8 = vadd.f32 %v2764_v13, %v2661_v27 }
 0x288   :  { %v2928_v58 = vadd.f32 %v2764_v13, %v2665_v33  ;;  %v2932_v3 = vadd.f32 %v2764_v13, %v2669_v39  ;;  %v2936_v16 = vadd.f32 %v2764_v13, %v2673_v45  ;;  %v2940_v20 = vadd.f32 %v2764_v13, %v2677_v51 }
 0x289   :  { %v2944_v27 = vadd.f32 %v2764_v13, %v2681_v57  ;;  %v2948_v33 = vadd.f32 %v2764_v13, %v2685_v63  ;;  %v2952_v39 = vadd.f32 %v2764_v13, %v2689_v5  ;;  %v2956_v45 = vadd.f32 %v2764_v13, %v2693_v11 }
 0x28a   :  { %v2960_v51 = vadd.f32 %v2764_v13, %v2697_v21  ;;  %v2964_v57 = vadd.f32 %v2764_v13, %v3475_v14  ;;  %v2968_v63 = vadd.f32 %v2764_v13, %v3477_v62  ;;  %v2972_v5 = vadd.f32 %v2764_v13, %v3479_v10 }
 0x28b   :  { %v2976_v11 = vadd.f32 %v2764_v13, %v2713_v55  ;;  %v2980_v21 = vadd.f32 %v2764_v13, %v2717_v1 }
 0x28c   :  { %3474 = vst [vmem:[#allocation8_spill] sm:$0xff] %v2960_v51  ;;  %3476 = vst [vmem:[#allocation9_spill] sm:$0xff] %v2964_v57  ;;  %v3483_v51 = vld [vmem:[#allocation2_spill] sm:$0xff]  ;;  %v3484_v57 = vld [vmem:[#allocation3_spill] sm:$0xff] }
 0x28d   :  { %3478 = vst [vmem:[#allocation10_spill] sm:$0xff] %v2968_v63  ;;  %3480 = vst [vmem:[#allocation11_spill] sm:$0xff] %v2972_v5  ;;  %v2984_v14 = vadd.f32 %v2764_v13, %v3483_v51  ;;  %v2988_v62 = vadd.f32 %v2764_v13, %v3484_v57  ;;  %v3485_v63 = vld [vmem:[#allocation4_spill] sm:$0xff]  ;;  %v3486_v5 = vld [vmem:[#allocation5_spill] sm:$0xff]  ;;  %v3008_v57 = vadd.f32 %v2764_v13, %v2745_v29  ;;  %v1387_v29 = vmax.f32 %v2780_v22, 0.0 }
 0x28e   :  { %3481 = vst [vmem:[#allocation12_spill] sm:$0xff] %v2976_v11  ;;  %3482 = vst [vmem:[#allocation13_spill] sm:$0xff] %v2980_v21  ;;  %v2992_v10 = vadd.f32 %v2764_v13, %v3485_v63  ;;  %v2996_v55 = vadd.f32 %v2764_v13, %v3486_v5  ;;  %v3487_v11 = vld [vmem:[#allocation6_spill] sm:$0xff]  ;;  %v3489_v21 = vld [vmem:[#allocation7_spill] sm:$0xff]  ;;  %v3012_v63 = vadd.f32 %v2764_v13, %v2749_v37  ;;  %v1389_v37 = vmax.f32 %v2788_v17, 0.0 }
 0x28f   :  { %v3000_v1 = vadd.f32 %v2764_v13, %v3487_v11  ;;  %v3004_v51 = vadd.f32 %v2764_v13, %v3489_v21  ;;  %3491 = vst [vmem:[#allocation19_spill] sm:$0xff] %v3008_v57  ;;  %v3016_v5 = vadd.f32 %v2764_v13, %v2753_v47  ;;  %v3020_v11 = vadd.f32 %v2764_v13, %v2757_v59 }
 0x290   :  { %3492 = vst [vmem:[#allocation21_spill] sm:$0xff] %v3012_v63  ;;  %v1385_v21 = vmax.f32 %v2772_v23, 0.0  ;;  %v1388_v57 = vmax.f32 %v2784_v48, 0.0  ;;  %v1390_v63 = vmax.f32 %v2792_v6, 0.0  ;;  %v1391_v47 = vmax.f32 %v2796_v53, 0.0  ;;  %1451 = vst.msk [vmem:[%s3346_s4 + $0x18] sm:$0xff] %vm839_vm3, %v1387_v29 }
 0x291   :  { %3488 = vst [vmem:[#allocation15_spill] sm:$0xff] %v3000_v1  ;;  %3490 = vst [vmem:[#allocation17_spill] sm:$0xff] %v3004_v51  ;;  %v1384_v1 = vmax.f32 %v2768_v9, 0.0  ;;  %v1386_v51 = vmax.f32 %v2776_v35, 0.0  ;;  %v1393_v13 = vmax.f32 %v2804_v2, 0.0  ;;  %v1394_v59 = vmax.f32 %v2808_v41, 0.0 }
 0x292   :  { %3493 = vst [vmem:[#allocation14_spill] sm:$0xff] %v3016_v5  ;;  %v1392_v5 = vmax.f32 %v2800_v24, 0.0  ;;  %v1395_v9 = vmax.f32 %v2812_v34, 0.0  ;;  %1449 = vst.msk [vmem:[%s3346_s4 + $0x8] sm:$0xff] %vm839_vm3, %v1385_v21  ;;  %v1396_v23 = vmax.f32 %v2816_v15, 0.0  ;;  %v1397_v35 = vmax.f32 %v2820_v19, 0.0 }
 0x293   :  { %1448 = vst.msk [vmem:[%s3346_s4] sm:$0xff] %vm839_vm3, %v1384_v1  ;;  %1450 = vst.msk [vmem:[%s3346_s4 + $0x10] sm:$0xff] %vm839_vm3, %v1386_v51  ;;  %v1398_v22 = vmax.f32 %v2824_v26, 0.0  ;;  %v1399_v48 = vmax.f32 %v2828_v43, 0.0  ;;  %v1400_v17 = vmax.f32 %v2832_v42, 0.0  ;;  %v1401_v6 = vmax.f32 %v2836_v40, 0.0 }
 0x294   :  { %1452 = vst.msk [vmem:[%s3346_s4 + $0x20] sm:$0xff] %vm839_vm3, %v1388_v57  ;;  %1453 = vst.msk [vmem:[%s3346_s4 + $0x28] sm:$0xff] %vm839_vm3, %v1389_v37  ;;  %v1402_v53 = vmax.f32 %v2840_v50, 0.0  ;;  %v1403_v24 = vmax.f32 %v2844_v56, 0.0  ;;  %v1404_v2 = vmax.f32 %v2848_v4, 0.0  ;;  %v1405_v41 = vmax.f32 %v2852_v18, 0.0 }
 0x295   :  { %1454 = vst.msk [vmem:[%s3346_s4 + $0x30] sm:$0xff] %vm839_vm3, %v1390_v63  ;;  %1455 = vst.msk [vmem:[%s3346_s4 + $0x38] sm:$0xff] %vm839_vm3, %v1391_v47  ;;  %v1406_v34 = vmax.f32 %v2856_v28, 0.0  ;;  %v1407_v15 = vmax.f32 %v2860_v36, 0.0  ;;  %v1408_v19 = vmax.f32 %v2864_v46, 0.0  ;;  %v1409_v26 = vmax.f32 %v2868_v49, 0.0 }
 0x296   :  { %1456 = vst.msk [vmem:[%s3346_s4 + $0x40] sm:$0xff] %vm839_vm3, %v1392_v5  ;;  %1457 = vst.msk [vmem:[%s3346_s4 + $0x48] sm:$0xff] %vm839_vm3, %v1393_v13  ;;  %v1410_v43 = vmax.f32 %v2872_v61, 0.0  ;;  %v1411_v42 = vmax.f32 %v2876_v31, 0.0  ;;  %v1412_v40 = vmax.f32 %v2880_v12, 0.0  ;;  %v1413_v50 = vmax.f32 %v2884_v25, 0.0 }
 0x297   :  { %1458 = vst.msk [vmem:[%s3346_s4 + $0x50] sm:$0xff] %vm839_vm3, %v1394_v59  ;;  %1459 = vst.msk [vmem:[%s3346_s4 + $0x58] sm:$0xff] %vm839_vm3, %v1395_v9  ;;  %v1414_v56 = vmax.f32 %v2888_v60, 0.0  ;;  %v1415_v4 = vmax.f32 %v2892_v7, 0.0  ;;  %v1416_v18 = vmax.f32 %v2896_v38, 0.0  ;;  %v1417_v28 = vmax.f32 %v2900_v32, 0.0 }
 0x298   :  { %1460 = vst.msk [vmem:[%s3346_s4 + $0x60] sm:$0xff] %vm839_vm3, %v1396_v23  ;;  %1461 = vst.msk [vmem:[%s3346_s4 + $0x68] sm:$0xff] %vm839_vm3, %v1397_v35  ;;  %v1418_v36 = vmax.f32 %v2904_v52, 0.0  ;;  %v1419_v46 = vmax.f32 %v2908_v44, 0.0  ;;  %v1420_v49 = vmax.f32 %v2912_v30, 0.0  ;;  %v1421_v61 = vmax.f32 %v2916_v54, 0.0 }
 0x299   :  { %1462 = vst.msk [vmem:[%s3346_s4 + $0x70] sm:$0xff] %vm839_vm3, %v1398_v22  ;;  %1463 = vst.msk [vmem:[%s3346_s4 + $0x78] sm:$0xff] %vm839_vm3, %v1399_v48  ;;  %v1422_v31 = vmax.f32 %v2920_v0, 0.0  ;;  %v1423_v12 = vmax.f32 %v2924_v8, 0.0  ;;  %v1424_v25 = vmax.f32 %v2928_v58, 0.0  ;;  %v1425_v60 = vmax.f32 %v2932_v3, 0.0 }
 0x29a   :  { %1464 = vst.msk [vmem:[%s3346_s4 + $0x80] sm:$0xff] %vm839_vm3, %v1400_v17  ;;  %1465 = vst.msk [vmem:[%s3346_s4 + $0x88] sm:$0xff] %vm839_vm3, %v1401_v6  ;;  %v1426_v7 = vmax.f32 %v2936_v16, 0.0  ;;  %v1427_v38 = vmax.f32 %v2940_v20, 0.0  ;;  %v1428_v32 = vmax.f32 %v2944_v27, 0.0  ;;  %v1429_v52 = vmax.f32 %v2948_v33, 0.0 }
 0x29b   :  { %1466 = vst.msk [vmem:[%s3346_s4 + $0x90] sm:$0xff] %vm839_vm3, %v1402_v53  ;;  %1467 = vst.msk [vmem:[%s3346_s4 + $0x98] sm:$0xff] %vm839_vm3, %v1403_v24  ;;  %v1430_v44 = vmax.f32 %v2952_v39, 0.0  ;;  %v1431_v30 = vmax.f32 %v2956_v45, 0.0  ;;  %v3494_v54 = vld [vmem:[#allocation8_spill] sm:$0xff]  ;;  %v3495_v8 = vld [vmem:[#allocation9_spill] sm:$0xff] }
 0x29c   :  { %1468 = vst.msk [vmem:[%s3346_s4 + $0xa0] sm:$0xff] %vm839_vm3, %v1404_v2  ;;  %1469 = vst.msk [vmem:[%s3346_s4 + $0xa8] sm:$0xff] %vm839_vm3, %v1405_v41  ;;  %v1432_v0 = vmax.f32 %v3494_v54, 0.0  ;;  %v1433_v58 = vmax.f32 %v3495_v8, 0.0  ;;  %v3496_v3 = vld [vmem:[#allocation10_spill] sm:$0xff]  ;;  %v3497_v20 = vld [vmem:[#allocation11_spill] sm:$0xff] }
 0x29d   :  { %1470 = vst.msk [vmem:[%s3346_s4 + $0xb0] sm:$0xff] %vm839_vm3, %v1406_v34  ;;  %1471 = vst.msk [vmem:[%s3346_s4 + $0xb8] sm:$0xff] %vm839_vm3, %v1407_v15  ;;  %v1434_v16 = vmax.f32 %v3496_v3, 0.0  ;;  %v1435_v27 = vmax.f32 %v3497_v20, 0.0  ;;  %v3498_v33 = vld [vmem:[#allocation12_spill] sm:$0xff]  ;;  %v3499_v45 = vld [vmem:[#allocation13_spill] sm:$0xff] }
 0x29e   :  { %1472 = vst.msk [vmem:[%s3346_s4 + $0xc0] sm:$0xff] %vm839_vm3, %v1408_v19  ;;  %1473 = vst.msk [vmem:[%s3346_s4 + $0xc8] sm:$0xff] %vm839_vm3, %v1409_v26  ;;  %v1436_v39 = vmax.f32 %v3498_v33, 0.0  ;;  %v1437_v1 = vmax.f32 %v3499_v45, 0.0  ;;  %v1438_v51 = vmax.f32 %v2984_v14, 0.0  ;;  %v1439_v57 = vmax.f32 %v2988_v62, 0.0 }
 0x29f   :  { %1474 = vst.msk [vmem:[%s3346_s4 + $0xd0] sm:$0xff] %vm839_vm3, %v1410_v43  ;;  %1475 = vst.msk [vmem:[%s3346_s4 + $0xd8] sm:$0xff] %vm839_vm3, %v1411_v42  ;;  %v1440_v14 = vmax.f32 %v2992_v10, 0.0  ;;  %v1441_v62 = vmax.f32 %v2996_v55, 0.0  ;;  %v3500_v63 = vld [vmem:[#allocation15_spill] sm:$0xff]  ;;  %v3501_v21 = vld [vmem:[#allocation17_spill] sm:$0xff] }
 0x2a0   :  { %1476 = vst.msk [vmem:[%s3346_s4 + $0xe0] sm:$0xff] %vm839_vm3, %v1412_v40  ;;  %1477 = vst.msk [vmem:[%s3346_s4 + $0xe8] sm:$0xff] %vm839_vm3, %v1413_v50  ;;  %v1442_v5 = vmax.f32 %v3500_v63, 0.0  ;;  %v1443_v29 = vmax.f32 %v3501_v21, 0.0  ;;  %v3502_v10 = vld [vmem:[#allocation19_spill] sm:$0xff]  ;;  %v3503_v37 = vld [vmem:[#allocation21_spill] sm:$0xff] }
 0x2a1   :  { %1478 = vst.msk [vmem:[%s3346_s4 + $0xf0] sm:$0xff] %vm839_vm3, %v1414_v56  ;;  %1479 = vst.msk [vmem:[%s3346_s4 + $0xf8] sm:$0xff] %vm839_vm3, %v1415_v4  ;;  %v1444_v55 = vmax.f32 %v3502_v10, 0.0  ;;  %v1445_v47 = vmax.f32 %v3503_v37, 0.0  ;;  %v3504_v13 = vld [vmem:[#allocation14_spill] sm:$0xff]  ;;  %v1447_v9 = vmax.f32 %v3020_v11, 0.0 }
 0x2a2   :  { %1480 = vst.msk [vmem:[%s3346_s4 + $0x100] sm:$0xff] %vm839_vm3, %v1416_v18  ;;  %1481 = vst.msk [vmem:[%s3346_s4 + $0x108] sm:$0xff] %vm839_vm3, %v1417_v28  ;;  %v1446_v59 = vmax.f32 %v3504_v13, 0.0 }
 0x2a3   :  { %1482 = vst.msk [vmem:[%s3346_s4 + $0x110] sm:$0xff] %vm839_vm3, %v1418_v36  ;;  %1483 = vst.msk [vmem:[%s3346_s4 + $0x118] sm:$0xff] %vm839_vm3, %v1419_v46 }
 0x2a4   :  { %1484 = vst.msk [vmem:[%s3346_s4 + $0x120] sm:$0xff] %vm839_vm3, %v1420_v49  ;;  %1485 = vst.msk [vmem:[%s3346_s4 + $0x128] sm:$0xff] %vm839_vm3, %v1421_v61 }
 0x2a5   :  { %1486 = vst.msk [vmem:[%s3346_s4 + $0x130] sm:$0xff] %vm839_vm3, %v1422_v31  ;;  %1487 = vst.msk [vmem:[%s3346_s4 + $0x138] sm:$0xff] %vm839_vm3, %v1423_v12 }
 0x2a6   :  { %1488 = vst.msk [vmem:[%s3346_s4 + $0x140] sm:$0xff] %vm839_vm3, %v1424_v25  ;;  %1489 = vst.msk [vmem:[%s3346_s4 + $0x148] sm:$0xff] %vm839_vm3, %v1425_v60 }
 0x2a7   :  { %1490 = vst.msk [vmem:[%s3346_s4 + $0x150] sm:$0xff] %vm839_vm3, %v1426_v7  ;;  %1491 = vst.msk [vmem:[%s3346_s4 + $0x158] sm:$0xff] %vm839_vm3, %v1427_v38 }
 0x2a8   :  { %1492 = vst.msk [vmem:[%s3346_s4 + $0x160] sm:$0xff] %vm839_vm3, %v1428_v32  ;;  %1493 = vst.msk [vmem:[%s3346_s4 + $0x168] sm:$0xff] %vm839_vm3, %v1429_v52 }
 0x2a9   :  { %1494 = vst.msk [vmem:[%s3346_s4 + $0x170] sm:$0xff] %vm839_vm3, %v1430_v44  ;;  %1495 = vst.msk [vmem:[%s3346_s4 + $0x178] sm:$0xff] %vm839_vm3, %v1431_v30 }
 0x2aa   :  { %1496 = vst.msk [vmem:[%s3346_s4 + $0x180] sm:$0xff] %vm839_vm3, %v1432_v0  ;;  %1497 = vst.msk [vmem:[%s3346_s4 + $0x188] sm:$0xff] %vm839_vm3, %v1433_v58 }
 0x2ab   :  { %1498 = vst.msk [vmem:[%s3346_s4 + $0x190] sm:$0xff] %vm839_vm3, %v1434_v16  ;;  %1499 = vst.msk [vmem:[%s3346_s4 + $0x198] sm:$0xff] %vm839_vm3, %v1435_v27 }
 0x2ac   :  { %1500 = vst.msk [vmem:[%s3346_s4 + $0x1a0] sm:$0xff] %vm839_vm3, %v1436_v39  ;;  %1501 = vst.msk [vmem:[%s3346_s4 + $0x1a8] sm:$0xff] %vm839_vm3, %v1437_v1 }
 0x2ad   :  { %1502 = vst.msk [vmem:[%s3346_s4 + $0x1b0] sm:$0xff] %vm839_vm3, %v1438_v51  ;;  %1503 = vst.msk [vmem:[%s3346_s4 + $0x1b8] sm:$0xff] %vm839_vm3, %v1439_v57 }
 0x2ae   :  { %1504 = vst.msk [vmem:[%s3346_s4 + $0x1c0] sm:$0xff] %vm839_vm3, %v1440_v14  ;;  %1505 = vst.msk [vmem:[%s3346_s4 + $0x1c8] sm:$0xff] %vm839_vm3, %v1441_v62 }
 0x2af   :  { %1506 = vst.msk [vmem:[%s3346_s4 + $0x1d0] sm:$0xff] %vm839_vm3, %v1442_v5  ;;  %1507 = vst.msk [vmem:[%s3346_s4 + $0x1d8] sm:$0xff] %vm839_vm3, %v1443_v29 }
 0x2b0   :  { %1508 = vst.msk [vmem:[%s3346_s4 + $0x1e0] sm:$0xff] %vm839_vm3, %v1444_v55  ;;  %1509 = vst.msk [vmem:[%s3346_s4 + $0x1e8] sm:$0xff] %vm839_vm3, %v1445_v47 }
 0x2b1   :  { %1510 = vst.msk [vmem:[%s3346_s4 + $0x1f0] sm:$0xff] %vm839_vm3, %v1446_v59  ;;  %1511 = vst.msk [vmem:[%s3346_s4 + $0x1f8] sm:$0xff] %vm839_vm3, %v1447_v9 }

// kernel: resnet_generator.11
= control target key start
LH: loop header
LB: loop body
LE: loop exit
PB: predicated region body
PF: predicated region fallthrough
CT: control target
= control target key end

     0   :  { %v584_v0 = vmov 0   ;;  %vm178_vm0 = vcmask 130048   ;;  %vm300_vm1 = vcmask 261120   ;;  %s894_s1 = inlined_call_operand.vmem [shape: bf16[144,32], index: 1, kind: input, shape index: {}]   ;;  %s895_s0 = inlined_call_operand.vmem [shape: bf16[128,144], index: 0, kind: input, shape index: {}]   ;;  %s896_s2 = inlined_call_operand.vmem [shape: f32[1,32], index: 2, kind: input, shape index: {}]   ;;  %s897_s3 = inlined_call_operand.vmem [shape: f32[1,32], index: 3, kind: input, shape index: {}]   ;;  %s898_s4 = inlined_call_operand.vmem [shape: f32[128,32], index: 4, kind: output, shape index: {}]  }
   0x1   :  { %203 = vmatprep.subr.bf16.mxu0 %v584_v0  ;;  %v549_v1 = vld [vmem:[%s894_s1] sm:$0xff]   ;;  %530 = vmatprep.subr.bf16.mxu1 %v584_v0  ;;  %v550_v2 = vld [vmem:[%s894_s1 + $0x8] sm:$0xff]   ;;  %v551_v3 = vld [vmem:[%s894_s1 + $0x10] sm:$0xff]  }
   0x2   :  { %204 = vmatpush1.bf16.msra.mxu0 %v549_v1  ;;  %539 = vmatpush1.bf16.msra.mxu1 %v549_v1  ;;  %v552_v4 = vld [vmem:[%s894_s1 + $0x18] sm:$0xff]   ;;  %v560_v5 = vld [vmem:[%s895_s0 + $0x4] ss:$8 sps:$4 sm:$0xff]   ;;  %v555_v9 = vld [vmem:[%s894_s1 + $0x30] sm:$0xff]  }
   0x3   :  { %205 = vmatprep.subr.bf16.mxu0 %v584_v0  ;;  %531 = vmatprep.subr.bf16.mxu1 %v584_v0  ;;  %v566_v6 = vld [vmem:[%s895_s0 + $0x44] ss:$8 sps:$4 sm:$0xff]   ;;  %v556_v10 = vld [vmem:[%s894_s1 + $0x38] sm:$0xff]   ;;  %v558_v12 = vld [vmem:[%s895_s0] ss:$8 sps:$4 sm:$0xff]  }
   0x4   :  { %522 = vmatprep.mubr.msk.bf16.mxu0 %vm178_vm0, %v560_v5  ;;  %v553_v7 = vld [vmem:[%s894_s1 + $0x20] sm:$0xff]   ;;  %526 = vmatprep.mubr.msk.bf16.mxu1 %vm178_vm0, %v566_v6  ;;  %v554_v8 = vld [vmem:[%s894_s1 + $0x28] sm:$0xff]   ;;  %v561_v14 = vld [vmem:[%s895_s0 + $0x14] ss:$8 sps:$4 sm:$0xff]  }
   0x5   :  { %v557_v11 = vld [vmem:[%s894_s1 + $0x40] sm:$0xff]   ;;  %v570_v15 = vld [vmem:[%s895_s0 + $0x54] ss:$8 sps:$4 sm:$0xff]   ;;  %v563_v16 = vld [vmem:[%s895_s0 + $0x10] ss:$8 sps:$4 sm:$0xff]  }
   0x6   :  { %206 = vmatpush1.bf16.msra.mxu0 %v550_v2  ;;  %540 = vmatpush1.bf16.msra.mxu1 %v550_v2  ;;  %v564_v13 = vld [vmem:[%s895_s0 + $0x40] ss:$8 sps:$4 sm:$0xff]   ;;  %v572_v17 = vld [vmem:[%s895_s0 + $0x50] ss:$8 sps:$4 sm:$0xff]   ;;  %v567_v18 = vld [vmem:[%s895_s0 + $0x24] ss:$8 sps:$4 sm:$0xff]  }
   0x7   :  { %207 = vmatprep.subr.bf16.mxu0 %v584_v0  ;;  %532 = vmatprep.subr.bf16.mxu1 %v584_v0  ;;  %v576_v19 = vld [vmem:[%s895_s0 + $0x64] ss:$8 sps:$4 sm:$0xff]   ;;  %v569_v20 = vld [vmem:[%s895_s0 + $0x20] ss:$8 sps:$4 sm:$0xff]   ;;  %v573_v22 = vld [vmem:[%s895_s0 + $0x34] ss:$8 sps:$4 sm:$0xff]  }
   0x8   :  { %v578_v21 = vld [vmem:[%s895_s0 + $0x60] ss:$8 sps:$4 sm:$0xff]   ;;  %v579_v23 = vld [vmem:[%s895_s0 + $0x74] ss:$8 sps:$4 sm:$0xff]   ;;  %v575_v24 = vld [vmem:[%s895_s0 + $0x30] ss:$8 sps:$4 sm:$0xff]  }
   0x9   :  { %v581_v25 = vld [vmem:[%s895_s0 + $0x70] ss:$8 sps:$4 sm:$0xff]  }
   0xa   :  { %208 = vmatpush1.bf16.msra.mxu0 %v551_v3  ;;  %541 = vmatpush1.bf16.msra.mxu1 %v551_v3 }
   0xb   :  { %209 = vmatprep.subr.bf16.mxu0 %v584_v0  ;;  %533 = vmatprep.subr.bf16.mxu1 %v584_v0 }
   0xe   :  { %210 = vmatpush1.bf16.msra.mxu0 %v552_v4  ;;  %542 = vmatpush1.bf16.msra.mxu1 %v552_v4 }
   0xf   :  { %211 = vmatprep.subr.bf16.mxu0 %v584_v0  ;;  %534 = vmatprep.subr.bf16.mxu1 %v584_v0 }
  0x12   :  { %212 = vmatpush1.bf16.msra.mxu0 %v553_v7  ;;  %543 = vmatpush1.bf16.msra.mxu1 %v553_v7 }
  0x13   :  { %213 = vmatprep.subr.bf16.mxu0 %v584_v0  ;;  %535 = vmatprep.subr.bf16.mxu1 %v584_v0 }
  0x16   :  { %214 = vmatpush1.bf16.msra.mxu0 %v554_v8  ;;  %544 = vmatpush1.bf16.msra.mxu1 %v554_v8 }
  0x17   :  { %215 = vmatprep.subr.bf16.mxu0 %v584_v0  ;;  %536 = vmatprep.subr.bf16.mxu1 %v584_v0 }
  0x1a   :  { %216 = vmatpush1.bf16.msra.mxu0 %v555_v9  ;;  %545 = vmatpush1.bf16.msra.mxu1 %v555_v9 }
  0x1b   :  { %217 = vmatprep.subr.bf16.mxu0 %v584_v0  ;;  %537 = vmatprep.subr.bf16.mxu1 %v584_v0 }
  0x1e   :  { %218 = vmatpush1.bf16.msra.mxu0 %v556_v10  ;;  %546 = vmatpush1.bf16.msra.mxu1 %v556_v10 }
  0x1f   :  { %219 = vmatprep.subr.bf16.mxu0 %v584_v0  ;;  %538 = vmatprep.subr.bf16.mxu1 %v584_v0 }
  0x22   :  { %220 = vmatpush1.bf16.msra.mxu0 %v557_v11  ;;  %547 = vmatpush1.bf16.msra.mxu1 %v557_v11 }
  0x25   :  { %236 = vmatmul.mubr.bf16.vlgmr.msra.gmra.mrb[0].mxu0 %v558_v12  ;;  %268 = vmatmul.mubr.bf16.vlgmr.msra.gmra.mrb[0].mxu1 %v564_v13 }
  0x26   :  { %523 = vmatprep.mubr.msk.bf16.mxu0 %vm178_vm0, %v561_v14  ;;  %527 = vmatprep.mubr.msk.bf16.mxu1 %vm178_vm0, %v570_v15 }
  0x2d   :  { %244 = vmatmul.mubr.bf16.gmra.mrb[4].mxu0 %v563_v16  ;;  %276 = vmatmul.mubr.bf16.gmra.mrb[4].mxu1 %v572_v17 }
  0x2e   :  { %524 = vmatprep.mubr.msk.bf16.mxu0 %vm178_vm0, %v567_v18  ;;  %528 = vmatprep.mubr.msk.bf16.mxu1 %vm178_vm0, %v576_v19 }
  0x35   :  { %252 = vmatmul.mubr.bf16.gmra.mrb[8].mxu0 %v569_v20  ;;  %284 = vmatmul.mubr.bf16.gmra.mrb[8].mxu1 %v578_v21 }
  0x36   :  { %525 = vmatprep.mubr.msk.bf16.mxu0 %vm178_vm0, %v573_v22  ;;  %529 = vmatprep.mubr.msk.bf16.mxu1 %vm178_vm0, %v579_v23 }
  0x3d   :  { %260 = vmatmul.mubr.bf16.gmra.mrb[12].mxu0 %v575_v24  ;;  %292 = vmatmul.mubr.bf16.gmra.mrb[12].mxu1 %v581_v25 }
  0xf8   :  { %v693_v26 = vpop.f32.mrb[0].mxu0  ;;  %v695_v27 = vpop.f32.mrb[0].mxu1 }
  0xf9   :  { %v239_v28 = vpop.f32.mrb[1].mxu0  ;;  %v271_v29 = vpop.f32.mrb[1].mxu1  ;;  %v301_v32 = vsel %vm300_vm1, %v693_v26, 0.0  ;;  %v316_v9 = vsel %vm300_vm1, %v695_v27, 0.0 }
  0xfa   :  { %v697_v30 = vpop.f32.mrb[2].mxu0  ;;  %v699_v31 = vpop.f32.mrb[2].mxu1 }
  0xfb   :  { %v302_v33 = vsel %vm300_vm1, %v697_v30, 0.0  ;;  %v242_v34 = vpop.f32.mrb[3].mxu0  ;;  %v274_v35 = vpop.f32.mrb[3].mxu1  ;;  %v318_v11 = vsel %vm300_vm1, %v699_v31, 0.0 }
  0xfc   :  { %v303_v36 = vadd.f32 %v302_v33, %v301_v32 }
 0x100   :  { %v705_v37 = vpop.f32.mrb[4].mxu0  ;;  %v707_v38 = vpop.f32.mrb[4].mxu1 }
 0x101   :  { %v304_v39 = vsel %vm300_vm1, %v705_v37, 0.0  ;;  %v247_v40 = vpop.f32.mrb[5].mxu0  ;;  %v279_v41 = vpop.f32.mrb[5].mxu1  ;;  %v320_v13 = vsel %vm300_vm1, %v707_v38, 0.0 }
 0x102   :  { %v305_v42 = vadd.f32 %v304_v39, %v303_v36  ;;  %v711_v43 = vpop.f32.mrb[6].mxu0  ;;  %v713_v44 = vpop.f32.mrb[6].mxu1 }
 0x103   :  { %v306_v45 = vsel %vm300_vm1, %v711_v43, 0.0  ;;  %v250_v46 = vpop.f32.mrb[7].mxu0  ;;  %v282_v47 = vpop.f32.mrb[7].mxu1  ;;  %v322_v15 = vsel %vm300_vm1, %v713_v44, 0.0 }
 0x104   :  { %v307_v48 = vadd.f32 %v306_v45, %v305_v42 }
 0x108   :  { %v717_v49 = vpop.f32.mrb[8].mxu0  ;;  %v719_v50 = vpop.f32.mrb[8].mxu1 }
 0x109   :  { %v308_v51 = vsel %vm300_vm1, %v717_v49, 0.0  ;;  %v255_v52 = vpop.f32.mrb[9].mxu0  ;;  %v287_v53 = vpop.f32.mrb[9].mxu1  ;;  %v324_v17 = vsel %vm300_vm1, %v719_v50, 0.0 }
 0x10a   :  { %v309_v54 = vadd.f32 %v308_v51, %v307_v48  ;;  %v723_v55 = vpop.f32.mrb[10].mxu0  ;;  %v725_v56 = vpop.f32.mrb[10].mxu1 }
 0x10b   :  { %v310_v57 = vsel %vm300_vm1, %v723_v55, 0.0  ;;  %v258_v58 = vpop.f32.mrb[11].mxu0  ;;  %v290_v59 = vpop.f32.mrb[11].mxu1  ;;  %v326_v19 = vsel %vm300_vm1, %v725_v56, 0.0 }
 0x10c   :  { %v311_v60 = vadd.f32 %v310_v57, %v309_v54 }
 0x110   :  { %v729_v61 = vpop.f32.mrb[12].mxu0  ;;  %v731_v62 = vpop.f32.mrb[12].mxu1 }
 0x111   :  { %v312_v63 = vsel %vm300_vm1, %v729_v61, 0.0  ;;  %v263_v0 = vpop.f32.mrb[13].mxu0  ;;  %v295_v1 = vpop.f32.mrb[13].mxu1  ;;  %v328_v20 = vsel %vm300_vm1, %v731_v62, 0.0 }
 0x112   :  { %v313_v2 = vadd.f32 %v312_v63, %v311_v60  ;;  %v735_v3 = vpop.f32.mrb[14].mxu0  ;;  %v737_v4 = vpop.f32.mrb[14].mxu1 }
 0x113   :  { %v314_v5 = vsel %vm300_vm1, %v735_v3, 0.0  ;;  %v266_v6 = vpop.f32.mrb[15].mxu0  ;;  %v298_v7 = vpop.f32.mrb[15].mxu1  ;;  %v330_v23 = vsel %vm300_vm1, %v737_v4, 0.0 }
 0x114   :  { %v315_v8 = vadd.f32 %v314_v5, %v313_v2 }
 0x116   :  { %v317_v10 = vadd.f32 %v316_v9, %v315_v8 }
 0x118   :  { %v319_v12 = vadd.f32 %v318_v11, %v317_v10 }
 0x11a   :  { %v321_v14 = vadd.f32 %v320_v13, %v319_v12 }
 0x11c   :  { %v323_v16 = vadd.f32 %v322_v15, %v321_v14 }
 0x11e   :  { %v325_v18 = vadd.f32 %v324_v17, %v323_v16 }
 0x120   :  { %v327_v21 = vadd.f32 %v326_v19, %v325_v18 }
 0x122   :  { %v329_v22 = vadd.f32 %v328_v20, %v327_v21 }
 0x124   :  { %v331_v24 = vadd.f32 %v330_v23, %v329_v22 }
 0x126   :  { %v332_v25 = vrot.slane %v331_v24, 4 }
 0x128   :  { %v333_v28 = vadd.f32 %v332_v25, %v331_v24 }
 0x12a   :  { %v334_v29 = vrot.slane %v333_v28, 2 }
 0x12c   :  { %v335_v32 = vadd.f32 %v334_v29, %v333_v28 }
 0x12e   :  { %v336_v33 = vrot.slane %v335_v32, 1 }
 0x130   :  { %v337_v34 = vadd.f32 %v336_v33, %v335_v32 }
 0x132   :  { %v757_v35 = vmul.f32 0.0078125, %v337_v34 }
 0x134   :  { %v340_v36 = vsub.f32 %v693_v26, %v757_v35  ;;  %v341_v39 = vsub.f32 %v697_v30, %v757_v35  ;;  %v342_v40 = vsub.f32 %v705_v37, %v757_v35  ;;  %v343_v41 = vsub.f32 %v711_v43, %v757_v35 }
 0x135   :  { %v344_v42 = vsub.f32 %v717_v49, %v757_v35  ;;  %v345_v45 = vsub.f32 %v723_v55, %v757_v35  ;;  %v346_v46 = vsub.f32 %v729_v61, %v757_v35  ;;  %v347_v47 = vsub.f32 %v735_v3, %v757_v35 }
 0x136   :  { %v348_v48 = vsub.f32 %v695_v27, %v757_v35  ;;  %v349_v51 = vsub.f32 %v699_v31, %v757_v35  ;;  %v350_v52 = vsub.f32 %v707_v38, %v757_v35  ;;  %v351_v53 = vsub.f32 %v713_v44, %v757_v35 }
 0x137   :  { %v352_v54 = vsub.f32 %v719_v50, %v757_v35  ;;  %v353_v57 = vsub.f32 %v725_v56, %v757_v35  ;;  %v354_v58 = vsub.f32 %v731_v62, %v757_v35  ;;  %v355_v59 = vsub.f32 %v737_v4, %v757_v35 }
 0x138   :  { %v356_v60 = vmul.f32 %v340_v36, %v340_v36  ;;  %v357_v63 = vmul.f32 %v341_v39, %v341_v39  ;;  %v358_v0 = vmul.f32 %v342_v40, %v342_v40  ;;  %v359_v1 = vmul.f32 %v343_v41, %v343_v41 }
 0x139   :  { %v360_v7 = vmul.f32 %v344_v42, %v344_v42  ;;  %v361_v10 = vmul.f32 %v345_v45, %v345_v45  ;;  %v362_v13 = vmul.f32 %v346_v46, %v346_v46  ;;  %v363_v16 = vmul.f32 %v347_v47, %v347_v47 }
 0x13a   :  { %v372_v2 = vsel %vm300_vm1, %v356_v60, 0.0  ;;  %v373_v5 = vsel %vm300_vm1, %v357_v63, 0.0  ;;  %v375_v8 = vsel %vm300_vm1, %v358_v0, 0.0  ;;  %v377_v11 = vsel %vm300_vm1, %v359_v1, 0.0 }
 0x13b   :  { %v374_v6 = vadd.f32 %v373_v5, %v372_v2  ;;  %v379_v14 = vsel %vm300_vm1, %v360_v7, 0.0  ;;  %v381_v17 = vsel %vm300_vm1, %v361_v10, 0.0  ;;  %v364_v19 = vmul.f32 %v348_v48, %v348_v48  ;;  %v410_v10 = vld [vmem:[%s896_s2] sm:$0x1] }
 0x13c   :  { %v383_v20 = vsel %vm300_vm1, %v362_v13, 0.0  ;;  %v365_v22 = vmul.f32 %v349_v51, %v349_v51  ;;  %v385_v23 = vsel %vm300_vm1, %v363_v16, 0.0  ;;  %v366_v25 = vmul.f32 %v350_v52, %v350_v52 }
 0x13d   :  { %v376_v9 = vadd.f32 %v375_v8, %v374_v6  ;;  %v387_v28 = vsel %vm300_vm1, %v364_v19, 0.0  ;;  %v367_v32 = vmul.f32 %v351_v53, %v351_v53  ;;  %v368_v36 = vmul.f32 %v352_v54, %v352_v54 }
 0x13e   :  { %v389_v33 = vsel %vm300_vm1, %v365_v22, 0.0  ;;  %v391_v39 = vsel %vm300_vm1, %v366_v25, 0.0  ;;  %v369_v41 = vmul.f32 %v353_v57, %v353_v57  ;;  %v370_v46 = vmul.f32 %v354_v58, %v354_v58 }
 0x13f   :  { %v378_v12 = vadd.f32 %v377_v11, %v376_v9  ;;  %v393_v42 = vsel %vm300_vm1, %v367_v32, 0.0  ;;  %v395_v47 = vsel %vm300_vm1, %v368_v36, 0.0  ;;  %v371_v51 = vmul.f32 %v355_v59, %v355_v59 }
 0x140   :  { %v397_v52 = vsel %vm300_vm1, %v369_v41, 0.0  ;;  %v399_v53 = vsel %vm300_vm1, %v370_v46, 0.0  ;;  %v418_v9 = vlaneseq }
 0x141   :  { %v380_v15 = vadd.f32 %v379_v14, %v378_v12  ;;  %v401_v54 = vsel %vm300_vm1, %v371_v51, 0.0  ;;  %v414_v14 = vld [vmem:[%s897_s3] sm:$0x1] }
 0x142   :  { %v419_v59 = vshrl.u32 %v418_v9, 7 }
 0x143   :  { %v382_v18 = vadd.f32 %v381_v17, %v380_v15 }
 0x144   :  { %v420_v11 = vsub.s32 0, %v419_v59 }
 0x145   :  { %v384_v21 = vadd.f32 %v383_v20, %v382_v18 }
 0x147   :  { %v386_v24 = vadd.f32 %v385_v23, %v384_v21 }
 0x149   :  { %v388_v29 = vadd.f32 %v387_v28, %v386_v24 }
 0x14b   :  { %v390_v34 = vadd.f32 %v389_v33, %v388_v29 }
 0x14d   :  { %v392_v40 = vadd.f32 %v391_v39, %v390_v34 }
 0x14f   :  { %v394_v45 = vadd.f32 %v393_v42, %v392_v40 }
 0x151   :  { %v396_v48 = vadd.f32 %v395_v47, %v394_v45 }
 0x153   :  { %v398_v60 = vadd.f32 %v397_v52, %v396_v48 }
 0x155   :  { %v400_v63 = vadd.f32 %v399_v53, %v398_v60 }
 0x157   :  { %v402_v0 = vadd.f32 %v401_v54, %v400_v63 }
 0x159   :  { %v403_v1 = vrot.slane %v402_v0, 4 }
 0x15b   :  { %v404_v2 = vadd.f32 %v403_v1, %v402_v0 }
 0x15d   :  { %v405_v57 = vrot.slane %v404_v2, 2 }
 0x15f   :  { %v406_v5 = vadd.f32 %v405_v57, %v404_v2 }
 0x161   :  { %v407_v6 = vrot.slane %v406_v5, 1 }
 0x163   :  { %v408_v7 = vadd.f32 %v407_v6, %v406_v5 }
 0x165   :  { %v409_v58 = vmul.f32 0.0078125, %v408_v7 }
 0x167   :  { %v411_v8 = vadd.f32 1e-05, %v409_v58 }
 0x169   :  { %582 = vrsqrt.f32 %v411_v8 }
 0x173   :  { %v583_v12 = vpop.eup %582 }
 0x174   :  { %v413_v13 = vmul.f32 %v583_v12, %v410_v10 }
 0x176   :  { %v415_v15 = vmul.f32 %v413_v13, %v757_v35  ;;  %v421_v16 = vrot.slane %v413_v13, %v420_v11 }
 0x178   :  { %v416_v17 = vsub.f32 %v414_v14, %v415_v15  ;;  %v423_v18 = vmul.f32 %v421_v16, %v693_v26  ;;  %v424_v19 = vmul.f32 %v421_v16, %v697_v30  ;;  %v425_v20 = vmul.f32 %v421_v16, %v705_v37 }
 0x179   :  { %v426_v21 = vmul.f32 %v421_v16, %v711_v43  ;;  %v427_v22 = vmul.f32 %v421_v16, %v717_v49  ;;  %v428_v23 = vmul.f32 %v421_v16, %v723_v55  ;;  %v429_v24 = vmul.f32 %v421_v16, %v729_v61 }
 0x17a   :  { %v430_v25 = vmul.f32 %v421_v16, %v735_v3  ;;  %v431_v35 = vmul.f32 %v421_v16, %v695_v27  ;;  %v432_v28 = vmul.f32 %v421_v16, %v699_v31  ;;  %v433_v26 = vmul.f32 %v421_v16, %v707_v38 }
 0x17b   :  { %v434_v30 = vmul.f32 %v421_v16, %v713_v44  ;;  %v435_v37 = vmul.f32 %v421_v16, %v719_v50  ;;  %v436_v43 = vmul.f32 %v421_v16, %v725_v56  ;;  %v437_v49 = vmul.f32 %v421_v16, %v731_v62 }
 0x17c   :  { %v438_v55 = vmul.f32 %v421_v16, %v737_v4  ;;  %v443_v29 = vrot.slane %v416_v17, %v420_v11 }
 0x17e   :  { %v445_v61 = vadd.f32 %v443_v29, %v423_v18  ;;  %v446_v32 = vadd.f32 %v443_v29, %v424_v19  ;;  %v447_v3 = vadd.f32 %v443_v29, %v425_v20  ;;  %v448_v33 = vadd.f32 %v443_v29, %v426_v21 }
 0x17f   :  { %v449_v27 = vadd.f32 %v443_v29, %v427_v22  ;;  %v450_v34 = vadd.f32 %v443_v29, %v428_v23  ;;  %v451_v31 = vadd.f32 %v443_v29, %v429_v24  ;;  %v452_v36 = vadd.f32 %v443_v29, %v430_v25 }
 0x180   :  { %v453_v38 = vadd.f32 %v443_v29, %v431_v35  ;;  %v454_v39 = vadd.f32 %v443_v29, %v432_v28  ;;  %v455_v44 = vadd.f32 %v443_v29, %v433_v26  ;;  %v456_v40 = vadd.f32 %v443_v29, %v434_v30 }
 0x181   :  { %v457_v50 = vadd.f32 %v443_v29, %v435_v37  ;;  %v458_v41 = vadd.f32 %v443_v29, %v436_v43  ;;  %v459_v56 = vadd.f32 %v443_v29, %v437_v49  ;;  %v460_v42 = vadd.f32 %v443_v29, %v438_v55 }
 0x182   :  { %v461_v62 = vmax.f32 %v445_v61, 0.0  ;;  %v462_v45 = vmax.f32 %v446_v32, 0.0  ;;  %v463_v4 = vmax.f32 %v447_v3, 0.0  ;;  %v464_v46 = vmax.f32 %v448_v33, 0.0 }
 0x183   :  { %v465_v47 = vmax.f32 %v449_v27, 0.0  ;;  %v466_v48 = vmax.f32 %v450_v34, 0.0  ;;  %v467_v51 = vmax.f32 %v451_v31, 0.0  ;;  %v468_v52 = vmax.f32 %v452_v36, 0.0 }
 0x184   :  { %v469_v60 = vmax.f32 %v453_v38, 0.0  ;;  %v470_v53 = vmax.f32 %v454_v39, 0.0  ;;  %v471_v63 = vmax.f32 %v455_v44, 0.0  ;;  %v472_v54 = vmax.f32 %v456_v40, 0.0  ;;  %477 = vst.msk [vmem:[%s898_s4] sm:$0xff] %vm300_vm1, %v461_v62  ;;  %478 = vst.msk [vmem:[%s898_s4 + $0x8] sm:$0xff] %vm300_vm1, %v462_v45 }
 0x185   :  { %479 = vst.msk [vmem:[%s898_s4 + $0x10] sm:$0xff] %vm300_vm1, %v463_v4  ;;  %480 = vst.msk [vmem:[%s898_s4 + $0x18] sm:$0xff] %vm300_vm1, %v464_v46  ;;  %v473_v0 = vmax.f32 %v457_v50, 0.0  ;;  %v474_v1 = vmax.f32 %v458_v41, 0.0  ;;  %v475_v2 = vmax.f32 %v459_v56, 0.0  ;;  %v476_v57 = vmax.f32 %v460_v42, 0.0 }
 0x186   :  { %481 = vst.msk [vmem:[%s898_s4 + $0x20] sm:$0xff] %vm300_vm1, %v465_v47  ;;  %482 = vst.msk [vmem:[%s898_s4 + $0x28] sm:$0xff] %vm300_vm1, %v466_v48 }
 0x187   :  { %483 = vst.msk [vmem:[%s898_s4 + $0x30] sm:$0xff] %vm300_vm1, %v467_v51  ;;  %484 = vst.msk [vmem:[%s898_s4 + $0x38] sm:$0xff] %vm300_vm1, %v468_v52 }
 0x188   :  { %485 = vst.msk [vmem:[%s898_s4 + $0x40] sm:$0xff] %vm300_vm1, %v469_v60  ;;  %486 = vst.msk [vmem:[%s898_s4 + $0x48] sm:$0xff] %vm300_vm1, %v470_v53 }
 0x189   :  { %487 = vst.msk [vmem:[%s898_s4 + $0x50] sm:$0xff] %vm300_vm1, %v471_v63  ;;  %488 = vst.msk [vmem:[%s898_s4 + $0x58] sm:$0xff] %vm300_vm1, %v472_v54 }
 0x18a   :  { %489 = vst.msk [vmem:[%s898_s4 + $0x60] sm:$0xff] %vm300_vm1, %v473_v0  ;;  %490 = vst.msk [vmem:[%s898_s4 + $0x68] sm:$0xff] %vm300_vm1, %v474_v1 }
 0x18b   :  { %491 = vst.msk [vmem:[%s898_s4 + $0x70] sm:$0xff] %vm300_vm1, %v475_v2  ;;  %492 = vst.msk [vmem:[%s898_s4 + $0x78] sm:$0xff] %vm300_vm1, %v476_v57 }

// kernel: resnet_generator.12
= control target key start
LH: loop header
LB: loop body
LE: loop exit
PB: predicated region body
PF: predicated region fallthrough
CT: control target
= control target key end

     0   :  { %vm200_vm0 = vcmask 261120   ;;  %vm305_vm1 = vcmask 523264   ;;  %s613_s1 = inlined_call_operand.vmem [shape: bf16[288,64], index: 1, kind: input, shape index: {}]   ;;  %s614_s0 = inlined_call_operand.vmem [shape: bf16[32,288], index: 0, kind: input, shape index: {}]   ;;  %s615_s2 = inlined_call_operand.vmem [shape: f32[1,64], index: 2, kind: input, shape index: {}]   ;;  %s616_s3 = inlined_call_operand.vmem [shape: f32[1,64], index: 3, kind: input, shape index: {}]   ;;  %s617_s4 = inlined_call_operand.vmem [shape: f32[32,64], index: 4, kind: output, shape index: {}]  }
   0x1   :  { %v448_v0 = vld [vmem:[%s613_s1 + $0x40] sm:$0xff]   ;;  %v450_v2 = vld [vmem:[%s613_s1 + $0x48] sm:$0xff]   ;;  %v452_v4 = vld [vmem:[%s613_s1 + $0x50] sm:$0xff]  }
   0x2   :  { %v449_v1 = vld [vmem:[%s613_s1] sm:$0xff]   ;;  %408 = vmatprep.subr.bf16.mxu0 %v448_v0  ;;  %v451_v3 = vld [vmem:[%s613_s1 + $0x8] sm:$0xff]   ;;  %v453_v5 = vld [vmem:[%s613_s1 + $0x10] sm:$0xff]  }
   0x3   :  { %409 = vmatpush3.bf16.msra.mxu0 %v449_v1  ;;  %v454_v6 = vld [vmem:[%s613_s1 + $0x58] sm:$0xff]   ;;  %v456_v8 = vld [vmem:[%s613_s1 + $0x60] sm:$0xff]   ;;  %v458_v11 = vld [vmem:[%s613_s1 + $0x68] sm:$0xff]  }
   0x4   :  { %410 = vmatprep.subr.bf16.mxu0 %v450_v2  ;;  %v455_v7 = vld [vmem:[%s613_s1 + $0x18] sm:$0xff]   ;;  %v462_v9 = vld [vmem:[%s613_s1 + $0x80] sm:$0xff]   ;;  %v459_v12 = vld [vmem:[%s613_s1 + $0x28] sm:$0xff]  }
   0x5   :  { %v457_v10 = vld [vmem:[%s613_s1 + $0x20] sm:$0xff]   ;;  %440 = vmatprep.subr.bf16.mxu1 %v462_v9  ;;  %v465_v13 = vld [vmem:[%s613_s1 + $0x88] sm:$0xff]   ;;  %v460_v14 = vld [vmem:[%s613_s1 + $0x70] sm:$0xff]  }
   0x6   :  { %441 = vmatpush3.bf16.msra.mxu1 %v462_v9  ;;  %v468_v15 = vld [vmem:[%s614_s0 + $0x4] ss:$12 sps:$4 sm:$0xff]   ;;  %v469_v16 = vld [vmem:[%s614_s0 + $0x8] ss:$12 sps:$4 sm:$0xff]   ;;  %v470_v17 = vld [vmem:[%s614_s0 + $0x20] ss:$12 sps:$4 sm:$0xff]  }
   0x7   :  { %411 = vmatpush3.bf16.msra.mxu0 %v451_v3  ;;  %442 = vmatprep.subr.bf16.mxu1 %v465_v13  ;;  %v461_v18 = vld [vmem:[%s613_s1 + $0x30] sm:$0xff]   ;;  %v463_v19 = vld [vmem:[%s613_s1 + $0x78] sm:$0xff]   ;;  %v466_v21 = vld [vmem:[%s614_s0] ss:$12 sps:$4 sm:$0xff]  }
   0x8   :  { %412 = vmatprep.subr.bf16.mxu0 %v452_v4  ;;  %239 = vmatprep.mubr.bf16.mxu0 %v468_v15  ;;  %v464_v20 = vld [vmem:[%s613_s1 + $0x38] sm:$0xff]  }
   0x9   :  { %444 = vmatprep.mubr.msk.bf16.mxu1 %vm200_vm0, %v469_v16  ;;  %v471_v22 = vld [vmem:[%s614_s0 + $0x1c] ss:$12 sps:$4 sm:$0xff]   ;;  %v473_v23 = vld [vmem:[%s614_s0 + $0x18] ss:$12 sps:$4 sm:$0xff]  }
   0xa   :  { %443 = vmatpush3.bf16.msra.mxu1 %v465_v13 }
   0xb   :  { %413 = vmatpush3.bf16.msra.mxu0 %v453_v5 }
   0xc   :  { %414 = vmatprep.subr.bf16.mxu0 %v454_v6 }
   0xd   :  { %445 = vmatmul.mubr.msk.bf16.vlgmr.msra.gmra.mrb[0].mxu1 %vm200_vm0, %v470_v17  ;;  %v351_v17 = vlaneseq }
   0xf   :  { %415 = vmatpush3.bf16.msra.mxu0 %v455_v7 }
  0x10   :  { %416 = vmatprep.subr.bf16.mxu0 %v456_v8 }
  0x13   :  { %417 = vmatpush3.bf16.msra.mxu0 %v457_v10 }
  0x14   :  { %418 = vmatprep.subr.bf16.mxu0 %v458_v11 }
  0x17   :  { %419 = vmatpush3.bf16.msra.mxu0 %v459_v12 }
  0x18   :  { %420 = vmatprep.subr.bf16.mxu0 %v460_v14 }
  0x1b   :  { %421 = vmatpush3.bf16.msra.mxu0 %v461_v18  ;;  %v352_v18 = vshrl.u32 %v351_v17, 7 }
  0x1c   :  { %422 = vmatprep.subr.bf16.mxu0 %v463_v19  ;;  %v343_v19 = vld [vmem:[%s615_s2] sm:$0x1] }
  0x1f   :  { %423 = vmatpush3.bf16.msra.mxu0 %v464_v20  ;;  %v353_v20 = vsub.s32 0, %v352_v18 }
  0x22   :  { %240 = vmatmul.mubr.bf16.vlgmr.msra.gmra.mrb[0].mxu0 %v466_v21 }
  0x23   :  { %247 = vmatprep.mubr.bf16.mxu0 %v471_v22 }
  0x2a   :  { %248 = vmatmul.mubr.bf16.gmra.mrb[4].mxu0 %v473_v23  ;;  %v347_v23 = vld [vmem:[%s616_s3] sm:$0x1] }
  0xe0   :  { %v446_v24 = vpop.f32.mrb[0].mxu1 }
  0xe1   :  { %v290_v25 = vpop.f32.mrb[1].mxu1 }
  0xe2   :  { %v447_v26 = vpop.f32.mrb[2].mxu1 }
  0xe3   :  { %v293_v27 = vpop.f32.mrb[3].mxu1 }
  0xf5   :  { %v424_v28 = vpop.f32.mrb[0].mxu0 }
  0xf6   :  { %v425_v29 = vpop.f32.mrb[1].mxu0 }
  0xf7   :  { %v426_v30 = vadd.f32 %v425_v29, %v424_v28  ;;  %v427_v31 = vpop.f32.mrb[2].mxu0 }
  0xf8   :  { %v428_v32 = vpop.f32.mrb[3].mxu0 }
  0xf9   :  { %v429_v33 = vadd.f32 %v428_v32, %v427_v31  ;;  %v573_v34 = vadd.f32 %v426_v30, %v290_v25 }
  0xfb   :  { %v575_v35 = vadd.f32 %v429_v33, %v293_v27  ;;  %v306_v42 = vsel %vm305_vm1, %v573_v34, 0.0 }
  0xfd   :  { %v430_v36 = vpop.f32.mrb[4].mxu0  ;;  %v307_v38 = vsel %vm305_vm1, %v575_v35, 0.0 }
  0xfe   :  { %v431_v37 = vpop.f32.mrb[5].mxu0  ;;  %v308_v45 = vadd.f32 %v307_v38, %v306_v42 }
  0xff   :  { %v432_v39 = vadd.f32 %v431_v37, %v430_v36  ;;  %v433_v40 = vpop.f32.mrb[6].mxu0 }
 0x100   :  { %v434_v41 = vpop.f32.mrb[7].mxu0 }
 0x101   :  { %v299_v43 = vadd.f32 %v446_v24, %v432_v39  ;;  %v435_v44 = vadd.f32 %v434_v41, %v433_v40 }
 0x103   :  { %v309_v46 = vsel %vm305_vm1, %v299_v43, 0.0  ;;  %v302_v47 = vadd.f32 %v447_v26, %v435_v44 }
 0x104   :  { %v310_v48 = vadd.f32 %v309_v46, %v308_v45 }
 0x105   :  { %v311_v49 = vsel %vm305_vm1, %v302_v47, 0.0 }
 0x106   :  { %v312_v50 = vadd.f32 %v311_v49, %v310_v48 }
 0x108   :  { %v313_v51 = vrot.slane %v312_v50, 4 }
 0x10a   :  { %v314_v52 = vadd.f32 %v313_v51, %v312_v50 }
 0x10c   :  { %v315_v53 = vrot.slane %v314_v52, 2 }
 0x10e   :  { %v316_v54 = vadd.f32 %v315_v53, %v314_v52 }
 0x110   :  { %v317_v55 = vrot.slane %v316_v54, 1 }
 0x112   :  { %v318_v56 = vadd.f32 %v317_v55, %v316_v54 }
 0x114   :  { %v320_v57 = vmul.f32 0.03125, %v318_v56 }
 0x116   :  { %v321_v58 = vsub.f32 %v573_v34, %v320_v57  ;;  %v322_v59 = vsub.f32 %v575_v35, %v320_v57  ;;  %v323_v60 = vsub.f32 %v299_v43, %v320_v57  ;;  %v324_v61 = vsub.f32 %v302_v47, %v320_v57 }
 0x118   :  { %v325_v62 = vmul.f32 %v321_v58, %v321_v58  ;;  %v326_v63 = vmul.f32 %v322_v59, %v322_v59  ;;  %v327_v0 = vmul.f32 %v323_v60, %v323_v60  ;;  %v328_v1 = vmul.f32 %v324_v61, %v324_v61 }
 0x11a   :  { %v329_v2 = vsel %vm305_vm1, %v325_v62, 0.0  ;;  %v330_v3 = vsel %vm305_vm1, %v326_v63, 0.0  ;;  %v332_v5 = vsel %vm305_vm1, %v327_v0, 0.0  ;;  %v334_v7 = vsel %vm305_vm1, %v328_v1, 0.0 }
 0x11b   :  { %v331_v4 = vadd.f32 %v330_v3, %v329_v2 }
 0x11d   :  { %v333_v6 = vadd.f32 %v332_v5, %v331_v4 }
 0x11f   :  { %v335_v8 = vadd.f32 %v334_v7, %v333_v6 }
 0x121   :  { %v336_v9 = vrot.slane %v335_v8, 4 }
 0x123   :  { %v337_v10 = vadd.f32 %v336_v9, %v335_v8 }
 0x125   :  { %v338_v11 = vrot.slane %v337_v10, 2 }
 0x127   :  { %v339_v12 = vadd.f32 %v338_v11, %v337_v10 }
 0x129   :  { %v340_v13 = vrot.slane %v339_v12, 1 }
 0x12b   :  { %v341_v14 = vadd.f32 %v340_v13, %v339_v12 }
 0x12d   :  { %v342_v15 = vmul.f32 0.03125, %v341_v14 }
 0x12f   :  { %v344_v16 = vadd.f32 1e-05, %v342_v15 }
 0x131   :  { %474 = vrsqrt.f32 %v344_v16 }
 0x13b   :  { %v475_v21 = vpop.eup %474 }
 0x13c   :  { %v346_v22 = vmul.f32 %v475_v21, %v343_v19 }
 0x13e   :  { %v348_v24 = vmul.f32 %v346_v22, %v320_v57  ;;  %v354_v25 = vrot.slane %v346_v22, %v353_v20 }
 0x140   :  { %v349_v26 = vsub.f32 %v347_v23, %v348_v24  ;;  %v358_v27 = vmul.f32 %v354_v25, %v299_v43  ;;  %v359_v28 = vmul.f32 %v354_v25, %v302_v47  ;;  %v356_v29 = vmul.f32 %v354_v25, %v573_v34 }
 0x141   :  { %v357_v30 = vmul.f32 %v354_v25, %v575_v35 }
 0x142   :  { %v364_v31 = vrot.slane %v349_v26, %v353_v20 }
 0x144   :  { %v366_v32 = vadd.f32 %v364_v31, %v356_v29  ;;  %v367_v33 = vadd.f32 %v364_v31, %v357_v30  ;;  %v368_v36 = vadd.f32 %v364_v31, %v358_v27  ;;  %v369_v37 = vadd.f32 %v364_v31, %v359_v28 }
 0x146   :  { %v370_v38 = vmax.f32 %v366_v32, 0.0  ;;  %v371_v39 = vmax.f32 %v367_v33, 0.0  ;;  %v372_v40 = vmax.f32 %v368_v36, 0.0  ;;  %v373_v41 = vmax.f32 %v369_v37, 0.0 }
 0x148   :  { %374 = vst.msk [vmem:[%s617_s4] sm:$0xff] %vm305_vm1, %v370_v38  ;;  %375 = vst.msk [vmem:[%s617_s4 + $0x8] sm:$0xff] %vm305_vm1, %v371_v39 }
 0x149   :  { %376 = vst.msk [vmem:[%s617_s4 + $0x10] sm:$0xff] %vm305_vm1, %v372_v40  ;;  %377 = vst.msk [vmem:[%s617_s4 + $0x18] sm:$0xff] %vm305_vm1, %v373_v41 }

// kernel: resnet_generator.14
= control target key start
LH: loop header
LB: loop body
LE: loop exit
PB: predicated region body
PF: predicated region fallthrough
CT: control target
= control target key end

     0   :  { %vm371_vm0 = vcmask 523264   ;;  %s991_s1 = inlined_call_operand.vmem [shape: bf16[576,64], index: 1, kind: input, shape index: {}]   ;;  %s992_s0 = inlined_call_operand.vmem [shape: bf16[32,576], index: 0, kind: input, shape index: {}]   ;;  %s993_s2 = inlined_call_operand.vmem [shape: f32[1,64], index: 2, kind: input, shape index: {}]   ;;  %s994_s3 = inlined_call_operand.vmem [shape: f32[1,64], index: 3, kind: input, shape index: {}]   ;;  %s995_s4 = inlined_call_operand.vmem [shape: f32[32,64], index: 4, kind: input, shape index: {}]   ;;  %s996_s5 = inlined_call_operand.vmem [shape: f32[32,64], index: 5, kind: output, shape index: {}]  }
   0x1   :  { %v727_v0 = vld [vmem:[%s991_s1 + $0x40] sm:$0xff]   ;;  %v731_v4 = vld [vmem:[%s991_s1 + $0x48] sm:$0xff]   ;;  %v735_v8 = vld [vmem:[%s991_s1 + $0x50] sm:$0xff]  }
   0x2   :  { %v728_v1 = vld [vmem:[%s991_s1 + $0xc0] sm:$0xff]   ;;  %653 = vmatprep.subr.bf16.mxu0 %v727_v0  ;;  %v732_v5 = vld [vmem:[%s991_s1 + $0xc8] sm:$0xff]   ;;  %v736_v9 = vld [vmem:[%s991_s1 + $0xd0] sm:$0xff]  }
   0x3   :  { %v729_v2 = vld [vmem:[%s991_s1] sm:$0xff]   ;;  %681 = vmatprep.subr.bf16.mxu1 %v728_v1  ;;  %v733_v6 = vld [vmem:[%s991_s1 + $0x8] sm:$0xff]   ;;  %v737_v10 = vld [vmem:[%s991_s1 + $0x10] sm:$0xff]  }
   0x4   :  { %v730_v3 = vld [vmem:[%s991_s1 + $0x80] sm:$0xff]   ;;  %654 = vmatpush3.bf16.msra.mxu0 %v729_v2  ;;  %v734_v7 = vld [vmem:[%s991_s1 + $0x88] sm:$0xff]   ;;  %v738_v11 = vld [vmem:[%s991_s1 + $0x90] sm:$0xff]  }
   0x5   :  { %682 = vmatpush3.bf16.msra.mxu1 %v730_v3  ;;  %655 = vmatprep.subr.bf16.mxu0 %v731_v4  ;;  %v739_v12 = vld [vmem:[%s991_s1 + $0x58] sm:$0xff]   ;;  %v743_v16 = vld [vmem:[%s991_s1 + $0x60] sm:$0xff]   ;;  %v747_v20 = vld [vmem:[%s991_s1 + $0x68] sm:$0xff]  }
   0x6   :  { %683 = vmatprep.subr.bf16.mxu1 %v732_v5  ;;  %v740_v13 = vld [vmem:[%s991_s1 + $0xd8] sm:$0xff]   ;;  %v744_v17 = vld [vmem:[%s991_s1 + $0xe0] sm:$0xff]   ;;  %v748_v21 = vld [vmem:[%s991_s1 + $0xe8] sm:$0xff]  }
   0x7   :  { %v741_v14 = vld [vmem:[%s991_s1 + $0x18] sm:$0xff]   ;;  %v745_v18 = vld [vmem:[%s991_s1 + $0x20] sm:$0xff]   ;;  %v749_v22 = vld [vmem:[%s991_s1 + $0x28] sm:$0xff]  }
   0x8   :  { %656 = vmatpush3.bf16.msra.mxu0 %v733_v6  ;;  %v742_v15 = vld [vmem:[%s991_s1 + $0x98] sm:$0xff]   ;;  %v746_v19 = vld [vmem:[%s991_s1 + $0xa0] sm:$0xff]   ;;  %v750_v23 = vld [vmem:[%s991_s1 + $0xa8] sm:$0xff]  }
   0x9   :  { %684 = vmatpush3.bf16.msra.mxu1 %v734_v7  ;;  %657 = vmatprep.subr.bf16.mxu0 %v735_v8  ;;  %v751_v24 = vld [vmem:[%s991_s1 + $0x70] sm:$0xff]   ;;  %v755_v28 = vld [vmem:[%s991_s1 + $0x78] sm:$0xff]   ;;  %v764_v35 = vld [vmem:[%s992_s0 + $0xc] ss:$20 sps:$4 sm:$0xff]  }
   0xa   :  { %685 = vmatprep.subr.bf16.mxu1 %v736_v9  ;;  %v752_v25 = vld [vmem:[%s991_s1 + $0xf0] sm:$0xff]   ;;  %v756_v29 = vld [vmem:[%s991_s1 + $0xf8] sm:$0xff]   ;;  %v765_v36 = vld [vmem:[%s991_s1 + $0x100] sm:$0xff]   ;;  %459 = vmatprep.mubr.bf16.mxu1 %v764_v35 }
   0xb   :  { %v753_v26 = vld [vmem:[%s991_s1 + $0x30] sm:$0xff]   ;;  %v757_v30 = vld [vmem:[%s991_s1 + $0x38] sm:$0xff]   ;;  %v766_v37 = vld [vmem:[%s991_s1 + $0x108] sm:$0xff]  }
   0xc   :  { %658 = vmatpush3.bf16.msra.mxu0 %v737_v10  ;;  %v754_v27 = vld [vmem:[%s991_s1 + $0xb0] sm:$0xff]   ;;  %v758_v31 = vld [vmem:[%s991_s1 + $0xb8] sm:$0xff]   ;;  %v767_v38 = vld [vmem:[%s992_s0 + $0x2c] ss:$20 sps:$4 sm:$0xff]  }
   0xd   :  { %686 = vmatpush3.bf16.msra.mxu1 %v738_v11  ;;  %659 = vmatprep.subr.bf16.mxu0 %v739_v12  ;;  %v759_v32 = vld [vmem:[%s992_s0] ss:$20 sps:$4 sm:$0xff]   ;;  %v761_v33 = vld [vmem:[%s992_s0 + $0x4] ss:$20 sps:$4 sm:$0xff]   ;;  %v762_v34 = vld [vmem:[%s992_s0 + $0x8] ss:$20 sps:$4 sm:$0xff]  }
   0xe   :  { %687 = vmatprep.subr.bf16.mxu1 %v740_v13  ;;  %410 = vmatprep.mubr.bf16.mxu0 %v761_v33  ;;  %v769_v39 = vld [vmem:[%s992_s0 + $0x34] ss:$20 sps:$4 sm:$0xff]   ;;  %v772_v42 = vld [vmem:[%s992_s0 + $0x30] ss:$20 sps:$4 sm:$0xff]   ;;  %v774_v44 = vld [vmem:[%s991_s1 + $0x118] sm:$0xff]  }
   0xf   :  { %v771_v40 = vld [vmem:[%s992_s0 + $0x28] ss:$20 sps:$4 sm:$0xff]   ;;  %v773_v41 = vld [vmem:[%s991_s1 + $0x110] sm:$0xff]   ;;  %v776_v45 = vld [vmem:[%s992_s0 + $0x38] ss:$20 sps:$4 sm:$0xff]  }
  0x10   :  { %660 = vmatpush3.bf16.msra.mxu0 %v741_v14  ;;  %v775_v43 = vld [vmem:[%s992_s0 + $0x10] ss:$20 sps:$4 sm:$0xff]  }
  0x11   :  { %688 = vmatpush3.bf16.msra.mxu1 %v742_v15  ;;  %661 = vmatprep.subr.bf16.mxu0 %v743_v16 }
  0x12   :  { %689 = vmatprep.subr.bf16.mxu1 %v744_v17 }
  0x14   :  { %662 = vmatpush3.bf16.msra.mxu0 %v745_v18 }
  0x15   :  { %690 = vmatpush3.bf16.msra.mxu1 %v746_v19  ;;  %663 = vmatprep.subr.bf16.mxu0 %v747_v20 }
  0x16   :  { %691 = vmatprep.subr.bf16.mxu1 %v748_v21 }
  0x18   :  { %664 = vmatpush3.bf16.msra.mxu0 %v749_v22 }
  0x19   :  { %692 = vmatpush3.bf16.msra.mxu1 %v750_v23  ;;  %665 = vmatprep.subr.bf16.mxu0 %v751_v24 }
  0x1a   :  { %693 = vmatprep.subr.bf16.mxu1 %v752_v25 }
  0x1c   :  { %666 = vmatpush3.bf16.msra.mxu0 %v753_v26 }
  0x1d   :  { %694 = vmatpush3.bf16.msra.mxu1 %v754_v27  ;;  %667 = vmatprep.subr.bf16.mxu0 %v755_v28 }
  0x1e   :  { %695 = vmatprep.subr.bf16.mxu1 %v756_v29 }
  0x20   :  { %668 = vmatpush3.bf16.msra.mxu0 %v757_v30 }
  0x21   :  { %696 = vmatpush3.bf16.msra.mxu1 %v758_v31  ;;  %715 = vmatprep.subr.bf16.mxu0 %v765_v36 }
  0x23   :  { %411 = vmatmul.mubr.bf16.vlgmr.msra.gmra.mrb[0].mxu0 %v759_v32 }
  0x24   :  { %460 = vmatmul.mubr.bf16.vlgmr.msra.gmra.mrb[0].mxu1 %v762_v34  ;;  %716 = vmatpush3.bf16.msra.mxu0 %v765_v36 }
  0x25   :  { %717 = vmatprep.subr.bf16.mxu0 %v766_v37  ;;  %418 = vmatprep.mubr.bf16.mxu0 %v767_v38 }
  0x26   :  { %467 = vmatprep.mubr.bf16.mxu1 %v769_v39 }
  0x28   :  { %718 = vmatpush3.bf16.msra.mxu0 %v766_v37 }
  0x29   :  { %719 = vmatprep.subr.bf16.mxu0 %v773_v41 }
  0x2b   :  { %419 = vmatmul.mubr.bf16.gmra.mrb[4].mxu0 %v771_v40 }
  0x2c   :  { %468 = vmatmul.mubr.bf16.gmra.mrb[4].mxu1 %v772_v42  ;;  %723 = vmatprep.mubr.msk.bf16.mxu0 %vm371_vm0, %v775_v43 }
  0x2d   :  { %720 = vmatpush3.bf16.msra.mxu0 %v773_v41 }
  0x2e   :  { %721 = vmatprep.subr.bf16.mxu0 %v774_v44 }
  0x31   :  { %722 = vmatpush3.bf16.msra.mxu0 %v774_v44 }
  0x34   :  { %724 = vmatmul.mubr.msk.bf16.vlgmr.msra.gmra.mrb[8].mxu0 %vm371_vm0, %v776_v45 }
  0xf6   :  { %v669_v46 = vpop.f32.mrb[0].mxu0 }
  0xf7   :  { %v697_v47 = vpop.f32.mrb[0].mxu1  ;;  %v670_v48 = vpop.f32.mrb[1].mxu0 }
  0xf8   :  { %v671_v49 = vadd.f32 %v670_v48, %v669_v46  ;;  %v698_v50 = vpop.f32.mrb[1].mxu1  ;;  %v672_v51 = vpop.f32.mrb[2].mxu0 }
  0xf9   :  { %v699_v52 = vadd.f32 %v698_v50, %v697_v47  ;;  %v700_v53 = vpop.f32.mrb[2].mxu1  ;;  %v673_v54 = vpop.f32.mrb[3].mxu0 }
  0xfa   :  { %v674_v55 = vadd.f32 %v673_v54, %v672_v51  ;;  %v701_v56 = vpop.f32.mrb[3].mxu1 }
  0xfb   :  { %v702_v57 = vadd.f32 %v701_v56, %v700_v53  ;;  %v462_v58 = vadd.f32 %v699_v52, %v671_v49 }
  0xfd   :  { %v465_v59 = vadd.f32 %v702_v57, %v674_v55  ;;  %v570_v55 = vlaneseq  ;;  %v562_v57 = vld [vmem:[%s993_s2] sm:$0x1] }
  0xfe   :  { %v675_v60 = vpop.f32.mrb[4].mxu0 }
  0xff   :  { %v703_v61 = vpop.f32.mrb[4].mxu1  ;;  %v676_v62 = vpop.f32.mrb[5].mxu0  ;;  %v571_v56 = vshrl.u32 %v570_v55, 7 }
 0x100   :  { %v677_v63 = vadd.f32 %v676_v62, %v675_v60  ;;  %v704_v0 = vpop.f32.mrb[5].mxu1  ;;  %v678_v1 = vpop.f32.mrb[6].mxu0 }
 0x101   :  { %v705_v2 = vadd.f32 %v704_v0, %v703_v61  ;;  %v706_v3 = vpop.f32.mrb[6].mxu1  ;;  %v679_v4 = vpop.f32.mrb[7].mxu0  ;;  %v566_v61 = vld [vmem:[%s994_s3] sm:$0x1] }
 0x102   :  { %v680_v5 = vadd.f32 %v679_v4, %v678_v1  ;;  %v707_v6 = vpop.f32.mrb[7].mxu1 }
 0x103   :  { %v708_v7 = vadd.f32 %v707_v6, %v706_v3  ;;  %v470_v8 = vadd.f32 %v705_v2, %v677_v63  ;;  %v589_v6 = vld [vmem:[%s995_s4] sm:$0xff] }
 0x105   :  { %v473_v9 = vadd.f32 %v708_v7, %v680_v5  ;;  %v590_v7 = vld [vmem:[%s995_s4 + $0x8] sm:$0xff] }
 0x107   :  { %v725_v10 = vpop.f32.mrb[8].mxu0 }
 0x108   :  { %v519_v11 = vadd.f32 %v725_v10, %v470_v8  ;;  %v510_v12 = vpop.f32.mrb[9].mxu0  ;;  %v591_v8 = vld [vmem:[%s995_s4 + $0x10] sm:$0xff] }
 0x109   :  { %v511_v13 = vadd.f32 %v510_v12, %v462_v58  ;;  %v726_v14 = vpop.f32.mrb[10].mxu0  ;;  %v572_v58 = vsub.s32 0, %v571_v56 }
 0x10a   :  { %v522_v15 = vadd.f32 %v726_v14, %v473_v9  ;;  %v513_v16 = vpop.f32.mrb[11].mxu0  ;;  %v528_v21 = vsel %vm371_vm0, %v519_v11, 0.0  ;;  %v592_v9 = vld [vmem:[%s995_s4 + $0x18] sm:$0xff] }
 0x10b   :  { %v514_v17 = vadd.f32 %v513_v16, %v465_v59  ;;  %v525_v18 = vsel %vm371_vm0, %v511_v13, 0.0 }
 0x10c   :  { %v530_v23 = vsel %vm371_vm0, %v522_v15, 0.0 }
 0x10d   :  { %v526_v19 = vsel %vm371_vm0, %v514_v17, 0.0 }
 0x10e   :  { %v527_v20 = vadd.f32 %v526_v19, %v525_v18 }
 0x110   :  { %v529_v22 = vadd.f32 %v528_v21, %v527_v20 }
 0x112   :  { %v531_v24 = vadd.f32 %v530_v23, %v529_v22 }
 0x114   :  { %v532_v25 = vrot.slane %v531_v24, 4 }
 0x116   :  { %v533_v26 = vadd.f32 %v532_v25, %v531_v24 }
 0x118   :  { %v534_v27 = vrot.slane %v533_v26, 2 }
 0x11a   :  { %v535_v28 = vadd.f32 %v534_v27, %v533_v26 }
 0x11c   :  { %v536_v29 = vrot.slane %v535_v28, 1 }
 0x11e   :  { %v537_v30 = vadd.f32 %v536_v29, %v535_v28 }
 0x120   :  { %v539_v31 = vmul.f32 0.03125, %v537_v30 }
 0x122   :  { %v540_v32 = vsub.f32 %v511_v13, %v539_v31  ;;  %v541_v33 = vsub.f32 %v514_v17, %v539_v31  ;;  %v542_v34 = vsub.f32 %v519_v11, %v539_v31  ;;  %v543_v35 = vsub.f32 %v522_v15, %v539_v31 }
 0x124   :  { %v544_v36 = vmul.f32 %v540_v32, %v540_v32  ;;  %v545_v37 = vmul.f32 %v541_v33, %v541_v33  ;;  %v546_v38 = vmul.f32 %v542_v34, %v542_v34  ;;  %v547_v39 = vmul.f32 %v543_v35, %v543_v35 }
 0x126   :  { %v548_v40 = vsel %vm371_vm0, %v544_v36, 0.0  ;;  %v549_v41 = vsel %vm371_vm0, %v545_v37, 0.0  ;;  %v551_v43 = vsel %vm371_vm0, %v546_v38, 0.0  ;;  %v553_v45 = vsel %vm371_vm0, %v547_v39, 0.0 }
 0x127   :  { %v550_v42 = vadd.f32 %v549_v41, %v548_v40 }
 0x129   :  { %v552_v44 = vadd.f32 %v551_v43, %v550_v42 }
 0x12b   :  { %v554_v46 = vadd.f32 %v553_v45, %v552_v44 }
 0x12d   :  { %v555_v47 = vrot.slane %v554_v46, 4 }
 0x12f   :  { %v556_v48 = vadd.f32 %v555_v47, %v554_v46 }
 0x131   :  { %v557_v49 = vrot.slane %v556_v48, 2 }
 0x133   :  { %v558_v50 = vadd.f32 %v557_v49, %v556_v48 }
 0x135   :  { %v559_v51 = vrot.slane %v558_v50, 1 }
 0x137   :  { %v560_v52 = vadd.f32 %v559_v51, %v558_v50 }
 0x139   :  { %v561_v53 = vmul.f32 0.03125, %v560_v52 }
 0x13b   :  { %v563_v54 = vadd.f32 1e-05, %v561_v53 }
 0x13d   :  { %777 = vrsqrt.f32 %v563_v54 }
 0x147   :  { %v778_v59 = vpop.eup %777 }
 0x148   :  { %v565_v60 = vmul.f32 %v778_v59, %v562_v57 }
 0x14a   :  { %v567_v62 = vmul.f32 %v565_v60, %v539_v31  ;;  %v573_v63 = vrot.slane %v565_v60, %v572_v58 }
 0x14c   :  { %v568_v0 = vsub.f32 %v566_v61, %v567_v62  ;;  %v576_v1 = vmul.f32 %v573_v63, %v514_v17  ;;  %v577_v2 = vmul.f32 %v573_v63, %v519_v11  ;;  %v578_v3 = vmul.f32 %v573_v63, %v522_v15 }
 0x14d   :  { %v575_v4 = vmul.f32 %v573_v63, %v511_v13 }
 0x14e   :  { %v583_v5 = vrot.slane %v568_v0, %v572_v58 }
 0x150   :  { %v585_v10 = vadd.f32 %v583_v5, %v575_v4  ;;  %v586_v11 = vadd.f32 %v583_v5, %v576_v1  ;;  %v587_v12 = vadd.f32 %v583_v5, %v577_v2  ;;  %v588_v13 = vadd.f32 %v583_v5, %v578_v3 }
 0x152   :  { %v593_v14 = vadd.f32 %v589_v6, %v585_v10  ;;  %v594_v15 = vadd.f32 %v590_v7, %v586_v11  ;;  %v595_v16 = vadd.f32 %v591_v8, %v587_v12  ;;  %v596_v17 = vadd.f32 %v592_v9, %v588_v13 }
 0x154   :  { %597 = vst.msk [vmem:[%s996_s5] sm:$0xff] %vm371_vm0, %v593_v14  ;;  %598 = vst.msk [vmem:[%s996_s5 + $0x8] sm:$0xff] %vm371_vm0, %v594_v15 }
 0x155   :  { %599 = vst.msk [vmem:[%s996_s5 + $0x10] sm:$0xff] %vm371_vm0, %v595_v16  ;;  %600 = vst.msk [vmem:[%s996_s5 + $0x18] sm:$0xff] %vm371_vm0, %v596_v17 }

// kernel: resnet_generator.13
= control target key start
LH: loop header
LB: loop body
LE: loop exit
PB: predicated region body
PF: predicated region fallthrough
CT: control target
= control target key end

     0   :  { %vm368_vm0 = vcmask 523264   ;;  %s967_s1 = inlined_call_operand.vmem [shape: bf16[576,64], index: 1, kind: input, shape index: {}]   ;;  %s968_s0 = inlined_call_operand.vmem [shape: bf16[32,576], index: 0, kind: input, shape index: {}]   ;;  %s969_s2 = inlined_call_operand.vmem [shape: f32[1,64], index: 2, kind: input, shape index: {}]   ;;  %s970_s3 = inlined_call_operand.vmem [shape: f32[1,64], index: 3, kind: input, shape index: {}]   ;;  %s971_s4 = inlined_call_operand.vmem [shape: f32[32,64], index: 4, kind: output, shape index: {}]  }
   0x1   :  { %v720_v0 = vld [vmem:[%s967_s1 + $0x40] sm:$0xff]   ;;  %v724_v4 = vld [vmem:[%s967_s1 + $0x48] sm:$0xff]   ;;  %v728_v8 = vld [vmem:[%s967_s1 + $0x50] sm:$0xff]  }
   0x2   :  { %v721_v1 = vld [vmem:[%s967_s1 + $0xc0] sm:$0xff]   ;;  %646 = vmatprep.subr.bf16.mxu0 %v720_v0  ;;  %v725_v5 = vld [vmem:[%s967_s1 + $0xc8] sm:$0xff]   ;;  %v729_v9 = vld [vmem:[%s967_s1 + $0xd0] sm:$0xff]  }
   0x3   :  { %v722_v2 = vld [vmem:[%s967_s1] sm:$0xff]   ;;  %674 = vmatprep.subr.bf16.mxu1 %v721_v1  ;;  %v726_v6 = vld [vmem:[%s967_s1 + $0x8] sm:$0xff]   ;;  %v730_v10 = vld [vmem:[%s967_s1 + $0x10] sm:$0xff]  }
   0x4   :  { %v723_v3 = vld [vmem:[%s967_s1 + $0x80] sm:$0xff]   ;;  %647 = vmatpush3.bf16.msra.mxu0 %v722_v2  ;;  %v727_v7 = vld [vmem:[%s967_s1 + $0x88] sm:$0xff]   ;;  %v731_v11 = vld [vmem:[%s967_s1 + $0x90] sm:$0xff]  }
   0x5   :  { %675 = vmatpush3.bf16.msra.mxu1 %v723_v3  ;;  %648 = vmatprep.subr.bf16.mxu0 %v724_v4  ;;  %v732_v12 = vld [vmem:[%s967_s1 + $0x58] sm:$0xff]   ;;  %v736_v16 = vld [vmem:[%s967_s1 + $0x60] sm:$0xff]   ;;  %v740_v20 = vld [vmem:[%s967_s1 + $0x68] sm:$0xff]  }
   0x6   :  { %676 = vmatprep.subr.bf16.mxu1 %v725_v5  ;;  %v733_v13 = vld [vmem:[%s967_s1 + $0xd8] sm:$0xff]   ;;  %v737_v17 = vld [vmem:[%s967_s1 + $0xe0] sm:$0xff]   ;;  %v741_v21 = vld [vmem:[%s967_s1 + $0xe8] sm:$0xff]  }
   0x7   :  { %v734_v14 = vld [vmem:[%s967_s1 + $0x18] sm:$0xff]   ;;  %v738_v18 = vld [vmem:[%s967_s1 + $0x20] sm:$0xff]   ;;  %v742_v22 = vld [vmem:[%s967_s1 + $0x28] sm:$0xff]  }
   0x8   :  { %649 = vmatpush3.bf16.msra.mxu0 %v726_v6  ;;  %v735_v15 = vld [vmem:[%s967_s1 + $0x98] sm:$0xff]   ;;  %v739_v19 = vld [vmem:[%s967_s1 + $0xa0] sm:$0xff]   ;;  %v743_v23 = vld [vmem:[%s967_s1 + $0xa8] sm:$0xff]  }
   0x9   :  { %677 = vmatpush3.bf16.msra.mxu1 %v727_v7  ;;  %650 = vmatprep.subr.bf16.mxu0 %v728_v8  ;;  %v744_v24 = vld [vmem:[%s967_s1 + $0x70] sm:$0xff]   ;;  %v748_v28 = vld [vmem:[%s967_s1 + $0x78] sm:$0xff]   ;;  %v757_v35 = vld [vmem:[%s968_s0 + $0xc] ss:$20 sps:$4 sm:$0xff]  }
   0xa   :  { %678 = vmatprep.subr.bf16.mxu1 %v729_v9  ;;  %v745_v25 = vld [vmem:[%s967_s1 + $0xf0] sm:$0xff]   ;;  %v749_v29 = vld [vmem:[%s967_s1 + $0xf8] sm:$0xff]   ;;  %v758_v36 = vld [vmem:[%s967_s1 + $0x100] sm:$0xff]   ;;  %456 = vmatprep.mubr.bf16.mxu1 %v757_v35 }
   0xb   :  { %v746_v26 = vld [vmem:[%s967_s1 + $0x30] sm:$0xff]   ;;  %v750_v30 = vld [vmem:[%s967_s1 + $0x38] sm:$0xff]   ;;  %v759_v37 = vld [vmem:[%s967_s1 + $0x108] sm:$0xff]  }
   0xc   :  { %651 = vmatpush3.bf16.msra.mxu0 %v730_v10  ;;  %v747_v27 = vld [vmem:[%s967_s1 + $0xb0] sm:$0xff]   ;;  %v751_v31 = vld [vmem:[%s967_s1 + $0xb8] sm:$0xff]   ;;  %v760_v38 = vld [vmem:[%s968_s0 + $0x2c] ss:$20 sps:$4 sm:$0xff]  }
   0xd   :  { %679 = vmatpush3.bf16.msra.mxu1 %v731_v11  ;;  %652 = vmatprep.subr.bf16.mxu0 %v732_v12  ;;  %v752_v32 = vld [vmem:[%s968_s0] ss:$20 sps:$4 sm:$0xff]   ;;  %v754_v33 = vld [vmem:[%s968_s0 + $0x4] ss:$20 sps:$4 sm:$0xff]   ;;  %v755_v34 = vld [vmem:[%s968_s0 + $0x8] ss:$20 sps:$4 sm:$0xff]  }
   0xe   :  { %680 = vmatprep.subr.bf16.mxu1 %v733_v13  ;;  %407 = vmatprep.mubr.bf16.mxu0 %v754_v33  ;;  %v762_v39 = vld [vmem:[%s968_s0 + $0x34] ss:$20 sps:$4 sm:$0xff]   ;;  %v765_v42 = vld [vmem:[%s968_s0 + $0x30] ss:$20 sps:$4 sm:$0xff]   ;;  %v767_v44 = vld [vmem:[%s967_s1 + $0x118] sm:$0xff]  }
   0xf   :  { %v764_v40 = vld [vmem:[%s968_s0 + $0x28] ss:$20 sps:$4 sm:$0xff]   ;;  %v766_v41 = vld [vmem:[%s967_s1 + $0x110] sm:$0xff]   ;;  %v769_v45 = vld [vmem:[%s968_s0 + $0x38] ss:$20 sps:$4 sm:$0xff]  }
  0x10   :  { %653 = vmatpush3.bf16.msra.mxu0 %v734_v14  ;;  %v768_v43 = vld [vmem:[%s968_s0 + $0x10] ss:$20 sps:$4 sm:$0xff]  }
  0x11   :  { %681 = vmatpush3.bf16.msra.mxu1 %v735_v15  ;;  %654 = vmatprep.subr.bf16.mxu0 %v736_v16 }
  0x12   :  { %682 = vmatprep.subr.bf16.mxu1 %v737_v17 }
  0x14   :  { %655 = vmatpush3.bf16.msra.mxu0 %v738_v18 }
  0x15   :  { %683 = vmatpush3.bf16.msra.mxu1 %v739_v19  ;;  %656 = vmatprep.subr.bf16.mxu0 %v740_v20 }
  0x16   :  { %684 = vmatprep.subr.bf16.mxu1 %v741_v21 }
  0x18   :  { %657 = vmatpush3.bf16.msra.mxu0 %v742_v22 }
  0x19   :  { %685 = vmatpush3.bf16.msra.mxu1 %v743_v23  ;;  %658 = vmatprep.subr.bf16.mxu0 %v744_v24 }
  0x1a   :  { %686 = vmatprep.subr.bf16.mxu1 %v745_v25 }
  0x1c   :  { %659 = vmatpush3.bf16.msra.mxu0 %v746_v26 }
  0x1d   :  { %687 = vmatpush3.bf16.msra.mxu1 %v747_v27  ;;  %660 = vmatprep.subr.bf16.mxu0 %v748_v28 }
  0x1e   :  { %688 = vmatprep.subr.bf16.mxu1 %v749_v29 }
  0x20   :  { %661 = vmatpush3.bf16.msra.mxu0 %v750_v30 }
  0x21   :  { %689 = vmatpush3.bf16.msra.mxu1 %v751_v31  ;;  %708 = vmatprep.subr.bf16.mxu0 %v758_v36 }
  0x23   :  { %408 = vmatmul.mubr.bf16.vlgmr.msra.gmra.mrb[0].mxu0 %v752_v32 }
  0x24   :  { %457 = vmatmul.mubr.bf16.vlgmr.msra.gmra.mrb[0].mxu1 %v755_v34  ;;  %709 = vmatpush3.bf16.msra.mxu0 %v758_v36 }
  0x25   :  { %710 = vmatprep.subr.bf16.mxu0 %v759_v37  ;;  %415 = vmatprep.mubr.bf16.mxu0 %v760_v38 }
  0x26   :  { %464 = vmatprep.mubr.bf16.mxu1 %v762_v39 }
  0x28   :  { %711 = vmatpush3.bf16.msra.mxu0 %v759_v37 }
  0x29   :  { %712 = vmatprep.subr.bf16.mxu0 %v766_v41 }
  0x2b   :  { %416 = vmatmul.mubr.bf16.gmra.mrb[4].mxu0 %v764_v40 }
  0x2c   :  { %465 = vmatmul.mubr.bf16.gmra.mrb[4].mxu1 %v765_v42  ;;  %716 = vmatprep.mubr.msk.bf16.mxu0 %vm368_vm0, %v768_v43 }
  0x2d   :  { %713 = vmatpush3.bf16.msra.mxu0 %v766_v41 }
  0x2e   :  { %714 = vmatprep.subr.bf16.mxu0 %v767_v44 }
  0x31   :  { %715 = vmatpush3.bf16.msra.mxu0 %v767_v44 }
  0x34   :  { %717 = vmatmul.mubr.msk.bf16.vlgmr.msra.gmra.mrb[8].mxu0 %vm368_vm0, %v769_v45 }
  0xf6   :  { %v662_v46 = vpop.f32.mrb[0].mxu0 }
  0xf7   :  { %v690_v47 = vpop.f32.mrb[0].mxu1  ;;  %v663_v48 = vpop.f32.mrb[1].mxu0 }
  0xf8   :  { %v664_v49 = vadd.f32 %v663_v48, %v662_v46  ;;  %v691_v50 = vpop.f32.mrb[1].mxu1  ;;  %v665_v51 = vpop.f32.mrb[2].mxu0 }
  0xf9   :  { %v692_v52 = vadd.f32 %v691_v50, %v690_v47  ;;  %v693_v53 = vpop.f32.mrb[2].mxu1  ;;  %v666_v54 = vpop.f32.mrb[3].mxu0 }
  0xfa   :  { %v667_v55 = vadd.f32 %v666_v54, %v665_v51  ;;  %v694_v56 = vpop.f32.mrb[3].mxu1 }
  0xfb   :  { %v695_v57 = vadd.f32 %v694_v56, %v693_v53  ;;  %v459_v58 = vadd.f32 %v692_v52, %v664_v49 }
  0xfd   :  { %v462_v59 = vadd.f32 %v695_v57, %v667_v55  ;;  %v567_v55 = vlaneseq  ;;  %v559_v57 = vld [vmem:[%s969_s2] sm:$0x1] }
  0xfe   :  { %v668_v60 = vpop.f32.mrb[4].mxu0 }
  0xff   :  { %v696_v61 = vpop.f32.mrb[4].mxu1  ;;  %v669_v62 = vpop.f32.mrb[5].mxu0  ;;  %v568_v56 = vshrl.u32 %v567_v55, 7 }
 0x100   :  { %v670_v63 = vadd.f32 %v669_v62, %v668_v60  ;;  %v697_v0 = vpop.f32.mrb[5].mxu1  ;;  %v671_v1 = vpop.f32.mrb[6].mxu0 }
 0x101   :  { %v698_v2 = vadd.f32 %v697_v0, %v696_v61  ;;  %v699_v3 = vpop.f32.mrb[6].mxu1  ;;  %v672_v4 = vpop.f32.mrb[7].mxu0  ;;  %v563_v61 = vld [vmem:[%s970_s3] sm:$0x1] }
 0x102   :  { %v673_v5 = vadd.f32 %v672_v4, %v671_v1  ;;  %v700_v6 = vpop.f32.mrb[7].mxu1 }
 0x103   :  { %v701_v7 = vadd.f32 %v700_v6, %v699_v3  ;;  %v467_v8 = vadd.f32 %v698_v2, %v670_v63 }
 0x105   :  { %v470_v9 = vadd.f32 %v701_v7, %v673_v5 }
 0x107   :  { %v718_v10 = vpop.f32.mrb[8].mxu0 }
 0x108   :  { %v516_v11 = vadd.f32 %v718_v10, %v467_v8  ;;  %v507_v12 = vpop.f32.mrb[9].mxu0 }
 0x109   :  { %v508_v13 = vadd.f32 %v507_v12, %v459_v58  ;;  %v719_v14 = vpop.f32.mrb[10].mxu0  ;;  %v569_v58 = vsub.s32 0, %v568_v56 }
 0x10a   :  { %v519_v15 = vadd.f32 %v719_v14, %v470_v9  ;;  %v510_v16 = vpop.f32.mrb[11].mxu0  ;;  %v525_v21 = vsel %vm368_vm0, %v516_v11, 0.0 }
 0x10b   :  { %v511_v17 = vadd.f32 %v510_v16, %v462_v59  ;;  %v522_v18 = vsel %vm368_vm0, %v508_v13, 0.0 }
 0x10c   :  { %v527_v23 = vsel %vm368_vm0, %v519_v15, 0.0 }
 0x10d   :  { %v523_v19 = vsel %vm368_vm0, %v511_v17, 0.0 }
 0x10e   :  { %v524_v20 = vadd.f32 %v523_v19, %v522_v18 }
 0x110   :  { %v526_v22 = vadd.f32 %v525_v21, %v524_v20 }
 0x112   :  { %v528_v24 = vadd.f32 %v527_v23, %v526_v22 }
 0x114   :  { %v529_v25 = vrot.slane %v528_v24, 4 }
 0x116   :  { %v530_v26 = vadd.f32 %v529_v25, %v528_v24 }
 0x118   :  { %v531_v27 = vrot.slane %v530_v26, 2 }
 0x11a   :  { %v532_v28 = vadd.f32 %v531_v27, %v530_v26 }
 0x11c   :  { %v533_v29 = vrot.slane %v532_v28, 1 }
 0x11e   :  { %v534_v30 = vadd.f32 %v533_v29, %v532_v28 }
 0x120   :  { %v536_v31 = vmul.f32 0.03125, %v534_v30 }
 0x122   :  { %v537_v32 = vsub.f32 %v508_v13, %v536_v31  ;;  %v538_v33 = vsub.f32 %v511_v17, %v536_v31  ;;  %v539_v34 = vsub.f32 %v516_v11, %v536_v31  ;;  %v540_v35 = vsub.f32 %v519_v15, %v536_v31 }
 0x124   :  { %v541_v36 = vmul.f32 %v537_v32, %v537_v32  ;;  %v542_v37 = vmul.f32 %v538_v33, %v538_v33  ;;  %v543_v38 = vmul.f32 %v539_v34, %v539_v34  ;;  %v544_v39 = vmul.f32 %v540_v35, %v540_v35 }
 0x126   :  { %v545_v40 = vsel %vm368_vm0, %v541_v36, 0.0  ;;  %v546_v41 = vsel %vm368_vm0, %v542_v37, 0.0  ;;  %v548_v43 = vsel %vm368_vm0, %v543_v38, 0.0  ;;  %v550_v45 = vsel %vm368_vm0, %v544_v39, 0.0 }
 0x127   :  { %v547_v42 = vadd.f32 %v546_v41, %v545_v40 }
 0x129   :  { %v549_v44 = vadd.f32 %v548_v43, %v547_v42 }
 0x12b   :  { %v551_v46 = vadd.f32 %v550_v45, %v549_v44 }
 0x12d   :  { %v552_v47 = vrot.slane %v551_v46, 4 }
 0x12f   :  { %v553_v48 = vadd.f32 %v552_v47, %v551_v46 }
 0x131   :  { %v554_v49 = vrot.slane %v553_v48, 2 }
 0x133   :  { %v555_v50 = vadd.f32 %v554_v49, %v553_v48 }
 0x135   :  { %v556_v51 = vrot.slane %v555_v50, 1 }
 0x137   :  { %v557_v52 = vadd.f32 %v556_v51, %v555_v50 }
 0x139   :  { %v558_v53 = vmul.f32 0.03125, %v557_v52 }
 0x13b   :  { %v560_v54 = vadd.f32 1e-05, %v558_v53 }
 0x13d   :  { %770 = vrsqrt.f32 %v560_v54 }
 0x147   :  { %v771_v59 = vpop.eup %770 }
 0x148   :  { %v562_v60 = vmul.f32 %v771_v59, %v559_v57 }
 0x14a   :  { %v564_v62 = vmul.f32 %v562_v60, %v536_v31  ;;  %v570_v63 = vrot.slane %v562_v60, %v569_v58 }
 0x14c   :  { %v565_v0 = vsub.f32 %v563_v61, %v564_v62  ;;  %v573_v1 = vmul.f32 %v570_v63, %v511_v17  ;;  %v574_v2 = vmul.f32 %v570_v63, %v516_v11  ;;  %v575_v3 = vmul.f32 %v570_v63, %v519_v15 }
 0x14d   :  { %v572_v4 = vmul.f32 %v570_v63, %v508_v13 }
 0x14e   :  { %v580_v5 = vrot.slane %v565_v0, %v569_v58 }
 0x150   :  { %v582_v6 = vadd.f32 %v580_v5, %v572_v4  ;;  %v583_v7 = vadd.f32 %v580_v5, %v573_v1  ;;  %v584_v8 = vadd.f32 %v580_v5, %v574_v2  ;;  %v585_v9 = vadd.f32 %v580_v5, %v575_v3 }
 0x152   :  { %v586_v10 = vmax.f32 %v582_v6, 0.0  ;;  %v587_v12 = vmax.f32 %v583_v7, 0.0  ;;  %v588_v14 = vmax.f32 %v584_v8, 0.0  ;;  %v589_v16 = vmax.f32 %v585_v9, 0.0 }
 0x154   :  { %590 = vst.msk [vmem:[%s971_s4] sm:$0xff] %vm368_vm0, %v586_v10  ;;  %591 = vst.msk [vmem:[%s971_s4 + $0x8] sm:$0xff] %vm368_vm0, %v587_v12 }
 0x155   :  { %592 = vst.msk [vmem:[%s971_s4 + $0x10] sm:$0xff] %vm368_vm0, %v588_v14  ;;  %593 = vst.msk [vmem:[%s971_s4 + $0x18] sm:$0xff] %vm368_vm0, %v589_v16 }

// kernel: resnet_generator.17
= control target key start
LH: loop header
LB: loop body
LE: loop exit
PB: predicated region body
PF: predicated region fallthrough
CT: control target
= control target key end

     0   :  { %vm554_vm0 = vcmask 523264   ;;  %vm870_vm1 = vcmask 261120   ;;  %s1903_s1 = inlined_call_operand.vmem [shape: bf16[576,32], index: 1, kind: input, shape index: {}]   ;;  %s1904_s0 = inlined_call_operand.vmem [shape: bf16[128,576], index: 0, kind: input, shape index: {}]   ;;  %s1905_s2 = inlined_call_operand.vmem [shape: f32[1,32], index: 2, kind: input, shape index: {}]   ;;  %s1906_s3 = inlined_call_operand.vmem [shape: f32[1,32], index: 3, kind: input, shape index: {}]   ;;  %s1907_s4 = inlined_call_operand.vmem [shape: f32[128,32], index: 4, kind: output, shape index: {}]  }
   0x1   :  { %v1323_v0 = vld [vmem:[%s1903_s1 + $0x40] sm:$0xff]   ;;  %v1327_v4 = vld [vmem:[%s1903_s1 + $0x48] sm:$0xff]   ;;  %v1331_v8 = vld [vmem:[%s1903_s1 + $0x50] sm:$0xff]  }
   0x2   :  { %v1324_v1 = vld [vmem:[%s1903_s1 + $0xc0] sm:$0xff]   ;;  %1151 = vmatprep.subr.bf16.mxu0 %v1323_v0  ;;  %v1328_v5 = vld [vmem:[%s1903_s1 + $0xc8] sm:$0xff]   ;;  %v1332_v9 = vld [vmem:[%s1903_s1 + $0xd0] sm:$0xff]  }
   0x3   :  { %v1325_v2 = vld [vmem:[%s1903_s1] sm:$0xff]   ;;  %1215 = vmatprep.subr.bf16.mxu1 %v1324_v1  ;;  %v1329_v6 = vld [vmem:[%s1903_s1 + $0x8] sm:$0xff]   ;;  %v1333_v10 = vld [vmem:[%s1903_s1 + $0x10] sm:$0xff]  }
   0x4   :  { %v1326_v3 = vld [vmem:[%s1903_s1 + $0x80] sm:$0xff]   ;;  %1152 = vmatpush3.bf16.msra.mxu0 %v1325_v2  ;;  %v1330_v7 = vld [vmem:[%s1903_s1 + $0x88] sm:$0xff]   ;;  %v1334_v11 = vld [vmem:[%s1903_s1 + $0x90] sm:$0xff]  }
   0x5   :  { %1216 = vmatpush3.bf16.msra.mxu1 %v1326_v3  ;;  %1153 = vmatprep.subr.bf16.mxu0 %v1327_v4  ;;  %v1335_v12 = vld [vmem:[%s1903_s1 + $0x58] sm:$0xff]   ;;  %v1339_v16 = vld [vmem:[%s1903_s1 + $0x60] sm:$0xff]   ;;  %v1343_v20 = vld [vmem:[%s1903_s1 + $0x68] sm:$0xff]  }
   0x6   :  { %1217 = vmatprep.subr.bf16.mxu1 %v1328_v5  ;;  %v1336_v13 = vld [vmem:[%s1903_s1 + $0xd8] sm:$0xff]   ;;  %v1340_v17 = vld [vmem:[%s1903_s1 + $0xe0] sm:$0xff]   ;;  %v1344_v21 = vld [vmem:[%s1903_s1 + $0xe8] sm:$0xff]  }
   0x7   :  { %v1337_v14 = vld [vmem:[%s1903_s1 + $0x18] sm:$0xff]   ;;  %v1341_v18 = vld [vmem:[%s1903_s1 + $0x20] sm:$0xff]   ;;  %v1345_v22 = vld [vmem:[%s1903_s1 + $0x28] sm:$0xff]  }
   0x8   :  { %1154 = vmatpush3.bf16.msra.mxu0 %v1329_v6  ;;  %v1338_v15 = vld [vmem:[%s1903_s1 + $0x98] sm:$0xff]   ;;  %v1342_v19 = vld [vmem:[%s1903_s1 + $0xa0] sm:$0xff]   ;;  %v1346_v23 = vld [vmem:[%s1903_s1 + $0xa8] sm:$0xff]  }
   0x9   :  { %1218 = vmatpush3.bf16.msra.mxu1 %v1330_v7  ;;  %1155 = vmatprep.subr.bf16.mxu0 %v1331_v8  ;;  %v1347_v24 = vld [vmem:[%s1903_s1 + $0x70] sm:$0xff]   ;;  %v1351_v28 = vld [vmem:[%s1903_s1 + $0x78] sm:$0xff]   ;;  %v1360_v35 = vld [vmem:[%s1904_s0 + $0xc] ss:$20 sps:$4 sm:$0xff]  }
   0xa   :  { %1219 = vmatprep.subr.bf16.mxu1 %v1332_v9  ;;  %v1348_v25 = vld [vmem:[%s1903_s1 + $0xf0] sm:$0xff]   ;;  %v1352_v29 = vld [vmem:[%s1903_s1 + $0xf8] sm:$0xff]   ;;  %v1361_v36 = vld [vmem:[%s1903_s1 + $0x100] sm:$0xff]   ;;  %708 = vmatprep.mubr.bf16.mxu1 %v1360_v35 }
   0xb   :  { %v1349_v26 = vld [vmem:[%s1903_s1 + $0x30] sm:$0xff]   ;;  %v1353_v30 = vld [vmem:[%s1903_s1 + $0x38] sm:$0xff]   ;;  %v1362_v37 = vld [vmem:[%s1904_s0 + $0x2c] ss:$20 sps:$4 sm:$0xff]  }
   0xc   :  { %1156 = vmatpush3.bf16.msra.mxu0 %v1333_v10  ;;  %v1350_v27 = vld [vmem:[%s1903_s1 + $0xb0] sm:$0xff]   ;;  %v1354_v31 = vld [vmem:[%s1903_s1 + $0xb8] sm:$0xff]   ;;  %v1374_v42 = vld [vmem:[%s1903_s1 + $0x108] sm:$0xff]  }
   0xd   :  { %1220 = vmatpush3.bf16.msra.mxu1 %v1334_v11  ;;  %1157 = vmatprep.subr.bf16.mxu0 %v1335_v12  ;;  %v1355_v32 = vld [vmem:[%s1904_s0] ss:$20 sps:$4 sm:$0xff]   ;;  %v1357_v33 = vld [vmem:[%s1904_s0 + $0x4] ss:$20 sps:$4 sm:$0xff]   ;;  %v1358_v34 = vld [vmem:[%s1904_s0 + $0x8] ss:$20 sps:$4 sm:$0xff]  }
   0xe   :  { %1221 = vmatprep.subr.bf16.mxu1 %v1336_v13  ;;  %611 = vmatprep.mubr.bf16.mxu0 %v1357_v33  ;;  %v1364_v38 = vld [vmem:[%s1904_s0 + $0x34] ss:$20 sps:$4 sm:$0xff]   ;;  %v1367_v40 = vld [vmem:[%s1904_s0 + $0x30] ss:$20 sps:$4 sm:$0xff]   ;;  %v1373_v45 = vld [vmem:[%s1904_s0 + $0x58] ss:$20 sps:$4 sm:$0xff]  }
   0xf   :  { %v1366_v39 = vld [vmem:[%s1904_s0 + $0x28] ss:$20 sps:$4 sm:$0xff]   ;;  %v1372_v44 = vld [vmem:[%s1904_s0 + $0x50] ss:$20 sps:$4 sm:$0xff]   ;;  %v1379_v50 = vld [vmem:[%s1904_s0 + $0x78] ss:$20 sps:$4 sm:$0xff]  }
  0x10   :  { %1158 = vmatpush3.bf16.msra.mxu0 %v1337_v14  ;;  %v1368_v41 = vld [vmem:[%s1904_s0 + $0x54] ss:$20 sps:$4 sm:$0xff]   ;;  %v1370_v43 = vld [vmem:[%s1904_s0 + $0x5c] ss:$20 sps:$4 sm:$0xff]   ;;  %v1377_v48 = vld [vmem:[%s1904_s0 + $0x84] ss:$20 sps:$4 sm:$0xff]  }
  0x11   :  { %1222 = vmatpush3.bf16.msra.mxu1 %v1338_v15  ;;  %1159 = vmatprep.subr.bf16.mxu0 %v1339_v16  ;;  %v1387_v46 = vld [vmem:[%s1903_s1 + $0x110] sm:$0xff]   ;;  %v1400_v49 = vld [vmem:[%s1903_s1 + $0x118] sm:$0xff]   ;;  %v1383_v53 = vld [vmem:[%s1904_s0 + $0xac] ss:$20 sps:$4 sm:$0xff]  }
  0x12   :  { %1223 = vmatprep.subr.bf16.mxu1 %v1340_v17  ;;  %v1375_v47 = vld [vmem:[%s1904_s0 + $0x7c] ss:$20 sps:$4 sm:$0xff]   ;;  %v1380_v51 = vld [vmem:[%s1904_s0 + $0x80] ss:$20 sps:$4 sm:$0xff]   ;;  %v1381_v52 = vld [vmem:[%s1904_s0 + $0xa4] ss:$20 sps:$4 sm:$0xff]  }
  0x13   :  { %v1385_v54 = vld [vmem:[%s1904_s0 + $0xa0] ss:$20 sps:$4 sm:$0xff]   ;;  %v1386_v55 = vld [vmem:[%s1904_s0 + $0xa8] ss:$20 sps:$4 sm:$0xff]   ;;  %v1393_v59 = vld [vmem:[%s1904_s0 + $0xd0] ss:$20 sps:$4 sm:$0xff]  }
  0x14   :  { %1160 = vmatpush3.bf16.msra.mxu0 %v1341_v18  ;;  %v1388_v56 = vld [vmem:[%s1904_s0 + $0xcc] ss:$20 sps:$4 sm:$0xff]   ;;  %v1390_v57 = vld [vmem:[%s1904_s0 + $0xd4] ss:$20 sps:$4 sm:$0xff]   ;;  %v1396_v61 = vld [vmem:[%s1904_s0 + $0xfc] ss:$20 sps:$4 sm:$0xff]  }
  0x15   :  { %1224 = vmatpush3.bf16.msra.mxu1 %v1342_v19  ;;  %1161 = vmatprep.subr.bf16.mxu0 %v1343_v20  ;;  %v1392_v58 = vld [vmem:[%s1904_s0 + $0xc8] ss:$20 sps:$4 sm:$0xff]   ;;  %v1398_v62 = vld [vmem:[%s1904_s0 + $0xf0] ss:$20 sps:$4 sm:$0xff]   ;;  %v1399_v63 = vld [vmem:[%s1904_s0 + $0xf8] ss:$20 sps:$4 sm:$0xff]  }
  0x16   :  { %1225 = vmatprep.subr.bf16.mxu1 %v1344_v21  ;;  %v1394_v60 = vld [vmem:[%s1904_s0 + $0xf4] ss:$20 sps:$4 sm:$0xff]   ;;  %v1401_v0 = vld [vmem:[%s1904_s0 + $0x11c] ss:$20 sps:$4 sm:$0xff]   ;;  %v1403_v1 = vld [vmem:[%s1904_s0 + $0x124] ss:$20 sps:$4 sm:$0xff]  }
  0x17   :  { %v1405_v2 = vld [vmem:[%s1904_s0 + $0x118] ss:$20 sps:$4 sm:$0xff]   ;;  %v1406_v3 = vld [vmem:[%s1904_s0 + $0x120] ss:$20 sps:$4 sm:$0xff]   ;;  %v1407_v4 = vld [vmem:[%s1904_s0 + $0x10] ss:$20 sps:$4 sm:$0xff]  }
  0x18   :  { %1162 = vmatpush3.bf16.msra.mxu0 %v1345_v22  ;;  %v1408_v5 = vld [vmem:[%s1904_s0 + $0xb0] ss:$20 sps:$4 sm:$0xff]   ;;  %v1409_v6 = vld [vmem:[%s1904_s0 + $0x38] ss:$20 sps:$4 sm:$0xff]   ;;  %v1411_v8 = vld [vmem:[%s1904_s0 + $0x60] ss:$20 sps:$4 sm:$0xff]  }
  0x19   :  { %1226 = vmatpush3.bf16.msra.mxu1 %v1346_v23  ;;  %1163 = vmatprep.subr.bf16.mxu0 %v1347_v24  ;;  %v1410_v7 = vld [vmem:[%s1904_s0 + $0xd8] ss:$20 sps:$4 sm:$0xff]   ;;  %v1412_v9 = vld [vmem:[%s1904_s0 + $0x100] ss:$20 sps:$4 sm:$0xff]   ;;  %v1413_v10 = vld [vmem:[%s1904_s0 + $0x88] ss:$20 sps:$4 sm:$0xff]  }
  0x1a   :  { %1227 = vmatprep.subr.bf16.mxu1 %v1348_v25  ;;  %v1414_v11 = vld [vmem:[%s1904_s0 + $0x128] ss:$20 sps:$4 sm:$0xff]  }
  0x1c   :  { %1164 = vmatpush3.bf16.msra.mxu0 %v1349_v26 }
  0x1d   :  { %1228 = vmatpush3.bf16.msra.mxu1 %v1350_v27  ;;  %1165 = vmatprep.subr.bf16.mxu0 %v1351_v28 }
  0x1e   :  { %1229 = vmatprep.subr.bf16.mxu1 %v1352_v29 }
  0x20   :  { %1166 = vmatpush3.bf16.msra.mxu0 %v1353_v30 }
  0x21   :  { %1230 = vmatpush3.bf16.msra.mxu1 %v1354_v31  ;;  %1291 = vmatprep.subr.bf16.mxu0 %v1361_v36 }
  0x22   :  { %1315 = vmatprep.subr.bf16.mxu1 %v1361_v36 }
  0x23   :  { %612 = vmatmul.mubr.bf16.vlgmr.msra.gmra.mrb[0].mxu0 %v1355_v32 }
  0x24   :  { %709 = vmatmul.mubr.bf16.vlgmr.msra.gmra.mrb[0].mxu1 %v1358_v34  ;;  %1292 = vmatpush3.bf16.msra.mxu0 %v1361_v36 }
  0x25   :  { %619 = vmatprep.mubr.bf16.mxu0 %v1362_v37  ;;  %716 = vmatprep.mubr.bf16.mxu1 %v1364_v38 }
  0x26   :  { %1319 = vmatpush3.bf16.msra.mxu1 %v1361_v36  ;;  %1293 = vmatprep.subr.bf16.mxu0 %v1374_v42 }
  0x27   :  { %1316 = vmatprep.subr.bf16.mxu1 %v1374_v42 }
  0x28   :  { %1294 = vmatpush3.bf16.msra.mxu0 %v1374_v42 }
  0x29   :  { %1295 = vmatprep.subr.bf16.mxu0 %v1387_v46 }
  0x2a   :  { %1320 = vmatpush3.bf16.msra.mxu1 %v1374_v42 }
  0x2b   :  { %620 = vmatmul.mubr.bf16.gmra.mrb[4].mxu0 %v1366_v39  ;;  %1317 = vmatprep.subr.bf16.mxu1 %v1387_v46 }
  0x2c   :  { %717 = vmatmul.mubr.bf16.gmra.mrb[4].mxu1 %v1367_v40  ;;  %627 = vmatprep.mubr.bf16.mxu0 %v1368_v41 }
  0x2d   :  { %724 = vmatprep.mubr.bf16.mxu1 %v1370_v43  ;;  %1296 = vmatpush3.bf16.msra.mxu0 %v1387_v46 }
  0x2e   :  { %1321 = vmatpush3.bf16.msra.mxu1 %v1387_v46  ;;  %1297 = vmatprep.subr.bf16.mxu0 %v1400_v49 }
  0x2f   :  { %1318 = vmatprep.subr.bf16.mxu1 %v1400_v49 }
  0x31   :  { %1298 = vmatpush3.bf16.msra.mxu0 %v1400_v49 }
  0x32   :  { %1322 = vmatpush3.bf16.msra.mxu1 %v1400_v49 }
  0x33   :  { %628 = vmatmul.mubr.bf16.gmra.mrb[8].mxu0 %v1372_v44 }
  0x34   :  { %725 = vmatmul.mubr.bf16.gmra.mrb[8].mxu1 %v1373_v45  ;;  %635 = vmatprep.mubr.bf16.mxu0 %v1375_v47 }
  0x35   :  { %732 = vmatprep.mubr.bf16.mxu1 %v1377_v48 }
  0x3b   :  { %636 = vmatmul.mubr.bf16.gmra.mrb[12].mxu0 %v1379_v50 }
  0x3c   :  { %733 = vmatmul.mubr.bf16.gmra.mrb[12].mxu1 %v1380_v51  ;;  %643 = vmatprep.mubr.bf16.mxu0 %v1381_v52 }
  0x3d   :  { %740 = vmatprep.mubr.bf16.mxu1 %v1383_v53 }
  0x43   :  { %644 = vmatmul.mubr.bf16.gmra.mrb[16].mxu0 %v1385_v54 }
  0x44   :  { %741 = vmatmul.mubr.bf16.gmra.mrb[16].mxu1 %v1386_v55  ;;  %651 = vmatprep.mubr.bf16.mxu0 %v1388_v56 }
  0x45   :  { %748 = vmatprep.mubr.bf16.mxu1 %v1390_v57 }
  0x4b   :  { %652 = vmatmul.mubr.bf16.gmra.mrb[20].mxu0 %v1392_v58 }
  0x4c   :  { %749 = vmatmul.mubr.bf16.gmra.mrb[20].mxu1 %v1393_v59  ;;  %659 = vmatprep.mubr.bf16.mxu0 %v1394_v60 }
  0x4d   :  { %756 = vmatprep.mubr.bf16.mxu1 %v1396_v61 }
  0x53   :  { %660 = vmatmul.mubr.bf16.gmra.mrb[24].mxu0 %v1398_v62 }
  0x54   :  { %757 = vmatmul.mubr.bf16.gmra.mrb[24].mxu1 %v1399_v63  ;;  %667 = vmatprep.mubr.bf16.mxu0 %v1401_v0 }
  0x55   :  { %764 = vmatprep.mubr.bf16.mxu1 %v1403_v1 }
  0x5b   :  { %668 = vmatmul.mubr.bf16.gmra.mrb[28].mxu0 %v1405_v2 }
  0x5c   :  { %765 = vmatmul.mubr.bf16.gmra.mrb[28].mxu1 %v1406_v3  ;;  %1299 = vmatprep.mubr.msk.bf16.mxu0 %vm554_vm0, %v1407_v4 }
  0x5d   :  { %1307 = vmatprep.mubr.msk.bf16.mxu1 %vm554_vm0, %v1408_v5 }
  0x63   :  { %1300 = vmatmul.mubr.msk.bf16.vlgmr.msra.gmra.mrb[32].mxu0 %vm554_vm0, %v1409_v6 }
  0x64   :  { %1308 = vmatmul.mubr.msk.bf16.vlgmr.msra.gmra.mrb[32].mxu1 %vm554_vm0, %v1410_v7  ;;  %1303 = vmatprep.mubr.msk.bf16.mxu0 %vm554_vm0, %v1411_v8 }
  0x65   :  { %1311 = vmatprep.mubr.msk.bf16.mxu1 %vm554_vm0, %v1412_v9 }
  0x6b   :  { %1304 = vmatmul.mubr.msk.bf16.gmra.mrb[36].mxu0 %vm554_vm0, %v1413_v10 }
  0x6c   :  { %1312 = vmatmul.mubr.msk.bf16.gmra.mrb[36].mxu1 %vm554_vm0, %v1414_v11 }
  0xf6   :  { %v1167_v12 = vpop.f32.mrb[0].mxu0 }
  0xf7   :  { %v1231_v13 = vpop.f32.mrb[0].mxu1  ;;  %v1168_v14 = vpop.f32.mrb[1].mxu0 }
  0xf8   :  { %v1169_v15 = vadd.f32 %v1168_v14, %v1167_v12  ;;  %v1232_v16 = vpop.f32.mrb[1].mxu1  ;;  %v1170_v17 = vpop.f32.mrb[2].mxu0 }
  0xf9   :  { %v1233_v18 = vadd.f32 %v1232_v16, %v1231_v13  ;;  %v1234_v19 = vpop.f32.mrb[2].mxu1  ;;  %v1171_v20 = vpop.f32.mrb[3].mxu0 }
  0xfa   :  { %v1172_v21 = vadd.f32 %v1171_v20, %v1170_v17  ;;  %v1235_v22 = vpop.f32.mrb[3].mxu1 }
  0xfb   :  { %v1236_v23 = vadd.f32 %v1235_v22, %v1234_v19  ;;  %v1678_v24 = vadd.f32 %v1233_v18, %v1169_v15 }
  0xfd   :  { %v1680_v25 = vadd.f32 %v1236_v23, %v1172_v21 }
  0xfe   :  { %v1173_v26 = vpop.f32.mrb[4].mxu0 }
  0xff   :  { %v1237_v27 = vpop.f32.mrb[4].mxu1  ;;  %v1174_v28 = vpop.f32.mrb[5].mxu0 }
 0x100   :  { %v1175_v29 = vadd.f32 %v1174_v28, %v1173_v26  ;;  %v1238_v30 = vpop.f32.mrb[5].mxu1  ;;  %v1176_v31 = vpop.f32.mrb[6].mxu0 }
 0x101   :  { %v1239_v32 = vadd.f32 %v1238_v30, %v1237_v27  ;;  %v1240_v33 = vpop.f32.mrb[6].mxu1  ;;  %v1177_v34 = vpop.f32.mrb[7].mxu0 }
 0x102   :  { %v1178_v35 = vadd.f32 %v1177_v34, %v1176_v31  ;;  %v1241_v36 = vpop.f32.mrb[7].mxu1 }
 0x103   :  { %v1242_v37 = vadd.f32 %v1241_v36, %v1240_v33  ;;  %v1682_v38 = vadd.f32 %v1239_v32, %v1175_v29 }
 0x105   :  { %v1684_v39 = vadd.f32 %v1242_v37, %v1178_v35 }
 0x106   :  { %v1179_v40 = vpop.f32.mrb[8].mxu0 }
 0x107   :  { %v1243_v41 = vpop.f32.mrb[8].mxu1  ;;  %v1180_v42 = vpop.f32.mrb[9].mxu0 }
 0x108   :  { %v1181_v43 = vadd.f32 %v1180_v42, %v1179_v40  ;;  %v1244_v44 = vpop.f32.mrb[9].mxu1  ;;  %v1182_v45 = vpop.f32.mrb[10].mxu0 }
 0x109   :  { %v1245_v46 = vadd.f32 %v1244_v44, %v1243_v41  ;;  %v1246_v47 = vpop.f32.mrb[10].mxu1  ;;  %v1183_v48 = vpop.f32.mrb[11].mxu0 }
 0x10a   :  { %v1184_v49 = vadd.f32 %v1183_v48, %v1182_v45  ;;  %v1247_v50 = vpop.f32.mrb[11].mxu1 }
 0x10b   :  { %v1248_v51 = vadd.f32 %v1247_v50, %v1246_v47  ;;  %v1686_v52 = vadd.f32 %v1245_v46, %v1181_v43 }
 0x10d   :  { %v1688_v53 = vadd.f32 %v1248_v51, %v1184_v49 }
 0x10e   :  { %v1185_v54 = vpop.f32.mrb[12].mxu0 }
 0x10f   :  { %v1249_v55 = vpop.f32.mrb[12].mxu1  ;;  %v1186_v56 = vpop.f32.mrb[13].mxu0 }
 0x110   :  { %v1187_v57 = vadd.f32 %v1186_v56, %v1185_v54  ;;  %v1250_v58 = vpop.f32.mrb[13].mxu1  ;;  %v1188_v59 = vpop.f32.mrb[14].mxu0 }
 0x111   :  { %v1251_v60 = vadd.f32 %v1250_v58, %v1249_v55  ;;  %v1252_v61 = vpop.f32.mrb[14].mxu1  ;;  %v1189_v62 = vpop.f32.mrb[15].mxu0 }
 0x112   :  { %v1190_v63 = vadd.f32 %v1189_v62, %v1188_v59  ;;  %v1253_v0 = vpop.f32.mrb[15].mxu1 }
 0x113   :  { %v1254_v1 = vadd.f32 %v1253_v0, %v1252_v61  ;;  %v1690_v2 = vadd.f32 %v1251_v60, %v1187_v57 }
 0x115   :  { %v1692_v3 = vadd.f32 %v1254_v1, %v1190_v63 }
 0x116   :  { %v1191_v4 = vpop.f32.mrb[16].mxu0 }
 0x117   :  { %v1255_v5 = vpop.f32.mrb[16].mxu1  ;;  %v1192_v6 = vpop.f32.mrb[17].mxu0 }
 0x118   :  { %v1193_v7 = vadd.f32 %v1192_v6, %v1191_v4  ;;  %v1256_v8 = vpop.f32.mrb[17].mxu1  ;;  %v1194_v9 = vpop.f32.mrb[18].mxu0 }
 0x119   :  { %v1257_v10 = vadd.f32 %v1256_v8, %v1255_v5  ;;  %v1258_v11 = vpop.f32.mrb[18].mxu1  ;;  %v1195_v12 = vpop.f32.mrb[19].mxu0 }
 0x11a   :  { %v1196_v13 = vadd.f32 %v1195_v12, %v1194_v9  ;;  %v1259_v14 = vpop.f32.mrb[19].mxu1 }
 0x11b   :  { %v1260_v15 = vadd.f32 %v1259_v14, %v1258_v11  ;;  %v743_v16 = vadd.f32 %v1257_v10, %v1193_v7 }
 0x11d   :  { %v746_v17 = vadd.f32 %v1260_v15, %v1196_v13 }
 0x11e   :  { %v1197_v18 = vpop.f32.mrb[20].mxu0 }
 0x11f   :  { %v1261_v19 = vpop.f32.mrb[20].mxu1  ;;  %v1198_v20 = vpop.f32.mrb[21].mxu0 }
 0x120   :  { %v1199_v21 = vadd.f32 %v1198_v20, %v1197_v18  ;;  %v1262_v22 = vpop.f32.mrb[21].mxu1  ;;  %v1200_v23 = vpop.f32.mrb[22].mxu0 }
 0x121   :  { %v1263_v26 = vadd.f32 %v1262_v22, %v1261_v19  ;;  %v1264_v27 = vpop.f32.mrb[22].mxu1  ;;  %v1201_v28 = vpop.f32.mrb[23].mxu0 }
 0x122   :  { %v1202_v29 = vadd.f32 %v1201_v28, %v1200_v23  ;;  %v1265_v30 = vpop.f32.mrb[23].mxu1 }
 0x123   :  { %v1266_v31 = vadd.f32 %v1265_v30, %v1264_v27  ;;  %v751_v32 = vadd.f32 %v1263_v26, %v1199_v21 }
 0x125   :  { %v754_v33 = vadd.f32 %v1266_v31, %v1202_v29 }
 0x126   :  { %v1203_v34 = vpop.f32.mrb[24].mxu0 }
 0x127   :  { %v1267_v35 = vpop.f32.mrb[24].mxu1  ;;  %v1204_v36 = vpop.f32.mrb[25].mxu0 }
 0x128   :  { %v1205_v37 = vadd.f32 %v1204_v36, %v1203_v34  ;;  %v1268_v40 = vpop.f32.mrb[25].mxu1  ;;  %v1206_v41 = vpop.f32.mrb[26].mxu0 }
 0x129   :  { %v1269_v42 = vadd.f32 %v1268_v40, %v1267_v35  ;;  %v1270_v43 = vpop.f32.mrb[26].mxu1  ;;  %v1207_v44 = vpop.f32.mrb[27].mxu0 }
 0x12a   :  { %v1208_v45 = vadd.f32 %v1207_v44, %v1206_v41  ;;  %v1271_v46 = vpop.f32.mrb[27].mxu1 }
 0x12b   :  { %v1272_v47 = vadd.f32 %v1271_v46, %v1270_v43  ;;  %v759_v48 = vadd.f32 %v1269_v42, %v1205_v37 }
 0x12d   :  { %v762_v49 = vadd.f32 %v1272_v47, %v1208_v45 }
 0x12e   :  { %v1209_v50 = vpop.f32.mrb[28].mxu0 }
 0x12f   :  { %v1273_v51 = vpop.f32.mrb[28].mxu1  ;;  %v1210_v54 = vpop.f32.mrb[29].mxu0 }
 0x130   :  { %v1211_v55 = vadd.f32 %v1210_v54, %v1209_v50  ;;  %v1274_v56 = vpop.f32.mrb[29].mxu1  ;;  %v1212_v57 = vpop.f32.mrb[30].mxu0 }
 0x131   :  { %v1275_v58 = vadd.f32 %v1274_v56, %v1273_v51  ;;  %v1276_v59 = vpop.f32.mrb[30].mxu1  ;;  %v1213_v60 = vpop.f32.mrb[31].mxu0 }
 0x132   :  { %v1214_v61 = vadd.f32 %v1213_v60, %v1212_v57  ;;  %v1277_v62 = vpop.f32.mrb[31].mxu1 }
 0x133   :  { %v1278_v63 = vadd.f32 %v1277_v62, %v1276_v59  ;;  %v767_v0 = vadd.f32 %v1275_v58, %v1211_v55 }
 0x135   :  { %v770_v1 = vadd.f32 %v1278_v63, %v1214_v61 }
 0x136   :  { %v1301_v4 = vpop.f32.mrb[32].mxu0 }
 0x137   :  { %v1695_v5 = vadd.f32 %v1301_v4, %v1682_v38  ;;  %v1309_v6 = vpop.f32.mrb[32].mxu1  ;;  %v807_v7 = vpop.f32.mrb[33].mxu0 }
 0x138   :  { %v1697_v8 = vadd.f32 %v1309_v6, %v751_v32  ;;  %v1700_v9 = vadd.f32 %v807_v7, %v1678_v24  ;;  %v839_v10 = vpop.f32.mrb[33].mxu1  ;;  %v1302_v11 = vpop.f32.mrb[34].mxu0 }
 0x139   :  { %v1702_v12 = vadd.f32 %v839_v10, %v743_v16  ;;  %v1705_v13 = vadd.f32 %v1302_v11, %v1684_v39  ;;  %v1310_v14 = vpop.f32.mrb[34].mxu1  ;;  %v810_v15 = vpop.f32.mrb[35].mxu0  ;;  %v874_v39 = vsel %vm870_vm1, %v1695_v5, 0.0 }
 0x13a   :  { %v1707_v18 = vadd.f32 %v1310_v14, %v754_v33  ;;  %v1710_v38 = vadd.f32 %v810_v15, %v1680_v25  ;;  %v842_v19 = vpop.f32.mrb[35].mxu1  ;;  %v871_v24 = vsel %vm870_vm1, %v1700_v9, 0.0  ;;  %v890_v51 = vsel %vm870_vm1, %v1697_v8, 0.0 }
 0x13b   :  { %v1712_v20 = vadd.f32 %v842_v19, %v746_v17  ;;  %v876_v17 = vsel %vm870_vm1, %v1705_v13, 0.0 }
 0x13c   :  { %v872_v16 = vsel %vm870_vm1, %v1710_v38, 0.0  ;;  %v892_v55 = vsel %vm870_vm1, %v1707_v18, 0.0 }
 0x13d   :  { %v873_v21 = vadd.f32 %v872_v16, %v871_v24 }
 0x13e   :  { %v1305_v22 = vpop.f32.mrb[36].mxu0 }
 0x13f   :  { %v875_v23 = vadd.f32 %v874_v39, %v873_v21  ;;  %v1721_v26 = vadd.f32 %v1305_v22, %v1690_v2  ;;  %v1313_v25 = vpop.f32.mrb[36].mxu1  ;;  %v823_v27 = vpop.f32.mrb[37].mxu0 }
 0x140   :  { %v1725_v28 = vadd.f32 %v1313_v25, %v767_v0  ;;  %v1728_v29 = vadd.f32 %v823_v27, %v1686_v52  ;;  %v855_v30 = vpop.f32.mrb[37].mxu1  ;;  %v1306_v31 = vpop.f32.mrb[38].mxu0 }
 0x141   :  { %v877_v32 = vadd.f32 %v876_v17, %v875_v23  ;;  %v1730_v33 = vadd.f32 %v855_v30, %v759_v48  ;;  %v1733_v34 = vadd.f32 %v1306_v31, %v1692_v3  ;;  %v1314_v2 = vpop.f32.mrb[38].mxu1  ;;  %v826_v35 = vpop.f32.mrb[39].mxu0  ;;  %v882_v3 = vsel %vm870_vm1, %v1721_v26, 0.0 }
 0x142   :  { %v878_v36 = vsel %vm870_vm1, %v1728_v29, 0.0  ;;  %v1737_v37 = vadd.f32 %v1314_v2, %v770_v1  ;;  %v1740_v40 = vadd.f32 %v826_v35, %v1688_v53  ;;  %v858_v52 = vpop.f32.mrb[39].mxu1  ;;  %v886_v53 = vsel %vm870_vm1, %v1702_v12, 0.0 }
 0x143   :  { %v879_v41 = vadd.f32 %v878_v36, %v877_v32  ;;  %v1742_v42 = vadd.f32 %v858_v52, %v762_v49  ;;  %v884_v46 = vsel %vm870_vm1, %v1733_v34, 0.0  ;;  %v888_v49 = vsel %vm870_vm1, %v1712_v20, 0.0 }
 0x144   :  { %v880_v43 = vsel %vm870_vm1, %v1740_v40, 0.0  ;;  %v894_v57 = vsel %vm870_vm1, %v1730_v33, 0.0  ;;  %v898_v61 = vsel %vm870_vm1, %v1725_v28, 0.0  ;;  %v900_v63 = vsel %vm870_vm1, %v1737_v37, 0.0 }
 0x145   :  { %v881_v44 = vadd.f32 %v880_v43, %v879_v41  ;;  %v896_v59 = vsel %vm870_vm1, %v1742_v42, 0.0 }
 0x147   :  { %v883_v45 = vadd.f32 %v882_v3, %v881_v44 }
 0x149   :  { %v885_v47 = vadd.f32 %v884_v46, %v883_v45 }
 0x14b   :  { %v887_v48 = vadd.f32 %v886_v53, %v885_v47 }
 0x14d   :  { %v889_v50 = vadd.f32 %v888_v49, %v887_v48 }
 0x14f   :  { %v891_v54 = vadd.f32 %v890_v51, %v889_v50 }
 0x151   :  { %v893_v56 = vadd.f32 %v892_v55, %v891_v54 }
 0x153   :  { %v895_v58 = vadd.f32 %v894_v57, %v893_v56 }
 0x155   :  { %v897_v60 = vadd.f32 %v896_v59, %v895_v58 }
 0x157   :  { %v899_v62 = vadd.f32 %v898_v61, %v897_v60 }
 0x159   :  { %v901_v0 = vadd.f32 %v900_v63, %v899_v62 }
 0x15b   :  { %v902_v1 = vrot.slane %v901_v0, 4 }
 0x15d   :  { %v903_v4 = vadd.f32 %v902_v1, %v901_v0 }
 0x15f   :  { %v904_v6 = vrot.slane %v903_v4, 2 }
 0x161   :  { %v905_v7 = vadd.f32 %v904_v6, %v903_v4 }
 0x163   :  { %v906_v10 = vrot.slane %v905_v7, 1 }
 0x165   :  { %v907_v11 = vadd.f32 %v906_v10, %v905_v7 }
 0x167   :  { %v1766_v14 = vmul.f32 0.0078125, %v907_v11 }
 0x169   :  { %v910_v15 = vsub.f32 %v1700_v9, %v1766_v14  ;;  %v911_v19 = vsub.f32 %v1710_v38, %v1766_v14  ;;  %v912_v24 = vsub.f32 %v1695_v5, %v1766_v14  ;;  %v913_v16 = vsub.f32 %v1705_v13, %v1766_v14 }
 0x16a   :  { %v914_v22 = vsub.f32 %v1728_v29, %v1766_v14  ;;  %v915_v25 = vsub.f32 %v1740_v40, %v1766_v14  ;;  %v916_v32 = vsub.f32 %v1721_v26, %v1766_v14  ;;  %v917_v52 = vsub.f32 %v1733_v34, %v1766_v14 }
 0x16b   :  { %v926_v21 = vmul.f32 %v910_v15, %v910_v15  ;;  %v927_v39 = vmul.f32 %v911_v19, %v911_v19  ;;  %v928_v23 = vmul.f32 %v912_v24, %v912_v24  ;;  %v929_v27 = vmul.f32 %v913_v16, %v913_v16 }
 0x16c   :  { %v930_v2 = vmul.f32 %v914_v22, %v914_v22  ;;  %v931_v41 = vmul.f32 %v915_v25, %v915_v25  ;;  %v918_v3 = vsub.f32 %v1702_v12, %v1766_v14  ;;  %v932_v45 = vmul.f32 %v916_v32, %v916_v32 }
 0x16d   :  { %v942_v17 = vsel %vm870_vm1, %v926_v21, 0.0  ;;  %v943_v30 = vsel %vm870_vm1, %v927_v39, 0.0  ;;  %v945_v35 = vsel %vm870_vm1, %v928_v23, 0.0  ;;  %v947_v43 = vsel %vm870_vm1, %v929_v27, 0.0 }
 0x16e   :  { %v944_v31 = vadd.f32 %v943_v30, %v942_v17  ;;  %v949_v46 = vsel %vm870_vm1, %v930_v2, 0.0  ;;  %v919_v53 = vsub.f32 %v1712_v20, %v1766_v14  ;;  %v933_v48 = vmul.f32 %v917_v52, %v917_v52 }
 0x16f   :  { %v951_v49 = vsel %vm870_vm1, %v931_v41, 0.0  ;;  %v920_v51 = vsub.f32 %v1697_v8, %v1766_v14  ;;  %v934_v54 = vmul.f32 %v918_v3, %v918_v3  ;;  %v953_v55 = vsel %vm870_vm1, %v932_v45, 0.0 }
 0x170   :  { %v946_v36 = vadd.f32 %v945_v35, %v944_v31  ;;  %v921_v57 = vsub.f32 %v1707_v18, %v1766_v14  ;;  %v935_v58 = vmul.f32 %v919_v53, %v919_v53  ;;  %v955_v59 = vsel %vm870_vm1, %v933_v48, 0.0  ;;  %v980_v48 = vld [vmem:[%s1905_s2] sm:$0x1] }
 0x171   :  { %v922_v61 = vsub.f32 %v1730_v33, %v1766_v14  ;;  %v936_v62 = vmul.f32 %v920_v51, %v920_v51  ;;  %v957_v63 = vsel %vm870_vm1, %v934_v54, 0.0  ;;  %v923_v1 = vsub.f32 %v1742_v42, %v1766_v14  ;;  %v984_v54 = vld [vmem:[%s1906_s3] sm:$0x1] }
 0x172   :  { %v948_v44 = vadd.f32 %v947_v43, %v946_v36  ;;  %v937_v4 = vmul.f32 %v921_v57, %v921_v57  ;;  %v959_v6 = vsel %vm870_vm1, %v935_v58, 0.0  ;;  %v924_v10 = vsub.f32 %v1725_v28, %v1766_v14 }
 0x173   :  { %v938_v11 = vmul.f32 %v922_v61, %v922_v61  ;;  %v961_v15 = vsel %vm870_vm1, %v936_v62, 0.0  ;;  %v925_v24 = vsub.f32 %v1737_v37, %v1766_v14  ;;  %v939_v16 = vmul.f32 %v923_v1, %v923_v1 }
 0x174   :  { %v950_v47 = vadd.f32 %v949_v46, %v948_v44  ;;  %v963_v21 = vsel %vm870_vm1, %v937_v4, 0.0  ;;  %v940_v22 = vmul.f32 %v924_v10, %v924_v10 }
 0x175   :  { %v965_v23 = vsel %vm870_vm1, %v938_v11, 0.0  ;;  %v941_v27 = vmul.f32 %v925_v24, %v925_v24  ;;  %v967_v17 = vsel %vm870_vm1, %v939_v16, 0.0 }
 0x176   :  { %v952_v50 = vadd.f32 %v951_v49, %v950_v47  ;;  %v969_v31 = vsel %vm870_vm1, %v940_v22, 0.0  ;;  %v988_v47 = vlaneseq }
 0x177   :  { %v971_v2 = vsel %vm870_vm1, %v941_v27, 0.0 }
 0x178   :  { %v954_v56 = vadd.f32 %v953_v55, %v952_v50  ;;  %v989_v53 = vshrl.u32 %v988_v47, 7 }
 0x17a   :  { %v956_v60 = vadd.f32 %v955_v59, %v954_v56  ;;  %v990_v49 = vsub.s32 0, %v989_v53 }
 0x17c   :  { %v958_v0 = vadd.f32 %v957_v63, %v956_v60 }
 0x17e   :  { %v960_v7 = vadd.f32 %v959_v6, %v958_v0 }
 0x180   :  { %v962_v19 = vadd.f32 %v961_v15, %v960_v7 }
 0x182   :  { %v964_v39 = vadd.f32 %v963_v21, %v962_v19 }
 0x184   :  { %v966_v25 = vadd.f32 %v965_v23, %v964_v39 }
 0x186   :  { %v968_v30 = vadd.f32 %v967_v17, %v966_v25 }
 0x188   :  { %v970_v32 = vadd.f32 %v969_v31, %v968_v30 }
 0x18a   :  { %v972_v35 = vadd.f32 %v971_v2, %v970_v32 }
 0x18c   :  { %v973_v36 = vrot.slane %v972_v35, 4 }
 0x18e   :  { %v974_v52 = vadd.f32 %v973_v36, %v972_v35 }
 0x190   :  { %v975_v41 = vrot.slane %v974_v52, 2 }
 0x192   :  { %v976_v43 = vadd.f32 %v975_v41, %v974_v52 }
 0x194   :  { %v977_v44 = vrot.slane %v976_v43, 1 }
 0x196   :  { %v978_v3 = vadd.f32 %v977_v44, %v976_v43 }
 0x198   :  { %v979_v45 = vmul.f32 0.0078125, %v978_v3 }
 0x19a   :  { %v981_v46 = vadd.f32 1e-05, %v979_v45 }
 0x19c   :  { %1415 = vrsqrt.f32 %v981_v46 }
 0x1a6   :  { %v1416_v50 = vpop.eup %1415 }
 0x1a7   :  { %v983_v51 = vmul.f32 %v1416_v50, %v980_v48 }
 0x1a9   :  { %v985_v55 = vmul.f32 %v983_v51, %v1766_v14  ;;  %v991_v56 = vrot.slane %v983_v51, %v990_v49 }
 0x1ab   :  { %v986_v57 = vsub.f32 %v984_v54, %v985_v55  ;;  %v993_v58 = vmul.f32 %v991_v56, %v1700_v9  ;;  %v994_v59 = vmul.f32 %v991_v56, %v1710_v38  ;;  %v995_v60 = vmul.f32 %v991_v56, %v1695_v5 }
 0x1ac   :  { %v996_v61 = vmul.f32 %v991_v56, %v1705_v13  ;;  %v997_v62 = vmul.f32 %v991_v56, %v1728_v29  ;;  %v998_v63 = vmul.f32 %v991_v56, %v1740_v40  ;;  %v999_v0 = vmul.f32 %v991_v56, %v1721_v26 }
 0x1ad   :  { %v1000_v1 = vmul.f32 %v991_v56, %v1733_v34  ;;  %v1001_v14 = vmul.f32 %v991_v56, %v1702_v12  ;;  %v1002_v4 = vmul.f32 %v991_v56, %v1712_v20  ;;  %v1003_v9 = vmul.f32 %v991_v56, %v1697_v8 }
 0x1ae   :  { %v1004_v38 = vmul.f32 %v991_v56, %v1707_v18  ;;  %v1013_v6 = vrot.slane %v986_v57, %v990_v49  ;;  %v1005_v5 = vmul.f32 %v991_v56, %v1730_v33  ;;  %v1006_v13 = vmul.f32 %v991_v56, %v1742_v42 }
 0x1af   :  { %v1007_v29 = vmul.f32 %v991_v56, %v1725_v28  ;;  %v1008_v40 = vmul.f32 %v991_v56, %v1737_v37 }
 0x1b0   :  { %v1015_v26 = vadd.f32 %v1013_v6, %v993_v58  ;;  %v1016_v7 = vadd.f32 %v1013_v6, %v994_v59  ;;  %v1017_v34 = vadd.f32 %v1013_v6, %v995_v60  ;;  %v1018_v10 = vadd.f32 %v1013_v6, %v996_v61 }
 0x1b1   :  { %v1019_v12 = vadd.f32 %v1013_v6, %v997_v62  ;;  %v1020_v11 = vadd.f32 %v1013_v6, %v998_v63  ;;  %v1021_v20 = vadd.f32 %v1013_v6, %v999_v0  ;;  %v1022_v15 = vadd.f32 %v1013_v6, %v1000_v1 }
 0x1b2   :  { %v1023_v8 = vadd.f32 %v1013_v6, %v1001_v14  ;;  %v1024_v19 = vadd.f32 %v1013_v6, %v1002_v4  ;;  %v1025_v18 = vadd.f32 %v1013_v6, %v1003_v9  ;;  %v1026_v24 = vadd.f32 %v1013_v6, %v1004_v38 }
 0x1b3   :  { %v1027_v16 = vadd.f32 %v1013_v6, %v1005_v5  ;;  %v1028_v33 = vadd.f32 %v1013_v6, %v1006_v13  ;;  %v1029_v21 = vadd.f32 %v1013_v6, %v1007_v29  ;;  %v1030_v42 = vadd.f32 %v1013_v6, %v1008_v40 }
 0x1b4   :  { %v1031_v39 = vmax.f32 %v1015_v26, 0.0  ;;  %v1032_v28 = vmax.f32 %v1016_v7, 0.0  ;;  %v1033_v22 = vmax.f32 %v1017_v34, 0.0  ;;  %v1034_v37 = vmax.f32 %v1018_v10, 0.0 }
 0x1b5   :  { %v1035_v23 = vmax.f32 %v1019_v12, 0.0  ;;  %v1036_v25 = vmax.f32 %v1020_v11, 0.0  ;;  %v1037_v27 = vmax.f32 %v1021_v20, 0.0  ;;  %v1038_v17 = vmax.f32 %v1022_v15, 0.0 }
 0x1b6   :  { %v1039_v30 = vmax.f32 %v1023_v8, 0.0  ;;  %v1040_v31 = vmax.f32 %v1024_v19, 0.0  ;;  %v1041_v32 = vmax.f32 %v1025_v18, 0.0  ;;  %v1042_v2 = vmax.f32 %v1026_v24, 0.0  ;;  %1047 = vst.msk [vmem:[%s1907_s4] sm:$0xff] %vm870_vm1, %v1031_v39  ;;  %1048 = vst.msk [vmem:[%s1907_s4 + $0x8] sm:$0xff] %vm870_vm1, %v1032_v28 }
 0x1b7   :  { %1049 = vst.msk [vmem:[%s1907_s4 + $0x10] sm:$0xff] %vm870_vm1, %v1033_v22  ;;  %1050 = vst.msk [vmem:[%s1907_s4 + $0x18] sm:$0xff] %vm870_vm1, %v1034_v37  ;;  %v1043_v35 = vmax.f32 %v1027_v16, 0.0  ;;  %v1044_v36 = vmax.f32 %v1028_v33, 0.0  ;;  %v1045_v52 = vmax.f32 %v1029_v21, 0.0  ;;  %v1046_v41 = vmax.f32 %v1030_v42, 0.0 }
 0x1b8   :  { %1051 = vst.msk [vmem:[%s1907_s4 + $0x20] sm:$0xff] %vm870_vm1, %v1035_v23  ;;  %1052 = vst.msk [vmem:[%s1907_s4 + $0x28] sm:$0xff] %vm870_vm1, %v1036_v25 }
 0x1b9   :  { %1053 = vst.msk [vmem:[%s1907_s4 + $0x30] sm:$0xff] %vm870_vm1, %v1037_v27  ;;  %1054 = vst.msk [vmem:[%s1907_s4 + $0x38] sm:$0xff] %vm870_vm1, %v1038_v17 }
 0x1ba   :  { %1055 = vst.msk [vmem:[%s1907_s4 + $0x40] sm:$0xff] %vm870_vm1, %v1039_v30  ;;  %1056 = vst.msk [vmem:[%s1907_s4 + $0x48] sm:$0xff] %vm870_vm1, %v1040_v31 }
 0x1bb   :  { %1057 = vst.msk [vmem:[%s1907_s4 + $0x50] sm:$0xff] %vm870_vm1, %v1041_v32  ;;  %1058 = vst.msk [vmem:[%s1907_s4 + $0x58] sm:$0xff] %vm870_vm1, %v1042_v2 }
 0x1bc   :  { %1059 = vst.msk [vmem:[%s1907_s4 + $0x60] sm:$0xff] %vm870_vm1, %v1043_v35  ;;  %1060 = vst.msk [vmem:[%s1907_s4 + $0x68] sm:$0xff] %vm870_vm1, %v1044_v36 }
 0x1bd   :  { %1061 = vst.msk [vmem:[%s1907_s4 + $0x70] sm:$0xff] %vm870_vm1, %v1045_v52  ;;  %1062 = vst.msk [vmem:[%s1907_s4 + $0x78] sm:$0xff] %vm870_vm1, %v1046_v41 }

// kernel: resnet_generator.18
= control target key start
LH: loop header
LB: loop body
LE: loop exit
PB: predicated region body
PF: predicated region fallthrough
CT: control target
= control target key end

     0   :  { %v2551_v0 = vmov 0   ;;  %vm770_vm0 = vcmask 261120   ;;  %vm1445_vm1 = vcmask 130048   ;;  %s4400_s1 = inlined_call_operand.vmem [shape: bf16[288,16], index: 1, kind: input, shape index: {}]   ;;  %s4401_s0 = inlined_call_operand.vmem [shape: bf16[512,288], index: 0, kind: input, shape index: {}]   ;;  %s4402_s2 = inlined_call_operand.vmem [shape: f32[1,16], index: 2, kind: input, shape index: {}]   ;;  %s4403_s3 = inlined_call_operand.vmem [shape: f32[1,16], index: 3, kind: input, shape index: {}]   ;;  %s4404_s4 = inlined_call_operand.vmem [shape: f32[512,16], index: 4, kind: output, shape index: {}]  }
   0x1   :  { %867 = vmatprep.subr.bf16.mxu0 %v2551_v0  ;;  %2370 = vmatprep.subr.bf16.mxu1 %v2551_v0  ;;  %v2403_v1 = vld [vmem:[%s4400_s1] sm:$0xff]   ;;  %v2404_v2 = vld [vmem:[%s4400_s1 + $0x8] sm:$0xff]   ;;  %v2405_v3 = vld [vmem:[%s4400_s1 + $0x10] sm:$0xff]  }
   0x2   :  { %868 = vmatpush1.bf16.msra.mxu0 %v2403_v1  ;;  %2386 = vmatpush1.bf16.msra.mxu1 %v2403_v1  ;;  %v2406_v4 = vld [vmem:[%s4400_s1 + $0x18] sm:$0xff]   ;;  %v2407_v5 = vld [vmem:[%s4400_s1 + $0x20] sm:$0xff]   ;;  %v2408_v7 = vld [vmem:[%s4400_s1 + $0x28] sm:$0xff]  }
   0x3   :  { %869 = vmatprep.subr.bf16.mxu0 %v2551_v0  ;;  %2371 = vmatprep.subr.bf16.mxu1 %v2551_v0  ;;  %v2421_v6 = vld [vmem:[%s4401_s0 + $0x4] ss:$12 sps:$4 sm:$0xff]   ;;  %v2410_v10 = vld [vmem:[%s4400_s1 + $0x38] sm:$0xff]   ;;  %v2412_v12 = vld [vmem:[%s4400_s1 + $0x48] sm:$0xff]  }
   0x4   :  { %v2424_v8 = vld [vmem:[%s4401_s0 + $0x244] ss:$12 sps:$4 sm:$0xff]   ;;  %899 = vmatprep.mubr.bf16.mxu0 %v2421_v6  ;;  %v2414_v14 = vld [vmem:[%s4400_s1 + $0x58] sm:$0xff]   ;;  %v2416_v16 = vld [vmem:[%s4400_s1 + $0x68] sm:$0xff]  }
   0x5   :  { %1091 = vmatprep.mubr.bf16.mxu1 %v2424_v8  ;;  %v2409_v9 = vld [vmem:[%s4400_s1 + $0x30] sm:$0xff]   ;;  %v2411_v11 = vld [vmem:[%s4400_s1 + $0x40] sm:$0xff]   ;;  %v2418_v18 = vld [vmem:[%s4400_s1 + $0x78] sm:$0xff]  }
   0x6   :  { %870 = vmatpush1.bf16.msra.mxu0 %v2404_v2  ;;  %2387 = vmatpush1.bf16.msra.mxu1 %v2404_v2  ;;  %v2413_v13 = vld [vmem:[%s4400_s1 + $0x50] sm:$0xff]   ;;  %v2415_v15 = vld [vmem:[%s4400_s1 + $0x60] sm:$0xff]   ;;  %v2425_v22 = vld [vmem:[%s4401_s0 + $0x1c] ss:$12 sps:$4 sm:$0xff]  }
   0x7   :  { %871 = vmatprep.subr.bf16.mxu0 %v2551_v0  ;;  %2372 = vmatprep.subr.bf16.mxu1 %v2551_v0  ;;  %v2417_v17 = vld [vmem:[%s4400_s1 + $0x70] sm:$0xff]   ;;  %v2443_v19 = vld [vmem:[%s4400_s1 + $0x80] sm:$0xff]   ;;  %v2427_v23 = vld [vmem:[%s4401_s0 + $0x25c] ss:$12 sps:$4 sm:$0xff]  }
   0x8   :  { %v2419_v20 = vld [vmem:[%s4401_s0] ss:$12 sps:$4 sm:$0xff]   ;;  %v2429_v25 = vld [vmem:[%s4401_s0 + $0x18] ss:$12 sps:$4 sm:$0xff]   ;;  %v2435_v29 = vld [vmem:[%s4401_s0 + $0x30] ss:$12 sps:$4 sm:$0xff]  }
   0x9   :  { %v2422_v21 = vld [vmem:[%s4401_s0 + $0x240] ss:$12 sps:$4 sm:$0xff]   ;;  %v2430_v26 = vld [vmem:[%s4401_s0 + $0x258] ss:$12 sps:$4 sm:$0xff]   ;;  %v2436_v30 = vld [vmem:[%s4401_s0 + $0x270] ss:$12 sps:$4 sm:$0xff]  }
   0xa   :  { %872 = vmatpush1.bf16.msra.mxu0 %v2405_v3  ;;  %2388 = vmatpush1.bf16.msra.mxu1 %v2405_v3  ;;  %v2468_v24 = vld [vmem:[%s4400_s1 + $0x88] sm:$0xff]   ;;  %v2431_v27 = vld [vmem:[%s4401_s0 + $0x34] ss:$12 sps:$4 sm:$0xff]   ;;  %v2444_v35 = vld [vmem:[%s4401_s0 + $0x64] ss:$12 sps:$4 sm:$0xff]  }
   0xb   :  { %873 = vmatprep.subr.bf16.mxu0 %v2551_v0  ;;  %2373 = vmatprep.subr.bf16.mxu1 %v2551_v0  ;;  %v2433_v28 = vld [vmem:[%s4401_s0 + $0x274] ss:$12 sps:$4 sm:$0xff]   ;;  %v2437_v31 = vld [vmem:[%s4401_s0 + $0x4c] ss:$12 sps:$4 sm:$0xff]   ;;  %v2446_v36 = vld [vmem:[%s4401_s0 + $0x2a4] ss:$12 sps:$4 sm:$0xff]  }
   0xc   :  { %v2439_v32 = vld [vmem:[%s4401_s0 + $0x28c] ss:$12 sps:$4 sm:$0xff]   ;;  %v2441_v33 = vld [vmem:[%s4401_s0 + $0x48] ss:$12 sps:$4 sm:$0xff]   ;;  %v2460_v45 = vld [vmem:[%s4401_s0 + $0x90] ss:$12 sps:$4 sm:$0xff]  }
   0xd   :  { %v2442_v34 = vld [vmem:[%s4401_s0 + $0x288] ss:$12 sps:$4 sm:$0xff]   ;;  %v2448_v37 = vld [vmem:[%s4401_s0 + $0x60] ss:$12 sps:$4 sm:$0xff]   ;;  %v2454_v41 = vld [vmem:[%s4401_s0 + $0x78] ss:$12 sps:$4 sm:$0xff]  }
   0xe   :  { %874 = vmatpush1.bf16.msra.mxu0 %v2406_v4  ;;  %2389 = vmatpush1.bf16.msra.mxu1 %v2406_v4  ;;  %v2449_v38 = vld [vmem:[%s4401_s0 + $0x2a0] ss:$12 sps:$4 sm:$0xff]   ;;  %v2450_v39 = vld [vmem:[%s4401_s0 + $0x7c] ss:$12 sps:$4 sm:$0xff]   ;;  %v2455_v42 = vld [vmem:[%s4401_s0 + $0x2b8] ss:$12 sps:$4 sm:$0xff]  }
   0xf   :  { %875 = vmatprep.subr.bf16.mxu0 %v2551_v0  ;;  %2374 = vmatprep.subr.bf16.mxu1 %v2551_v0  ;;  %v2452_v40 = vld [vmem:[%s4401_s0 + $0x2bc] ss:$12 sps:$4 sm:$0xff]   ;;  %v2456_v43 = vld [vmem:[%s4401_s0 + $0x94] ss:$12 sps:$4 sm:$0xff]   ;;  %v2462_v47 = vld [vmem:[%s4401_s0 + $0xac] ss:$12 sps:$4 sm:$0xff]  }
  0x10   :  { %v2458_v44 = vld [vmem:[%s4401_s0 + $0x2d4] ss:$12 sps:$4 sm:$0xff]   ;;  %v2461_v46 = vld [vmem:[%s4401_s0 + $0x2d0] ss:$12 sps:$4 sm:$0xff]   ;;  %v2464_v48 = vld [vmem:[%s4401_s0 + $0x2ec] ss:$12 sps:$4 sm:$0xff]  }
  0x11   :  { %v2466_v49 = vld [vmem:[%s4401_s0 + $0xa8] ss:$12 sps:$4 sm:$0xff]   ;;  %v2469_v51 = vld [vmem:[%s4401_s0 + $0xc4] ss:$12 sps:$4 sm:$0xff]   ;;  %v2472_v53 = vld [vmem:[%s4401_s0 + $0xc0] ss:$12 sps:$4 sm:$0xff]  }
  0x12   :  { %876 = vmatpush1.bf16.msra.mxu0 %v2407_v5  ;;  %2390 = vmatpush1.bf16.msra.mxu1 %v2407_v5  ;;  %v2467_v50 = vld [vmem:[%s4401_s0 + $0x2e8] ss:$12 sps:$4 sm:$0xff]   ;;  %v2473_v54 = vld [vmem:[%s4401_s0 + $0x20] ss:$12 sps:$4 sm:$0xff]   ;;  %v2476_v56 = vld [vmem:[%s4401_s0 + $0x38] ss:$12 sps:$4 sm:$0xff]  }
  0x13   :  { %877 = vmatprep.subr.bf16.mxu0 %v2551_v0  ;;  %2375 = vmatprep.subr.bf16.mxu1 %v2551_v0  ;;  %v2471_v52 = vld [vmem:[%s4401_s0 + $0x8] ss:$12 sps:$4 sm:$0xff]   ;;  %v2477_v57 = vld [vmem:[%s4401_s0 + $0xd8] ss:$12 sps:$4 sm:$0xff]   ;;  %v2478_v58 = vld [vmem:[%s4401_s0 + $0x50] ss:$12 sps:$4 sm:$0xff]  }
  0x14   :  { %v2474_v55 = vld [vmem:[%s4401_s0 + $0xdc] ss:$12 sps:$4 sm:$0xff]   ;;  %v2479_v59 = vld [vmem:[%s4401_s0 + $0xf4] ss:$12 sps:$4 sm:$0xff]   ;;  %v2484_v63 = vld [vmem:[%s4401_s0 + $0x10c] ss:$12 sps:$4 sm:$0xff]  }
  0x15   :  { %v2481_v60 = vld [vmem:[%s4401_s0 + $0x68] ss:$12 sps:$4 sm:$0xff]   ;;  %v2482_v61 = vld [vmem:[%s4401_s0 + $0xf0] ss:$12 sps:$4 sm:$0xff]   ;;  %v2483_v62 = vld [vmem:[%s4401_s0 + $0x80] ss:$12 sps:$4 sm:$0xff]  }
  0x16   :  { %878 = vmatpush1.bf16.msra.mxu0 %v2408_v7  ;;  %2391 = vmatpush1.bf16.msra.mxu1 %v2408_v7  ;;  %v2487_v1 = vld [vmem:[%s4401_s0 + $0x108] ss:$12 sps:$4 sm:$0xff]   ;;  %v2488_v2 = vld [vmem:[%s4401_s0 + $0xb0] ss:$12 sps:$4 sm:$0xff]   ;;  %v2492_v5 = vld [vmem:[%s4401_s0 + $0x120] ss:$12 sps:$4 sm:$0xff]  }
  0x17   :  { %879 = vmatprep.subr.bf16.mxu0 %v2551_v0  ;;  %2376 = vmatprep.subr.bf16.mxu1 %v2551_v0  ;;  %v2489_v3 = vld [vmem:[%s4401_s0 + $0x124] ss:$12 sps:$4 sm:$0xff]   ;;  %v2491_v4 = vld [vmem:[%s4401_s0 + $0xc8] ss:$12 sps:$4 sm:$0xff]   ;;  %v2493_v6 = vld [vmem:[%s4401_s0 + $0xe0] ss:$12 sps:$4 sm:$0xff]  }
  0x18   :  { %v2494_v7 = vld [vmem:[%s4401_s0 + $0x13c] ss:$12 sps:$4 sm:$0xff]   ;;  %v2496_v8 = vld [vmem:[%s4401_s0 + $0xf8] ss:$12 sps:$4 sm:$0xff]  }
  0x1a   :  { %880 = vmatpush1.bf16.msra.mxu0 %v2409_v9  ;;  %2392 = vmatpush1.bf16.msra.mxu1 %v2409_v9  ;;  %v2497_v9 = vld [vmem:[%s4401_s0 + $0x138] ss:$12 sps:$4 sm:$0xff]  }
  0x1b   :  { %881 = vmatprep.subr.bf16.mxu0 %v2551_v0  ;;  %2377 = vmatprep.subr.bf16.mxu1 %v2551_v0 }
  0x1e   :  { %882 = vmatpush1.bf16.msra.mxu0 %v2410_v10  ;;  %2393 = vmatpush1.bf16.msra.mxu1 %v2410_v10  ;;  %v2498_v10 = vld [vmem:[%s4401_s0 + $0x110] ss:$12 sps:$4 sm:$0xff]  }
  0x1f   :  { %883 = vmatprep.subr.bf16.mxu0 %v2551_v0  ;;  %2378 = vmatprep.subr.bf16.mxu1 %v2551_v0 }
  0x22   :  { %884 = vmatpush1.bf16.msra.mxu0 %v2411_v11  ;;  %2394 = vmatpush1.bf16.msra.mxu1 %v2411_v11  ;;  %v2499_v11 = vld [vmem:[%s4401_s0 + $0x154] ss:$12 sps:$4 sm:$0xff]  }
  0x23   :  { %885 = vmatprep.subr.bf16.mxu0 %v2551_v0  ;;  %2379 = vmatprep.subr.bf16.mxu1 %v2551_v0 }
  0x26   :  { %886 = vmatpush1.bf16.msra.mxu0 %v2412_v12  ;;  %2395 = vmatpush1.bf16.msra.mxu1 %v2412_v12  ;;  %v2501_v12 = vld [vmem:[%s4401_s0 + $0x128] ss:$12 sps:$4 sm:$0xff]  }
  0x27   :  { %887 = vmatprep.subr.bf16.mxu0 %v2551_v0  ;;  %2380 = vmatprep.subr.bf16.mxu1 %v2551_v0 }
  0x2a   :  { %888 = vmatpush1.bf16.msra.mxu0 %v2413_v13  ;;  %2396 = vmatpush1.bf16.msra.mxu1 %v2413_v13  ;;  %v2502_v13 = vld [vmem:[%s4401_s0 + $0x150] ss:$12 sps:$4 sm:$0xff]  }
  0x2b   :  { %889 = vmatprep.subr.bf16.mxu0 %v2551_v0  ;;  %2381 = vmatprep.subr.bf16.mxu1 %v2551_v0 }
  0x2e   :  { %890 = vmatpush1.bf16.msra.mxu0 %v2414_v14  ;;  %2397 = vmatpush1.bf16.msra.mxu1 %v2414_v14  ;;  %v2503_v14 = vld [vmem:[%s4401_s0 + $0x140] ss:$12 sps:$4 sm:$0xff]  }
  0x2f   :  { %891 = vmatprep.subr.bf16.mxu0 %v2551_v0  ;;  %2382 = vmatprep.subr.bf16.mxu1 %v2551_v0 }
  0x32   :  { %892 = vmatpush1.bf16.msra.mxu0 %v2415_v15  ;;  %2398 = vmatpush1.bf16.msra.mxu1 %v2415_v15  ;;  %v2504_v15 = vld [vmem:[%s4401_s0 + $0x16c] ss:$12 sps:$4 sm:$0xff]  }
  0x33   :  { %893 = vmatprep.subr.bf16.mxu0 %v2551_v0  ;;  %2383 = vmatprep.subr.bf16.mxu1 %v2551_v0 }
  0x36   :  { %894 = vmatpush1.bf16.msra.mxu0 %v2416_v16  ;;  %2399 = vmatpush1.bf16.msra.mxu1 %v2416_v16  ;;  %v2506_v16 = vld [vmem:[%s4401_s0 + $0x158] ss:$12 sps:$4 sm:$0xff]  }
  0x37   :  { %895 = vmatprep.subr.bf16.mxu0 %v2551_v0  ;;  %2384 = vmatprep.subr.bf16.mxu1 %v2551_v0 }
  0x3a   :  { %896 = vmatpush1.bf16.msra.mxu0 %v2417_v17  ;;  %2400 = vmatpush1.bf16.msra.mxu1 %v2417_v17  ;;  %v2507_v17 = vld [vmem:[%s4401_s0 + $0x168] ss:$12 sps:$4 sm:$0xff]  }
  0x3b   :  { %897 = vmatprep.subr.bf16.mxu0 %v2551_v0  ;;  %2385 = vmatprep.subr.bf16.mxu1 %v2551_v0  ;;  %v2486_v0 = vld [vmem:[%s4401_s0 + $0x98] ss:$12 sps:$4 sm:$0xff]  }
  0x3e   :  { %898 = vmatpush1.bf16.msra.mxu0 %v2418_v18  ;;  %2401 = vmatpush1.bf16.msra.mxu1 %v2418_v18  ;;  %v2508_v18 = vld [vmem:[%s4401_s0 + $0x170] ss:$12 sps:$4 sm:$0xff]  }
  0x3f   :  { %2302 = vmatprep.subr.bf16.mxu1 %v2443_v19 }
  0x41   :  { %900 = vmatmul.mubr.bf16.vlgmr.msra.gmra.mrb[0].mxu0 %v2419_v20  ;;  %1092 = vmatmul.mubr.bf16.vlgmr.msra.gmra.mrb[0].mxu1 %v2422_v21  ;;  %v2511_v20 = vld [vmem:[%s4401_s0 + $0x188] ss:$12 sps:$4 sm:$0xff]   ;;  %v2512_v21 = vld [vmem:[%s4401_s0 + $0x180] ss:$12 sps:$4 sm:$0xff]  }
  0x42   :  { %907 = vmatprep.mubr.bf16.mxu0 %v2425_v22  ;;  %1099 = vmatprep.mubr.bf16.mxu1 %v2427_v23  ;;  %v2513_v22 = vld [vmem:[%s4401_s0 + $0x1a0] ss:$12 sps:$4 sm:$0xff]   ;;  %v2514_v23 = vld [vmem:[%s4401_s0 + $0x19c] ss:$12 sps:$4 sm:$0xff]  }
  0x43   :  { %2303 = vmatpush3.bf16.msra.mxu1 %v2443_v19  ;;  %v2509_v19 = vld [vmem:[%s4401_s0 + $0x184] ss:$12 sps:$4 sm:$0xff]  }
  0x44   :  { %2304 = vmatprep.subr.bf16.mxu1 %v2468_v24 }
  0x47   :  { %2305 = vmatpush3.bf16.msra.mxu1 %v2468_v24  ;;  %v2516_v24 = vld [vmem:[%s4401_s0 + $0x1b8] ss:$12 sps:$4 sm:$0xff]  }
  0x49   :  { %908 = vmatmul.mubr.bf16.gmra.mrb[4].mxu0 %v2429_v25  ;;  %1100 = vmatmul.mubr.bf16.gmra.mrb[4].mxu1 %v2430_v26  ;;  %v2517_v25 = vld [vmem:[%s4401_s0 + $0x198] ss:$12 sps:$4 sm:$0xff]   ;;  %v2518_v26 = vld [vmem:[%s4401_s0 + $0x1d0] ss:$12 sps:$4 sm:$0xff]  }
  0x4a   :  { %915 = vmatprep.mubr.bf16.mxu0 %v2431_v27  ;;  %1107 = vmatprep.mubr.bf16.mxu1 %v2433_v28  ;;  %v2519_v27 = vld [vmem:[%s4401_s0 + $0x1b4] ss:$12 sps:$4 sm:$0xff]  }
  0x4b   :  { %v2521_v28 = vld [vmem:[%s4401_s0 + $0x1e8] ss:$12 sps:$4 sm:$0xff]  }
  0x51   :  { %916 = vmatmul.mubr.bf16.gmra.mrb[8].mxu0 %v2435_v29  ;;  %1108 = vmatmul.mubr.bf16.gmra.mrb[8].mxu1 %v2436_v30  ;;  %v2522_v29 = vld [vmem:[%s4401_s0 + $0x1b0] ss:$12 sps:$4 sm:$0xff]   ;;  %v2523_v30 = vld [vmem:[%s4401_s0 + $0x200] ss:$12 sps:$4 sm:$0xff]  }
  0x52   :  { %923 = vmatprep.mubr.bf16.mxu0 %v2437_v31  ;;  %1115 = vmatprep.mubr.bf16.mxu1 %v2439_v32  ;;  %v2524_v31 = vld [vmem:[%s4401_s0 + $0x1cc] ss:$12 sps:$4 sm:$0xff]  }
  0x53   :  { %v2526_v32 = vld [vmem:[%s4401_s0 + $0x218] ss:$12 sps:$4 sm:$0xff]  }
  0x59   :  { %924 = vmatmul.mubr.bf16.gmra.mrb[12].mxu0 %v2441_v33  ;;  %1116 = vmatmul.mubr.bf16.gmra.mrb[12].mxu1 %v2442_v34  ;;  %v2527_v33 = vld [vmem:[%s4401_s0 + $0x1c8] ss:$12 sps:$4 sm:$0xff]   ;;  %v2528_v34 = vld [vmem:[%s4401_s0 + $0x230] ss:$12 sps:$4 sm:$0xff]  }
  0x5a   :  { %931 = vmatprep.mubr.bf16.mxu0 %v2444_v35  ;;  %1123 = vmatprep.mubr.bf16.mxu1 %v2446_v36  ;;  %v2529_v35 = vld [vmem:[%s4401_s0 + $0x1e4] ss:$12 sps:$4 sm:$0xff]   ;;  %v2531_v36 = vld [vmem:[%s4401_s0 + $0x248] ss:$12 sps:$4 sm:$0xff]  }
  0x61   :  { %932 = vmatmul.mubr.bf16.gmra.mrb[16].mxu0 %v2448_v37  ;;  %1124 = vmatmul.mubr.bf16.gmra.mrb[16].mxu1 %v2449_v38  ;;  %v2532_v37 = vld [vmem:[%s4401_s0 + $0x1e0] ss:$12 sps:$4 sm:$0xff]  }
  0x62   :  { %939 = vmatprep.mubr.bf16.mxu0 %v2450_v39  ;;  %1131 = vmatprep.mubr.bf16.mxu1 %v2452_v40  ;;  %v2533_v38 = vld [vmem:[%s4401_s0 + $0x260] ss:$12 sps:$4 sm:$0xff]   ;;  %v2534_v39 = vld [vmem:[%s4401_s0 + $0x1fc] ss:$12 sps:$4 sm:$0xff]   ;;  %v2536_v40 = vld [vmem:[%s4401_s0 + $0x278] ss:$12 sps:$4 sm:$0xff]  }
  0x69   :  { %940 = vmatmul.mubr.bf16.gmra.mrb[20].mxu0 %v2454_v41  ;;  %1132 = vmatmul.mubr.bf16.gmra.mrb[20].mxu1 %v2455_v42  ;;  %v2537_v41 = vld [vmem:[%s4401_s0 + $0x1f8] ss:$12 sps:$4 sm:$0xff]   ;;  %v2538_v42 = vld [vmem:[%s4401_s0 + $0x290] ss:$12 sps:$4 sm:$0xff]  }
  0x6a   :  { %947 = vmatprep.mubr.bf16.mxu0 %v2456_v43  ;;  %1139 = vmatprep.mubr.bf16.mxu1 %v2458_v44  ;;  %v2539_v43 = vld [vmem:[%s4401_s0 + $0x214] ss:$12 sps:$4 sm:$0xff]  }
  0x6b   :  { %v2541_v44 = vld [vmem:[%s4401_s0 + $0x2a8] ss:$12 sps:$4 sm:$0xff]  }
  0x71   :  { %948 = vmatmul.mubr.bf16.gmra.mrb[24].mxu0 %v2460_v45  ;;  %1140 = vmatmul.mubr.bf16.gmra.mrb[24].mxu1 %v2461_v46  ;;  %v2542_v45 = vld [vmem:[%s4401_s0 + $0x210] ss:$12 sps:$4 sm:$0xff]   ;;  %v2543_v46 = vld [vmem:[%s4401_s0 + $0x2c0] ss:$12 sps:$4 sm:$0xff]  }
  0x72   :  { %955 = vmatprep.mubr.bf16.mxu0 %v2462_v47  ;;  %1147 = vmatprep.mubr.bf16.mxu1 %v2464_v48  ;;  %v2544_v47 = vld [vmem:[%s4401_s0 + $0x22c] ss:$12 sps:$4 sm:$0xff]  }
  0x73   :  { %v2546_v48 = vld [vmem:[%s4401_s0 + $0x2d8] ss:$12 sps:$4 sm:$0xff]  }
  0x79   :  { %956 = vmatmul.mubr.bf16.gmra.mrb[28].mxu0 %v2466_v49  ;;  %1148 = vmatmul.mubr.bf16.gmra.mrb[28].mxu1 %v2467_v50  ;;  %v2547_v49 = vld [vmem:[%s4401_s0 + $0x228] ss:$12 sps:$4 sm:$0xff]   ;;  %v2548_v50 = vld [vmem:[%s4401_s0 + $0x2f0] ss:$12 sps:$4 sm:$0xff]  }
  0x7a   :  { %963 = vmatprep.mubr.bf16.mxu0 %v2469_v51  ;;  %2306 = vmatprep.mubr.msk.bf16.mxu1 %vm770_vm0, %v2471_v52 }
  0x81   :  { %964 = vmatmul.mubr.bf16.gmra.mrb[32].mxu0 %v2472_v53  ;;  %2307 = vmatmul.mubr.msk.bf16.vlgmr.msra.gmra.mrb[32].mxu1 %vm770_vm0, %v2473_v54 }
  0x82   :  { %971 = vmatprep.mubr.bf16.mxu0 %v2474_v55  ;;  %2310 = vmatprep.mubr.msk.bf16.mxu1 %vm770_vm0, %v2476_v56 }
  0x89   :  { %972 = vmatmul.mubr.bf16.gmra.mrb[36].mxu0 %v2477_v57  ;;  %2311 = vmatmul.mubr.msk.bf16.gmra.mrb[36].mxu1 %vm770_vm0, %v2478_v58 }
  0x8a   :  { %979 = vmatprep.mubr.bf16.mxu0 %v2479_v59  ;;  %2314 = vmatprep.mubr.msk.bf16.mxu1 %vm770_vm0, %v2481_v60 }
  0x91   :  { %980 = vmatmul.mubr.bf16.gmra.mrb[40].mxu0 %v2482_v61  ;;  %2315 = vmatmul.mubr.msk.bf16.gmra.mrb[40].mxu1 %vm770_vm0, %v2483_v62 }
  0x92   :  { %987 = vmatprep.mubr.bf16.mxu0 %v2484_v63  ;;  %2318 = vmatprep.mubr.msk.bf16.mxu1 %vm770_vm0, %v2486_v0 }
  0x99   :  { %988 = vmatmul.mubr.bf16.gmra.mrb[44].mxu0 %v2487_v1  ;;  %2319 = vmatmul.mubr.msk.bf16.gmra.mrb[44].mxu1 %vm770_vm0, %v2488_v2 }
  0x9a   :  { %995 = vmatprep.mubr.bf16.mxu0 %v2489_v3  ;;  %2322 = vmatprep.mubr.msk.bf16.mxu1 %vm770_vm0, %v2491_v4 }
  0xa1   :  { %996 = vmatmul.mubr.bf16.gmra.mrb[48].mxu0 %v2492_v5  ;;  %2323 = vmatmul.mubr.msk.bf16.gmra.mrb[48].mxu1 %vm770_vm0, %v2493_v6 }
  0xa2   :  { %1003 = vmatprep.mubr.bf16.mxu0 %v2494_v7  ;;  %2326 = vmatprep.mubr.msk.bf16.mxu1 %vm770_vm0, %v2496_v8 }
  0xa9   :  { %1004 = vmatmul.mubr.bf16.gmra.mrb[52].mxu0 %v2497_v9  ;;  %2327 = vmatmul.mubr.msk.bf16.gmra.mrb[52].mxu1 %vm770_vm0, %v2498_v10 }
  0xaa   :  { %1011 = vmatprep.mubr.bf16.mxu0 %v2499_v11  ;;  %2330 = vmatprep.mubr.msk.bf16.mxu1 %vm770_vm0, %v2501_v12 }
  0xb1   :  { %1012 = vmatmul.mubr.bf16.gmra.mrb[56].mxu0 %v2502_v13  ;;  %2331 = vmatmul.mubr.msk.bf16.gmra.mrb[56].mxu1 %vm770_vm0, %v2503_v14 }
  0xb2   :  { %1019 = vmatprep.mubr.bf16.mxu0 %v2504_v15  ;;  %2334 = vmatprep.mubr.msk.bf16.mxu1 %vm770_vm0, %v2506_v16 }
  0xb9   :  { %1020 = vmatmul.mubr.bf16.gmra.mrb[60].mxu0 %v2507_v17  ;;  %2335 = vmatmul.mubr.msk.bf16.gmra.mrb[60].mxu1 %vm770_vm0, %v2508_v18 }
  0xba   :  { %1027 = vmatprep.mubr.bf16.mxu0 %v2509_v19  ;;  %2338 = vmatprep.mubr.msk.bf16.mxu1 %vm770_vm0, %v2511_v20 }
  0xc1   :  { %1028 = vmatmul.mubr.bf16.gmra.mrb[64].mxu0 %v2512_v21  ;;  %2339 = vmatmul.mubr.msk.bf16.gmra.mrb[64].mxu1 %vm770_vm0, %v2513_v22 }
  0xc2   :  { %1035 = vmatprep.mubr.bf16.mxu0 %v2514_v23  ;;  %2342 = vmatprep.mubr.msk.bf16.mxu1 %vm770_vm0, %v2516_v24 }
  0xc9   :  { %1036 = vmatmul.mubr.bf16.gmra.mrb[68].mxu0 %v2517_v25  ;;  %2343 = vmatmul.mubr.msk.bf16.gmra.mrb[68].mxu1 %vm770_vm0, %v2518_v26 }
  0xca   :  { %1043 = vmatprep.mubr.bf16.mxu0 %v2519_v27  ;;  %2346 = vmatprep.mubr.msk.bf16.mxu1 %vm770_vm0, %v2521_v28 }
  0xd1   :  { %1044 = vmatmul.mubr.bf16.gmra.mrb[72].mxu0 %v2522_v29  ;;  %2347 = vmatmul.mubr.msk.bf16.gmra.mrb[72].mxu1 %vm770_vm0, %v2523_v30 }
  0xd2   :  { %1051 = vmatprep.mubr.bf16.mxu0 %v2524_v31  ;;  %2350 = vmatprep.mubr.msk.bf16.mxu1 %vm770_vm0, %v2526_v32 }
  0xd9   :  { %1052 = vmatmul.mubr.bf16.gmra.mrb[76].mxu0 %v2527_v33  ;;  %2351 = vmatmul.mubr.msk.bf16.gmra.mrb[76].mxu1 %vm770_vm0, %v2528_v34 }
  0xda   :  { %1059 = vmatprep.mubr.bf16.mxu0 %v2529_v35  ;;  %2354 = vmatprep.mubr.msk.bf16.mxu1 %vm770_vm0, %v2531_v36 }
  0xe1   :  { %1060 = vmatmul.mubr.bf16.gmra.mrb[80].mxu0 %v2532_v37  ;;  %2355 = vmatmul.mubr.msk.bf16.gmra.mrb[80].mxu1 %vm770_vm0, %v2533_v38 }
  0xe2   :  { %1067 = vmatprep.mubr.bf16.mxu0 %v2534_v39  ;;  %2358 = vmatprep.mubr.msk.bf16.mxu1 %vm770_vm0, %v2536_v40 }
  0xe9   :  { %1068 = vmatmul.mubr.bf16.gmra.mrb[84].mxu0 %v2537_v41  ;;  %2359 = vmatmul.mubr.msk.bf16.gmra.mrb[84].mxu1 %vm770_vm0, %v2538_v42 }
  0xea   :  { %1075 = vmatprep.mubr.bf16.mxu0 %v2539_v43  ;;  %2362 = vmatprep.mubr.msk.bf16.mxu1 %vm770_vm0, %v2541_v44 }
  0xf1   :  { %1076 = vmatmul.mubr.bf16.gmra.mrb[88].mxu0 %v2542_v45  ;;  %2363 = vmatmul.mubr.msk.bf16.gmra.mrb[88].mxu1 %vm770_vm0, %v2543_v46 }
  0xf2   :  { %1083 = vmatprep.mubr.bf16.mxu0 %v2544_v47  ;;  %2366 = vmatprep.mubr.msk.bf16.mxu1 %vm770_vm0, %v2546_v48 }
  0xf9   :  { %1084 = vmatmul.mubr.bf16.gmra.mrb[92].mxu0 %v2547_v49  ;;  %2367 = vmatmul.mubr.msk.bf16.gmra.mrb[92].mxu1 %vm770_vm0, %v2548_v50 }
 0x114   :  { %v2983_v51 = vpop.f32.mrb[0].mxu0  ;;  %v2985_v52 = vpop.f32.mrb[0].mxu1 }
 0x115   :  { %v903_v53 = vpop.f32.mrb[1].mxu0  ;;  %v1095_v54 = vpop.f32.mrb[1].mxu1 }
 0x116   :  { %v2987_v55 = vpop.f32.mrb[2].mxu0  ;;  %v2989_v56 = vpop.f32.mrb[2].mxu1 }
 0x117   :  { %v906_v57 = vpop.f32.mrb[3].mxu0  ;;  %v1098_v58 = vpop.f32.mrb[3].mxu1 }
 0x11c   :  { %v909_v59 = vpop.f32.mrb[4].mxu0  ;;  %v2991_v60 = vpop.f32.mrb[4].mxu1 }
 0x11d   :  { %v911_v61 = vpop.f32.mrb[5].mxu0  ;;  %v1103_v62 = vpop.f32.mrb[5].mxu1 }
 0x11e   :  { %v912_v63 = vpop.f32.mrb[6].mxu0  ;;  %v2993_v0 = vpop.f32.mrb[6].mxu1 }
 0x11f   :  { %v914_v1 = vpop.f32.mrb[7].mxu0  ;;  %v1106_v2 = vpop.f32.mrb[7].mxu1 }
 0x124   :  { %v2995_v3 = vpop.f32.mrb[8].mxu0  ;;  %v2997_v4 = vpop.f32.mrb[8].mxu1 }
 0x125   :  { %v919_v5 = vpop.f32.mrb[9].mxu0  ;;  %v1111_v6 = vpop.f32.mrb[9].mxu1 }
 0x126   :  { %v2999_v7 = vpop.f32.mrb[10].mxu0  ;;  %v3001_v8 = vpop.f32.mrb[10].mxu1 }
 0x127   :  { %v922_v9 = vpop.f32.mrb[11].mxu0  ;;  %v1114_v10 = vpop.f32.mrb[11].mxu1 }
 0x12c   :  { %v925_v11 = vpop.f32.mrb[12].mxu0  ;;  %v3003_v12 = vpop.f32.mrb[12].mxu1 }
 0x12d   :  { %v927_v13 = vpop.f32.mrb[13].mxu0  ;;  %v1119_v14 = vpop.f32.mrb[13].mxu1 }
 0x12e   :  { %v3005_v15 = vpop.f32.mrb[14].mxu0  ;;  %v3007_v16 = vpop.f32.mrb[14].mxu1 }
 0x12f   :  { %v930_v17 = vpop.f32.mrb[15].mxu0  ;;  %v1122_v18 = vpop.f32.mrb[15].mxu1 }
 0x134   :  { %v3009_v19 = vpop.f32.mrb[16].mxu0  ;;  %v3011_v20 = vpop.f32.mrb[16].mxu1 }
 0x135   :  { %v935_v21 = vpop.f32.mrb[17].mxu0  ;;  %v1127_v22 = vpop.f32.mrb[17].mxu1 }
 0x136   :  { %v3013_v23 = vpop.f32.mrb[18].mxu0  ;;  %v3015_v24 = vpop.f32.mrb[18].mxu1 }
 0x137   :  { %v938_v25 = vpop.f32.mrb[19].mxu0  ;;  %v1130_v26 = vpop.f32.mrb[19].mxu1 }
 0x13c   :  { %v3017_v27 = vpop.f32.mrb[20].mxu0  ;;  %v3019_v28 = vpop.f32.mrb[20].mxu1 }
 0x13d   :  { %v943_v29 = vpop.f32.mrb[21].mxu0  ;;  %v1135_v30 = vpop.f32.mrb[21].mxu1 }
 0x13e   :  { %v3021_v31 = vpop.f32.mrb[22].mxu0  ;;  %v3023_v32 = vpop.f32.mrb[22].mxu1 }
 0x13f   :  { %v946_v33 = vpop.f32.mrb[23].mxu0  ;;  %v1138_v34 = vpop.f32.mrb[23].mxu1 }
 0x144   :  { %v3025_v35 = vpop.f32.mrb[24].mxu0  ;;  %v3027_v36 = vpop.f32.mrb[24].mxu1 }
 0x145   :  { %v951_v37 = vpop.f32.mrb[25].mxu0  ;;  %v1143_v38 = vpop.f32.mrb[25].mxu1 }
 0x146   :  { %v3029_v39 = vpop.f32.mrb[26].mxu0  ;;  %v3031_v40 = vpop.f32.mrb[26].mxu1 }
 0x147   :  { %v954_v41 = vpop.f32.mrb[27].mxu0  ;;  %v1146_v42 = vpop.f32.mrb[27].mxu1 }
 0x14c   :  { %v3033_v43 = vpop.f32.mrb[28].mxu0  ;;  %v3035_v44 = vpop.f32.mrb[28].mxu1 }
 0x14d   :  { %v959_v45 = vpop.f32.mrb[29].mxu0  ;;  %v1151_v46 = vpop.f32.mrb[29].mxu1 }
 0x14e   :  { %v3037_v47 = vpop.f32.mrb[30].mxu0  ;;  %v3039_v48 = vpop.f32.mrb[30].mxu1 }
 0x14f   :  { %v962_v49 = vpop.f32.mrb[31].mxu0  ;;  %v1154_v50 = vpop.f32.mrb[31].mxu1 }
 0x154   :  { %v3041_v53 = vpop.f32.mrb[32].mxu0  ;;  %v2308_v54 = vpop.f32.mrb[32].mxu1 }
 0x155   :  { %v3043_v57 = vadd.f32 %v2308_v54, %v909_v59  ;;  %v967_v58 = vpop.f32.mrb[33].mxu0  ;;  %v1190_v61 = vpop.f32.mrb[33].mxu1 }
 0x156   :  { %v3046_v62 = vadd.f32 %v1190_v61, %v2983_v51  ;;  %v3048_v1 = vpop.f32.mrb[34].mxu0  ;;  %v2309_v2 = vpop.f32.mrb[34].mxu1 }
 0x157   :  { %v3050_v5 = vadd.f32 %v2309_v2, %v912_v63  ;;  %v970_v6 = vpop.f32.mrb[35].mxu0  ;;  %v1193_v9 = vpop.f32.mrb[35].mxu1  ;;  %v1449_v51 = vsel %vm1445_vm1, %v3043_v57, 0.0 }
 0x158   :  { %v3053_v10 = vadd.f32 %v1193_v9, %v2987_v55  ;;  %v1446_v59 = vsel %vm1445_vm1, %v3046_v62, 0.0 }
 0x159   :  { %v1451_v55 = vsel %vm1445_vm1, %v3050_v5, 0.0 }
 0x15a   :  { %v1447_v13 = vsel %vm1445_vm1, %v3053_v10, 0.0 }
 0x15b   :  { %v1448_v14 = vadd.f32 %v1447_v13, %v1446_v59 }
 0x15c   :  { %v3061_v17 = vpop.f32.mrb[36].mxu0  ;;  %v2312_v18 = vpop.f32.mrb[36].mxu1 }
 0x15d   :  { %v1450_v63 = vadd.f32 %v1449_v51, %v1448_v14  ;;  %v3063_v21 = vadd.f32 %v2312_v18, %v925_v11  ;;  %v975_v22 = vpop.f32.mrb[37].mxu0  ;;  %v1206_v25 = vpop.f32.mrb[37].mxu1 }
 0x15e   :  { %v3068_v26 = vadd.f32 %v1206_v25, %v2995_v3  ;;  %v3070_v29 = vpop.f32.mrb[38].mxu0  ;;  %v2313_v30 = vpop.f32.mrb[38].mxu1 }
 0x15f   :  { %v1452_v33 = vadd.f32 %v1451_v55, %v1450_v63  ;;  %v3073_v34 = vadd.f32 %v2313_v30, %v3005_v15  ;;  %v978_v37 = vpop.f32.mrb[39].mxu0  ;;  %v1209_v38 = vpop.f32.mrb[39].mxu1  ;;  %v1457_v46 = vsel %vm1445_vm1, %v3063_v21, 0.0 }
 0x160   :  { %4449 = vst [vmem:[#allocation2_spill] sm:$0xff] %v3068_v26  ;;  %v1453_v11 = vsel %vm1445_vm1, %v3068_v26, 0.0  ;;  %v3078_v41 = vadd.f32 %v1209_v38, %v2999_v7 }
 0x161   :  { %v1454_v42 = vadd.f32 %v1453_v11, %v1452_v33  ;;  %v1459_v7 = vsel %vm1445_vm1, %v3073_v34, 0.0 }
 0x162   :  { %4450 = vst [vmem:[#allocation3_spill] sm:$0xff] %v3078_v41  ;;  %v1455_v3 = vsel %vm1445_vm1, %v3078_v41, 0.0 }
 0x163   :  { %v1456_v45 = vadd.f32 %v1455_v3, %v1454_v42 }
 0x164   :  { %v3084_v49 = vpop.f32.mrb[40].mxu0  ;;  %v2316_v15 = vpop.f32.mrb[40].mxu1 }
 0x165   :  { %v1458_v50 = vadd.f32 %v1457_v46, %v1456_v45  ;;  %v3087_v54 = vadd.f32 %v2316_v15, %v3017_v27  ;;  %v983_v58 = vpop.f32.mrb[41].mxu0  ;;  %v1222_v61 = vpop.f32.mrb[41].mxu1 }
 0x166   :  { %v3092_v2 = vadd.f32 %v1222_v61, %v3009_v19  ;;  %v3094_v6 = vpop.f32.mrb[42].mxu0  ;;  %v2317_v9 = vpop.f32.mrb[42].mxu1 }
 0x167   :  { %v1460_v59 = vadd.f32 %v1459_v7, %v1458_v50  ;;  %v3097_v13 = vadd.f32 %v2317_v9, %v3021_v31  ;;  %v986_v14 = vpop.f32.mrb[43].mxu0  ;;  %v1225_v51 = vpop.f32.mrb[43].mxu1  ;;  %v1465_v25 = vsel %vm1445_vm1, %v3087_v54, 0.0 }
 0x168   :  { %v1461_v27 = vsel %vm1445_vm1, %v3092_v2, 0.0  ;;  %v3102_v18 = vadd.f32 %v1225_v51, %v3013_v23 }
 0x169   :  { %v1462_v63 = vadd.f32 %v1461_v27, %v1460_v59  ;;  %v1467_v23 = vsel %vm1445_vm1, %v3097_v13, 0.0 }
 0x16a   :  { %v1463_v19 = vsel %vm1445_vm1, %v3102_v18, 0.0 }
 0x16b   :  { %v1464_v22 = vadd.f32 %v1463_v19, %v1462_v63 }
 0x16c   :  { %v989_v55 = vpop.f32.mrb[44].mxu0  ;;  %v2320_v30 = vpop.f32.mrb[44].mxu1 }
 0x16d   :  { %v1466_v31 = vadd.f32 %v1465_v25, %v1464_v22  ;;  %v3109_v33 = vadd.f32 %v2320_v30, %v3033_v43  ;;  %v991_v37 = vpop.f32.mrb[45].mxu0  ;;  %v1238_v38 = vpop.f32.mrb[45].mxu1 }
 0x16e   :  { %v3114_v11 = vadd.f32 %v1238_v38, %v3025_v35  ;;  %v992_v42 = vpop.f32.mrb[46].mxu0  ;;  %v2321_v3 = vpop.f32.mrb[46].mxu1 }
 0x16f   :  { %v1468_v45 = vadd.f32 %v1467_v23, %v1466_v31  ;;  %v3117_v46 = vadd.f32 %v2321_v3, %v3037_v47  ;;  %v994_v15 = vpop.f32.mrb[47].mxu0  ;;  %v1241_v50 = vpop.f32.mrb[47].mxu1  ;;  %v1473_v9 = vsel %vm1445_vm1, %v3109_v33, 0.0 }
 0x170   :  { %v1469_v43 = vsel %vm1445_vm1, %v3114_v11, 0.0  ;;  %v3122_v58 = vadd.f32 %v1241_v50, %v3029_v39 }
 0x171   :  { %v1470_v61 = vadd.f32 %v1469_v43, %v1468_v45  ;;  %v1475_v39 = vsel %vm1445_vm1, %v3117_v46, 0.0 }
 0x172   :  { %v1471_v7 = vsel %vm1445_vm1, %v3122_v58, 0.0 }
 0x173   :  { %v1472_v35 = vadd.f32 %v1471_v7, %v1470_v61 }
 0x174   :  { %v997_v59 = vpop.f32.mrb[48].mxu0  ;;  %v2324_v14 = vpop.f32.mrb[48].mxu1 }
 0x175   :  { %v1474_v47 = vadd.f32 %v1473_v9, %v1472_v35  ;;  %v3129_v51 = vadd.f32 %v2324_v14, %v3061_v17  ;;  %v999_v27 = vpop.f32.mrb[49].mxu0  ;;  %v1254_v63 = vpop.f32.mrb[49].mxu1 }
 0x176   :  { %v3134_v19 = vadd.f32 %v1254_v63, %v3041_v53  ;;  %v1000_v22 = vpop.f32.mrb[50].mxu0  ;;  %v2325_v25 = vpop.f32.mrb[50].mxu1 }
 0x177   :  { %v1476_v30 = vadd.f32 %v1475_v39, %v1474_v47  ;;  %v3137_v31 = vadd.f32 %v2325_v25, %v3070_v29  ;;  %v1002_v37 = vpop.f32.mrb[51].mxu0  ;;  %v1257_v38 = vpop.f32.mrb[51].mxu1  ;;  %v1481_v15 = vsel %vm1445_vm1, %v3129_v51, 0.0 }
 0x178   :  { %v1477_v17 = vsel %vm1445_vm1, %v3134_v19, 0.0  ;;  %v3142_v23 = vadd.f32 %v1257_v38, %v3048_v1 }
 0x179   :  { %4451 = vst [vmem:[#allocation4_spill] sm:$0xff] %v3137_v31  ;;  %v1478_v3 = vadd.f32 %v1477_v17, %v1476_v30  ;;  %v1483_v9 = vsel %vm1445_vm1, %v3137_v31, 0.0 }
 0x17a   :  { %v1479_v45 = vsel %vm1445_vm1, %v3142_v23, 0.0 }
 0x17b   :  { %v1480_v53 = vadd.f32 %v1479_v45, %v1478_v3 }
 0x17c   :  { %v1005_v50 = vpop.f32.mrb[52].mxu0  ;;  %v2328_v43 = vpop.f32.mrb[52].mxu1 }
 0x17d   :  { %v1482_v29 = vadd.f32 %v1481_v15, %v1480_v53  ;;  %v3148_v61 = vadd.f32 %v2328_v43, %v989_v55  ;;  %v1007_v7 = vpop.f32.mrb[53].mxu0  ;;  %v1270_v35 = vpop.f32.mrb[53].mxu1 }
 0x17e   :  { %v3153_v1 = vadd.f32 %v1270_v35, %v3084_v49  ;;  %v1008_v14 = vpop.f32.mrb[54].mxu0  ;;  %v2329_v47 = vpop.f32.mrb[54].mxu1 }
 0x17f   :  { %4452 = vst [vmem:[#allocation5_spill] sm:$0xff] %v3148_v61  ;;  %v1484_v27 = vadd.f32 %v1483_v9, %v1482_v29  ;;  %v3155_v63 = vadd.f32 %v2329_v47, %v992_v42  ;;  %v1010_v39 = vpop.f32.mrb[55].mxu0  ;;  %v1273_v25 = vpop.f32.mrb[55].mxu1  ;;  %v1489_v49 = vsel %vm1445_vm1, %v3148_v61, 0.0 }
 0x180   :  { %4453 = vst [vmem:[#allocation6_spill] sm:$0xff] %v3153_v1  ;;  %v1485_v30 = vsel %vm1445_vm1, %v3153_v1, 0.0  ;;  %v3160_v55 = vadd.f32 %v1273_v25, %v3094_v6 }
 0x181   :  { %4454 = vst [vmem:[#allocation7_spill] sm:$0xff] %v3155_v63  ;;  %v1486_v37 = vadd.f32 %v1485_v30, %v1484_v27  ;;  %v1491_v29 = vsel %vm1445_vm1, %v3155_v63, 0.0 }
 0x182   :  { %4455 = vst [vmem:[#allocation8_spill] sm:$0xff] %v3160_v55  ;;  %v1487_v38 = vsel %vm1445_vm1, %v3160_v55, 0.0 }
 0x183   :  { %v1488_v17 = vadd.f32 %v1487_v38, %v1486_v37 }
 0x184   :  { %v1013_v3 = vpop.f32.mrb[56].mxu0  ;;  %v2332_v45 = vpop.f32.mrb[56].mxu1 }
 0x185   :  { %v1490_v42 = vadd.f32 %v1489_v49, %v1488_v17  ;;  %v3166_v53 = vadd.f32 %v2332_v45, %v1005_v50  ;;  %v1015_v15 = vpop.f32.mrb[57].mxu0  ;;  %v1286_v43 = vpop.f32.mrb[57].mxu1 }
 0x186   :  { %v3170_v6 = vadd.f32 %v1286_v43, %v997_v59  ;;  %v1016_v7 = vpop.f32.mrb[58].mxu0  ;;  %v2333_v35 = vpop.f32.mrb[58].mxu1 }
 0x187   :  { %4456 = vst [vmem:[#allocation9_spill] sm:$0xff] %v3166_v53  ;;  %v1492_v9 = vadd.f32 %v1491_v29, %v1490_v42  ;;  %v3172_v47 = vadd.f32 %v2333_v35, %v1008_v14  ;;  %v1018_v27 = vpop.f32.mrb[59].mxu0  ;;  %v1289_v39 = vpop.f32.mrb[59].mxu1  ;;  %v1497_v49 = vsel %vm1445_vm1, %v3166_v53, 0.0 }
 0x188   :  { %4457 = vst [vmem:[#allocation10_spill] sm:$0xff] %v3170_v6  ;;  %v1493_v25 = vsel %vm1445_vm1, %v3170_v6, 0.0  ;;  %v3176_v30 = vadd.f32 %v1289_v39, %v1000_v22 }
 0x189   :  { %4458 = vst [vmem:[#allocation11_spill] sm:$0xff] %v3172_v47  ;;  %v1494_v50 = vadd.f32 %v1493_v25, %v1492_v9  ;;  %v1499_v25 = vsel %vm1445_vm1, %v3172_v47, 0.0 }
 0x18a   :  { %4459 = vst [vmem:[#allocation12_spill] sm:$0xff] %v3176_v30  ;;  %v1495_v37 = vsel %vm1445_vm1, %v3176_v30, 0.0 }
 0x18b   :  { %v1496_v38 = vadd.f32 %v1495_v37, %v1494_v50 }
 0x18c   :  { %v1021_v17 = vpop.f32.mrb[60].mxu0  ;;  %v2336_v59 = vpop.f32.mrb[60].mxu1 }
 0x18d   :  { %v3182_v45 = vadd.f32 %v2336_v59, %v1021_v17  ;;  %v1023_v14 = vpop.f32.mrb[61].mxu0  ;;  %v1302_v42 = vpop.f32.mrb[61].mxu1  ;;  %v1498_v15 = vadd.f32 %v1497_v49, %v1496_v38 }
 0x18e   :  { %v3184_v43 = vadd.f32 %v1302_v42, %v1013_v3  ;;  %v1024_v29 = vpop.f32.mrb[62].mxu0  ;;  %v2337_v22 = vpop.f32.mrb[62].mxu1 }
 0x18f   :  { %4460 = vst [vmem:[#allocation13_spill] sm:$0xff] %v3182_v45  ;;  %v3186_v35 = vadd.f32 %v2337_v22, %v1024_v29  ;;  %v1026_v9 = vpop.f32.mrb[63].mxu0  ;;  %v1305_v27 = vpop.f32.mrb[63].mxu1  ;;  %v1500_v50 = vadd.f32 %v1499_v25, %v1498_v15 }
 0x190   :  { %4461 = vst [vmem:[#allocation14_spill] sm:$0xff] %v3184_v43  ;;  %v3188_v39 = vadd.f32 %v1305_v27, %v1016_v7  ;;  %v1501_v37 = vsel %vm1445_vm1, %v3184_v43, 0.0  ;;  %v1505_v43 = vsel %vm1445_vm1, %v3182_v45, 0.0 }
 0x191   :  { %4462 = vst [vmem:[#allocation15_spill] sm:$0xff] %v3186_v35  ;;  %v1502_v49 = vadd.f32 %v1501_v37, %v1500_v50 }
 0x192   :  { %4463 = vst [vmem:[#allocation16_spill] sm:$0xff] %v3188_v39  ;;  %v1503_v7 = vsel %vm1445_vm1, %v3188_v39, 0.0 }
 0x193   :  { %v1504_v15 = vadd.f32 %v1503_v7, %v1502_v49 }
 0x194   :  { %v1029_v17 = vpop.f32.mrb[64].mxu0  ;;  %v2340_v59 = vpop.f32.mrb[64].mxu1 }
 0x195   :  { %v1031_v38 = vpop.f32.mrb[65].mxu0  ;;  %v1318_v3 = vpop.f32.mrb[65].mxu1 }
 0x196   :  { %v3194_v14 = vadd.f32 %v1318_v3, %v1029_v17  ;;  %v1032_v42 = vpop.f32.mrb[66].mxu0  ;;  %v2341_v29 = vpop.f32.mrb[66].mxu1  ;;  %v1506_v17 = vadd.f32 %v1505_v43, %v1504_v15 }
 0x197   :  { %v1034_v22 = vpop.f32.mrb[67].mxu0  ;;  %v1321_v9 = vpop.f32.mrb[67].mxu1 }
 0x198   :  { %4464 = vst [vmem:[#allocation17_spill] sm:$0xff] %v3194_v14  ;;  %v3198_v27 = vadd.f32 %v1321_v9, %v1032_v42  ;;  %v1507_v42 = vsel %vm1445_vm1, %v3186_v35, 0.0  ;;  %v1509_v7 = vsel %vm1445_vm1, %v3194_v14, 0.0 }
 0x199   :  { %v1508_v49 = vadd.f32 %v1507_v42, %v1506_v17 }
 0x19a   :  { %4465 = vst [vmem:[#allocation18_spill] sm:$0xff] %v3198_v27 }
 0x19b   :  { %v1510_v43 = vadd.f32 %v1509_v7, %v1508_v49 }
 0x19c   :  { %v1037_v25 = vpop.f32.mrb[68].mxu0  ;;  %v2344_v47 = vpop.f32.mrb[68].mxu1 }
 0x19d   :  { %v3202_v38 = vadd.f32 %v2340_v59, %v1037_v25  ;;  %v1039_v50 = vpop.f32.mrb[69].mxu0  ;;  %v1334_v37 = vpop.f32.mrb[69].mxu1 }
 0x19e   :  { %v1040_v3 = vpop.f32.mrb[70].mxu0  ;;  %v2345_v53 = vpop.f32.mrb[70].mxu1 }
 0x19f   :  { %4466 = vst [vmem:[#allocation19_spill] sm:$0xff] %v3202_v38  ;;  %v3204_v30 = vadd.f32 %v2341_v29, %v1040_v3  ;;  %v1042_v39 = vpop.f32.mrb[71].mxu0  ;;  %v1337_v22 = vpop.f32.mrb[71].mxu1  ;;  %v1513_v17 = vsel %vm1445_vm1, %v3202_v38, 0.0 }
 0x1a0   :  { %v1511_v39 = vsel %vm1445_vm1, %v3198_v27, 0.0 }
 0x1a1   :  { %4467 = vst [vmem:[#allocation20_spill] sm:$0xff] %v3204_v30  ;;  %v1512_v42 = vadd.f32 %v1511_v39, %v1510_v43  ;;  %v1515_v49 = vsel %vm1445_vm1, %v3204_v30, 0.0 }
 0x1a3   :  { %v1514_v14 = vadd.f32 %v1513_v17, %v1512_v42 }
 0x1a4   :  { %v1045_v9 = vpop.f32.mrb[72].mxu0  ;;  %v2348_v45 = vpop.f32.mrb[72].mxu1 }
 0x1a5   :  { %v3210_v59 = vadd.f32 %v1334_v37, %v1045_v9  ;;  %v1047_v25 = vpop.f32.mrb[73].mxu0  ;;  %v1350_v50 = vpop.f32.mrb[73].mxu1  ;;  %v1516_v17 = vadd.f32 %v1515_v49, %v1514_v14 }
 0x1a6   :  { %v1048_v15 = vpop.f32.mrb[74].mxu0  ;;  %v2349_v6 = vpop.f32.mrb[74].mxu1 }
 0x1a7   :  { %4468 = vst [vmem:[#allocation21_spill] sm:$0xff] %v3210_v59  ;;  %v3214_v29 = vadd.f32 %v1337_v22, %v1048_v15  ;;  %v1050_v3 = vpop.f32.mrb[75].mxu0  ;;  %v1353_v35 = vpop.f32.mrb[75].mxu1  ;;  %v1517_v15 = vsel %vm1445_vm1, %v3210_v59, 0.0 }
 0x1a8   :  { %v1518_v42 = vadd.f32 %v1517_v15, %v1516_v17 }
 0x1a9   :  { %4469 = vst [vmem:[#allocation22_spill] sm:$0xff] %v3214_v29  ;;  %v1519_v38 = vsel %vm1445_vm1, %v3214_v29, 0.0 }
 0x1ac   :  { %v1053_v63 = vpop.f32.mrb[76].mxu0  ;;  %v3218_v37 = vpop.f32.mrb[76].mxu1 }
 0x1ad   :  { %v3222_v7 = vadd.f32 %v2344_v47, %v1053_v63  ;;  %v1055_v9 = vpop.f32.mrb[77].mxu0  ;;  %v1366_v25 = vpop.f32.mrb[77].mxu1 }
 0x1ae   :  { %v1056_v27 = vpop.f32.mrb[78].mxu0  ;;  %v3224_v22 = vpop.f32.mrb[78].mxu1 }
 0x1af   :  { %4470 = vst [vmem:[#allocation23_spill] sm:$0xff] %v3222_v7  ;;  %v3228_v3 = vadd.f32 %v2345_v53, %v1056_v27  ;;  %v1058_v43 = vpop.f32.mrb[79].mxu0  ;;  %v1369_v39 = vpop.f32.mrb[79].mxu1  ;;  %v1521_v47 = vsel %vm1445_vm1, %v3222_v7, 0.0  ;;  %v1520_v27 = vadd.f32 %v1519_v38, %v1518_v42 }
 0x1b4   :  { %v1061_v30 = vpop.f32.mrb[80].mxu0  ;;  %v2356_v63 = vpop.f32.mrb[80].mxu1 }
 0x1b5   :  { %v3234_v9 = vadd.f32 %v1350_v50, %v1061_v30  ;;  %v3237_v61 = vadd.f32 %v2356_v63, %v2991_v60  ;;  %v1063_v59 = vpop.f32.mrb[81].mxu0  ;;  %v1382_v53 = vpop.f32.mrb[81].mxu1  ;;  %v1522_v30 = vadd.f32 %v1521_v47, %v1520_v27  ;;  %v1523_v60 = vsel %vm1445_vm1, %v3228_v3, 0.0 }
 0x1b6   :  { %v3240_v43 = vadd.f32 %v1382_v53, %v2985_v52  ;;  %v1064_v14 = vpop.f32.mrb[82].mxu0  ;;  %v2357_v49 = vpop.f32.mrb[82].mxu1 }
 0x1b7   :  { %v3242_v15 = vadd.f32 %v1353_v35, %v1064_v14  ;;  %v3245_v17 = vadd.f32 %v2357_v49, %v2993_v0  ;;  %v1066_v29 = vpop.f32.mrb[83].mxu0  ;;  %v1385_v7 = vpop.f32.mrb[83].mxu1  ;;  %v1525_v52 = vsel %vm1445_vm1, %v3234_v9, 0.0  ;;  %v1524_v38 = vadd.f32 %v1523_v60, %v1522_v30 }
 0x1b8   :  { %v3248_v50 = vadd.f32 %v1385_v7, %v2989_v56 }
 0x1b9   :  { %v1526_v47 = vadd.f32 %v1525_v52, %v1524_v38  ;;  %v1527_v27 = vsel %vm1445_vm1, %v3242_v15, 0.0 }
 0x1bc   :  { %v1069_v59 = vpop.f32.mrb[84].mxu0  ;;  %v2360_v42 = vpop.f32.mrb[84].mxu1 }
 0x1bd   :  { %v3254_v35 = vadd.f32 %v2348_v45, %v1069_v59  ;;  %v3257_v0 = vadd.f32 %v2360_v42, %v3003_v12  ;;  %v1071_v29 = vpop.f32.mrb[85].mxu0  ;;  %v1398_v63 = vpop.f32.mrb[85].mxu1 }
 0x1be   :  { %v3260_v56 = vadd.f32 %v1398_v63, %v2997_v4  ;;  %v1072_v7 = vpop.f32.mrb[86].mxu0  ;;  %v2361_v53 = vpop.f32.mrb[86].mxu1  ;;  %v1528_v4 = vadd.f32 %v1527_v27, %v1526_v47 }
 0x1bf   :  { %v3264_v14 = vadd.f32 %v2349_v6, %v1072_v7  ;;  %v3267_v49 = vadd.f32 %v2361_v53, %v3007_v16  ;;  %v1074_v45 = vpop.f32.mrb[87].mxu0  ;;  %v1401_v30 = vpop.f32.mrb[87].mxu1  ;;  %v1529_v60 = vsel %vm1445_vm1, %v3254_v35, 0.0 }
 0x1c0   :  { %v3270_v12 = vadd.f32 %v1401_v30, %v3001_v8  ;;  %v1530_v52 = vadd.f32 %v1529_v60, %v1528_v4 }
 0x1c1   :  { %v1531_v42 = vsel %vm1445_vm1, %v3264_v14, 0.0 }
 0x1c2   :  { %v1532_v60 = vadd.f32 %v1531_v42, %v1530_v52 }
 0x1c4   :  { %v1077_v38 = vpop.f32.mrb[88].mxu0  ;;  %v2364_v59 = vpop.f32.mrb[88].mxu1 }
 0x1c5   :  { %v3276_v6 = vadd.f32 %v1366_v25, %v1077_v38  ;;  %v3279_v16 = vadd.f32 %v2364_v59, %v3019_v28  ;;  %v1079_v29 = vpop.f32.mrb[89].mxu0  ;;  %v1414_v63 = vpop.f32.mrb[89].mxu1 }
 0x1c6   :  { %v3282_v8 = vadd.f32 %v1414_v63, %v3011_v20  ;;  %v1080_v7 = vpop.f32.mrb[90].mxu0  ;;  %v2365_v53 = vpop.f32.mrb[90].mxu1 }
 0x1c7   :  { %v1533_v47 = vsel %vm1445_vm1, %v3276_v6, 0.0  ;;  %v3286_v27 = vadd.f32 %v1369_v39, %v1080_v7  ;;  %v3289_v45 = vadd.f32 %v2365_v53, %v3023_v32  ;;  %v1082_v25 = vpop.f32.mrb[91].mxu0  ;;  %v1417_v30 = vpop.f32.mrb[91].mxu1 }
 0x1c8   :  { %v3292_v28 = vadd.f32 %v1417_v30, %v3015_v24  ;;  %v1534_v4 = vadd.f32 %v1533_v47, %v1532_v60 }
 0x1c9   :  { %v1535_v20 = vsel %vm1445_vm1, %v3286_v27, 0.0 }
 0x1ca   :  { %v1536_v7 = vadd.f32 %v1535_v20, %v1534_v4  ;;  %v1541_v20 = vsel %vm1445_vm1, %v3240_v43, 0.0 }
 0x1cc   :  { %v1085_v38 = vpop.f32.mrb[92].mxu0  ;;  %v2368_v59 = vpop.f32.mrb[92].mxu1 }
 0x1cd   :  { %v3297_v29 = vadd.f32 %v3218_v37, %v1085_v38  ;;  %v3300_v39 = vadd.f32 %v2368_v59, %v3035_v44  ;;  %v1087_v32 = vpop.f32.mrb[93].mxu0  ;;  %v1430_v63 = vpop.f32.mrb[93].mxu1 }
 0x1ce   :  { %v3303_v52 = vadd.f32 %v1430_v63, %v3027_v36  ;;  %v1088_v24 = vpop.f32.mrb[94].mxu0  ;;  %v2369_v42 = vpop.f32.mrb[94].mxu1 }
 0x1cf   :  { %4471 = vst [vmem:[#allocation24_spill] sm:$0xff] %v3300_v39  ;;  %v1537_v53 = vsel %vm1445_vm1, %v3297_v29, 0.0  ;;  %v3308_v47 = vadd.f32 %v3224_v22, %v1088_v24  ;;  %v3311_v37 = vadd.f32 %v2369_v42, %v3039_v48  ;;  %v1090_v25 = vpop.f32.mrb[95].mxu0  ;;  %v1433_v44 = vpop.f32.mrb[95].mxu1  ;;  %v1543_v22 = vsel %vm1445_vm1, %v3248_v50, 0.0 }
 0x1d0   :  { %4472 = vst [vmem:[#allocation25_spill] sm:$0xff] %v3303_v52  ;;  %v1538_v30 = vadd.f32 %v1537_v53, %v1536_v7  ;;  %v3314_v60 = vadd.f32 %v1433_v44, %v3031_v40  ;;  %v1545_v48 = vsel %vm1445_vm1, %v3237_v61, 0.0  ;;  %v1547_v40 = vsel %vm1445_vm1, %v3245_v17, 0.0 }
 0x1d1   :  { %4473 = vst [vmem:[#allocation26_spill] sm:$0xff] %v3311_v37  ;;  %v1539_v36 = vsel %vm1445_vm1, %v3308_v47, 0.0  ;;  %v1549_v7 = vsel %vm1445_vm1, %v3260_v56, 0.0  ;;  %v1551_v42 = vsel %vm1445_vm1, %v3270_v12, 0.0  ;;  %v1553_v25 = vsel %vm1445_vm1, %v3257_v0, 0.0 }
 0x1d2   :  { %4474 = vst [vmem:[#allocation27_spill] sm:$0xff] %v3314_v60  ;;  %v1540_v4 = vadd.f32 %v1539_v36, %v1538_v30  ;;  %v1555_v30 = vsel %vm1445_vm1, %v3267_v49, 0.0 }
 0x1d4   :  { %v1542_v38 = vadd.f32 %v1541_v20, %v1540_v4  ;;  %v1557_v4 = vsel %vm1445_vm1, %v3282_v8, 0.0 }
 0x1d6   :  { %v1544_v59 = vadd.f32 %v1543_v22, %v1542_v38  ;;  %v1559_v38 = vsel %vm1445_vm1, %v3292_v28, 0.0 }
 0x1d8   :  { %v1546_v32 = vadd.f32 %v1545_v48, %v1544_v59  ;;  %v1561_v59 = vsel %vm1445_vm1, %v3279_v16, 0.0 }
 0x1da   :  { %v1548_v63 = vadd.f32 %v1547_v40, %v1546_v32  ;;  %v1563_v32 = vsel %vm1445_vm1, %v3289_v45, 0.0 }
 0x1dc   :  { %v1550_v24 = vadd.f32 %v1549_v7, %v1548_v63  ;;  %v1565_v63 = vsel %vm1445_vm1, %v3303_v52, 0.0 }
 0x1de   :  { %v1552_v53 = vadd.f32 %v1551_v42, %v1550_v24  ;;  %v1567_v24 = vsel %vm1445_vm1, %v3314_v60, 0.0 }
 0x1e0   :  { %v1554_v44 = vadd.f32 %v1553_v25, %v1552_v53  ;;  %v1569_v53 = vsel %vm1445_vm1, %v3300_v39, 0.0 }
 0x1e2   :  { %v1556_v36 = vadd.f32 %v1555_v30, %v1554_v44  ;;  %v1571_v44 = vsel %vm1445_vm1, %v3311_v37, 0.0 }
 0x1e4   :  { %v1558_v20 = vadd.f32 %v1557_v4, %v1556_v36 }
 0x1e6   :  { %v1560_v22 = vadd.f32 %v1559_v38, %v1558_v20 }
 0x1e8   :  { %v1562_v48 = vadd.f32 %v1561_v59, %v1560_v22 }
 0x1ea   :  { %v1564_v40 = vadd.f32 %v1563_v32, %v1562_v48 }
 0x1ec   :  { %v1566_v7 = vadd.f32 %v1565_v63, %v1564_v40 }
 0x1ee   :  { %v1568_v42 = vadd.f32 %v1567_v24, %v1566_v7 }
 0x1f0   :  { %v1570_v25 = vadd.f32 %v1569_v53, %v1568_v42 }
 0x1f2   :  { %v1572_v30 = vadd.f32 %v1571_v44, %v1570_v25 }
 0x1f4   :  { %v1573_v36 = vrot.slane %v1572_v30, 4 }
 0x1f6   :  { %v1574_v4 = vadd.f32 %v1573_v36, %v1572_v30 }
 0x1f8   :  { %v1575_v20 = vrot.slane %v1574_v4, 2 }
 0x1fa   :  { %v1576_v38 = vadd.f32 %v1575_v20, %v1574_v4 }
 0x1fc   :  { %v1577_v22 = vrot.slane %v1576_v38, 1 }
 0x1fe   :  { %v1578_v59 = vadd.f32 %v1577_v22, %v1576_v38 }
 0x200   :  { %v3350_v48 = vmul.f32 0.001953125, %v1578_v59 }
 0x202   :  { %v1581_v32 = vsub.f32 %v3046_v62, %v3350_v48  ;;  %v1582_v40 = vsub.f32 %v3053_v10, %v3350_v48  ;;  %v1583_v63 = vsub.f32 %v3043_v57, %v3350_v48  ;;  %v1584_v7 = vsub.f32 %v3050_v5, %v3350_v48 }
 0x203   :  { %v1585_v53 = vsub.f32 %v3068_v26, %v3350_v48  ;;  %v1586_v44 = vsub.f32 %v3078_v41, %v3350_v48  ;;  %v1587_v38 = vsub.f32 %v3063_v21, %v3350_v48 }
 0x204   :  { %v1645_v24 = vmul.f32 %v1581_v32, %v1581_v32  ;;  %v1646_v42 = vmul.f32 %v1582_v40, %v1582_v40  ;;  %v1647_v25 = vmul.f32 %v1583_v63, %v1583_v63  ;;  %v1648_v30 = vmul.f32 %v1584_v7, %v1584_v7 }
 0x205   :  { %v1649_v22 = vmul.f32 %v1585_v53, %v1585_v53  ;;  %v1588_v40 = vsub.f32 %v3073_v34, %v3350_v48  ;;  %v1650_v63 = vmul.f32 %v1586_v44, %v1586_v44  ;;  %v1589_v7 = vsub.f32 %v3092_v2, %v3350_v48 }
 0x206   :  { %v1709_v36 = vsel %vm1445_vm1, %v1645_v24, 0.0  ;;  %v1710_v4 = vsel %vm1445_vm1, %v1646_v42, 0.0  ;;  %v1712_v59 = vsel %vm1445_vm1, %v1647_v25, 0.0  ;;  %v1714_v26 = vsel %vm1445_vm1, %v1648_v30, 0.0 }
 0x207   :  { %v1711_v20 = vadd.f32 %v1710_v4, %v1709_v36  ;;  %v1651_v24 = vmul.f32 %v1587_v38, %v1587_v38  ;;  %v1716_v42 = vsel %vm1445_vm1, %v1649_v22, 0.0  ;;  %v1590_v53 = vsub.f32 %v3102_v18, %v3350_v48 }
 0x208   :  { %v1652_v4 = vmul.f32 %v1588_v40, %v1588_v40  ;;  %v1718_v25 = vsel %vm1445_vm1, %v1650_v63, 0.0  ;;  %v1591_v44 = vsub.f32 %v3087_v54, %v3350_v48  ;;  %v1592_v38 = vsub.f32 %v3097_v13, %v3350_v48 }
 0x209   :  { %v1713_v32 = vadd.f32 %v1712_v59, %v1711_v20  ;;  %v1653_v59 = vmul.f32 %v1589_v7, %v1589_v7  ;;  %v1593_v40 = vsub.f32 %v3114_v11, %v3350_v48  ;;  %v1594_v7 = vsub.f32 %v3122_v58, %v3350_v48 }
 0x20b   :  { %v1715_v41 = vadd.f32 %v1714_v26, %v1713_v32  ;;  %v1720_v26 = vsel %vm1445_vm1, %v1651_v24, 0.0  ;;  %v1654_v32 = vmul.f32 %v1590_v53, %v1590_v53  ;;  %v1724_v63 = vsel %vm1445_vm1, %v1653_v59, 0.0 }
 0x20c   :  { %v1595_v53 = vsub.f32 %v3109_v33, %v3350_v48 }
 0x20d   :  { %v1717_v36 = vadd.f32 %v1716_v42, %v1715_v41  ;;  %v1722_v41 = vsel %vm1445_vm1, %v1652_v4, 0.0  ;;  %v1655_v42 = vmul.f32 %v1591_v44, %v1591_v44  ;;  %v1726_v24 = vsel %vm1445_vm1, %v1654_v32, 0.0 }
 0x20e   :  { %v1596_v44 = vsub.f32 %v3117_v46, %v3350_v48 }
 0x20f   :  { %v1719_v20 = vadd.f32 %v1718_v25, %v1717_v36  ;;  %v1656_v25 = vmul.f32 %v1592_v38, %v1592_v38  ;;  %v1728_v4 = vsel %vm1445_vm1, %v1655_v42, 0.0  ;;  %v1597_v38 = vsub.f32 %v3134_v19, %v3350_v48 }
 0x211   :  { %v1721_v30 = vadd.f32 %v1720_v26, %v1719_v20  ;;  %v1657_v26 = vmul.f32 %v1593_v40, %v1593_v40  ;;  %v1730_v59 = vsel %vm1445_vm1, %v1656_v25, 0.0  ;;  %v1598_v40 = vsub.f32 %v3142_v23, %v3350_v48 }
 0x213   :  { %v1723_v22 = vadd.f32 %v1722_v41, %v1721_v30  ;;  %v1658_v41 = vmul.f32 %v1594_v7, %v1594_v7  ;;  %v1732_v32 = vsel %vm1445_vm1, %v1657_v26, 0.0  ;;  %v1599_v7 = vsub.f32 %v3129_v51, %v3350_v48 }
 0x215   :  { %v1725_v36 = vadd.f32 %v1724_v63, %v1723_v22  ;;  %v1659_v63 = vmul.f32 %v1595_v53, %v1595_v53  ;;  %v1734_v42 = vsel %vm1445_vm1, %v1658_v41, 0.0  ;;  %v1600_v53 = vsub.f32 %v3137_v31, %v3350_v48 }
 0x217   :  { %v1727_v20 = vadd.f32 %v1726_v24, %v1725_v36  ;;  %v1660_v24 = vmul.f32 %v1596_v44, %v1596_v44  ;;  %v1736_v25 = vsel %vm1445_vm1, %v1659_v63, 0.0  ;;  %v1601_v44 = vsub.f32 %v3153_v1, %v3350_v48 }
 0x219   :  { %v1729_v30 = vadd.f32 %v1728_v4, %v1727_v20  ;;  %v1661_v4 = vmul.f32 %v1597_v38, %v1597_v38  ;;  %v1738_v26 = vsel %vm1445_vm1, %v1660_v24, 0.0  ;;  %v1602_v38 = vsub.f32 %v3160_v55, %v3350_v48 }
 0x21a   :  { %v1665_v31 = vmul.f32 %v1601_v44, %v1601_v44 }
 0x21b   :  { %v1731_v22 = vadd.f32 %v1730_v59, %v1729_v30  ;;  %v1662_v59 = vmul.f32 %v1598_v40, %v1598_v40  ;;  %v1740_v41 = vsel %vm1445_vm1, %v1661_v4, 0.0  ;;  %v1666_v1 = vmul.f32 %v1602_v38, %v1602_v38 }
 0x21d   :  { %v1733_v36 = vadd.f32 %v1732_v32, %v1731_v22  ;;  %v1663_v32 = vmul.f32 %v1599_v7, %v1599_v7  ;;  %v1742_v63 = vsel %vm1445_vm1, %v1662_v59, 0.0  ;;  %v1748_v59 = vsel %vm1445_vm1, %v1665_v31, 0.0 }
 0x21f   :  { %v1735_v20 = vadd.f32 %v1734_v42, %v1733_v36  ;;  %v1664_v42 = vmul.f32 %v1600_v53, %v1600_v53  ;;  %v1744_v24 = vsel %vm1445_vm1, %v1663_v32, 0.0  ;;  %v1750_v32 = vsel %vm1445_vm1, %v1666_v1, 0.0 }
 0x221   :  { %v1737_v30 = vadd.f32 %v1736_v25, %v1735_v20  ;;  %v4475_v25 = vld [vmem:[#allocation5_spill] sm:$0xff]  ;;  %v1746_v4 = vsel %vm1445_vm1, %v1664_v42, 0.0 }
 0x222   :  { %v1603_v40 = vsub.f32 %v4475_v25, %v3350_v48 }
 0x223   :  { %v1739_v22 = vadd.f32 %v1738_v26, %v1737_v30  ;;  %v4476_v26 = vld [vmem:[#allocation7_spill] sm:$0xff] }
 0x224   :  { %v1604_v7 = vsub.f32 %v4476_v26, %v3350_v48  ;;  %v1667_v55 = vmul.f32 %v1603_v40, %v1603_v40 }
 0x225   :  { %v1741_v36 = vadd.f32 %v1740_v41, %v1739_v22  ;;  %v4477_v41 = vld [vmem:[#allocation10_spill] sm:$0xff] }
 0x226   :  { %v1605_v53 = vsub.f32 %v4477_v41, %v3350_v48  ;;  %v1668_v25 = vmul.f32 %v1604_v7, %v1604_v7  ;;  %v1752_v42 = vsel %vm1445_vm1, %v1667_v55, 0.0 }
 0x227   :  { %v1743_v20 = vadd.f32 %v1742_v63, %v1741_v36  ;;  %v4478_v63 = vld [vmem:[#allocation12_spill] sm:$0xff] }
 0x228   :  { %v1606_v44 = vsub.f32 %v4478_v63, %v3350_v48  ;;  %v1669_v26 = vmul.f32 %v1605_v53, %v1605_v53  ;;  %v1754_v31 = vsel %vm1445_vm1, %v1668_v25, 0.0 }
 0x229   :  { %v1745_v30 = vadd.f32 %v1744_v24, %v1743_v20  ;;  %v4479_v24 = vld [vmem:[#allocation9_spill] sm:$0xff] }
 0x22a   :  { %v1607_v38 = vsub.f32 %v4479_v24, %v3350_v48  ;;  %v1670_v41 = vmul.f32 %v1606_v44, %v1606_v44  ;;  %v1756_v1 = vsel %vm1445_vm1, %v1669_v26, 0.0 }
 0x22b   :  { %v1747_v22 = vadd.f32 %v1746_v4, %v1745_v30  ;;  %v4480_v4 = vld [vmem:[#allocation11_spill] sm:$0xff] }
 0x22c   :  { %v1608_v40 = vsub.f32 %v4480_v4, %v3350_v48  ;;  %v1671_v63 = vmul.f32 %v1607_v38, %v1607_v38  ;;  %v1758_v55 = vsel %vm1445_vm1, %v1670_v41, 0.0 }
 0x22d   :  { %v1749_v36 = vadd.f32 %v1748_v59, %v1747_v22  ;;  %v4481_v59 = vld [vmem:[#allocation14_spill] sm:$0xff] }
 0x22e   :  { %v1609_v7 = vsub.f32 %v4481_v59, %v3350_v48  ;;  %v1672_v24 = vmul.f32 %v1608_v40, %v1608_v40  ;;  %v1760_v25 = vsel %vm1445_vm1, %v1671_v63, 0.0 }
 0x22f   :  { %v1751_v20 = vadd.f32 %v1750_v32, %v1749_v36  ;;  %v4482_v32 = vld [vmem:[#allocation16_spill] sm:$0xff] }
 0x230   :  { %v1610_v53 = vsub.f32 %v4482_v32, %v3350_v48  ;;  %v1673_v4 = vmul.f32 %v1609_v7, %v1609_v7  ;;  %v1762_v26 = vsel %vm1445_vm1, %v1672_v24, 0.0 }
 0x231   :  { %v1753_v30 = vadd.f32 %v1752_v42, %v1751_v20  ;;  %v4483_v42 = vld [vmem:[#allocation13_spill] sm:$0xff] }
 0x232   :  { %v1611_v44 = vsub.f32 %v4483_v42, %v3350_v48  ;;  %v1674_v59 = vmul.f32 %v1610_v53, %v1610_v53  ;;  %v1764_v41 = vsel %vm1445_vm1, %v1673_v4, 0.0 }
 0x233   :  { %v1755_v22 = vadd.f32 %v1754_v31, %v1753_v30  ;;  %v4484_v31 = vld [vmem:[#allocation15_spill] sm:$0xff] }
 0x234   :  { %v1612_v38 = vsub.f32 %v4484_v31, %v3350_v48  ;;  %v1675_v32 = vmul.f32 %v1611_v44, %v1611_v44  ;;  %v1766_v63 = vsel %vm1445_vm1, %v1674_v59, 0.0 }
 0x235   :  { %v1757_v36 = vadd.f32 %v1756_v1, %v1755_v22  ;;  %v4485_v1 = vld [vmem:[#allocation17_spill] sm:$0xff] }
 0x236   :  { %v1613_v40 = vsub.f32 %v4485_v1, %v3350_v48  ;;  %v1676_v42 = vmul.f32 %v1612_v38, %v1612_v38  ;;  %v1768_v24 = vsel %vm1445_vm1, %v1675_v32, 0.0 }
 0x237   :  { %v1759_v20 = vadd.f32 %v1758_v55, %v1757_v36  ;;  %v4486_v55 = vld [vmem:[#allocation18_spill] sm:$0xff] }
 0x238   :  { %v1614_v7 = vsub.f32 %v4486_v55, %v3350_v48  ;;  %v1677_v31 = vmul.f32 %v1613_v40, %v1613_v40  ;;  %v1770_v4 = vsel %vm1445_vm1, %v1676_v42, 0.0 }
 0x239   :  { %v1761_v30 = vadd.f32 %v1760_v25, %v1759_v20  ;;  %v4487_v25 = vld [vmem:[#allocation19_spill] sm:$0xff] }
 0x23a   :  { %v1615_v53 = vsub.f32 %v4487_v25, %v3350_v48  ;;  %v1678_v1 = vmul.f32 %v1614_v7, %v1614_v7  ;;  %v1772_v59 = vsel %vm1445_vm1, %v1677_v31, 0.0 }
 0x23b   :  { %v1763_v22 = vadd.f32 %v1762_v26, %v1761_v30  ;;  %v4488_v26 = vld [vmem:[#allocation20_spill] sm:$0xff] }
 0x23c   :  { %v1616_v44 = vsub.f32 %v4488_v26, %v3350_v48  ;;  %v1679_v55 = vmul.f32 %v1615_v53, %v1615_v53  ;;  %v1774_v32 = vsel %vm1445_vm1, %v1678_v1, 0.0  ;;  %v1620_v53 = vsub.f32 %v3228_v3, %v3350_v48 }
 0x23d   :  { %v1765_v36 = vadd.f32 %v1764_v41, %v1763_v22  ;;  %v4489_v41 = vld [vmem:[#allocation21_spill] sm:$0xff] }
 0x23e   :  { %v1617_v38 = vsub.f32 %v4489_v41, %v3350_v48  ;;  %v1680_v25 = vmul.f32 %v1616_v44, %v1616_v44  ;;  %v1776_v42 = vsel %vm1445_vm1, %v1679_v55, 0.0  ;;  %v1621_v44 = vsub.f32 %v3234_v9, %v3350_v48 }
 0x23f   :  { %v1767_v20 = vadd.f32 %v1766_v63, %v1765_v36  ;;  %v4490_v63 = vld [vmem:[#allocation22_spill] sm:$0xff] }
 0x240   :  { %v1618_v40 = vsub.f32 %v4490_v63, %v3350_v48  ;;  %v1681_v26 = vmul.f32 %v1617_v38, %v1617_v38  ;;  %v1778_v31 = vsel %vm1445_vm1, %v1680_v25, 0.0  ;;  %v1622_v38 = vsub.f32 %v3242_v15, %v3350_v48 }
 0x241   :  { %v1769_v30 = vadd.f32 %v1768_v24, %v1767_v20  ;;  %v4491_v24 = vld [vmem:[#allocation23_spill] sm:$0xff] }
 0x242   :  { %v1619_v7 = vsub.f32 %v4491_v24, %v3350_v48  ;;  %v1780_v1 = vsel %vm1445_vm1, %v1681_v26, 0.0 }
 0x243   :  { %v1771_v22 = vadd.f32 %v1770_v4, %v1769_v30  ;;  %v1682_v4 = vmul.f32 %v1618_v40, %v1618_v40  ;;  %v1623_v40 = vsub.f32 %v3254_v35, %v3350_v48 }
 0x245   :  { %v1773_v36 = vadd.f32 %v1772_v59, %v1771_v22  ;;  %v1683_v59 = vmul.f32 %v1619_v7, %v1619_v7  ;;  %v1782_v55 = vsel %vm1445_vm1, %v1682_v4, 0.0  ;;  %v1624_v7 = vsub.f32 %v3264_v14, %v3350_v48 }
 0x247   :  { %v1775_v20 = vadd.f32 %v1774_v32, %v1773_v36  ;;  %v1684_v32 = vmul.f32 %v1620_v53, %v1620_v53  ;;  %v1784_v25 = vsel %vm1445_vm1, %v1683_v59, 0.0  ;;  %v1625_v53 = vsub.f32 %v3276_v6, %v3350_v48 }
 0x249   :  { %v1777_v30 = vadd.f32 %v1776_v42, %v1775_v20  ;;  %v1685_v42 = vmul.f32 %v1621_v44, %v1621_v44  ;;  %v1786_v26 = vsel %vm1445_vm1, %v1684_v32, 0.0  ;;  %v1626_v44 = vsub.f32 %v3286_v27, %v3350_v48 }
 0x24b   :  { %v1779_v22 = vadd.f32 %v1778_v31, %v1777_v30  ;;  %v1686_v31 = vmul.f32 %v1622_v38, %v1622_v38  ;;  %v1788_v4 = vsel %vm1445_vm1, %v1685_v42, 0.0  ;;  %v1627_v38 = vsub.f32 %v3297_v29, %v3350_v48 }
 0x24d   :  { %v1781_v36 = vadd.f32 %v1780_v1, %v1779_v22  ;;  %v1687_v1 = vmul.f32 %v1623_v40, %v1623_v40  ;;  %v1790_v59 = vsel %vm1445_vm1, %v1686_v31, 0.0  ;;  %v1628_v40 = vsub.f32 %v3308_v47, %v3350_v48 }
 0x24f   :  { %v1783_v20 = vadd.f32 %v1782_v55, %v1781_v36  ;;  %v1688_v55 = vmul.f32 %v1624_v7, %v1624_v7  ;;  %v1792_v32 = vsel %vm1445_vm1, %v1687_v1, 0.0  ;;  %v1629_v7 = vsub.f32 %v3240_v43, %v3350_v48 }
 0x251   :  { %v1785_v30 = vadd.f32 %v1784_v25, %v1783_v20  ;;  %v1689_v25 = vmul.f32 %v1625_v53, %v1625_v53  ;;  %v1794_v42 = vsel %vm1445_vm1, %v1688_v55, 0.0  ;;  %v1630_v53 = vsub.f32 %v3248_v50, %v3350_v48 }
 0x253   :  { %v1787_v22 = vadd.f32 %v1786_v26, %v1785_v30  ;;  %v1690_v26 = vmul.f32 %v1626_v44, %v1626_v44  ;;  %v1796_v31 = vsel %vm1445_vm1, %v1689_v25, 0.0  ;;  %v1631_v44 = vsub.f32 %v3237_v61, %v3350_v48 }
 0x255   :  { %v1789_v36 = vadd.f32 %v1788_v4, %v1787_v22  ;;  %v1691_v4 = vmul.f32 %v1627_v38, %v1627_v38  ;;  %v1798_v1 = vsel %vm1445_vm1, %v1690_v26, 0.0  ;;  %v1632_v38 = vsub.f32 %v3245_v17, %v3350_v48 }
 0x257   :  { %v1791_v20 = vadd.f32 %v1790_v59, %v1789_v36  ;;  %v1692_v59 = vmul.f32 %v1628_v40, %v1628_v40  ;;  %v1800_v55 = vsel %vm1445_vm1, %v1691_v4, 0.0  ;;  %v1633_v40 = vsub.f32 %v3260_v56, %v3350_v48 }
 0x259   :  { %v1793_v30 = vadd.f32 %v1792_v32, %v1791_v20  ;;  %v1693_v32 = vmul.f32 %v1629_v7, %v1629_v7  ;;  %v1802_v25 = vsel %vm1445_vm1, %v1692_v59, 0.0  ;;  %v1634_v7 = vsub.f32 %v3270_v12, %v3350_v48 }
 0x25b   :  { %v1795_v22 = vadd.f32 %v1794_v42, %v1793_v30  ;;  %v1694_v42 = vmul.f32 %v1630_v53, %v1630_v53  ;;  %v1804_v26 = vsel %vm1445_vm1, %v1693_v32, 0.0  ;;  %v1635_v53 = vsub.f32 %v3257_v0, %v3350_v48 }
 0x25d   :  { %v1797_v36 = vadd.f32 %v1796_v31, %v1795_v22  ;;  %v1695_v31 = vmul.f32 %v1631_v44, %v1631_v44  ;;  %v1806_v4 = vsel %vm1445_vm1, %v1694_v42, 0.0  ;;  %v1636_v44 = vsub.f32 %v3267_v49, %v3350_v48 }
 0x25f   :  { %v1799_v20 = vadd.f32 %v1798_v1, %v1797_v36  ;;  %v1696_v1 = vmul.f32 %v1632_v38, %v1632_v38  ;;  %v1808_v59 = vsel %vm1445_vm1, %v1695_v31, 0.0  ;;  %v1637_v38 = vsub.f32 %v3282_v8, %v3350_v48 }
 0x261   :  { %v1801_v30 = vadd.f32 %v1800_v55, %v1799_v20  ;;  %v1697_v55 = vmul.f32 %v1633_v40, %v1633_v40  ;;  %v1810_v32 = vsel %vm1445_vm1, %v1696_v1, 0.0  ;;  %v1638_v40 = vsub.f32 %v3292_v28, %v3350_v48 }
 0x263   :  { %v1803_v22 = vadd.f32 %v1802_v25, %v1801_v30  ;;  %v1698_v25 = vmul.f32 %v1634_v7, %v1634_v7  ;;  %v1812_v42 = vsel %vm1445_vm1, %v1697_v55, 0.0  ;;  %v1639_v7 = vsub.f32 %v3279_v16, %v3350_v48 }
 0x265   :  { %v1805_v36 = vadd.f32 %v1804_v26, %v1803_v22  ;;  %v1699_v26 = vmul.f32 %v1635_v53, %v1635_v53  ;;  %v1814_v31 = vsel %vm1445_vm1, %v1698_v25, 0.0  ;;  %v1640_v53 = vsub.f32 %v3289_v45, %v3350_v48 }
 0x267   :  { %v1807_v20 = vadd.f32 %v1806_v4, %v1805_v36  ;;  %v1700_v4 = vmul.f32 %v1636_v44, %v1636_v44  ;;  %v1816_v1 = vsel %vm1445_vm1, %v1699_v26, 0.0  ;;  %v1641_v44 = vsub.f32 %v3303_v52, %v3350_v48 }
 0x269   :  { %v1809_v30 = vadd.f32 %v1808_v59, %v1807_v20  ;;  %v1701_v59 = vmul.f32 %v1637_v38, %v1637_v38  ;;  %v1818_v55 = vsel %vm1445_vm1, %v1700_v4, 0.0  ;;  %v1642_v38 = vsub.f32 %v3314_v60, %v3350_v48 }
 0x26b   :  { %v1811_v22 = vadd.f32 %v1810_v32, %v1809_v30  ;;  %v1702_v32 = vmul.f32 %v1638_v40, %v1638_v40  ;;  %v1820_v25 = vsel %vm1445_vm1, %v1701_v59, 0.0  ;;  %v1643_v40 = vsub.f32 %v3300_v39, %v3350_v48 }
 0x26d   :  { %v1813_v36 = vadd.f32 %v1812_v42, %v1811_v22  ;;  %v1703_v42 = vmul.f32 %v1639_v7, %v1639_v7  ;;  %v1822_v26 = vsel %vm1445_vm1, %v1702_v32, 0.0  ;;  %v1644_v7 = vsub.f32 %v3311_v37, %v3350_v48 }
 0x26f   :  { %v1815_v20 = vadd.f32 %v1814_v31, %v1813_v36  ;;  %v1704_v31 = vmul.f32 %v1640_v53, %v1640_v53  ;;  %v1824_v4 = vsel %vm1445_vm1, %v1703_v42, 0.0  ;;  %v1708_v32 = vmul.f32 %v1644_v7, %v1644_v7 }
 0x271   :  { %v1817_v30 = vadd.f32 %v1816_v1, %v1815_v20  ;;  %v1705_v1 = vmul.f32 %v1641_v44, %v1641_v44  ;;  %v1826_v59 = vsel %vm1445_vm1, %v1704_v31, 0.0  ;;  %v1834_v42 = vsel %vm1445_vm1, %v1708_v32, 0.0 }
 0x273   :  { %v1819_v22 = vadd.f32 %v1818_v55, %v1817_v30  ;;  %v1706_v55 = vmul.f32 %v1642_v38, %v1642_v38  ;;  %v1828_v53 = vsel %vm1445_vm1, %v1705_v1, 0.0  ;;  %v1851_v1 = vlaneseq }
 0x275   :  { %v1821_v36 = vadd.f32 %v1820_v25, %v1819_v22  ;;  %v1707_v25 = vmul.f32 %v1643_v40, %v1643_v40  ;;  %v3544_v7 = vshrl.u32 %v1851_v1, 7  ;;  %v4498_v1 = vld [vmem:[#allocation7_spill] sm:$0xff] }
 0x277   :  { %v1823_v20 = vadd.f32 %v1822_v26, %v1821_v36  ;;  %v1830_v36 = vsel %vm1445_vm1, %v1706_v55, 0.0  ;;  %v1832_v44 = vsel %vm1445_vm1, %v1707_v25, 0.0  ;;  %v4448_v55 = vsub.s32 0, %v3544_v7 }
 0x279   :  { %v1825_v30 = vadd.f32 %v1824_v4, %v1823_v20 }
 0x27b   :  { %v1827_v22 = vadd.f32 %v1826_v59, %v1825_v30 }
 0x27d   :  { %v1829_v60 = vadd.f32 %v1828_v53, %v1827_v22 }
 0x27f   :  { %v1831_v26 = vadd.f32 %v1830_v36, %v1829_v60  ;;  %v1843_v60 = vld [vmem:[%s4402_s2] sm:$0x1] }
 0x281   :  { %v1833_v39 = vadd.f32 %v1832_v44, %v1831_v26  ;;  %v4492_v44 = vld [vmem:[#allocation2_spill] sm:$0xff] }
 0x283   :  { %v1835_v20 = vadd.f32 %v1834_v42, %v1833_v39 }
 0x285   :  { %v1836_v4 = vrot.slane %v1835_v20, 4 }
 0x287   :  { %v1837_v37 = vadd.f32 %v1836_v4, %v1835_v20  ;;  %v4493_v20 = vld [vmem:[#allocation3_spill] sm:$0xff] }
 0x289   :  { %v1838_v38 = vrot.slane %v1837_v37, 2 }
 0x28b   :  { %v1839_v52 = vadd.f32 %v1838_v38, %v1837_v37  ;;  %v3553_v37 = vld [vmem:[%s4403_s3] sm:$0x1] }
 0x28d   :  { %v1840_v31 = vrot.slane %v1839_v52, 1 }
 0x28f   :  { %v1841_v30 = vadd.f32 %v1840_v31, %v1839_v52  ;;  %v4494_v31 = vld [vmem:[#allocation4_spill] sm:$0xff] }
 0x291   :  { %v1842_v40 = vmul.f32 0.001953125, %v1841_v30  ;;  %v4495_v30 = vld [vmem:[#allocation6_spill] sm:$0xff] }
 0x293   :  { %v1844_v59 = vadd.f32 1e-05, %v1842_v40  ;;  %v4496_v40 = vld [vmem:[#allocation8_spill] sm:$0xff] }
 0x295   :  { %2549 = vrsqrt.f32 %v1844_v59  ;;  %v4497_v59 = vld [vmem:[#allocation5_spill] sm:$0xff] }
 0x29f   :  { %v2550_v22 = vpop.eup %2549 }
 0x2a0   :  { %v1846_v39 = vmul.f32 %v2550_v22, %v1843_v60  ;;  %v4499_v60 = vld [vmem:[#allocation10_spill] sm:$0xff] }
 0x2a2   :  { %v3556_v52 = vmul.f32 %v1846_v39, %v3350_v48  ;;  %v3560_v25 = vrot.slane %v1846_v39, %v4448_v55  ;;  %v4500_v39 = vld [vmem:[#allocation12_spill] sm:$0xff]  ;;  %v4510_v55 = vld [vmem:[#allocation15_spill] sm:$0xff] }
 0x2a4   :  { %v1849_v53 = vsub.f32 %v3553_v37, %v3556_v52  ;;  %v3566_v32 = vmul.f32 %v3560_v25, %v3046_v62  ;;  %v3570_v36 = vmul.f32 %v3560_v25, %v3053_v10  ;;  %v3574_v26 = vmul.f32 %v3560_v25, %v3043_v57  ;;  %v4501_v52 = vld [vmem:[#allocation9_spill] sm:$0xff] }
 0x2a5   :  { %v3578_v48 = vmul.f32 %v3560_v25, %v3050_v5  ;;  %v3582_v42 = vmul.f32 %v3560_v25, %v4492_v44  ;;  %v3586_v62 = vmul.f32 %v3560_v25, %v4493_v20  ;;  %v3590_v10 = vmul.f32 %v3560_v25, %v3063_v21  ;;  %v4503_v20 = vld [vmem:[#allocation11_spill] sm:$0xff] }
 0x2a6   :  { %v3594_v57 = vmul.f32 %v3560_v25, %v3073_v34  ;;  %v3598_v5 = vmul.f32 %v3560_v25, %v3092_v2  ;;  %v3602_v4 = vmul.f32 %v3560_v25, %v3102_v18  ;;  %v3606_v38 = vmul.f32 %v3560_v25, %v3087_v54 }
 0x2a7   :  { %v3610_v21 = vmul.f32 %v3560_v25, %v3097_v13  ;;  %v3614_v34 = vmul.f32 %v3560_v25, %v3114_v11  ;;  %v3618_v2 = vmul.f32 %v3560_v25, %v3122_v58  ;;  %v3622_v18 = vmul.f32 %v3560_v25, %v3109_v33 }
 0x2a8   :  { %v3626_v54 = vmul.f32 %v3560_v25, %v3117_v46  ;;  %v3630_v13 = vmul.f32 %v3560_v25, %v3134_v19  ;;  %v3634_v11 = vmul.f32 %v3560_v25, %v3142_v23  ;;  %v3638_v58 = vmul.f32 %v3560_v25, %v3129_v51 }
 0x2a9   :  { %v3642_v33 = vmul.f32 %v3560_v25, %v4494_v31  ;;  %v3646_v46 = vmul.f32 %v3560_v25, %v4495_v30  ;;  %v3650_v19 = vmul.f32 %v3560_v25, %v4496_v40  ;;  %v3654_v23 = vmul.f32 %v3560_v25, %v4497_v59  ;;  %v4505_v30 = vld [vmem:[#allocation14_spill] sm:$0xff]  ;;  %v4507_v59 = vld [vmem:[#allocation16_spill] sm:$0xff] }
 0x2aa   :  { %v3658_v51 = vmul.f32 %v3560_v25, %v4498_v1  ;;  %v3662_v22 = vmul.f32 %v3560_v25, %v4499_v60  ;;  %v3666_v37 = vmul.f32 %v3560_v25, %v4500_v39  ;;  %v3670_v44 = vmul.f32 %v3560_v25, %v4501_v52  ;;  %v4509_v60 = vld [vmem:[#allocation13_spill] sm:$0xff] }
 0x2ab   :  { %v3674_v31 = vmul.f32 %v3560_v25, %v4503_v20  ;;  %v3678_v40 = vmul.f32 %v3560_v25, %v4505_v30  ;;  %v3682_v1 = vmul.f32 %v3560_v25, %v4507_v59  ;;  %v3686_v39 = vmul.f32 %v3560_v25, %v4509_v60 }
 0x2ac   :  { %4502 = vst [vmem:[#allocation21_spill] sm:$0xff] %v3670_v44  ;;  %v3690_v52 = vmul.f32 %v3560_v25, %v4510_v55  ;;  %v4511_v44 = vld [vmem:[#allocation17_spill] sm:$0xff]  ;;  %v3710_v55 = vmul.f32 %v3560_v25, %v4489_v41  ;;  %v3730_v41 = vmul.f32 %v3560_v25, %v3242_v15  ;;  %v3750_v15 = vmul.f32 %v3560_v25, %v3297_v29 }
 0x2ad   :  { %4504 = vst [vmem:[#allocation22_spill] sm:$0xff] %v3674_v31  ;;  %4506 = vst [vmem:[#allocation23_spill] sm:$0xff] %v3678_v40  ;;  %v3694_v20 = vmul.f32 %v3560_v25, %v4511_v44  ;;  %v4512_v31 = vld [vmem:[#allocation18_spill] sm:$0xff]  ;;  %v4513_v40 = vld [vmem:[#allocation19_spill] sm:$0xff]  ;;  %v3714_v44 = vmul.f32 %v3560_v25, %v4490_v63  ;;  %v3734_v63 = vmul.f32 %v3560_v25, %v3254_v35 }
 0x2ae   :  { %4508 = vst [vmem:[#allocation2_spill] sm:$0xff] %v3682_v1  ;;  %v3698_v30 = vmul.f32 %v3560_v25, %v4512_v31  ;;  %v3702_v59 = vmul.f32 %v3560_v25, %v4513_v40  ;;  %v4514_v1 = vld [vmem:[#allocation20_spill] sm:$0xff]  ;;  %v3718_v31 = vmul.f32 %v3560_v25, %v4491_v24  ;;  %v3722_v40 = vmul.f32 %v3560_v25, %v3228_v3 }
 0x2af   :  { %v3706_v60 = vmul.f32 %v3560_v25, %v4514_v1  ;;  %v3726_v1 = vmul.f32 %v3560_v25, %v3234_v9  ;;  %v3738_v24 = vmul.f32 %v3560_v25, %v3264_v14  ;;  %v3742_v3 = vmul.f32 %v3560_v25, %v3276_v6 }
 0x2b0   :  { %v3746_v9 = vmul.f32 %v3560_v25, %v3286_v27  ;;  %v3754_v35 = vmul.f32 %v3560_v25, %v3308_v47  ;;  %v3758_v14 = vmul.f32 %v3560_v25, %v3240_v43  ;;  %v3762_v6 = vmul.f32 %v3560_v25, %v3248_v50 }
 0x2b1   :  { %v3766_v27 = vmul.f32 %v3560_v25, %v3237_v61  ;;  %v3770_v29 = vmul.f32 %v3560_v25, %v3245_v17  ;;  %v3774_v47 = vmul.f32 %v3560_v25, %v3260_v56  ;;  %v3778_v43 = vmul.f32 %v3560_v25, %v3270_v12 }
 0x2b2   :  { %v3782_v50 = vmul.f32 %v3560_v25, %v3257_v0  ;;  %v3786_v61 = vmul.f32 %v3560_v25, %v3267_v49  ;;  %v3790_v17 = vmul.f32 %v3560_v25, %v3282_v8  ;;  %v3794_v56 = vmul.f32 %v3560_v25, %v3292_v28 }
 0x2b3   :  { %v3798_v12 = vmul.f32 %v3560_v25, %v3279_v16  ;;  %v3802_v0 = vmul.f32 %v3560_v25, %v3289_v45 }
 0x2b4   :  { %4515 = vst [vmem:[#allocation3_spill] sm:$0xff] %v3782_v50  ;;  %4516 = vst [vmem:[#allocation4_spill] sm:$0xff] %v3786_v61  ;;  %v4520_v50 = vsub.s32 0, %v3544_v7  ;;  %v4521_v61 = vld [vmem:[#allocation25_spill] sm:$0xff] }
 0x2b5   :  { %4517 = vst [vmem:[#allocation6_spill] sm:$0xff] %v3790_v17  ;;  %4518 = vst [vmem:[#allocation8_spill] sm:$0xff] %v3794_v56  ;;  %v3810_v8 = vmul.f32 %v3560_v25, %v4521_v61  ;;  %v4522_v17 = vld [vmem:[#allocation27_spill] sm:$0xff]  ;;  %v4523_v56 = vld [vmem:[#allocation24_spill] sm:$0xff] }
 0x2b6   :  { %4519 = vst [vmem:[#allocation5_spill] sm:$0xff] %v3798_v12  ;;  %v3806_v49 = vrot.slane %v1849_v53, %v4520_v50  ;;  %v3814_v28 = vmul.f32 %v3560_v25, %v4522_v17  ;;  %v3818_v16 = vmul.f32 %v3560_v25, %v4523_v56  ;;  %v4524_v12 = vld [vmem:[#allocation26_spill] sm:$0xff]  ;;  %v4526_v17 = vld [vmem:[#allocation21_spill] sm:$0xff] }
 0x2b7   :  { %v3822_v45 = vmul.f32 %v3560_v25, %v4524_v12  ;;  %v4527_v56 = vld [vmem:[#allocation22_spill] sm:$0xff]  ;;  %v4528_v12 = vld [vmem:[#allocation23_spill] sm:$0xff] }
 0x2b8   :  { %v3826_v7 = vadd.f32 %v3806_v49, %v3566_v32  ;;  %v3830_v53 = vadd.f32 %v3806_v49, %v3570_v36  ;;  %v3834_v50 = vadd.f32 %v3806_v49, %v3574_v26  ;;  %v3838_v61 = vadd.f32 %v3806_v49, %v3578_v48 }
 0x2b9   :  { %v3842_v25 = vadd.f32 %v3806_v49, %v3582_v42  ;;  %v3846_v32 = vadd.f32 %v3806_v49, %v3586_v62  ;;  %v3850_v36 = vadd.f32 %v3806_v49, %v3590_v10  ;;  %v3854_v26 = vadd.f32 %v3806_v49, %v3594_v57 }
 0x2ba   :  { %v3858_v48 = vadd.f32 %v3806_v49, %v3598_v5  ;;  %v3862_v42 = vadd.f32 %v3806_v49, %v3602_v4  ;;  %v3866_v62 = vadd.f32 %v3806_v49, %v3606_v38  ;;  %v3870_v10 = vadd.f32 %v3806_v49, %v3610_v21 }
 0x2bb   :  { %v3874_v57 = vadd.f32 %v3806_v49, %v3614_v34  ;;  %v3878_v5 = vadd.f32 %v3806_v49, %v3618_v2  ;;  %v3882_v4 = vadd.f32 %v3806_v49, %v3622_v18  ;;  %v3886_v38 = vadd.f32 %v3806_v49, %v3626_v54 }
 0x2bc   :  { %v3890_v21 = vadd.f32 %v3806_v49, %v3630_v13  ;;  %v3894_v34 = vadd.f32 %v3806_v49, %v3634_v11  ;;  %v3898_v2 = vadd.f32 %v3806_v49, %v3638_v58  ;;  %v3902_v18 = vadd.f32 %v3806_v49, %v3642_v33 }
 0x2bd   :  { %v3906_v54 = vadd.f32 %v3806_v49, %v3646_v46  ;;  %v3910_v13 = vadd.f32 %v3806_v49, %v3650_v19  ;;  %v3914_v11 = vadd.f32 %v3806_v49, %v3654_v23  ;;  %v3918_v58 = vadd.f32 %v3806_v49, %v3658_v51 }
 0x2be   :  { %v3922_v33 = vadd.f32 %v3806_v49, %v3662_v22  ;;  %v3926_v46 = vadd.f32 %v3806_v49, %v3666_v37  ;;  %v3930_v19 = vadd.f32 %v3806_v49, %v4526_v17  ;;  %v3934_v23 = vadd.f32 %v3806_v49, %v4527_v56 }
 0x2bf   :  { %4525 = vst [vmem:[#allocation7_spill] sm:$0xff] %v3918_v58  ;;  %v3938_v51 = vadd.f32 %v3806_v49, %v4528_v12  ;;  %v4529_v58 = vld [vmem:[#allocation2_spill] sm:$0xff]  ;;  %v3946_v37 = vadd.f32 %v3806_v49, %v3686_v39  ;;  %v3950_v17 = vadd.f32 %v3806_v49, %v3690_v52  ;;  %v3954_v56 = vadd.f32 %v3806_v49, %v3694_v20 }
 0x2c0   :  { %v3942_v22 = vadd.f32 %v3806_v49, %v4529_v58  ;;  %v3958_v12 = vadd.f32 %v3806_v49, %v3698_v30  ;;  %v3962_v58 = vadd.f32 %v3806_v49, %v3702_v59  ;;  %v3966_v39 = vadd.f32 %v3806_v49, %v3706_v60 }
 0x2c1   :  { %v3970_v52 = vadd.f32 %v3806_v49, %v3710_v55  ;;  %v3974_v20 = vadd.f32 %v3806_v49, %v3714_v44  ;;  %v3978_v30 = vadd.f32 %v3806_v49, %v3718_v31  ;;  %v3982_v59 = vadd.f32 %v3806_v49, %v3722_v40 }
 0x2c2   :  { %v3986_v60 = vadd.f32 %v3806_v49, %v3726_v1  ;;  %v3990_v55 = vadd.f32 %v3806_v49, %v3730_v41  ;;  %v3994_v44 = vadd.f32 %v3806_v49, %v3734_v63  ;;  %v3998_v31 = vadd.f32 %v3806_v49, %v3738_v24 }
 0x2c3   :  { %v4002_v40 = vadd.f32 %v3806_v49, %v3742_v3  ;;  %v4006_v1 = vadd.f32 %v3806_v49, %v3746_v9  ;;  %v4010_v41 = vadd.f32 %v3806_v49, %v3750_v15  ;;  %v4014_v63 = vadd.f32 %v3806_v49, %v3754_v35 }
 0x2c4   :  { %v4018_v24 = vadd.f32 %v3806_v49, %v3758_v14  ;;  %v4022_v3 = vadd.f32 %v3806_v49, %v3762_v6  ;;  %v4026_v9 = vadd.f32 %v3806_v49, %v3766_v27  ;;  %v4030_v15 = vadd.f32 %v3806_v49, %v3770_v29 }
 0x2c5   :  { %v4034_v35 = vadd.f32 %v3806_v49, %v3774_v47  ;;  %v4038_v14 = vadd.f32 %v3806_v49, %v3778_v43 }
 0x2c6   :  { %4530 = vst [vmem:[#allocation10_spill] sm:$0xff] %v4018_v24  ;;  %4531 = vst [vmem:[#allocation12_spill] sm:$0xff] %v4022_v3  ;;  %v4535_v24 = vld [vmem:[#allocation3_spill] sm:$0xff]  ;;  %v4536_v3 = vld [vmem:[#allocation4_spill] sm:$0xff] }
 0x2c7   :  { %4532 = vst [vmem:[#allocation9_spill] sm:$0xff] %v4026_v9  ;;  %4533 = vst [vmem:[#allocation11_spill] sm:$0xff] %v4030_v15  ;;  %v4042_v6 = vadd.f32 %v3806_v49, %v4535_v24  ;;  %v4046_v27 = vadd.f32 %v3806_v49, %v4536_v3  ;;  %v4537_v9 = vld [vmem:[#allocation6_spill] sm:$0xff]  ;;  %v4538_v15 = vld [vmem:[#allocation8_spill] sm:$0xff]  ;;  %v4062_v24 = vadd.f32 %v3806_v49, %v3802_v0  ;;  %v1991_v0 = vmax.f32 %v3830_v53, 0.0 }
 0x2c8   :  { %4534 = vst [vmem:[#allocation14_spill] sm:$0xff] %v4034_v35  ;;  %v4050_v29 = vadd.f32 %v3806_v49, %v4537_v9  ;;  %v4054_v47 = vadd.f32 %v3806_v49, %v4538_v15  ;;  %v4539_v35 = vld [vmem:[#allocation5_spill] sm:$0xff]  ;;  %v4066_v3 = vadd.f32 %v3806_v49, %v3810_v8  ;;  %v4070_v9 = vadd.f32 %v3806_v49, %v3814_v28 }
 0x2c9   :  { %v4058_v43 = vadd.f32 %v3806_v49, %v4539_v35  ;;  %4541 = vst [vmem:[#allocation13_spill] sm:$0xff] %v4062_v24  ;;  %v4074_v15 = vadd.f32 %v3806_v49, %v3818_v16  ;;  %v4078_v35 = vadd.f32 %v3806_v49, %v3822_v45  ;;  %v1992_v24 = vmax.f32 %v3834_v50, 0.0  ;;  %2055 = vst.msk [vmem:[%s4404_s4 + $0x8] sm:$0xff] %vm1445_vm1, %v1991_v0 }
 0x2ca   :  { %4542 = vst [vmem:[#allocation15_spill] sm:$0xff] %v4066_v3  ;;  %4543 = vst [vmem:[#allocation17_spill] sm:$0xff] %v4070_v9  ;;  %v1993_v8 = vmax.f32 %v3838_v61, 0.0  ;;  %v1994_v3 = vmax.f32 %v3842_v25, 0.0  ;;  %v1995_v28 = vmax.f32 %v3846_v32, 0.0  ;;  %v1996_v9 = vmax.f32 %v3850_v36, 0.0 }
 0x2cb   :  { %4540 = vst [vmem:[#allocation16_spill] sm:$0xff] %v4058_v43  ;;  %4544 = vst [vmem:[#allocation18_spill] sm:$0xff] %v4074_v15  ;;  %v1990_v43 = vmax.f32 %v3826_v7, 0.0  ;;  %v1997_v16 = vmax.f32 %v3854_v26, 0.0  ;;  %v1998_v15 = vmax.f32 %v3858_v48, 0.0  ;;  %v1999_v49 = vmax.f32 %v3862_v42, 0.0 }
 0x2cc   :  { %v2000_v45 = vmax.f32 %v3866_v62, 0.0  ;;  %v2001_v7 = vmax.f32 %v3870_v10, 0.0  ;;  %2056 = vst.msk [vmem:[%s4404_s4 + $0x10] sm:$0xff] %vm1445_vm1, %v1992_v24  ;;  %2057 = vst.msk [vmem:[%s4404_s4 + $0x18] sm:$0xff] %vm1445_vm1, %v1993_v8  ;;  %v2002_v53 = vmax.f32 %v3874_v57, 0.0  ;;  %v2003_v50 = vmax.f32 %v3878_v5, 0.0 }
 0x2cd   :  { %2054 = vst.msk [vmem:[%s4404_s4] sm:$0xff] %vm1445_vm1, %v1990_v43  ;;  %v2004_v61 = vmax.f32 %v3882_v4, 0.0  ;;  %v2005_v25 = vmax.f32 %v3886_v38, 0.0  ;;  %2058 = vst.msk [vmem:[%s4404_s4 + $0x20] sm:$0xff] %vm1445_vm1, %v1994_v3  ;;  %v2006_v32 = vmax.f32 %v3890_v21, 0.0  ;;  %v2007_v36 = vmax.f32 %v3894_v34, 0.0 }
 0x2ce   :  { %2059 = vst.msk [vmem:[%s4404_s4 + $0x28] sm:$0xff] %vm1445_vm1, %v1995_v28  ;;  %2060 = vst.msk [vmem:[%s4404_s4 + $0x30] sm:$0xff] %vm1445_vm1, %v1996_v9  ;;  %v2008_v26 = vmax.f32 %v3898_v2, 0.0  ;;  %v2009_v48 = vmax.f32 %v3902_v18, 0.0  ;;  %v2010_v42 = vmax.f32 %v3906_v54, 0.0  ;;  %v2011_v62 = vmax.f32 %v3910_v13, 0.0 }
 0x2cf   :  { %2061 = vst.msk [vmem:[%s4404_s4 + $0x38] sm:$0xff] %vm1445_vm1, %v1997_v16  ;;  %2062 = vst.msk [vmem:[%s4404_s4 + $0x40] sm:$0xff] %vm1445_vm1, %v1998_v15  ;;  %v2012_v10 = vmax.f32 %v3914_v11, 0.0  ;;  %v4545_v57 = vld [vmem:[#allocation7_spill] sm:$0xff]  ;;  %v2014_v4 = vmax.f32 %v3922_v33, 0.0  ;;  %v2015_v38 = vmax.f32 %v3926_v46, 0.0 }
 0x2d0   :  { %2063 = vst.msk [vmem:[%s4404_s4 + $0x48] sm:$0xff] %vm1445_vm1, %v1999_v49  ;;  %2064 = vst.msk [vmem:[%s4404_s4 + $0x50] sm:$0xff] %vm1445_vm1, %v2000_v45  ;;  %v2013_v5 = vmax.f32 %v4545_v57, 0.0  ;;  %v2016_v21 = vmax.f32 %v3930_v19, 0.0  ;;  %v2017_v34 = vmax.f32 %v3934_v23, 0.0  ;;  %v2018_v2 = vmax.f32 %v3938_v51, 0.0 }
 0x2d1   :  { %2065 = vst.msk [vmem:[%s4404_s4 + $0x58] sm:$0xff] %vm1445_vm1, %v2001_v7  ;;  %2066 = vst.msk [vmem:[%s4404_s4 + $0x60] sm:$0xff] %vm1445_vm1, %v2002_v53  ;;  %v2019_v18 = vmax.f32 %v3942_v22, 0.0  ;;  %v2020_v54 = vmax.f32 %v3946_v37, 0.0  ;;  %v2021_v13 = vmax.f32 %v3950_v17, 0.0  ;;  %v2022_v11 = vmax.f32 %v3954_v56, 0.0 }
 0x2d2   :  { %2067 = vst.msk [vmem:[%s4404_s4 + $0x68] sm:$0xff] %vm1445_vm1, %v2003_v50  ;;  %2068 = vst.msk [vmem:[%s4404_s4 + $0x70] sm:$0xff] %vm1445_vm1, %v2004_v61  ;;  %v2023_v33 = vmax.f32 %v3958_v12, 0.0  ;;  %v2024_v46 = vmax.f32 %v3962_v58, 0.0  ;;  %v2025_v19 = vmax.f32 %v3966_v39, 0.0  ;;  %v2026_v23 = vmax.f32 %v3970_v52, 0.0 }
 0x2d3   :  { %2069 = vst.msk [vmem:[%s4404_s4 + $0x78] sm:$0xff] %vm1445_vm1, %v2005_v25  ;;  %2070 = vst.msk [vmem:[%s4404_s4 + $0x80] sm:$0xff] %vm1445_vm1, %v2006_v32  ;;  %v2027_v51 = vmax.f32 %v3974_v20, 0.0  ;;  %v2028_v22 = vmax.f32 %v3978_v30, 0.0  ;;  %v2029_v37 = vmax.f32 %v3982_v59, 0.0  ;;  %v2030_v17 = vmax.f32 %v3986_v60, 0.0 }
 0x2d4   :  { %2071 = vst.msk [vmem:[%s4404_s4 + $0x88] sm:$0xff] %vm1445_vm1, %v2007_v36  ;;  %2072 = vst.msk [vmem:[%s4404_s4 + $0x90] sm:$0xff] %vm1445_vm1, %v2008_v26  ;;  %v2031_v56 = vmax.f32 %v3990_v55, 0.0  ;;  %v2032_v12 = vmax.f32 %v3994_v44, 0.0  ;;  %v2033_v58 = vmax.f32 %v3998_v31, 0.0  ;;  %v2034_v39 = vmax.f32 %v4002_v40, 0.0 }
 0x2d5   :  { %2073 = vst.msk [vmem:[%s4404_s4 + $0x98] sm:$0xff] %vm1445_vm1, %v2009_v48  ;;  %2074 = vst.msk [vmem:[%s4404_s4 + $0xa0] sm:$0xff] %vm1445_vm1, %v2010_v42  ;;  %v2035_v52 = vmax.f32 %v4006_v1, 0.0  ;;  %v2036_v20 = vmax.f32 %v4010_v41, 0.0  ;;  %v2037_v30 = vmax.f32 %v4014_v63, 0.0  ;;  %v4546_v59 = vld [vmem:[#allocation10_spill] sm:$0xff] }
 0x2d6   :  { %2075 = vst.msk [vmem:[%s4404_s4 + $0xa8] sm:$0xff] %vm1445_vm1, %v2011_v62  ;;  %2076 = vst.msk [vmem:[%s4404_s4 + $0xb0] sm:$0xff] %vm1445_vm1, %v2012_v10  ;;  %v2038_v60 = vmax.f32 %v4546_v59, 0.0  ;;  %v4547_v55 = vld [vmem:[#allocation12_spill] sm:$0xff]  ;;  %v4548_v31 = vld [vmem:[#allocation9_spill] sm:$0xff]  ;;  %v2043_v24 = vmax.f32 %v4038_v14, 0.0 }
 0x2d7   :  { %2077 = vst.msk [vmem:[%s4404_s4 + $0xb8] sm:$0xff] %vm1445_vm1, %v2013_v5  ;;  %2078 = vst.msk [vmem:[%s4404_s4 + $0xc0] sm:$0xff] %vm1445_vm1, %v2014_v4  ;;  %v2039_v44 = vmax.f32 %v4547_v55, 0.0  ;;  %v2040_v40 = vmax.f32 %v4548_v31, 0.0  ;;  %v4549_v1 = vld [vmem:[#allocation11_spill] sm:$0xff]  ;;  %v4550_v63 = vld [vmem:[#allocation14_spill] sm:$0xff] }
 0x2d8   :  { %2079 = vst.msk [vmem:[%s4404_s4 + $0xc8] sm:$0xff] %vm1445_vm1, %v2015_v38  ;;  %2080 = vst.msk [vmem:[%s4404_s4 + $0xd0] sm:$0xff] %vm1445_vm1, %v2016_v21  ;;  %v2041_v41 = vmax.f32 %v4549_v1, 0.0  ;;  %v2042_v43 = vmax.f32 %v4550_v63, 0.0  ;;  %v2044_v3 = vmax.f32 %v4042_v6, 0.0  ;;  %v2045_v9 = vmax.f32 %v4046_v27, 0.0 }
 0x2d9   :  { %2081 = vst.msk [vmem:[%s4404_s4 + $0xd8] sm:$0xff] %vm1445_vm1, %v2017_v34  ;;  %2082 = vst.msk [vmem:[%s4404_s4 + $0xe0] sm:$0xff] %vm1445_vm1, %v2018_v2  ;;  %v2046_v14 = vmax.f32 %v4050_v29, 0.0  ;;  %v2047_v6 = vmax.f32 %v4054_v47, 0.0  ;;  %v4551_v27 = vld [vmem:[#allocation16_spill] sm:$0xff]  ;;  %v4552_v0 = vld [vmem:[#allocation13_spill] sm:$0xff] }
 0x2da   :  { %2083 = vst.msk [vmem:[%s4404_s4 + $0xe8] sm:$0xff] %vm1445_vm1, %v2019_v18  ;;  %2084 = vst.msk [vmem:[%s4404_s4 + $0xf0] sm:$0xff] %vm1445_vm1, %v2020_v54  ;;  %v2048_v15 = vmax.f32 %v4551_v27, 0.0  ;;  %v2049_v8 = vmax.f32 %v4552_v0, 0.0  ;;  %v4553_v29 = vld [vmem:[#allocation15_spill] sm:$0xff]  ;;  %v4554_v28 = vld [vmem:[#allocation17_spill] sm:$0xff] }
 0x2db   :  { %2085 = vst.msk [vmem:[%s4404_s4 + $0xf8] sm:$0xff] %vm1445_vm1, %v2021_v13  ;;  %2086 = vst.msk [vmem:[%s4404_s4 + $0x100] sm:$0xff] %vm1445_vm1, %v2022_v11  ;;  %v2050_v47 = vmax.f32 %v4553_v29, 0.0  ;;  %v2051_v16 = vmax.f32 %v4554_v28, 0.0  ;;  %v4555_v49 = vld [vmem:[#allocation18_spill] sm:$0xff]  ;;  %v2053_v7 = vmax.f32 %v4078_v35, 0.0 }
 0x2dc   :  { %2087 = vst.msk [vmem:[%s4404_s4 + $0x108] sm:$0xff] %vm1445_vm1, %v2023_v33  ;;  %2088 = vst.msk [vmem:[%s4404_s4 + $0x110] sm:$0xff] %vm1445_vm1, %v2024_v46  ;;  %v2052_v45 = vmax.f32 %v4555_v49, 0.0 }
 0x2dd   :  { %2089 = vst.msk [vmem:[%s4404_s4 + $0x118] sm:$0xff] %vm1445_vm1, %v2025_v19  ;;  %2090 = vst.msk [vmem:[%s4404_s4 + $0x120] sm:$0xff] %vm1445_vm1, %v2026_v23 }
 0x2de   :  { %2091 = vst.msk [vmem:[%s4404_s4 + $0x128] sm:$0xff] %vm1445_vm1, %v2027_v51  ;;  %2092 = vst.msk [vmem:[%s4404_s4 + $0x130] sm:$0xff] %vm1445_vm1, %v2028_v22 }
 0x2df   :  { %2093 = vst.msk [vmem:[%s4404_s4 + $0x138] sm:$0xff] %vm1445_vm1, %v2029_v37  ;;  %2094 = vst.msk [vmem:[%s4404_s4 + $0x140] sm:$0xff] %vm1445_vm1, %v2030_v17 }
 0x2e0   :  { %2095 = vst.msk [vmem:[%s4404_s4 + $0x148] sm:$0xff] %vm1445_vm1, %v2031_v56  ;;  %2096 = vst.msk [vmem:[%s4404_s4 + $0x150] sm:$0xff] %vm1445_vm1, %v2032_v12 }
 0x2e1   :  { %2097 = vst.msk [vmem:[%s4404_s4 + $0x158] sm:$0xff] %vm1445_vm1, %v2033_v58  ;;  %2098 = vst.msk [vmem:[%s4404_s4 + $0x160] sm:$0xff] %vm1445_vm1, %v2034_v39 }
 0x2e2   :  { %2099 = vst.msk [vmem:[%s4404_s4 + $0x168] sm:$0xff] %vm1445_vm1, %v2035_v52  ;;  %2100 = vst.msk [vmem:[%s4404_s4 + $0x170] sm:$0xff] %vm1445_vm1, %v2036_v20 }
 0x2e3   :  { %2101 = vst.msk [vmem:[%s4404_s4 + $0x178] sm:$0xff] %vm1445_vm1, %v2037_v30  ;;  %2102 = vst.msk [vmem:[%s4404_s4 + $0x180] sm:$0xff] %vm1445_vm1, %v2038_v60 }
 0x2e4   :  { %2103 = vst.msk [vmem:[%s4404_s4 + $0x188] sm:$0xff] %vm1445_vm1, %v2039_v44  ;;  %2104 = vst.msk [vmem:[%s4404_s4 + $0x190] sm:$0xff] %vm1445_vm1, %v2040_v40 }
 0x2e5   :  { %2105 = vst.msk [vmem:[%s4404_s4 + $0x198] sm:$0xff] %vm1445_vm1, %v2041_v41  ;;  %2106 = vst.msk [vmem:[%s4404_s4 + $0x1a0] sm:$0xff] %vm1445_vm1, %v2042_v43 }
 0x2e6   :  { %2107 = vst.msk [vmem:[%s4404_s4 + $0x1a8] sm:$0xff] %vm1445_vm1, %v2043_v24  ;;  %2108 = vst.msk [vmem:[%s4404_s4 + $0x1b0] sm:$0xff] %vm1445_vm1, %v2044_v3 }
 0x2e7   :  { %2109 = vst.msk [vmem:[%s4404_s4 + $0x1b8] sm:$0xff] %vm1445_vm1, %v2045_v9  ;;  %2110 = vst.msk [vmem:[%s4404_s4 + $0x1c0] sm:$0xff] %vm1445_vm1, %v2046_v14 }
 0x2e8   :  { %2111 = vst.msk [vmem:[%s4404_s4 + $0x1c8] sm:$0xff] %vm1445_vm1, %v2047_v6  ;;  %2112 = vst.msk [vmem:[%s4404_s4 + $0x1d0] sm:$0xff] %vm1445_vm1, %v2048_v15 }
 0x2e9   :  { %2113 = vst.msk [vmem:[%s4404_s4 + $0x1d8] sm:$0xff] %vm1445_vm1, %v2049_v8  ;;  %2114 = vst.msk [vmem:[%s4404_s4 + $0x1e0] sm:$0xff] %vm1445_vm1, %v2050_v47 }
 0x2ea   :  { %2115 = vst.msk [vmem:[%s4404_s4 + $0x1e8] sm:$0xff] %vm1445_vm1, %v2051_v16  ;;  %2116 = vst.msk [vmem:[%s4404_s4 + $0x1f0] sm:$0xff] %vm1445_vm1, %v2052_v45 }
 0x2eb   :  { %2117 = vst.msk [vmem:[%s4404_s4 + $0x1f8] sm:$0xff] %vm1445_vm1, %v2053_v7 }

// kernel: resnet_generator.19
= control target key start
LH: loop header
LB: loop body
LE: loop exit
PB: predicated region body
PF: predicated region fallthrough
CT: control target
= control target key end

     0   :  { %v4368_v0 = vmov 0   ;;  %vm1790_vm0 = vcmask 130048   ;;  %vm3107_vm1 = vcmask 23552   ;;  %s6056_s1 = inlined_call_operand.vmem [shape: bf16[784,3], index: 1, kind: input, shape index: {}]   ;;  %s6057_s0 = inlined_call_operand.vmem [shape: bf16[512,784], index: 0, kind: input, shape index: {}]   ;;  %s6058_s2 = inlined_call_operand.vmem [shape: f32[1,3], index: 2, kind: input, shape index: {}]   ;;  %s6059_s3 = inlined_call_operand.vmem [shape: f32[512,3], index: 3, kind: output, shape index: {}]  }
   0x1   :  { %1887 = vmatprep.subr.bf16.mxu1 %v4368_v0  ;;  %2176 = vmatprep.subr.bf16.mxu0 %v4368_v0  ;;  %v3870_v1 = vld [vmem:[%s6056_s1] sm:$0xff]   ;;  %v3872_v3 = vld [vmem:[%s6056_s1 + $0x8] sm:$0xff]   ;;  %v3874_v5 = vld [vmem:[%s6056_s1 + $0x10] sm:$0xff]  }
   0x2   :  { %v4397_v2 = vld [vmem:[%s6056_s1 + $0x80] sm:$0xff]   ;;  %1888 = vmatpush1.bf16.msra.mxu1 %v3870_v1  ;;  %v4407_v4 = vld [vmem:[%s6056_s1 + $0x88] sm:$0xff]   ;;  %v4418_v6 = vld [vmem:[%s6056_s1 + $0x90] sm:$0xff]  }
   0x3   :  { %2177 = vmatpush1.bf16.msra.mxu0 %v4397_v2  ;;  %1889 = vmatprep.subr.bf16.mxu1 %v4368_v0  ;;  %v3876_v7 = vld [vmem:[%s6056_s1 + $0x18] sm:$0xff]   ;;  %v3878_v9 = vld [vmem:[%s6056_s1 + $0x20] sm:$0xff]   ;;  %v3880_v11 = vld [vmem:[%s6056_s1 + $0x28] sm:$0xff]  }
   0x4   :  { %2178 = vmatprep.subr.bf16.mxu0 %v4368_v0  ;;  %v4429_v8 = vld [vmem:[%s6056_s1 + $0x98] sm:$0xff]   ;;  %v4440_v10 = vld [vmem:[%s6056_s1 + $0xa0] sm:$0xff]   ;;  %v4451_v12 = vld [vmem:[%s6056_s1 + $0xa8] sm:$0xff]  }
   0x5   :  { %v3882_v13 = vld [vmem:[%s6056_s1 + $0x30] sm:$0xff]   ;;  %v3884_v15 = vld [vmem:[%s6056_s1 + $0x38] sm:$0xff]   ;;  %v3886_v17 = vld [vmem:[%s6056_s1 + $0x40] sm:$0xff]  }
   0x6   :  { %1890 = vmatpush1.bf16.msra.mxu1 %v3872_v3  ;;  %v4462_v14 = vld [vmem:[%s6056_s1 + $0xb0] sm:$0xff]   ;;  %v4473_v16 = vld [vmem:[%s6056_s1 + $0xb8] sm:$0xff]   ;;  %v4484_v18 = vld [vmem:[%s6056_s1 + $0xc0] sm:$0xff]  }
   0x7   :  { %2179 = vmatpush1.bf16.msra.mxu0 %v4407_v4  ;;  %1891 = vmatprep.subr.bf16.mxu1 %v4368_v0  ;;  %v3904_v19 = vld [vmem:[%s6057_s0 + $0x4] ss:$28 sps:$4 sm:$0xff]   ;;  %v3888_v20 = vld [vmem:[%s6056_s1 + $0x48] sm:$0xff]   ;;  %v3890_v23 = vld [vmem:[%s6056_s1 + $0x50] sm:$0xff]  }
   0x8   :  { %2180 = vmatprep.subr.bf16.mxu0 %v4368_v0  ;;  %v3907_v21 = vld [vmem:[%s6057_s0 + $0xc] ss:$28 sps:$4 sm:$0xff]   ;;  %1919 = vmatprep.mubr.bf16.mxu1 %v3904_v19  ;;  %v4512_v24 = vld [vmem:[%s6056_s1 + $0xd0] sm:$0xff]   ;;  %v3892_v25 = vld [vmem:[%s6056_s1 + $0x58] sm:$0xff]  }
   0x9   :  { %v4501_v22 = vld [vmem:[%s6056_s1 + $0xc8] sm:$0xff]   ;;  %2208 = vmatprep.mubr.bf16.mxu0 %v3907_v21  ;;  %v4523_v26 = vld [vmem:[%s6056_s1 + $0xd8] sm:$0xff]   ;;  %v3894_v27 = vld [vmem:[%s6056_s1 + $0x60] sm:$0xff]  }
   0xa   :  { %1892 = vmatpush1.bf16.msra.mxu1 %v3874_v5  ;;  %v4534_v28 = vld [vmem:[%s6056_s1 + $0xe0] sm:$0xff]   ;;  %v3896_v29 = vld [vmem:[%s6056_s1 + $0x68] sm:$0xff]   ;;  %v3898_v31 = vld [vmem:[%s6056_s1 + $0x70] sm:$0xff]  }
   0xb   :  { %2181 = vmatpush1.bf16.msra.mxu0 %v4418_v6  ;;  %1893 = vmatprep.subr.bf16.mxu1 %v4368_v0  ;;  %v4545_v30 = vld [vmem:[%s6056_s1 + $0xe8] sm:$0xff]   ;;  %v4556_v32 = vld [vmem:[%s6056_s1 + $0xf0] sm:$0xff]   ;;  %v3900_v33 = vld [vmem:[%s6056_s1 + $0x78] sm:$0xff]  }
   0xc   :  { %2182 = vmatprep.subr.bf16.mxu0 %v4368_v0  ;;  %v4567_v34 = vld [vmem:[%s6056_s1 + $0xf8] sm:$0xff]   ;;  %v3905_v36 = vld [vmem:[%s6057_s0 + $0x8] ss:$28 sps:$4 sm:$0xff]   ;;  %v3916_v43 = vld [vmem:[%s6057_s0 + $0x74] ss:$28 sps:$4 sm:$0xff]  }
   0xd   :  { %v3902_v35 = vld [vmem:[%s6057_s0] ss:$28 sps:$4 sm:$0xff]   ;;  %v3915_v40 = vld [vmem:[%s6056_s1 + $0x108] sm:$0xff]   ;;  %v3913_v41 = vld [vmem:[%s6057_s0 + $0x38] ss:$28 sps:$4 sm:$0xff]  }
   0xe   :  { %1894 = vmatpush1.bf16.msra.mxu1 %v3876_v7  ;;  %v3908_v37 = vld [vmem:[%s6056_s1 + $0x100] sm:$0xff]   ;;  %v3909_v38 = vld [vmem:[%s6057_s0 + $0x3c] ss:$28 sps:$4 sm:$0xff]   ;;  %v3928_v45 = vld [vmem:[%s6056_s1 + $0x110] sm:$0xff]  }
   0xf   :  { %2183 = vmatpush1.bf16.msra.mxu0 %v4429_v8  ;;  %1895 = vmatprep.subr.bf16.mxu1 %v4368_v0  ;;  %v3911_v39 = vld [vmem:[%s6057_s0 + $0x44] ss:$28 sps:$4 sm:$0xff]   ;;  %v3918_v44 = vld [vmem:[%s6057_s0 + $0x7c] ss:$28 sps:$4 sm:$0xff]   ;;  %v3920_v47 = vld [vmem:[%s6057_s0 + $0x70] ss:$28 sps:$4 sm:$0xff]  }
  0x10   :  { %2184 = vmatprep.subr.bf16.mxu0 %v4368_v0  ;;  %v3914_v42 = vld [vmem:[%s6057_s0 + $0x40] ss:$28 sps:$4 sm:$0xff]   ;;  %v3921_v48 = vld [vmem:[%s6057_s0 + $0x78] ss:$28 sps:$4 sm:$0xff]   ;;  %v3922_v49 = vld [vmem:[%s6057_s0 + $0xac] ss:$28 sps:$4 sm:$0xff]  }
  0x11   :  { %v3935_v46 = vld [vmem:[%s6056_s1 + $0x118] sm:$0xff]   ;;  %v3924_v50 = vld [vmem:[%s6057_s0 + $0xb4] ss:$28 sps:$4 sm:$0xff]   ;;  %v3948_v51 = vld [vmem:[%s6056_s1 + $0x120] sm:$0xff]  }
  0x12   :  { %1896 = vmatpush1.bf16.msra.mxu1 %v3878_v9  ;;  %v3955_v52 = vld [vmem:[%s6056_s1 + $0x128] sm:$0xff]   ;;  %v3929_v55 = vld [vmem:[%s6057_s0 + $0xe4] ss:$28 sps:$4 sm:$0xff]   ;;  %v3968_v57 = vld [vmem:[%s6056_s1 + $0x130] sm:$0xff]  }
  0x13   :  { %2185 = vmatpush1.bf16.msra.mxu0 %v4440_v10  ;;  %1897 = vmatprep.subr.bf16.mxu1 %v4368_v0  ;;  %v3926_v53 = vld [vmem:[%s6057_s0 + $0xa8] ss:$28 sps:$4 sm:$0xff]   ;;  %v3927_v54 = vld [vmem:[%s6057_s0 + $0xb0] ss:$28 sps:$4 sm:$0xff]   ;;  %v3975_v58 = vld [vmem:[%s6056_s1 + $0x138] sm:$0xff]  }
  0x14   :  { %2186 = vmatprep.subr.bf16.mxu0 %v4368_v0  ;;  %v3931_v56 = vld [vmem:[%s6057_s0 + $0xec] ss:$28 sps:$4 sm:$0xff]   ;;  %v3933_v59 = vld [vmem:[%s6057_s0 + $0xe0] ss:$28 sps:$4 sm:$0xff]   ;;  %v3947_v9 = vld [vmem:[%s6057_s0 + $0x158] ss:$28 sps:$4 sm:$0xff]  }
  0x15   :  { %v3934_v60 = vld [vmem:[%s6057_s0 + $0xe8] ss:$28 sps:$4 sm:$0xff]   ;;  %v3936_v61 = vld [vmem:[%s6057_s0 + $0x11c] ss:$28 sps:$4 sm:$0xff]   ;;  %v3946_v7 = vld [vmem:[%s6057_s0 + $0x150] ss:$28 sps:$4 sm:$0xff]  }
  0x16   :  { %1898 = vmatpush1.bf16.msra.mxu1 %v3880_v11  ;;  %v3938_v62 = vld [vmem:[%s6057_s0 + $0x124] ss:$28 sps:$4 sm:$0xff]   ;;  %v3995_v1 = vld [vmem:[%s6056_s1 + $0x148] sm:$0xff]   ;;  %v3944_v5 = vld [vmem:[%s6057_s0 + $0x15c] ss:$28 sps:$4 sm:$0xff]  }
  0x17   :  { %2187 = vmatpush1.bf16.msra.mxu0 %v4451_v12  ;;  %1899 = vmatprep.subr.bf16.mxu1 %v4368_v0  ;;  %v3988_v63 = vld [vmem:[%s6056_s1 + $0x140] sm:$0xff]   ;;  %v3951_v11 = vld [vmem:[%s6057_s0 + $0x194] ss:$28 sps:$4 sm:$0xff]  }
  0x18   :  { %2188 = vmatprep.subr.bf16.mxu0 %v4368_v0  ;;  %v3941_v3 = vld [vmem:[%s6057_s0 + $0x120] ss:$28 sps:$4 sm:$0xff]   ;;  %v3961_v21 = vld [vmem:[%s6057_s0 + $0x1c8] ss:$28 sps:$4 sm:$0xff]  }
  0x19   :  { %v3960_v19 = vld [vmem:[%s6057_s0 + $0x1c0] ss:$28 sps:$4 sm:$0xff]  }
  0x1a   :  { %1900 = vmatpush1.bf16.msra.mxu1 %v3882_v13  ;;  %v3953_v13 = vld [vmem:[%s6057_s0 + $0x188] ss:$28 sps:$4 sm:$0xff]  }
  0x1b   :  { %2189 = vmatpush1.bf16.msra.mxu0 %v4462_v14  ;;  %1901 = vmatprep.subr.bf16.mxu1 %v4368_v0 }
  0x1c   :  { %2190 = vmatprep.subr.bf16.mxu0 %v4368_v0 }
  0x1e   :  { %1902 = vmatpush1.bf16.msra.mxu1 %v3884_v15  ;;  %v3954_v15 = vld [vmem:[%s6057_s0 + $0x190] ss:$28 sps:$4 sm:$0xff]  }
  0x1f   :  { %2191 = vmatpush1.bf16.msra.mxu0 %v4473_v16  ;;  %1903 = vmatprep.subr.bf16.mxu1 %v4368_v0 }
  0x20   :  { %2192 = vmatprep.subr.bf16.mxu0 %v4368_v0 }
  0x22   :  { %1904 = vmatpush1.bf16.msra.mxu1 %v3886_v17  ;;  %v3958_v17 = vld [vmem:[%s6057_s0 + $0x1cc] ss:$28 sps:$4 sm:$0xff]  }
  0x23   :  { %2193 = vmatpush1.bf16.msra.mxu0 %v4484_v18  ;;  %1905 = vmatprep.subr.bf16.mxu1 %v4368_v0 }
  0x24   :  { %2194 = vmatprep.subr.bf16.mxu0 %v4368_v0 }
  0x26   :  { %1906 = vmatpush1.bf16.msra.mxu1 %v3888_v20  ;;  %v4055_v20 = vld [vmem:[%s6056_s1 + $0x178] sm:$0xff]  }
  0x27   :  { %2195 = vmatpush1.bf16.msra.mxu0 %v4501_v22  ;;  %1907 = vmatprep.subr.bf16.mxu1 %v4368_v0 }
  0x28   :  { %2196 = vmatprep.subr.bf16.mxu0 %v4368_v0 }
  0x2a   :  { %1908 = vmatpush1.bf16.msra.mxu1 %v3890_v23  ;;  %v3964_v23 = vld [vmem:[%s6057_s0 + $0x204] ss:$28 sps:$4 sm:$0xff]  }
  0x2b   :  { %2197 = vmatpush1.bf16.msra.mxu0 %v4512_v24  ;;  %1909 = vmatprep.subr.bf16.mxu1 %v4368_v0 }
  0x2c   :  { %2198 = vmatprep.subr.bf16.mxu0 %v4368_v0 }
  0x2e   :  { %1910 = vmatpush1.bf16.msra.mxu1 %v3892_v25  ;;  %v3967_v25 = vld [vmem:[%s6057_s0 + $0x200] ss:$28 sps:$4 sm:$0xff]  }
  0x2f   :  { %2199 = vmatpush1.bf16.msra.mxu0 %v4523_v26  ;;  %1911 = vmatprep.subr.bf16.mxu1 %v4368_v0 }
  0x30   :  { %2200 = vmatprep.subr.bf16.mxu0 %v4368_v0 }
  0x32   :  { %1912 = vmatpush1.bf16.msra.mxu1 %v3894_v27  ;;  %v3973_v27 = vld [vmem:[%s6057_s0 + $0x230] ss:$28 sps:$4 sm:$0xff]  }
  0x33   :  { %2201 = vmatpush1.bf16.msra.mxu0 %v4534_v28  ;;  %1913 = vmatprep.subr.bf16.mxu1 %v4368_v0 }
  0x34   :  { %2202 = vmatprep.subr.bf16.mxu0 %v4368_v0 }
  0x36   :  { %1914 = vmatpush1.bf16.msra.mxu1 %v3896_v29  ;;  %v3976_v29 = vld [vmem:[%s6057_s0 + $0x26c] ss:$28 sps:$4 sm:$0xff]  }
  0x37   :  { %2203 = vmatpush1.bf16.msra.mxu0 %v4545_v30  ;;  %1915 = vmatprep.subr.bf16.mxu1 %v4368_v0 }
  0x38   :  { %2204 = vmatprep.subr.bf16.mxu0 %v4368_v0 }
  0x3a   :  { %1916 = vmatpush1.bf16.msra.mxu1 %v3898_v31  ;;  %v3980_v31 = vld [vmem:[%s6057_s0 + $0x268] ss:$28 sps:$4 sm:$0xff]  }
  0x3b   :  { %2205 = vmatpush1.bf16.msra.mxu0 %v4556_v32  ;;  %1917 = vmatprep.subr.bf16.mxu1 %v4368_v0 }
  0x3c   :  { %2206 = vmatprep.subr.bf16.mxu0 %v4368_v0 }
  0x3e   :  { %1918 = vmatpush1.bf16.msra.mxu1 %v3900_v33  ;;  %v3982_v33 = vld [vmem:[%s6057_s0 + $0x2a4] ss:$28 sps:$4 sm:$0xff]  }
  0x3f   :  { %2207 = vmatpush1.bf16.msra.mxu0 %v4567_v34  ;;  %3581 = vmatprep.subr.bf16.mxu1 %v4368_v0 }
  0x40   :  { %2465 = vmatprep.subr.bf16.mxu0 %v4368_v0 }
  0x41   :  { %1920 = vmatmul.mubr.bf16.vlgmr.msra.gmra.mrb[0].mxu1 %v3902_v35  ;;  %v3986_v35 = vld [vmem:[%s6057_s0 + $0x2a0] ss:$28 sps:$4 sm:$0xff]  }
  0x42   :  { %2209 = vmatmul.mubr.bf16.vlgmr.msra.gmra.mrb[0].mxu0 %v3905_v36  ;;  %3597 = vmatpush1.bf16.msra.mxu1 %v4397_v2  ;;  %v3940_v2 = vld [vmem:[%s6057_s0 + $0x118] ss:$28 sps:$4 sm:$0xff]   ;;  %v3987_v36 = vld [vmem:[%s6057_s0 + $0x2a8] ss:$28 sps:$4 sm:$0xff]  }
  0x43   :  { %2466 = vmatpush1.bf16.msra.mxu0 %v3908_v37  ;;  %1927 = vmatprep.mubr.bf16.mxu1 %v3909_v38  ;;  %v3989_v37 = vld [vmem:[%s6057_s0 + $0x2dc] ss:$28 sps:$4 sm:$0xff]   ;;  %v3991_v38 = vld [vmem:[%s6057_s0 + $0x2e4] ss:$28 sps:$4 sm:$0xff]  }
  0x44   :  { %2216 = vmatprep.mubr.bf16.mxu0 %v3911_v39  ;;  %2467 = vmatprep.subr.bf16.mxu0 %v4368_v0  ;;  %v3993_v39 = vld [vmem:[%s6057_s0 + $0x2d8] ss:$28 sps:$4 sm:$0xff]  }
  0x45   :  { %3582 = vmatprep.subr.bf16.mxu1 %v4368_v0 }
  0x46   :  { %3598 = vmatpush1.bf16.msra.mxu1 %v4407_v4  ;;  %v3942_v4 = vld [vmem:[%s6057_s0 + $0x154] ss:$28 sps:$4 sm:$0xff]  }
  0x47   :  { %2468 = vmatpush1.bf16.msra.mxu0 %v3915_v40  ;;  %3583 = vmatprep.subr.bf16.mxu1 %v4368_v0  ;;  %v3994_v40 = vld [vmem:[%s6057_s0 + $0x2e0] ss:$28 sps:$4 sm:$0xff]  }
  0x48   :  { %2469 = vmatprep.subr.bf16.mxu0 %v4368_v0 }
  0x49   :  { %1928 = vmatmul.mubr.bf16.gmra.mrb[4].mxu1 %v3913_v41  ;;  %v3996_v41 = vld [vmem:[%s6057_s0 + $0x314] ss:$28 sps:$4 sm:$0xff]  }
  0x4a   :  { %2217 = vmatmul.mubr.bf16.gmra.mrb[4].mxu0 %v3914_v42  ;;  %1935 = vmatprep.mubr.bf16.mxu1 %v3916_v43  ;;  %v3998_v42 = vld [vmem:[%s6057_s0 + $0x31c] ss:$28 sps:$4 sm:$0xff]   ;;  %v4000_v43 = vld [vmem:[%s6057_s0 + $0x310] ss:$28 sps:$4 sm:$0xff]  }
  0x4b   :  { %2224 = vmatprep.mubr.bf16.mxu0 %v3918_v44  ;;  %2470 = vmatpush1.bf16.msra.mxu0 %v3928_v45  ;;  %v4001_v44 = vld [vmem:[%s6057_s0 + $0x318] ss:$28 sps:$4 sm:$0xff]   ;;  %v4002_v45 = vld [vmem:[%s6057_s0 + $0x34c] ss:$28 sps:$4 sm:$0xff]  }
  0x4c   :  { %3599 = vmatpush1.bf16.msra.mxu1 %v4418_v6  ;;  %2471 = vmatprep.subr.bf16.mxu0 %v4368_v0  ;;  %v4008_v6 = vld [vmem:[%s6056_s1 + $0x150] sm:$0xff]  }
  0x4d   :  { %3584 = vmatprep.subr.bf16.mxu1 %v4368_v0 }
  0x4f   :  { %2472 = vmatpush1.bf16.msra.mxu0 %v3935_v46  ;;  %v4004_v46 = vld [vmem:[%s6057_s0 + $0x354] ss:$28 sps:$4 sm:$0xff]  }
  0x50   :  { %2473 = vmatprep.subr.bf16.mxu0 %v4368_v0  ;;  %3600 = vmatpush1.bf16.msra.mxu1 %v4429_v8  ;;  %v4015_v8 = vld [vmem:[%s6056_s1 + $0x158] sm:$0xff]  }
  0x51   :  { %1936 = vmatmul.mubr.bf16.gmra.mrb[8].mxu1 %v3920_v47  ;;  %3585 = vmatprep.subr.bf16.mxu1 %v4368_v0  ;;  %v4006_v47 = vld [vmem:[%s6057_s0 + $0x348] ss:$28 sps:$4 sm:$0xff]  }
  0x52   :  { %2225 = vmatmul.mubr.bf16.gmra.mrb[8].mxu0 %v3921_v48  ;;  %1943 = vmatprep.mubr.bf16.mxu1 %v3922_v49  ;;  %v4007_v48 = vld [vmem:[%s6057_s0 + $0x350] ss:$28 sps:$4 sm:$0xff]   ;;  %v4009_v49 = vld [vmem:[%s6057_s0 + $0x384] ss:$28 sps:$4 sm:$0xff]  }
  0x53   :  { %2232 = vmatprep.mubr.bf16.mxu0 %v3924_v50  ;;  %2474 = vmatpush1.bf16.msra.mxu0 %v3948_v51  ;;  %v4011_v50 = vld [vmem:[%s6057_s0 + $0x38c] ss:$28 sps:$4 sm:$0xff]   ;;  %v4013_v51 = vld [vmem:[%s6057_s0 + $0x380] ss:$28 sps:$4 sm:$0xff]  }
  0x54   :  { %2475 = vmatprep.subr.bf16.mxu0 %v4368_v0  ;;  %3601 = vmatpush1.bf16.msra.mxu1 %v4440_v10  ;;  %v3949_v10 = vld [vmem:[%s6057_s0 + $0x18c] ss:$28 sps:$4 sm:$0xff]  }
  0x55   :  { %3586 = vmatprep.subr.bf16.mxu1 %v4368_v0 }
  0x57   :  { %2476 = vmatpush1.bf16.msra.mxu0 %v3955_v52  ;;  %v4014_v52 = vld [vmem:[%s6057_s0 + $0x388] ss:$28 sps:$4 sm:$0xff]  }
  0x58   :  { %2477 = vmatprep.subr.bf16.mxu0 %v4368_v0  ;;  %3602 = vmatpush1.bf16.msra.mxu1 %v4451_v12  ;;  %v4028_v12 = vld [vmem:[%s6056_s1 + $0x160] sm:$0xff]  }
  0x59   :  { %1944 = vmatmul.mubr.bf16.gmra.mrb[12].mxu1 %v3926_v53  ;;  %3587 = vmatprep.subr.bf16.mxu1 %v4368_v0  ;;  %v4016_v53 = vld [vmem:[%s6057_s0 + $0x3bc] ss:$28 sps:$4 sm:$0xff]  }
  0x5a   :  { %2233 = vmatmul.mubr.bf16.gmra.mrb[12].mxu0 %v3927_v54  ;;  %1951 = vmatprep.mubr.bf16.mxu1 %v3929_v55  ;;  %v4018_v54 = vld [vmem:[%s6057_s0 + $0x3c4] ss:$28 sps:$4 sm:$0xff]  }
  0x5b   :  { %2240 = vmatprep.mubr.bf16.mxu0 %v3931_v56  ;;  %2478 = vmatpush1.bf16.msra.mxu0 %v3968_v57  ;;  %v4874_v55 = vld [vmem:[%s6056_s1 + $0x180] sm:$0xff]   ;;  %v4020_v56 = vld [vmem:[%s6057_s0 + $0x3b8] ss:$28 sps:$4 sm:$0xff]  }
  0x5c   :  { %2479 = vmatprep.subr.bf16.mxu0 %v4368_v0  ;;  %3603 = vmatpush1.bf16.msra.mxu1 %v4462_v14  ;;  %v4035_v14 = vld [vmem:[%s6056_s1 + $0x168] sm:$0xff]   ;;  %v4021_v57 = vld [vmem:[%s6057_s0 + $0x3c0] ss:$28 sps:$4 sm:$0xff]  }
  0x5d   :  { %3588 = vmatprep.subr.bf16.mxu1 %v4368_v0 }
  0x5f   :  { %2480 = vmatpush1.bf16.msra.mxu0 %v3975_v58  ;;  %v4022_v58 = vld [vmem:[%s6057_s0 + $0x3f4] ss:$28 sps:$4 sm:$0xff]  }
  0x60   :  { %2481 = vmatprep.subr.bf16.mxu0 %v4368_v0  ;;  %3604 = vmatpush1.bf16.msra.mxu1 %v4473_v16  ;;  %v3956_v16 = vld [vmem:[%s6057_s0 + $0x1c4] ss:$28 sps:$4 sm:$0xff]  }
  0x61   :  { %1952 = vmatmul.mubr.bf16.gmra.mrb[16].mxu1 %v3933_v59  ;;  %3589 = vmatprep.subr.bf16.mxu1 %v4368_v0  ;;  %v4024_v59 = vld [vmem:[%s6057_s0 + $0x3fc] ss:$28 sps:$4 sm:$0xff]  }
  0x62   :  { %2241 = vmatmul.mubr.bf16.gmra.mrb[16].mxu0 %v3934_v60  ;;  %1959 = vmatprep.mubr.bf16.mxu1 %v3936_v61  ;;  %v4026_v60 = vld [vmem:[%s6057_s0 + $0x3f0] ss:$28 sps:$4 sm:$0xff]   ;;  %v4027_v61 = vld [vmem:[%s6057_s0 + $0x3f8] ss:$28 sps:$4 sm:$0xff]  }
  0x63   :  { %2248 = vmatprep.mubr.bf16.mxu0 %v3938_v62  ;;  %2482 = vmatpush1.bf16.msra.mxu0 %v3988_v63  ;;  %v4029_v62 = vld [vmem:[%s6057_s0 + $0x42c] ss:$28 sps:$4 sm:$0xff]   ;;  %v4031_v63 = vld [vmem:[%s6057_s0 + $0x434] ss:$28 sps:$4 sm:$0xff]  }
  0x64   :  { %2483 = vmatprep.subr.bf16.mxu0 %v4368_v0  ;;  %3605 = vmatpush1.bf16.msra.mxu1 %v4484_v18  ;;  %v4048_v18 = vld [vmem:[%s6056_s1 + $0x170] sm:$0xff]  }
  0x65   :  { %3590 = vmatprep.subr.bf16.mxu1 %v4368_v0 }
  0x67   :  { %2484 = vmatpush1.bf16.msra.mxu0 %v3995_v1  ;;  %v4033_v1 = vld [vmem:[%s6057_s0 + $0x428] ss:$28 sps:$4 sm:$0xff]  }
  0x68   :  { %2485 = vmatprep.subr.bf16.mxu0 %v4368_v0  ;;  %3606 = vmatpush1.bf16.msra.mxu1 %v4501_v22  ;;  %v3962_v22 = vld [vmem:[%s6057_s0 + $0x1fc] ss:$28 sps:$4 sm:$0xff]  }
  0x69   :  { %1960 = vmatmul.mubr.bf16.gmra.mrb[20].mxu1 %v3940_v2  ;;  %3591 = vmatprep.subr.bf16.mxu1 %v4368_v0  ;;  %v4034_v2 = vld [vmem:[%s6057_s0 + $0x430] ss:$28 sps:$4 sm:$0xff]  }
  0x6a   :  { %2249 = vmatmul.mubr.bf16.gmra.mrb[20].mxu0 %v3941_v3  ;;  %1967 = vmatprep.mubr.bf16.mxu1 %v3942_v4  ;;  %v4036_v3 = vld [vmem:[%s6057_s0 + $0x464] ss:$28 sps:$4 sm:$0xff]   ;;  %v4038_v4 = vld [vmem:[%s6057_s0 + $0x46c] ss:$28 sps:$4 sm:$0xff]  }
  0x6b   :  { %2256 = vmatprep.mubr.bf16.mxu0 %v3944_v5  ;;  %2486 = vmatpush1.bf16.msra.mxu0 %v4008_v6  ;;  %v4040_v5 = vld [vmem:[%s6057_s0 + $0x460] ss:$28 sps:$4 sm:$0xff]   ;;  %v4041_v6 = vld [vmem:[%s6057_s0 + $0x468] ss:$28 sps:$4 sm:$0xff]  }
  0x6c   :  { %2487 = vmatprep.subr.bf16.mxu0 %v4368_v0  ;;  %3607 = vmatpush1.bf16.msra.mxu1 %v4512_v24  ;;  %v3966_v24 = vld [vmem:[%s6057_s0 + $0x1f8] ss:$28 sps:$4 sm:$0xff]  }
  0x6d   :  { %3592 = vmatprep.subr.bf16.mxu1 %v4368_v0 }
  0x6f   :  { %2488 = vmatpush1.bf16.msra.mxu0 %v4015_v8  ;;  %v4044_v8 = vld [vmem:[%s6057_s0 + $0x4a4] ss:$28 sps:$4 sm:$0xff]  }
  0x70   :  { %2489 = vmatprep.subr.bf16.mxu0 %v4368_v0  ;;  %3608 = vmatpush1.bf16.msra.mxu1 %v4523_v26  ;;  %v3969_v26 = vld [vmem:[%s6057_s0 + $0x234] ss:$28 sps:$4 sm:$0xff]  }
  0x71   :  { %1968 = vmatmul.mubr.bf16.gmra.mrb[24].mxu1 %v3946_v7  ;;  %3593 = vmatprep.subr.bf16.mxu1 %v4368_v0  ;;  %v4042_v7 = vld [vmem:[%s6057_s0 + $0x49c] ss:$28 sps:$4 sm:$0xff]  }
  0x72   :  { %2257 = vmatmul.mubr.bf16.gmra.mrb[24].mxu0 %v3947_v9  ;;  %1975 = vmatprep.mubr.bf16.mxu1 %v3949_v10  ;;  %v4046_v9 = vld [vmem:[%s6057_s0 + $0x498] ss:$28 sps:$4 sm:$0xff]   ;;  %v4047_v10 = vld [vmem:[%s6057_s0 + $0x4a0] ss:$28 sps:$4 sm:$0xff]  }
  0x73   :  { %2264 = vmatprep.mubr.bf16.mxu0 %v3951_v11  ;;  %2490 = vmatpush1.bf16.msra.mxu0 %v4028_v12  ;;  %v4049_v11 = vld [vmem:[%s6057_s0 + $0x4d4] ss:$28 sps:$4 sm:$0xff]   ;;  %v4051_v12 = vld [vmem:[%s6057_s0 + $0x4dc] ss:$28 sps:$4 sm:$0xff]  }
  0x74   :  { %2491 = vmatprep.subr.bf16.mxu0 %v4368_v0  ;;  %3609 = vmatpush1.bf16.msra.mxu1 %v4534_v28  ;;  %v3974_v28 = vld [vmem:[%s6057_s0 + $0x238] ss:$28 sps:$4 sm:$0xff]  }
  0x75   :  { %3594 = vmatprep.subr.bf16.mxu1 %v4368_v0 }
  0x77   :  { %2492 = vmatpush1.bf16.msra.mxu0 %v4035_v14  ;;  %v4054_v14 = vld [vmem:[%s6057_s0 + $0x4d8] ss:$28 sps:$4 sm:$0xff]  }
  0x78   :  { %2493 = vmatprep.subr.bf16.mxu0 %v4368_v0  ;;  %3610 = vmatpush1.bf16.msra.mxu1 %v4545_v30  ;;  %v3978_v30 = vld [vmem:[%s6057_s0 + $0x274] ss:$28 sps:$4 sm:$0xff]  }
  0x79   :  { %1976 = vmatmul.mubr.bf16.gmra.mrb[28].mxu1 %v3953_v13  ;;  %3595 = vmatprep.subr.bf16.mxu1 %v4368_v0  ;;  %v4053_v13 = vld [vmem:[%s6057_s0 + $0x4d0] ss:$28 sps:$4 sm:$0xff]  }
  0x7a   :  { %2265 = vmatmul.mubr.bf16.gmra.mrb[28].mxu0 %v3954_v15  ;;  %1983 = vmatprep.mubr.bf16.mxu1 %v3956_v16  ;;  %v4056_v15 = vld [vmem:[%s6057_s0 + $0x50c] ss:$28 sps:$4 sm:$0xff]   ;;  %v4058_v16 = vld [vmem:[%s6057_s0 + $0x514] ss:$28 sps:$4 sm:$0xff]  }
  0x7b   :  { %2272 = vmatprep.mubr.bf16.mxu0 %v3958_v17  ;;  %2494 = vmatpush1.bf16.msra.mxu0 %v4048_v18  ;;  %v4060_v17 = vld [vmem:[%s6057_s0 + $0x508] ss:$28 sps:$4 sm:$0xff]   ;;  %v4061_v18 = vld [vmem:[%s6057_s0 + $0x510] ss:$28 sps:$4 sm:$0xff]  }
  0x7c   :  { %2495 = vmatprep.subr.bf16.mxu0 %v4368_v0  ;;  %3611 = vmatpush1.bf16.msra.mxu1 %v4556_v32  ;;  %v3981_v32 = vld [vmem:[%s6057_s0 + $0x270] ss:$28 sps:$4 sm:$0xff]  }
  0x7d   :  { %3596 = vmatprep.subr.bf16.mxu1 %v4368_v0  ;;  %v3971_v0 = vld [vmem:[%s6057_s0 + $0x23c] ss:$28 sps:$4 sm:$0xff]  }
  0x7f   :  { %2496 = vmatpush1.bf16.msra.mxu0 %v4055_v20  ;;  %v4066_v20 = vld [vmem:[%s6057_s0 + $0x14] ss:$28 sps:$4 sm:$0xff]  }
  0x80   :  { %3612 = vmatpush1.bf16.msra.mxu1 %v4567_v34  ;;  %v3984_v34 = vld [vmem:[%s6057_s0 + $0x2ac] ss:$28 sps:$4 sm:$0xff]  }
  0x81   :  { %1984 = vmatmul.mubr.bf16.gmra.mrb[32].mxu1 %v3960_v19  ;;  %3515 = vmatprep.subr.bf16.mxu1 %v4874_v55  ;;  %v4062_v19 = vld [vmem:[%s6057_s0 + $0x544] ss:$28 sps:$4 sm:$0xff]  }
  0x82   :  { %2273 = vmatmul.mubr.bf16.gmra.mrb[32].mxu0 %v3961_v21  ;;  %1991 = vmatprep.mubr.bf16.mxu1 %v3962_v22  ;;  %v4067_v21 = vld [vmem:[%s6057_s0 + $0x540] ss:$28 sps:$4 sm:$0xff]   ;;  %v4064_v22 = vld [vmem:[%s6057_s0 + $0x10] ss:$28 sps:$4 sm:$0xff]  }
  0x83   :  { %2280 = vmatprep.mubr.bf16.mxu0 %v3964_v23  ;;  %v4068_v23 = vld [vmem:[%s6057_s0 + $0x57c] ss:$28 sps:$4 sm:$0xff]  }
  0x89   :  { %1992 = vmatmul.mubr.bf16.gmra.mrb[36].mxu1 %v3966_v24  ;;  %v4070_v24 = vld [vmem:[%s6057_s0 + $0x4c] ss:$28 sps:$4 sm:$0xff]  }
  0x8a   :  { %2281 = vmatmul.mubr.bf16.gmra.mrb[36].mxu0 %v3967_v25  ;;  %1999 = vmatprep.mubr.bf16.mxu1 %v3969_v26  ;;  %v4072_v25 = vld [vmem:[%s6057_s0 + $0x578] ss:$28 sps:$4 sm:$0xff]   ;;  %v4073_v26 = vld [vmem:[%s6057_s0 + $0x48] ss:$28 sps:$4 sm:$0xff]  }
  0x8b   :  { %2288 = vmatprep.mubr.bf16.mxu0 %v3971_v0  ;;  %v4074_v0 = vld [vmem:[%s6057_s0 + $0x5b4] ss:$28 sps:$4 sm:$0xff]  }
  0x91   :  { %2000 = vmatmul.mubr.bf16.gmra.mrb[40].mxu1 %v3973_v27  ;;  %v4076_v27 = vld [vmem:[%s6057_s0 + $0x84] ss:$28 sps:$4 sm:$0xff]  }
  0x92   :  { %2289 = vmatmul.mubr.bf16.gmra.mrb[40].mxu0 %v3974_v28  ;;  %2007 = vmatprep.mubr.bf16.mxu1 %v3976_v29  ;;  %v4078_v28 = vld [vmem:[%s6057_s0 + $0x5b0] ss:$28 sps:$4 sm:$0xff]   ;;  %v4079_v29 = vld [vmem:[%s6057_s0 + $0x80] ss:$28 sps:$4 sm:$0xff]  }
  0x93   :  { %2296 = vmatprep.mubr.bf16.mxu0 %v3978_v30  ;;  %v4080_v30 = vld [vmem:[%s6057_s0 + $0x5ec] ss:$28 sps:$4 sm:$0xff]  }
  0x99   :  { %2008 = vmatmul.mubr.bf16.gmra.mrb[44].mxu1 %v3980_v31  ;;  %v4082_v31 = vld [vmem:[%s6057_s0 + $0xbc] ss:$28 sps:$4 sm:$0xff]  }
  0x9a   :  { %2297 = vmatmul.mubr.bf16.gmra.mrb[44].mxu0 %v3981_v32  ;;  %2015 = vmatprep.mubr.bf16.mxu1 %v3982_v33 }
  0x9b   :  { %2304 = vmatprep.mubr.bf16.mxu0 %v3984_v34  ;;  %v4084_v34 = vld [vmem:[%s6057_s0 + $0x5e8] ss:$28 sps:$4 sm:$0xff]  }
  0xa1   :  { %2016 = vmatmul.mubr.bf16.gmra.mrb[48].mxu1 %v3986_v35 }
  0xa2   :  { %2305 = vmatmul.mubr.bf16.gmra.mrb[48].mxu0 %v3987_v36  ;;  %2023 = vmatprep.mubr.bf16.mxu1 %v3989_v37  ;;  %v4085_v36 = vld [vmem:[%s6057_s0 + $0xb8] ss:$28 sps:$4 sm:$0xff]   ;;  %v4086_v37 = vld [vmem:[%s6057_s0 + $0x624] ss:$28 sps:$4 sm:$0xff]  }
  0xa3   :  { %2312 = vmatprep.mubr.bf16.mxu0 %v3991_v38 }
  0xa9   :  { %2024 = vmatmul.mubr.bf16.gmra.mrb[52].mxu1 %v3993_v39  ;;  %v4088_v39 = vld [vmem:[%s6057_s0 + $0xf4] ss:$28 sps:$4 sm:$0xff]  }
  0xaa   :  { %2313 = vmatmul.mubr.bf16.gmra.mrb[52].mxu0 %v3994_v40  ;;  %2031 = vmatprep.mubr.bf16.mxu1 %v3996_v41 }
  0xab   :  { %2320 = vmatprep.mubr.bf16.mxu0 %v3998_v42  ;;  %v4090_v42 = vld [vmem:[%s6057_s0 + $0x620] ss:$28 sps:$4 sm:$0xff]  }
  0xb1   :  { %2032 = vmatmul.mubr.bf16.gmra.mrb[56].mxu1 %v4000_v43 }
  0xb2   :  { %2321 = vmatmul.mubr.bf16.gmra.mrb[56].mxu0 %v4001_v44  ;;  %2039 = vmatprep.mubr.bf16.mxu1 %v4002_v45  ;;  %v4091_v44 = vld [vmem:[%s6057_s0 + $0xf0] ss:$28 sps:$4 sm:$0xff]   ;;  %v4092_v45 = vld [vmem:[%s6057_s0 + $0x65c] ss:$28 sps:$4 sm:$0xff]  }
  0xb3   :  { %2328 = vmatprep.mubr.bf16.mxu0 %v4004_v46 }
  0xb9   :  { %2040 = vmatmul.mubr.bf16.gmra.mrb[60].mxu1 %v4006_v47  ;;  %v4094_v47 = vld [vmem:[%s6057_s0 + $0x12c] ss:$28 sps:$4 sm:$0xff]  }
  0xba   :  { %2329 = vmatmul.mubr.bf16.gmra.mrb[60].mxu0 %v4007_v48  ;;  %2047 = vmatprep.mubr.bf16.mxu1 %v4009_v49 }
  0xbb   :  { %2336 = vmatprep.mubr.bf16.mxu0 %v4011_v50  ;;  %v4096_v50 = vld [vmem:[%s6057_s0 + $0x658] ss:$28 sps:$4 sm:$0xff]  }
  0xc1   :  { %2048 = vmatmul.mubr.bf16.gmra.mrb[64].mxu1 %v4013_v51 }
  0xc2   :  { %2337 = vmatmul.mubr.bf16.gmra.mrb[64].mxu0 %v4014_v52  ;;  %2055 = vmatprep.mubr.bf16.mxu1 %v4016_v53  ;;  %v4097_v52 = vld [vmem:[%s6057_s0 + $0x128] ss:$28 sps:$4 sm:$0xff]   ;;  %v4098_v53 = vld [vmem:[%s6057_s0 + $0x694] ss:$28 sps:$4 sm:$0xff]  }
  0xc3   :  { %2344 = vmatprep.mubr.bf16.mxu0 %v4018_v54 }
  0xc9   :  { %2056 = vmatmul.mubr.bf16.gmra.mrb[68].mxu1 %v4020_v56  ;;  %v4100_v56 = vld [vmem:[%s6057_s0 + $0x164] ss:$28 sps:$4 sm:$0xff]  }
  0xca   :  { %2345 = vmatmul.mubr.bf16.gmra.mrb[68].mxu0 %v4021_v57  ;;  %2063 = vmatprep.mubr.bf16.mxu1 %v4022_v58 }
  0xcb   :  { %2352 = vmatprep.mubr.bf16.mxu0 %v4024_v59  ;;  %v4102_v59 = vld [vmem:[%s6057_s0 + $0x690] ss:$28 sps:$4 sm:$0xff]  }
  0xd1   :  { %2064 = vmatmul.mubr.bf16.gmra.mrb[72].mxu1 %v4026_v60 }
  0xd2   :  { %2353 = vmatmul.mubr.bf16.gmra.mrb[72].mxu0 %v4027_v61  ;;  %2071 = vmatprep.mubr.bf16.mxu1 %v4029_v62  ;;  %v4103_v61 = vld [vmem:[%s6057_s0 + $0x160] ss:$28 sps:$4 sm:$0xff]   ;;  %v4104_v62 = vld [vmem:[%s6057_s0 + $0x6cc] ss:$28 sps:$4 sm:$0xff]  }
  0xd3   :  { %2360 = vmatprep.mubr.bf16.mxu0 %v4031_v63 }
  0xd9   :  { %2072 = vmatmul.mubr.bf16.gmra.mrb[76].mxu1 %v4033_v1  ;;  %v4106_v1 = vld [vmem:[%s6057_s0 + $0x19c] ss:$28 sps:$4 sm:$0xff]  }
  0xda   :  { %2361 = vmatmul.mubr.bf16.gmra.mrb[76].mxu0 %v4034_v2  ;;  %2079 = vmatprep.mubr.bf16.mxu1 %v4036_v3 }
  0xdb   :  { %2368 = vmatprep.mubr.bf16.mxu0 %v4038_v4  ;;  %v4108_v4 = vld [vmem:[%s6057_s0 + $0x6c8] ss:$28 sps:$4 sm:$0xff]  }
  0xe1   :  { %2080 = vmatmul.mubr.bf16.gmra.mrb[80].mxu1 %v4040_v5 }
  0xe2   :  { %2369 = vmatmul.mubr.bf16.gmra.mrb[80].mxu0 %v4041_v6  ;;  %2087 = vmatprep.mubr.bf16.mxu1 %v4042_v7  ;;  %v4109_v6 = vld [vmem:[%s6057_s0 + $0x198] ss:$28 sps:$4 sm:$0xff]   ;;  %v4112_v7 = vld [vmem:[%s6057_s0 + $0x54c] ss:$28 sps:$4 sm:$0xff]  }
  0xe3   :  { %2376 = vmatprep.mubr.bf16.mxu0 %v4044_v8 }
  0xe9   :  { %2088 = vmatmul.mubr.bf16.gmra.mrb[84].mxu1 %v4046_v9  ;;  %v4113_v9 = vld [vmem:[%s6057_s0 + $0x1d4] ss:$28 sps:$4 sm:$0xff]  }
  0xea   :  { %2377 = vmatmul.mubr.bf16.gmra.mrb[84].mxu0 %v4047_v10  ;;  %2095 = vmatprep.mubr.bf16.mxu1 %v4049_v11 }
  0xeb   :  { %2384 = vmatprep.mubr.bf16.mxu0 %v4051_v12  ;;  %v4110_v12 = vld [vmem:[%s6057_s0 + $0x548] ss:$28 sps:$4 sm:$0xff]  }
  0xf1   :  { %2096 = vmatmul.mubr.bf16.gmra.mrb[88].mxu1 %v4053_v13 }
  0xf2   :  { %2385 = vmatmul.mubr.bf16.gmra.mrb[88].mxu0 %v4054_v14  ;;  %2103 = vmatprep.mubr.bf16.mxu1 %v4056_v15  ;;  %v4115_v14 = vld [vmem:[%s6057_s0 + $0x1d0] ss:$28 sps:$4 sm:$0xff]  }
  0xf3   :  { %2392 = vmatprep.mubr.bf16.mxu0 %v4058_v16  ;;  %v4117_v16 = vld [vmem:[%s6057_s0 + $0x584] ss:$28 sps:$4 sm:$0xff]  }
  0xf9   :  { %2104 = vmatmul.mubr.bf16.gmra.mrb[92].mxu1 %v4060_v17  ;;  %v4119_v17 = vld [vmem:[%s6057_s0 + $0x20c] ss:$28 sps:$4 sm:$0xff]  }
  0xfa   :  { %2393 = vmatmul.mubr.bf16.gmra.mrb[92].mxu0 %v4061_v18  ;;  %2111 = vmatprep.mubr.bf16.mxu1 %v4062_v19 }
  0xfb   :  { %2497 = vmatprep.mubr.bf16.mxu0 %v4066_v20  ;;  %v4121_v20 = vld [vmem:[%s6057_s0 + $0x580] ss:$28 sps:$4 sm:$0xff]  }
 0x101   :  { %2112 = vmatmul.mubr.bf16.gmra.mrb[96].mxu1 %v4067_v21 }
 0x102   :  { %2498 = vmatmul.mubr.bf16.vlgmr.msra.gmra.mrb[0].mxu0 %v4064_v22  ;;  %2119 = vmatprep.mubr.bf16.mxu1 %v4068_v23  ;;  %v4122_v22 = vld [vmem:[%s6057_s0 + $0x208] ss:$28 sps:$4 sm:$0xff]   ;;  %v4123_v23 = vld [vmem:[%s6057_s0 + $0x5bc] ss:$28 sps:$4 sm:$0xff]  }
 0x103   :  { %2505 = vmatprep.mubr.bf16.mxu0 %v4070_v24  ;;  %v4125_v24 = vld [vmem:[%s6057_s0 + $0x244] ss:$28 sps:$4 sm:$0xff]  }
 0x109   :  { %2120 = vmatmul.mubr.bf16.gmra.mrb[100].mxu1 %v4072_v25 }
 0x10a   :  { %2506 = vmatmul.mubr.bf16.gmra.mrb[4].mxu0 %v4073_v26  ;;  %2127 = vmatprep.mubr.bf16.mxu1 %v4074_v0  ;;  %v4127_v0 = vld [vmem:[%s6057_s0 + $0x5b8] ss:$28 sps:$4 sm:$0xff]  }
 0x10b   :  { %2513 = vmatprep.mubr.bf16.mxu0 %v4076_v27 }
 0x111   :  { %2128 = vmatmul.mubr.bf16.gmra.mrb[104].mxu1 %v4078_v28  ;;  %v4128_v28 = vld [vmem:[%s6057_s0 + $0x240] ss:$28 sps:$4 sm:$0xff]  }
 0x112   :  { %2514 = vmatmul.mubr.bf16.gmra.mrb[8].mxu0 %v4079_v29  ;;  %2135 = vmatprep.mubr.bf16.mxu1 %v4080_v30  ;;  %v4129_v29 = vld [vmem:[%s6057_s0 + $0x5f4] ss:$28 sps:$4 sm:$0xff]  }
 0x113   :  { %2521 = vmatprep.mubr.bf16.mxu0 %v4082_v31  ;;  %v4131_v31 = vld [vmem:[%s6057_s0 + $0x27c] ss:$28 sps:$4 sm:$0xff]  }
 0x114   :  { %v4997_v32 = vpop.f32.mrb[0].mxu1 }
 0x115   :  { %v1923_v33 = vpop.f32.mrb[1].mxu1 }
 0x116   :  { %v5002_v35 = vpop.f32.mrb[2].mxu1 }
 0x117   :  { %v1926_v38 = vpop.f32.mrb[3].mxu1 }
 0x118   :  { %v4134_v38 = vld [vmem:[%s6057_s0 + $0x278] ss:$28 sps:$4 sm:$0xff]  }
 0x119   :  { %2136 = vmatmul.mubr.bf16.gmra.mrb[108].mxu1 %v4084_v34 }
 0x11a   :  { %2522 = vmatmul.mubr.bf16.gmra.mrb[12].mxu0 %v4085_v36  ;;  %2143 = vmatprep.mubr.bf16.mxu1 %v4086_v37  ;;  %v4133_v36 = vld [vmem:[%s6057_s0 + $0x5f0] ss:$28 sps:$4 sm:$0xff]  }
 0x11b   :  { %2529 = vmatprep.mubr.bf16.mxu0 %v4088_v39  ;;  %v4135_v39 = vld [vmem:[%s6057_s0 + $0x62c] ss:$28 sps:$4 sm:$0xff]  }
 0x11c   :  { %v5013_v40 = vpop.f32.mrb[4].mxu1 }
 0x11d   :  { %v1931_v41 = vpop.f32.mrb[5].mxu1 }
 0x11e   :  { %v5018_v43 = vpop.f32.mrb[6].mxu1 }
 0x11f   :  { %v1934_v46 = vpop.f32.mrb[7].mxu1 }
 0x120   :  { %v4139_v46 = vld [vmem:[%s6057_s0 + $0x628] ss:$28 sps:$4 sm:$0xff]  }
 0x121   :  { %2144 = vmatmul.mubr.bf16.gmra.mrb[112].mxu1 %v4090_v42  ;;  %v4137_v42 = vld [vmem:[%s6057_s0 + $0x2b4] ss:$28 sps:$4 sm:$0xff]  }
 0x122   :  { %2530 = vmatmul.mubr.bf16.gmra.mrb[16].mxu0 %v4091_v44  ;;  %2151 = vmatprep.mubr.bf16.mxu1 %v4092_v45 }
 0x123   :  { %2537 = vmatprep.mubr.bf16.mxu0 %v4094_v47 }
 0x124   :  { %v5029_v48 = vpop.f32.mrb[8].mxu1 }
 0x125   :  { %v1939_v49 = vpop.f32.mrb[9].mxu1 }
 0x126   :  { %v5034_v51 = vpop.f32.mrb[10].mxu1  ;;  %v4140_v49 = vld [vmem:[%s6057_s0 + $0x2b0] ss:$28 sps:$4 sm:$0xff]  }
 0x127   :  { %v1942_v54 = vpop.f32.mrb[11].mxu1 }
 0x129   :  { %2152 = vmatmul.mubr.bf16.gmra.mrb[116].mxu1 %v4096_v50  ;;  %v4141_v50 = vld [vmem:[%s6057_s0 + $0x664] ss:$28 sps:$4 sm:$0xff]  }
 0x12a   :  { %2538 = vmatmul.mubr.bf16.gmra.mrb[20].mxu0 %v4097_v52  ;;  %2159 = vmatprep.mubr.bf16.mxu1 %v4098_v53  ;;  %v4143_v53 = vld [vmem:[%s6057_s0 + $0x2ec] ss:$28 sps:$4 sm:$0xff]  }
 0x12b   :  { %2545 = vmatprep.mubr.bf16.mxu0 %v4100_v56 }
 0x12c   :  { %v5045_v57 = vpop.f32.mrb[12].mxu1 }
 0x12d   :  { %v1947_v58 = vpop.f32.mrb[13].mxu1 }
 0x12e   :  { %v5050_v60 = vpop.f32.mrb[14].mxu1  ;;  %v4145_v58 = vld [vmem:[%s6057_s0 + $0x660] ss:$28 sps:$4 sm:$0xff]  }
 0x12f   :  { %v1950_v63 = vpop.f32.mrb[15].mxu1 }
 0x131   :  { %2160 = vmatmul.mubr.bf16.gmra.mrb[120].mxu1 %v4102_v59 }
 0x132   :  { %2546 = vmatmul.mubr.bf16.gmra.mrb[24].mxu0 %v4103_v61  ;;  %2167 = vmatprep.mubr.bf16.mxu1 %v4104_v62  ;;  %v4146_v61 = vld [vmem:[%s6057_s0 + $0x2e8] ss:$28 sps:$4 sm:$0xff]   ;;  %v4147_v62 = vld [vmem:[%s6057_s0 + $0x69c] ss:$28 sps:$4 sm:$0xff]  }
 0x133   :  { %2553 = vmatprep.mubr.bf16.mxu0 %v4106_v1  ;;  %v4149_v1 = vld [vmem:[%s6057_s0 + $0x324] ss:$28 sps:$4 sm:$0xff]  }
 0x134   :  { %v5061_v2 = vpop.f32.mrb[16].mxu1 }
 0x135   :  { %v1955_v3 = vpop.f32.mrb[17].mxu1 }
 0x136   :  { %v5066_v5 = vpop.f32.mrb[18].mxu1 }
 0x137   :  { %v1958_v8 = vpop.f32.mrb[19].mxu1 }
 0x138   :  { %v4152_v8 = vld [vmem:[%s6057_s0 + $0x320] ss:$28 sps:$4 sm:$0xff]  }
 0x139   :  { %2168 = vmatmul.mubr.bf16.gmra.mrb[124].mxu1 %v4108_v4 }
 0x13a   :  { %2554 = vmatmul.mubr.bf16.gmra.mrb[28].mxu0 %v4109_v6  ;;  %2400 = vmatprep.mubr.bf16.mxu1 %v4112_v7  ;;  %v4151_v6 = vld [vmem:[%s6057_s0 + $0x698] ss:$28 sps:$4 sm:$0xff]  }
 0x13b   :  { %2561 = vmatprep.mubr.bf16.mxu0 %v4113_v9  ;;  %v4153_v9 = vld [vmem:[%s6057_s0 + $0x6d4] ss:$28 sps:$4 sm:$0xff]  }
 0x13c   :  { %v5077_v10 = vpop.f32.mrb[20].mxu1 }
 0x13d   :  { %v1963_v11 = vpop.f32.mrb[21].mxu1 }
 0x13e   :  { %v5082_v13 = vpop.f32.mrb[22].mxu1 }
 0x13f   :  { %v1966_v15 = vpop.f32.mrb[23].mxu1 }
 0x141   :  { %2401 = vmatmul.mubr.bf16.vlgmr.msra.gmra.mrb[96].mxu1 %v4110_v12  ;;  %v4155_v12 = vld [vmem:[%s6057_s0 + $0x35c] ss:$28 sps:$4 sm:$0xff]  }
 0x142   :  { %2562 = vmatmul.mubr.bf16.gmra.mrb[32].mxu0 %v4115_v14  ;;  %3516 = vmatpush3.bf16.msra.mxu1 %v4874_v55 }
 0x143   :  { %2408 = vmatprep.mubr.bf16.mxu1 %v4117_v16  ;;  %2569 = vmatprep.mubr.bf16.mxu0 %v4119_v17  ;;  %v4157_v16 = vld [vmem:[%s6057_s0 + $0x6d0] ss:$28 sps:$4 sm:$0xff]  }
 0x144   :  { %v5094_v18 = vpop.f32.mrb[24].mxu1 }
 0x145   :  { %v1971_v19 = vpop.f32.mrb[25].mxu1 }
 0x146   :  { %v5099_v21 = vpop.f32.mrb[26].mxu1  ;;  %v4158_v19 = vld [vmem:[%s6057_s0 + $0x358] ss:$28 sps:$4 sm:$0xff]  }
 0x147   :  { %v1974_v55 = vpop.f32.mrb[27].mxu1 }
 0x149   :  { %2409 = vmatmul.mubr.bf16.gmra.mrb[100].mxu1 %v4121_v20  ;;  %v4161_v20 = vld [vmem:[%s6057_s0 + $0x18] ss:$28 sps:$4 sm:$0xff]  }
 0x14a   :  { %2570 = vmatmul.mubr.bf16.gmra.mrb[36].mxu0 %v4122_v22  ;;  %2416 = vmatprep.mubr.bf16.mxu1 %v4123_v23  ;;  %v4159_v23 = vld [vmem:[%s6057_s0 + $0x394] ss:$28 sps:$4 sm:$0xff]  }
 0x14b   :  { %2577 = vmatprep.mubr.bf16.mxu0 %v4125_v24 }
 0x14c   :  { %v5110_v25 = vpop.f32.mrb[28].mxu1 }
 0x14d   :  { %v1979_v26 = vpop.f32.mrb[29].mxu1 }
 0x14e   :  { %v5115_v27 = vpop.f32.mrb[30].mxu1  ;;  %v4163_v26 = vld [vmem:[%s6057_s0 + $0x50] ss:$28 sps:$4 sm:$0xff]  }
 0x14f   :  { %v1982_v30 = vpop.f32.mrb[31].mxu1 }
 0x151   :  { %2417 = vmatmul.mubr.bf16.gmra.mrb[104].mxu1 %v4127_v0 }
 0x152   :  { %2578 = vmatmul.mubr.bf16.gmra.mrb[40].mxu0 %v4128_v28  ;;  %2424 = vmatprep.mubr.bf16.mxu1 %v4129_v29  ;;  %v4162_v28 = vld [vmem:[%s6057_s0 + $0x390] ss:$28 sps:$4 sm:$0xff]   ;;  %v4166_v29 = vld [vmem:[%s6057_s0 + $0x88] ss:$28 sps:$4 sm:$0xff]  }
 0x153   :  { %2585 = vmatprep.mubr.bf16.mxu0 %v4131_v31  ;;  %v4164_v31 = vld [vmem:[%s6057_s0 + $0x3cc] ss:$28 sps:$4 sm:$0xff]  }
 0x154   :  { %v5126_v33 = vpop.f32.mrb[32].mxu1 }
 0x155   :  { %v1987_v34 = vpop.f32.mrb[33].mxu1 }
 0x156   :  { %v5131_v37 = vpop.f32.mrb[34].mxu1 }
 0x157   :  { %v1990_v41 = vpop.f32.mrb[35].mxu1 }
 0x158   :  { %v4167_v41 = vld [vmem:[%s6057_s0 + $0x3c8] ss:$28 sps:$4 sm:$0xff]  }
 0x159   :  { %2425 = vmatmul.mubr.bf16.gmra.mrb[108].mxu1 %v4133_v36 }
 0x15a   :  { %2586 = vmatmul.mubr.bf16.gmra.mrb[44].mxu0 %v4134_v38  ;;  %2432 = vmatprep.mubr.bf16.mxu1 %v4135_v39  ;;  %v4168_v38 = vld [vmem:[%s6057_s0 + $0xc0] ss:$28 sps:$4 sm:$0xff]  }
 0x15b   :  { %2593 = vmatprep.mubr.bf16.mxu0 %v4137_v42  ;;  %v4171_v42 = vld [vmem:[%s6057_s0 + $0xf8] ss:$28 sps:$4 sm:$0xff]  }
 0x15c   :  { %v5142_v44 = vpop.f32.mrb[36].mxu1 }
 0x15d   :  { %v1995_v45 = vpop.f32.mrb[37].mxu1 }
 0x15e   :  { %v5147_v47 = vpop.f32.mrb[38].mxu1 }
 0x15f   :  { %v1998_v52 = vpop.f32.mrb[39].mxu1 }
 0x160   :  { %v4173_v52 = vld [vmem:[%s6057_s0 + $0x130] ss:$28 sps:$4 sm:$0xff]  }
 0x161   :  { %2433 = vmatmul.mubr.bf16.gmra.mrb[112].mxu1 %v4139_v46  ;;  %v4169_v46 = vld [vmem:[%s6057_s0 + $0x404] ss:$28 sps:$4 sm:$0xff]  }
 0x162   :  { %2594 = vmatmul.mubr.bf16.gmra.mrb[48].mxu0 %v4140_v49  ;;  %2440 = vmatprep.mubr.bf16.mxu1 %v4141_v50 }
 0x163   :  { %2601 = vmatprep.mubr.bf16.mxu0 %v4143_v53 }
 0x164   :  { %v5158_v54 = vpop.f32.mrb[40].mxu1 }
 0x165   :  { %v2003_v56 = vpop.f32.mrb[41].mxu1 }
 0x166   :  { %v5163_v59 = vpop.f32.mrb[42].mxu1  ;;  %v4172_v56 = vld [vmem:[%s6057_s0 + $0x400] ss:$28 sps:$4 sm:$0xff]  }
 0x167   :  { %v2006_v63 = vpop.f32.mrb[43].mxu1 }
 0x169   :  { %2441 = vmatmul.mubr.bf16.gmra.mrb[116].mxu1 %v4145_v58  ;;  %v4176_v58 = vld [vmem:[%s6057_s0 + $0x168] ss:$28 sps:$4 sm:$0xff]  }
 0x16a   :  { %2602 = vmatmul.mubr.bf16.gmra.mrb[52].mxu0 %v4146_v61  ;;  %2448 = vmatprep.mubr.bf16.mxu1 %v4147_v62  ;;  %v4174_v62 = vld [vmem:[%s6057_s0 + $0x43c] ss:$28 sps:$4 sm:$0xff]  }
 0x16b   :  { %2609 = vmatprep.mubr.bf16.mxu0 %v4149_v1 }
 0x16c   :  { %v5174_v3 = vpop.f32.mrb[44].mxu1 }
 0x16d   :  { %v2011_v4 = vpop.f32.mrb[45].mxu1 }
 0x16e   :  { %v5179_v7 = vpop.f32.mrb[46].mxu1  ;;  %v4178_v4 = vld [vmem:[%s6057_s0 + $0x1a0] ss:$28 sps:$4 sm:$0xff]  }
 0x16f   :  { %v2014_v11 = vpop.f32.mrb[47].mxu1 }
 0x171   :  { %2449 = vmatmul.mubr.bf16.gmra.mrb[120].mxu1 %v4151_v6 }
 0x172   :  { %2610 = vmatmul.mubr.bf16.gmra.mrb[56].mxu0 %v4152_v8  ;;  %2456 = vmatprep.mubr.bf16.mxu1 %v4153_v9  ;;  %v4177_v8 = vld [vmem:[%s6057_s0 + $0x438] ss:$28 sps:$4 sm:$0xff]  }
 0x173   :  { %2617 = vmatprep.mubr.bf16.mxu0 %v4155_v12  ;;  %v4181_v9 = vld [vmem:[%s6057_s0 + $0x1d8] ss:$28 sps:$4 sm:$0xff]  }
 0x174   :  { %v5190_v14 = vpop.f32.mrb[48].mxu1  ;;  %v4179_v12 = vld [vmem:[%s6057_s0 + $0x474] ss:$28 sps:$4 sm:$0xff]  }
 0x175   :  { %v2019_v15 = vpop.f32.mrb[49].mxu1 }
 0x176   :  { %v5195_v17 = vpop.f32.mrb[50].mxu1 }
 0x177   :  { %v2022_v22 = vpop.f32.mrb[51].mxu1 }
 0x178   :  { %v4182_v22 = vld [vmem:[%s6057_s0 + $0x470] ss:$28 sps:$4 sm:$0xff]  }
 0x179   :  { %2457 = vmatmul.mubr.bf16.gmra.mrb[124].mxu1 %v4157_v16 }
 0x17a   :  { %2618 = vmatmul.mubr.bf16.gmra.mrb[60].mxu0 %v4158_v19  ;;  %3517 = vmatprep.mubr.msk.bf16.mxu1 %vm1790_vm0, %v4161_v20  ;;  %v4183_v19 = vld [vmem:[%s6057_s0 + $0x210] ss:$28 sps:$4 sm:$0xff]  }
 0x17b   :  { %2625 = vmatprep.mubr.bf16.mxu0 %v4159_v23  ;;  %v4186_v23 = vld [vmem:[%s6057_s0 + $0x248] ss:$28 sps:$4 sm:$0xff]  }
 0x17c   :  { %v5207_v55 = vpop.f32.mrb[52].mxu1 }
 0x17d   :  { %v2027_v24 = vpop.f32.mrb[53].mxu1 }
 0x17e   :  { %v5212_v0 = vpop.f32.mrb[54].mxu1 }
 0x17f   :  { %v2030_v30 = vpop.f32.mrb[55].mxu1 }
 0x180   :  { %v4188_v30 = vld [vmem:[%s6057_s0 + $0x280] ss:$28 sps:$4 sm:$0xff]  }
 0x181   :  { %3518 = vmatmul.mubr.msk.bf16.vlgmr.msra.gmra.mrb[128].mxu1 %vm1790_vm0, %v4163_v26  ;;  %v4184_v26 = vld [vmem:[%s6057_s0 + $0x4ac] ss:$28 sps:$4 sm:$0xff]  }
 0x182   :  { %2626 = vmatmul.mubr.bf16.gmra.mrb[64].mxu0 %v4162_v28  ;;  %3521 = vmatprep.mubr.msk.bf16.mxu1 %vm1790_vm0, %v4166_v29 }
 0x183   :  { %2633 = vmatprep.mubr.bf16.mxu0 %v4164_v31 }
 0x184   :  { %v5225_v34 = vpop.f32.mrb[56].mxu1 }
 0x185   :  { %v2035_v36 = vpop.f32.mrb[57].mxu1 }
 0x186   :  { %v5230_v39 = vpop.f32.mrb[58].mxu1  ;;  %v4187_v36 = vld [vmem:[%s6057_s0 + $0x4a8] ss:$28 sps:$4 sm:$0xff]  }
 0x187   :  { %v2038_v45 = vpop.f32.mrb[59].mxu1 }
 0x189   :  { %3522 = vmatmul.mubr.msk.bf16.gmra.mrb[132].mxu1 %vm1790_vm0, %v4168_v38  ;;  %v4191_v38 = vld [vmem:[%s6057_s0 + $0x2b8] ss:$28 sps:$4 sm:$0xff]  }
 0x18a   :  { %2634 = vmatmul.mubr.bf16.gmra.mrb[68].mxu0 %v4167_v41  ;;  %3525 = vmatprep.mubr.msk.bf16.mxu1 %vm1790_vm0, %v4171_v42  ;;  %v4189_v42 = vld [vmem:[%s6057_s0 + $0x4e4] ss:$28 sps:$4 sm:$0xff]  }
 0x18b   :  { %2641 = vmatprep.mubr.bf16.mxu0 %v4169_v46 }
 0x18c   :  { %v5243_v49 = vpop.f32.mrb[60].mxu1 }
 0x18d   :  { %v2043_v50 = vpop.f32.mrb[61].mxu1 }
 0x18e   :  { %v5248_v53 = vpop.f32.mrb[62].mxu1  ;;  %v4193_v50 = vld [vmem:[%s6057_s0 + $0x2f0] ss:$28 sps:$4 sm:$0xff]  }
 0x18f   :  { %v2046_v61 = vpop.f32.mrb[63].mxu1 }
 0x191   :  { %3526 = vmatmul.mubr.msk.bf16.gmra.mrb[136].mxu1 %vm1790_vm0, %v4173_v52 }
 0x192   :  { %2642 = vmatmul.mubr.bf16.gmra.mrb[72].mxu0 %v4172_v56  ;;  %3529 = vmatprep.mubr.msk.bf16.mxu1 %vm1790_vm0, %v4176_v58  ;;  %v4192_v56 = vld [vmem:[%s6057_s0 + $0x4e0] ss:$28 sps:$4 sm:$0xff]   ;;  %v4196_v58 = vld [vmem:[%s6057_s0 + $0x328] ss:$28 sps:$4 sm:$0xff]  }
 0x193   :  { %2649 = vmatprep.mubr.bf16.mxu0 %v4174_v62  ;;  %v4194_v62 = vld [vmem:[%s6057_s0 + $0x51c] ss:$28 sps:$4 sm:$0xff]  }
 0x194   :  { %v5261_v63 = vpop.f32.mrb[64].mxu1 }
 0x195   :  { %v2051_v1 = vpop.f32.mrb[65].mxu1 }
 0x196   :  { %v5266_v6 = vpop.f32.mrb[66].mxu1 }
 0x197   :  { %v2054_v11 = vpop.f32.mrb[67].mxu1 }
 0x198   :  { %v4197_v11 = vld [vmem:[%s6057_s0 + $0x518] ss:$28 sps:$4 sm:$0xff]  }
 0x199   :  { %3530 = vmatmul.mubr.msk.bf16.gmra.mrb[140].mxu1 %vm1790_vm0, %v4178_v4 }
 0x19a   :  { %2650 = vmatmul.mubr.bf16.gmra.mrb[76].mxu0 %v4177_v8  ;;  %3533 = vmatprep.mubr.msk.bf16.mxu1 %vm1790_vm0, %v4181_v9  ;;  %v4198_v8 = vld [vmem:[%s6057_s0 + $0x360] ss:$28 sps:$4 sm:$0xff]  }
 0x19b   :  { %2657 = vmatprep.mubr.bf16.mxu0 %v4179_v12  ;;  %v4201_v12 = vld [vmem:[%s6057_s0 + $0x398] ss:$28 sps:$4 sm:$0xff]  }
 0x19c   :  { %v5279_v15 = vpop.f32.mrb[68].mxu1 }
 0x19d   :  { %v2059_v16 = vpop.f32.mrb[69].mxu1 }
 0x19e   :  { %v5284_v20 = vpop.f32.mrb[70].mxu1 }
 0x19f   :  { %v2062_v24 = vpop.f32.mrb[71].mxu1 }
 0x1a0   :  { %v4203_v24 = vld [vmem:[%s6057_s0 + $0x3d0] ss:$28 sps:$4 sm:$0xff]  }
 0x1a1   :  { %3534 = vmatmul.mubr.msk.bf16.gmra.mrb[144].mxu1 %vm1790_vm0, %v4183_v19  ;;  %v4199_v19 = vld [vmem:[%s6057_s0 + $0x554] ss:$28 sps:$4 sm:$0xff]  }
 0x1a2   :  { %2658 = vmatmul.mubr.bf16.gmra.mrb[80].mxu0 %v4182_v22  ;;  %3537 = vmatprep.mubr.msk.bf16.mxu1 %vm1790_vm0, %v4186_v23 }
 0x1a3   :  { %2665 = vmatprep.mubr.bf16.mxu0 %v4184_v26 }
 0x1a4   :  { %v5297_v28 = vpop.f32.mrb[72].mxu1 }
 0x1a5   :  { %v2067_v29 = vpop.f32.mrb[73].mxu1 }
 0x1a6   :  { %v5302_v31 = vpop.f32.mrb[74].mxu1  ;;  %v4202_v29 = vld [vmem:[%s6057_s0 + $0x550] ss:$28 sps:$4 sm:$0xff]  }
 0x1a7   :  { %v2070_v41 = vpop.f32.mrb[75].mxu1 }
 0x1a9   :  { %3538 = vmatmul.mubr.msk.bf16.gmra.mrb[148].mxu1 %vm1790_vm0, %v4188_v30  ;;  %v4206_v30 = vld [vmem:[%s6057_s0 + $0x408] ss:$28 sps:$4 sm:$0xff]  }
 0x1aa   :  { %2666 = vmatmul.mubr.bf16.gmra.mrb[84].mxu0 %v4187_v36  ;;  %3541 = vmatprep.mubr.msk.bf16.mxu1 %vm1790_vm0, %v4191_v38  ;;  %v4204_v38 = vld [vmem:[%s6057_s0 + $0x58c] ss:$28 sps:$4 sm:$0xff]  }
 0x1ab   :  { %2673 = vmatprep.mubr.bf16.mxu0 %v4189_v42 }
 0x1ac   :  { %v5315_v45 = vpop.f32.mrb[76].mxu1 }
 0x1ad   :  { %v2075_v46 = vpop.f32.mrb[77].mxu1 }
 0x1ae   :  { %v5320_v52 = vpop.f32.mrb[78].mxu1  ;;  %v4208_v46 = vld [vmem:[%s6057_s0 + $0x440] ss:$28 sps:$4 sm:$0xff]  }
 0x1af   :  { %v2078_v61 = vpop.f32.mrb[79].mxu1 }
 0x1b1   :  { %3542 = vmatmul.mubr.msk.bf16.gmra.mrb[152].mxu1 %vm1790_vm0, %v4193_v50 }
 0x1b2   :  { %2674 = vmatmul.mubr.bf16.gmra.mrb[88].mxu0 %v4192_v56  ;;  %3545 = vmatprep.mubr.msk.bf16.mxu1 %vm1790_vm0, %v4196_v58  ;;  %v4207_v56 = vld [vmem:[%s6057_s0 + $0x588] ss:$28 sps:$4 sm:$0xff]   ;;  %v4211_v58 = vld [vmem:[%s6057_s0 + $0x478] ss:$28 sps:$4 sm:$0xff]  }
 0x1b3   :  { %2681 = vmatprep.mubr.bf16.mxu0 %v4194_v62  ;;  %v4209_v62 = vld [vmem:[%s6057_s0 + $0x5c4] ss:$28 sps:$4 sm:$0xff]  }
 0x1b4   :  { %v5333_v1 = vpop.f32.mrb[80].mxu1 }
 0x1b5   :  { %v2083_v4 = vpop.f32.mrb[81].mxu1 }
 0x1b6   :  { %v5338_v9 = vpop.f32.mrb[82].mxu1 }
 0x1b7   :  { %v2086_v16 = vpop.f32.mrb[83].mxu1 }
 0x1b8   :  { %v4212_v16 = vld [vmem:[%s6057_s0 + $0x5c0] ss:$28 sps:$4 sm:$0xff]  }
 0x1b9   :  { %3546 = vmatmul.mubr.msk.bf16.gmra.mrb[156].mxu1 %vm1790_vm0, %v4198_v8 }
 0x1ba   :  { %2682 = vmatmul.mubr.bf16.gmra.mrb[92].mxu0 %v4197_v11  ;;  %3549 = vmatprep.mubr.msk.bf16.mxu1 %vm1790_vm0, %v4201_v12  ;;  %v4213_v11 = vld [vmem:[%s6057_s0 + $0x4b0] ss:$28 sps:$4 sm:$0xff]  }
 0x1bb   :  { %2689 = vmatprep.mubr.bf16.mxu0 %v4199_v19  ;;  %v4216_v19 = vld [vmem:[%s6057_s0 + $0x4e8] ss:$28 sps:$4 sm:$0xff]  }
 0x1bc   :  { %v5351_v22 = vpop.f32.mrb[84].mxu1 }
 0x1bd   :  { %v2091_v23 = vpop.f32.mrb[85].mxu1 }
 0x1be   :  { %v5356_v26 = vpop.f32.mrb[86].mxu1 }
 0x1bf   :  { %v2094_v36 = vpop.f32.mrb[87].mxu1 }
 0x1c1   :  { %3550 = vmatmul.mubr.msk.bf16.gmra.mrb[160].mxu1 %vm1790_vm0, %v4203_v24  ;;  %v4214_v24 = vld [vmem:[%s6057_s0 + $0x5fc] ss:$28 sps:$4 sm:$0xff]  }
 0x1c2   :  { %2690 = vmatmul.mubr.bf16.gmra.mrb[96].mxu0 %v4202_v29  ;;  %3553 = vmatprep.mubr.msk.bf16.mxu1 %vm1790_vm0, %v4206_v30  ;;  %v5406_v29 = vld [vmem:[%s6058_s2] ss:$0 sm:$0xff] }
 0x1c3   :  { %2697 = vmatprep.mubr.bf16.mxu0 %v4204_v38  ;;  %v1922_v30 = vadd.f32 %v5406_v29, %v4997_v32  ;;  %v4218_v38 = vld [vmem:[%s6057_s0 + $0x520] ss:$28 sps:$4 sm:$0xff]  }
 0x1c4   :  { %v5369_v41 = vpop.f32.mrb[88].mxu1 }
 0x1c5   :  { %v2099_v42 = vpop.f32.mrb[89].mxu1 }
 0x1c6   :  { %v5374_v50 = vpop.f32.mrb[90].mxu1  ;;  %v1925_v42 = vadd.f32 %v5406_v29, %v5002_v35  ;;  %v1930_v35 = vadd.f32 %v5406_v29, %v5013_v40 }
 0x1c7   :  { %v2102_v61 = vpop.f32.mrb[91].mxu1 }
 0x1c8   :  { %v4221_v61 = vld [vmem:[%s6057_s0 + $0x558] ss:$28 sps:$4 sm:$0xff]  }
 0x1c9   :  { %3554 = vmatmul.mubr.msk.bf16.gmra.mrb[164].mxu1 %vm1790_vm0, %v4208_v46 }
 0x1ca   :  { %2698 = vmatmul.mubr.bf16.gmra.mrb[100].mxu0 %v4207_v56  ;;  %3557 = vmatprep.mubr.msk.bf16.mxu1 %vm1790_vm0, %v4211_v58  ;;  %v4217_v58 = vld [vmem:[%s6057_s0 + $0x5f8] ss:$28 sps:$4 sm:$0xff]  }
 0x1cb   :  { %2705 = vmatprep.mubr.bf16.mxu0 %v4209_v62  ;;  %v4219_v62 = vld [vmem:[%s6057_s0 + $0x634] ss:$28 sps:$4 sm:$0xff]  }
 0x1cc   :  { %v5387_v4 = vpop.f32.mrb[92].mxu1 }
 0x1cd   :  { %v2107_v8 = vpop.f32.mrb[93].mxu1 }
 0x1ce   :  { %v5392_v12 = vpop.f32.mrb[94].mxu1 }
 0x1cf   :  { %v2110_v23 = vpop.f32.mrb[95].mxu1 }
 0x1d0   :  { %v1933_v23 = vadd.f32 %v5406_v29, %v5018_v43  ;;  %v1938_v43 = vadd.f32 %v5406_v29, %v5029_v48 }
 0x1d1   :  { %3558 = vmatmul.mubr.msk.bf16.gmra.mrb[168].mxu1 %vm1790_vm0, %v4213_v11 }
 0x1d2   :  { %2706 = vmatmul.mubr.bf16.gmra.mrb[104].mxu0 %v4212_v16  ;;  %3561 = vmatprep.mubr.msk.bf16.mxu1 %vm1790_vm0, %v4216_v19  ;;  %v4223_v19 = vld [vmem:[%s6057_s0 + $0x590] ss:$28 sps:$4 sm:$0xff]  }
 0x1d3   :  { %2713 = vmatprep.mubr.bf16.mxu0 %v4214_v24 }
 0x1d5   :  { %v2499_v36 = vpop.f32.mrb[0].mxu0 }
 0x1d6   :  { %v5417_v46 = vadd.f32 %v2499_v36, %v1922_v30  ;;  %v2501_v56 = vpop.f32.mrb[1].mxu0  ;;  %v4222_v36 = vld [vmem:[%s6057_s0 + $0x630] ss:$28 sps:$4 sm:$0xff]  }
 0x1d7   :  { %v2502_v32 = vpop.f32.mrb[2].mxu0 }
 0x1d8   :  { %v5428_v8 = vadd.f32 %v2502_v32, %v1925_v42  ;;  %v2504_v11 = vpop.f32.mrb[3].mxu0  ;;  %v4224_v42 = vld [vmem:[%s6057_s0 + $0x66c] ss:$28 sps:$4 sm:$0xff]   ;;  %v4228_v32 = vld [vmem:[%s6057_s0 + $0x600] ss:$28 sps:$4 sm:$0xff]  }
 0x1d9   :  { %3562 = vmatmul.mubr.msk.bf16.gmra.mrb[172].mxu1 %vm1790_vm0, %v4218_v38  ;;  %v4226_v38 = vld [vmem:[%s6057_s0 + $0x5c8] ss:$28 sps:$4 sm:$0xff]  }
 0x1da   :  { %2714 = vmatmul.mubr.bf16.gmra.mrb[108].mxu0 %v4217_v58  ;;  %3565 = vmatprep.mubr.msk.bf16.mxu1 %vm1790_vm0, %v4221_v61 }
 0x1db   :  { %2721 = vmatprep.mubr.bf16.mxu0 %v4219_v62  ;;  %v1941_v62 = vadd.f32 %v5406_v29, %v5034_v51  ;;  %v1946_v51 = vadd.f32 %v5406_v29, %v5045_v57 }
 0x1dd   :  { %v2507_v16 = vpop.f32.mrb[4].mxu0 }
 0x1de   :  { %v5439_v24 = vadd.f32 %v2507_v16, %v1930_v35  ;;  %v2509_v30 = vpop.f32.mrb[5].mxu0  ;;  %v4227_v16 = vld [vmem:[%s6057_s0 + $0x668] ss:$28 sps:$4 sm:$0xff]  }
 0x1df   :  { %v2510_v40 = vpop.f32.mrb[6].mxu0 }
 0x1e0   :  { %v5450_v56 = vadd.f32 %v2510_v40, %v1933_v23  ;;  %v2512_v58 = vpop.f32.mrb[7].mxu0  ;;  %v4229_v23 = vld [vmem:[%s6057_s0 + $0x6a4] ss:$28 sps:$4 sm:$0xff]   ;;  %v4233_v40 = vld [vmem:[%s6057_s0 + $0x670] ss:$28 sps:$4 sm:$0xff]  }
 0x1e1   :  { %3566 = vmatmul.mubr.msk.bf16.gmra.mrb[176].mxu1 %vm1790_vm0, %v4223_v19  ;;  %v4231_v19 = vld [vmem:[%s6057_s0 + $0x638] ss:$28 sps:$4 sm:$0xff]  }
 0x1e2   :  { %2722 = vmatmul.mubr.bf16.gmra.mrb[112].mxu0 %v4222_v36  ;;  %3569 = vmatprep.mubr.msk.bf16.mxu1 %vm1790_vm0, %v4226_v38 }
 0x1e3   :  { %2729 = vmatprep.mubr.bf16.mxu0 %v4224_v42  ;;  %v1949_v42 = vadd.f32 %v5406_v29, %v5050_v60  ;;  %v1954_v60 = vadd.f32 %v5406_v29, %v5061_v2  ;;  %v1962_v2 = vadd.f32 %v5406_v29, %v5077_v10 }
 0x1e5   :  { %v2515_v61 = vpop.f32.mrb[8].mxu0 }
 0x1e6   :  { %v5461_v11 = vadd.f32 %v2515_v61, %v1938_v43  ;;  %v2517_v35 = vpop.f32.mrb[9].mxu0  ;;  %v4232_v61 = vld [vmem:[%s6057_s0 + $0x6a0] ss:$28 sps:$4 sm:$0xff]  }
 0x1e7   :  { %v2518_v48 = vpop.f32.mrb[10].mxu0 }
 0x1e8   :  { %v5472_v30 = vadd.f32 %v2518_v48, %v1941_v62  ;;  %v2520_v36 = vpop.f32.mrb[11].mxu0  ;;  %v4234_v62 = vld [vmem:[%s6057_s0 + $0x6dc] ss:$28 sps:$4 sm:$0xff]  }
 0x1e9   :  { %3570 = vmatmul.mubr.msk.bf16.gmra.mrb[180].mxu1 %vm1790_vm0, %v4228_v32  ;;  %v4236_v32 = vld [vmem:[%s6057_s0 + $0x6a8] ss:$28 sps:$4 sm:$0xff]   ;;  %v4238_v48 = vld [vmem:[%s6057_s0 + $0x6e0] ss:$28 sps:$4 sm:$0xff]  }
 0x1ea   :  { %2730 = vmatmul.mubr.bf16.gmra.mrb[116].mxu0 %v4227_v16  ;;  %3573 = vmatprep.mubr.msk.bf16.mxu1 %vm1790_vm0, %v4231_v19 }
 0x1eb   :  { %2737 = vmatprep.mubr.bf16.mxu0 %v4229_v23  ;;  %v1957_v23 = vadd.f32 %v5406_v29, %v5066_v5  ;;  %v1965_v5 = vadd.f32 %v5406_v29, %v5082_v13 }
 0x1ed   :  { %v2523_v38 = vpop.f32.mrb[12].mxu0 }
 0x1ee   :  { %v5483_v58 = vadd.f32 %v2523_v38, %v1946_v51  ;;  %v2525_v43 = vpop.f32.mrb[13].mxu0  ;;  %v4237_v38 = vld [vmem:[%s6057_s0 + $0x6d8] ss:$28 sps:$4 sm:$0xff]  }
 0x1ef   :  { %v2526_v57 = vpop.f32.mrb[14].mxu0 }
 0x1f0   :  { %v5494_v35 = vadd.f32 %v2526_v57, %v1949_v42  ;;  %v2528_v16 = vpop.f32.mrb[15].mxu0 }
 0x1f1   :  { %3574 = vmatmul.mubr.msk.bf16.gmra.mrb[184].mxu1 %vm1790_vm0, %v4233_v40 }
 0x1f2   :  { %2738 = vmatmul.mubr.bf16.gmra.mrb[120].mxu0 %v4232_v61  ;;  %3577 = vmatprep.mubr.msk.bf16.mxu1 %vm1790_vm0, %v4236_v32 }
 0x1f3   :  { %2745 = vmatprep.mubr.bf16.mxu0 %v4234_v62 }
 0x1f5   :  { %v2531_v19 = vpop.f32.mrb[16].mxu0 }
 0x1f6   :  { %v5505_v36 = vadd.f32 %v2531_v19, %v1954_v60  ;;  %v2533_v51 = vpop.f32.mrb[17].mxu0  ;;  %v1970_v19 = vadd.f32 %v5406_v29, %v5094_v18 }
 0x1f7   :  { %v2534_v40 = vpop.f32.mrb[18].mxu0 }
 0x1f8   :  { %v5510_v42 = vadd.f32 %v2534_v40, %v1957_v23  ;;  %v2536_v43 = vpop.f32.mrb[19].mxu0 }
 0x1f9   :  { %3578 = vmatmul.mubr.msk.bf16.gmra.mrb[188].mxu1 %vm1790_vm0, %v4238_v48  ;;  %v1973_v48 = vadd.f32 %v5406_v29, %v5099_v21  ;;  %v1978_v43 = vadd.f32 %v5406_v29, %v5110_v25  ;;  %v1989_v25 = vadd.f32 %v5406_v29, %v5131_v37  ;;  %v1997_v37 = vadd.f32 %v5406_v29, %v5147_v47 }
 0x1fa   :  { %2746 = vmatmul.mubr.bf16.gmra.mrb[124].mxu0 %v4237_v38  ;;  %v2005_v47 = vadd.f32 %v5406_v29, %v5163_v59  ;;  %v2013_v59 = vadd.f32 %v5406_v29, %v5179_v7  ;;  %v2021_v7 = vadd.f32 %v5406_v29, %v5195_v17  ;;  %v2029_v17 = vadd.f32 %v5406_v29, %v5212_v0 }
 0x1fb   :  { %v2037_v0 = vadd.f32 %v5406_v29, %v5230_v39  ;;  %v2045_v39 = vadd.f32 %v5406_v29, %v5248_v53  ;;  %v2053_v53 = vadd.f32 %v5406_v29, %v5266_v6  ;;  %v2058_v6 = vadd.f32 %v5406_v29, %v5279_v15 }
 0x1fd   :  { %v2539_v61 = vpop.f32.mrb[20].mxu0 }
 0x1fe   :  { %v5517_v32 = vadd.f32 %v2539_v61, %v1962_v2  ;;  %v2541_v57 = vpop.f32.mrb[21].mxu0  ;;  %v1981_v61 = vadd.f32 %v5406_v29, %v5115_v27 }
 0x1ff   :  { %v2542_v62 = vpop.f32.mrb[22].mxu0 }
 0x200   :  { %v5519_v16 = vadd.f32 %v2542_v62, %v1965_v5  ;;  %v2544_v60 = vpop.f32.mrb[23].mxu0 }
 0x201   :  { %v1986_v60 = vadd.f32 %v5406_v29, %v5126_v33  ;;  %v1994_v33 = vadd.f32 %v5406_v29, %v5142_v44  ;;  %v2002_v44 = vadd.f32 %v5406_v29, %v5158_v54  ;;  %v2010_v54 = vadd.f32 %v5406_v29, %v5174_v3 }
 0x202   :  { %v2018_v3 = vadd.f32 %v5406_v29, %v5190_v14  ;;  %v2026_v14 = vadd.f32 %v5406_v29, %v5207_v55  ;;  %v2034_v55 = vadd.f32 %v5406_v29, %v5225_v34  ;;  %v2042_v34 = vadd.f32 %v5406_v29, %v5243_v49 }
 0x203   :  { %v2050_v49 = vadd.f32 %v5406_v29, %v5261_v63 }
 0x205   :  { %v2547_v23 = vpop.f32.mrb[24].mxu0 }
 0x206   :  { %v5525_v51 = vadd.f32 %v2547_v23, %v1970_v19  ;;  %v2549_v10 = vpop.f32.mrb[25].mxu0 }
 0x207   :  { %v2550_v38 = vpop.f32.mrb[26].mxu0 }
 0x208   :  { %v5527_v40 = vadd.f32 %v2550_v38, %v1973_v48  ;;  %v2552_v13 = vpop.f32.mrb[27].mxu0 }
 0x20d   :  { %v2555_v2 = vpop.f32.mrb[28].mxu0 }
 0x20e   :  { %v5533_v5 = vadd.f32 %v2555_v2, %v1978_v43  ;;  %v2557_v18 = vpop.f32.mrb[29].mxu0 }
 0x20f   :  { %v2558_v57 = vpop.f32.mrb[30].mxu0 }
 0x210   :  { %v5535_v62 = vadd.f32 %v2558_v57, %v1981_v61  ;;  %v2560_v21 = vpop.f32.mrb[31].mxu0 }
 0x214   :  { %v5539_v19 = vpop.f32.mrb[96].mxu1 }
 0x215   :  { %v2563_v23 = vpop.f32.mrb[32].mxu0  ;;  %v2404_v48 = vpop.f32.mrb[97].mxu1 }
 0x216   :  { %v5543_v10 = vadd.f32 %v2563_v23, %v1986_v60  ;;  %v2565_v27 = vpop.f32.mrb[33].mxu0  ;;  %v5545_v38 = vpop.f32.mrb[98].mxu1 }
 0x217   :  { %6060 = vst [vmem:[#allocation2_spill] sm:$0xff] %v5545_v38  ;;  %v2566_v13 = vpop.f32.mrb[34].mxu0  ;;  %v2407_v43 = vpop.f32.mrb[99].mxu1 }
 0x218   :  { %v5547_v2 = vadd.f32 %v2566_v13, %v1989_v25  ;;  %v2568_v61 = vpop.f32.mrb[35].mxu0 }
 0x21c   :  { %v5551_v18 = vpop.f32.mrb[100].mxu1 }
 0x21d   :  { %6061 = vst [vmem:[#allocation3_spill] sm:$0xff] %v5551_v18  ;;  %v2571_v57 = vpop.f32.mrb[36].mxu0  ;;  %v2412_v21 = vpop.f32.mrb[101].mxu1 }
 0x21e   :  { %v5555_v60 = vadd.f32 %v2571_v57, %v1994_v33  ;;  %v2573_v23 = vpop.f32.mrb[37].mxu0  ;;  %v5557_v48 = vpop.f32.mrb[102].mxu1 }
 0x21f   :  { %6062 = vst [vmem:[#allocation4_spill] sm:$0xff] %v5557_v48  ;;  %v2574_v27 = vpop.f32.mrb[38].mxu0  ;;  %v2415_v43 = vpop.f32.mrb[103].mxu1 }
 0x220   :  { %v5559_v25 = vadd.f32 %v2574_v27, %v1997_v37  ;;  %v2576_v13 = vpop.f32.mrb[39].mxu0 }
 0x224   :  { %v5563_v61 = vpop.f32.mrb[104].mxu1 }
 0x225   :  { %6063 = vst [vmem:[#allocation5_spill] sm:$0xff] %v5563_v61  ;;  %v2579_v18 = vpop.f32.mrb[40].mxu0  ;;  %v2420_v21 = vpop.f32.mrb[105].mxu1 }
 0x226   :  { %v5567_v33 = vadd.f32 %v2579_v18, %v2002_v44  ;;  %v2581_v57 = vpop.f32.mrb[41].mxu0  ;;  %v5569_v23 = vpop.f32.mrb[106].mxu1 }
 0x227   :  { %6064 = vst [vmem:[#allocation6_spill] sm:$0xff] %v5569_v23  ;;  %v2582_v48 = vpop.f32.mrb[42].mxu0  ;;  %v2423_v43 = vpop.f32.mrb[107].mxu1 }
 0x228   :  { %v5571_v37 = vadd.f32 %v2582_v48, %v2005_v47  ;;  %v2584_v27 = vpop.f32.mrb[43].mxu0 }
 0x22c   :  { %v5575_v13 = vpop.f32.mrb[108].mxu1 }
 0x22d   :  { %6065 = vst [vmem:[#allocation7_spill] sm:$0xff] %v5575_v13  ;;  %v2587_v61 = vpop.f32.mrb[44].mxu0  ;;  %v2428_v21 = vpop.f32.mrb[109].mxu1 }
 0x22e   :  { %v5579_v18 = vadd.f32 %v2587_v61, %v2010_v54  ;;  %v2589_v44 = vpop.f32.mrb[45].mxu0  ;;  %v5581_v57 = vpop.f32.mrb[110].mxu1 }
 0x22f   :  { %6066 = vst [vmem:[#allocation8_spill] sm:$0xff] %v5581_v57  ;;  %v2590_v23 = vpop.f32.mrb[46].mxu0  ;;  %v2431_v43 = vpop.f32.mrb[111].mxu1 }
 0x230   :  { %v5583_v48 = vadd.f32 %v2590_v23, %v2013_v59  ;;  %v2592_v47 = vpop.f32.mrb[47].mxu0 }
 0x234   :  { %v5587_v27 = vpop.f32.mrb[112].mxu1 }
 0x235   :  { %6067 = vst [vmem:[#allocation9_spill] sm:$0xff] %v5587_v27  ;;  %v2595_v13 = vpop.f32.mrb[48].mxu0  ;;  %v2436_v21 = vpop.f32.mrb[113].mxu1 }
 0x236   :  { %v5591_v61 = vadd.f32 %v2595_v13, %v2018_v3  ;;  %v2597_v54 = vpop.f32.mrb[49].mxu0  ;;  %v5593_v44 = vpop.f32.mrb[114].mxu1 }
 0x237   :  { %6068 = vst [vmem:[#allocation10_spill] sm:$0xff] %v5593_v44  ;;  %v2598_v57 = vpop.f32.mrb[50].mxu0  ;;  %v2439_v43 = vpop.f32.mrb[115].mxu1 }
 0x238   :  { %v5595_v23 = vadd.f32 %v2598_v57, %v2021_v7  ;;  %v2600_v59 = vpop.f32.mrb[51].mxu0 }
 0x23c   :  { %v5599_v47 = vpop.f32.mrb[116].mxu1 }
 0x23d   :  { %6069 = vst [vmem:[#allocation11_spill] sm:$0xff] %v5599_v47  ;;  %v2603_v27 = vpop.f32.mrb[52].mxu0  ;;  %v2444_v21 = vpop.f32.mrb[117].mxu1 }
 0x23e   :  { %v5603_v13 = vadd.f32 %v2603_v27, %v2026_v14  ;;  %v2605_v3 = vpop.f32.mrb[53].mxu0  ;;  %v5605_v54 = vpop.f32.mrb[118].mxu1 }
 0x23f   :  { %6070 = vst [vmem:[#allocation12_spill] sm:$0xff] %v5605_v54  ;;  %v2606_v44 = vpop.f32.mrb[54].mxu0  ;;  %v2447_v43 = vpop.f32.mrb[119].mxu1 }
 0x240   :  { %v5607_v57 = vadd.f32 %v2606_v44, %v2029_v17  ;;  %v2608_v7 = vpop.f32.mrb[55].mxu0 }
 0x244   :  { %v5611_v59 = vpop.f32.mrb[120].mxu1 }
 0x245   :  { %6071 = vst [vmem:[#allocation13_spill] sm:$0xff] %v5611_v59  ;;  %v2611_v47 = vpop.f32.mrb[56].mxu0  ;;  %v2452_v21 = vpop.f32.mrb[121].mxu1 }
 0x246   :  { %v5615_v27 = vadd.f32 %v2611_v47, %v2034_v55  ;;  %v2613_v14 = vpop.f32.mrb[57].mxu0  ;;  %v5617_v3 = vpop.f32.mrb[122].mxu1 }
 0x247   :  { %6072 = vst [vmem:[#allocation14_spill] sm:$0xff] %v5617_v3  ;;  %v2614_v54 = vpop.f32.mrb[58].mxu0  ;;  %v2455_v43 = vpop.f32.mrb[123].mxu1 }
 0x248   :  { %v5619_v44 = vadd.f32 %v2614_v54, %v2037_v0  ;;  %v2616_v17 = vpop.f32.mrb[59].mxu0 }
 0x24c   :  { %v5623_v7 = vpop.f32.mrb[124].mxu1 }
 0x24d   :  { %6073 = vst [vmem:[#allocation15_spill] sm:$0xff] %v5623_v7  ;;  %v2619_v59 = vpop.f32.mrb[60].mxu0  ;;  %v2460_v21 = vpop.f32.mrb[125].mxu1 }
 0x24e   :  { %v5627_v47 = vadd.f32 %v2619_v59, %v2042_v34  ;;  %v2621_v55 = vpop.f32.mrb[61].mxu0  ;;  %v5629_v14 = vpop.f32.mrb[126].mxu1 }
 0x24f   :  { %6074 = vst [vmem:[#allocation16_spill] sm:$0xff] %v5629_v14  ;;  %v2622_v3 = vpop.f32.mrb[62].mxu0  ;;  %v2463_v43 = vpop.f32.mrb[127].mxu1 }
 0x250   :  { %v5631_v54 = vadd.f32 %v2622_v3, %v2045_v39  ;;  %v2624_v0 = vpop.f32.mrb[63].mxu0 }
 0x254   :  { %v3519_v17 = vpop.f32.mrb[128].mxu1 }
 0x255   :  { %v2627_v7 = vpop.f32.mrb[64].mxu0  ;;  %v2797_v21 = vadd.f32 %v5439_v24, %v3519_v17  ;;  %v2788_v38 = vpop.f32.mrb[129].mxu1 }
 0x256   :  { %v5638_v59 = vadd.f32 %v2627_v7, %v2050_v49  ;;  %v2629_v34 = vpop.f32.mrb[65].mxu0  ;;  %v2789_v55 = vadd.f32 %v5417_v46, %v2788_v38  ;;  %v3520_v43 = vpop.f32.mrb[130].mxu1 }
 0x257   :  { %4239 = vtanh.f32 %v2797_v21  ;;  %v2630_v3 = vpop.f32.mrb[66].mxu0  ;;  %v2800_v39 = vadd.f32 %v5450_v56, %v3520_v43  ;;  %v2791_v0 = vpop.f32.mrb[131].mxu1  ;;  %v2061_v56 = vadd.f32 %v5406_v29, %v5284_v20 }
 0x258   :  { %4241 = vtanh.f32 %v2789_v55  ;;  %v5642_v63 = vadd.f32 %v2630_v3, %v2053_v53  ;;  %v2632_v14 = vpop.f32.mrb[67].mxu0  ;;  %v2792_v24 = vadd.f32 %v5428_v8, %v2791_v0 }
 0x259   :  { %4243 = vtanh.f32 %v2800_v39  ;;  %v2066_v39 = vadd.f32 %v5406_v29, %v5297_v28 }
 0x25a   :  { %4245 = vtanh.f32 %v2792_v24 }
 0x25c   :  { %v3523_v7 = vpop.f32.mrb[132].mxu1 }
 0x25d   :  { %v2635_v49 = vpop.f32.mrb[68].mxu0  ;;  %v2813_v46 = vadd.f32 %v5483_v58, %v3523_v7  ;;  %v2804_v38 = vpop.f32.mrb[133].mxu1  ;;  %v2069_v7 = vadd.f32 %v5406_v29, %v5302_v31 }
 0x25e   :  { %v5650_v17 = vadd.f32 %v2635_v49, %v2058_v6  ;;  %v2637_v21 = vpop.f32.mrb[69].mxu0  ;;  %v2805_v14 = vadd.f32 %v5461_v11, %v2804_v38  ;;  %v3524_v53 = vpop.f32.mrb[134].mxu1 }
 0x25f   :  { %4247 = vtanh.f32 %v2813_v46  ;;  %v2638_v8 = vpop.f32.mrb[70].mxu0  ;;  %v2816_v34 = vadd.f32 %v5494_v35, %v3524_v53  ;;  %v2807_v15 = vpop.f32.mrb[135].mxu1 }
 0x260   :  { %4249 = vtanh.f32 %v2805_v14  ;;  %v5654_v55 = vadd.f32 %v2638_v8, %v2061_v56  ;;  %v2640_v58 = vpop.f32.mrb[71].mxu0  ;;  %v2808_v43 = vadd.f32 %v5472_v30, %v2807_v15  ;;  %v2074_v15 = vadd.f32 %v5406_v29, %v5315_v45 }
 0x261   :  { %v4240_v3 = vpop.eup %4239  ;;  %4251 = vtanh.f32 %v2816_v34 }
 0x262   :  { %v4242_v20 = vpop.eup %4241  ;;  %3110 = vst.msk [vmem:[%s6059_s3 + $0x10] sm:$0xff] %vm3107_vm1, %v4240_v3  ;;  %4253 = vtanh.f32 %v2808_v43 }
 0x263   :  { %v4244_v11 = vpop.eup %4243  ;;  %3108 = vst.msk [vmem:[%s6059_s3] sm:$0xff] %vm3107_vm1, %v4242_v20  ;;  %v2077_v20 = vadd.f32 %v5406_v29, %v5320_v52 }
 0x264   :  { %v4246_v35 = vpop.eup %4245  ;;  %3111 = vst.msk [vmem:[%s6059_s3 + $0x18] sm:$0xff] %vm3107_vm1, %v4244_v11  ;;  %v3527_v30 = vpop.f32.mrb[136].mxu1 }
 0x265   :  { %3109 = vst.msk [vmem:[%s6059_s3 + $0x8] sm:$0xff] %vm3107_vm1, %v4246_v35  ;;  %v2643_v0 = vpop.f32.mrb[72].mxu0  ;;  %v2829_v24 = vadd.f32 %v5517_v32, %v3527_v30  ;;  %v2820_v6 = vpop.f32.mrb[137].mxu1 }
 0x266   :  { %v5678_v49 = vadd.f32 %v2643_v0, %v2066_v39  ;;  %v2645_v28 = vpop.f32.mrb[73].mxu0  ;;  %v2821_v46 = vadd.f32 %v5505_v36, %v2820_v6  ;;  %v3528_v38 = vpop.f32.mrb[138].mxu1 }
 0x267   :  { %4255 = vtanh.f32 %v2829_v24  ;;  %v2646_v56 = vpop.f32.mrb[74].mxu0  ;;  %v2832_v21 = vadd.f32 %v5519_v16, %v3528_v38  ;;  %v2823_v14 = vpop.f32.mrb[139].mxu1 }
 0x268   :  { %4257 = vtanh.f32 %v2821_v46  ;;  %v5682_v53 = vadd.f32 %v2646_v56, %v2069_v7  ;;  %v2648_v8 = vpop.f32.mrb[75].mxu0  ;;  %v2824_v32 = vadd.f32 %v5510_v42, %v2823_v14  ;;  %v2082_v46 = vadd.f32 %v5406_v29, %v5333_v1 }
 0x269   :  { %v4248_v34 = vpop.eup %4247  ;;  %4259 = vtanh.f32 %v2832_v21  ;;  %v2085_v14 = vadd.f32 %v5406_v29, %v5338_v9 }
 0x26a   :  { %v4250_v31 = vpop.eup %4249  ;;  %3114 = vst.msk [vmem:[%s6059_s3 + $0x30] sm:$0xff] %vm3107_vm1, %v4248_v34  ;;  %4261 = vtanh.f32 %v2824_v32 }
 0x26b   :  { %v4252_v36 = vpop.eup %4251  ;;  %3112 = vst.msk [vmem:[%s6059_s3 + $0x20] sm:$0xff] %vm3107_vm1, %v4250_v31 }
 0x26c   :  { %v4254_v16 = vpop.eup %4253  ;;  %3115 = vst.msk [vmem:[%s6059_s3 + $0x38] sm:$0xff] %vm3107_vm1, %v4252_v36  ;;  %v3531_v42 = vpop.f32.mrb[140].mxu1 }
 0x26d   :  { %3113 = vst.msk [vmem:[%s6059_s3 + $0x28] sm:$0xff] %vm3107_vm1, %v4254_v16  ;;  %v2651_v58 = vpop.f32.mrb[76].mxu0  ;;  %v2845_v43 = vadd.f32 %v5533_v5, %v3531_v42  ;;  %v2836_v3 = vpop.f32.mrb[141].mxu1 }
 0x26e   :  { %v5706_v11 = vadd.f32 %v2651_v58, %v2074_v15  ;;  %v2653_v45 = vpop.f32.mrb[77].mxu0  ;;  %v2837_v35 = vadd.f32 %v5525_v51, %v2836_v3  ;;  %v3532_v39 = vpop.f32.mrb[142].mxu1 }
 0x26f   :  { %4263 = vtanh.f32 %v2845_v43  ;;  %v2654_v30 = vpop.f32.mrb[78].mxu0  ;;  %v2848_v0 = vadd.f32 %v5535_v62, %v3532_v39  ;;  %v2839_v24 = vpop.f32.mrb[143].mxu1  ;;  %v2090_v43 = vadd.f32 %v5406_v29, %v5351_v22 }
 0x270   :  { %4265 = vtanh.f32 %v2837_v35  ;;  %v5710_v6 = vadd.f32 %v2654_v30, %v2077_v20  ;;  %v2656_v7 = vpop.f32.mrb[79].mxu0  ;;  %v2840_v5 = vadd.f32 %v5527_v40, %v2839_v24  ;;  %v2093_v35 = vadd.f32 %v5406_v29, %v5356_v26 }
 0x271   :  { %v4256_v28 = vpop.eup %4255  ;;  %4267 = vtanh.f32 %v2848_v0 }
 0x272   :  { %v4258_v52 = vpop.eup %4257  ;;  %3118 = vst.msk [vmem:[%s6059_s3 + $0x50] sm:$0xff] %vm3107_vm1, %v4256_v28  ;;  %4269 = vtanh.f32 %v2840_v5 }
 0x273   :  { %v4260_v51 = vpop.eup %4259  ;;  %3116 = vst.msk [vmem:[%s6059_s3 + $0x40] sm:$0xff] %vm3107_vm1, %v4258_v52 }
 0x274   :  { %v4262_v62 = vpop.eup %4261  ;;  %3119 = vst.msk [vmem:[%s6059_s3 + $0x58] sm:$0xff] %vm3107_vm1, %v4260_v51  ;;  %v3535_v40 = vpop.f32.mrb[144].mxu1 }
 0x275   :  { %3117 = vst.msk [vmem:[%s6059_s3 + $0x48] sm:$0xff] %vm3107_vm1, %v4262_v62  ;;  %v2659_v38 = vpop.f32.mrb[80].mxu0  ;;  %v2861_v56 = vadd.f32 %v5555_v60, %v3535_v40  ;;  %v2852_v21 = vpop.f32.mrb[145].mxu1  ;;  %v2098_v62 = vadd.f32 %v5406_v29, %v5369_v41 }
 0x276   :  { %v5734_v8 = vadd.f32 %v2659_v38, %v2082_v46  ;;  %v2661_v1 = vpop.f32.mrb[81].mxu0  ;;  %v2853_v32 = vadd.f32 %v5543_v10, %v2852_v21  ;;  %v3536_v34 = vpop.f32.mrb[146].mxu1 }
 0x277   :  { %4271 = vtanh.f32 %v2861_v56  ;;  %v2662_v31 = vpop.f32.mrb[82].mxu0  ;;  %v2864_v36 = vadd.f32 %v5559_v25, %v3536_v34  ;;  %v2855_v16 = vpop.f32.mrb[147].mxu1  ;;  %v2101_v56 = vadd.f32 %v5406_v29, %v5374_v50 }
 0x278   :  { %4273 = vtanh.f32 %v2853_v32  ;;  %v5738_v15 = vadd.f32 %v2662_v31, %v2085_v14  ;;  %v2664_v42 = vpop.f32.mrb[83].mxu0  ;;  %v2856_v60 = vadd.f32 %v5547_v2, %v2855_v16 }
 0x279   :  { %v4264_v58 = vpop.eup %4263  ;;  %4275 = vtanh.f32 %v2864_v36 }
 0x27a   :  { %v4266_v9 = vpop.eup %4265  ;;  %3122 = vst.msk [vmem:[%s6059_s3 + $0x70] sm:$0xff] %vm3107_vm1, %v4264_v58  ;;  %4277 = vtanh.f32 %v2856_v60  ;;  %v2106_v60 = vadd.f32 %v5406_v29, %v5387_v4 }
 0x27b   :  { %v4268_v10 = vpop.eup %4267  ;;  %3120 = vst.msk [vmem:[%s6059_s3 + $0x60] sm:$0xff] %vm3107_vm1, %v4266_v9 }
 0x27c   :  { %v4270_v25 = vpop.eup %4269  ;;  %3123 = vst.msk [vmem:[%s6059_s3 + $0x78] sm:$0xff] %vm3107_vm1, %v4268_v10  ;;  %v3539_v2 = vpop.f32.mrb[148].mxu1 }
 0x27d   :  { %3121 = vst.msk [vmem:[%s6059_s3 + $0x68] sm:$0xff] %vm3107_vm1, %v4270_v25  ;;  %v2667_v3 = vpop.f32.mrb[84].mxu0  ;;  %v2877_v20 = vadd.f32 %v5579_v18, %v3539_v2  ;;  %v2868_v45 = vpop.f32.mrb[149].mxu1  ;;  %v2109_v25 = vadd.f32 %v5406_v29, %v5392_v12 }
 0x27e   :  { %v5762_v39 = vadd.f32 %v2667_v3, %v2090_v43  ;;  %v2669_v22 = vpop.f32.mrb[85].mxu0  ;;  %v2869_v30 = vadd.f32 %v5567_v33, %v2868_v45  ;;  %v3540_v0 = vpop.f32.mrb[150].mxu1 }
 0x27f   :  { %4279 = vtanh.f32 %v2877_v20  ;;  %v2670_v24 = vpop.f32.mrb[86].mxu0  ;;  %v2880_v7 = vadd.f32 %v5583_v48, %v3540_v0  ;;  %v2871_v5 = vpop.f32.mrb[151].mxu1 }
 0x280   :  { %4281 = vtanh.f32 %v2869_v30  ;;  %v5766_v28 = vadd.f32 %v2670_v24, %v2093_v35  ;;  %v2672_v52 = vpop.f32.mrb[87].mxu0  ;;  %v2872_v18 = vadd.f32 %v5571_v37, %v2871_v5  ;;  %v3709_v24 = vadd.f32 %v5406_v29, %v5539_v19 }
 0x281   :  { %v4272_v51 = vpop.eup %4271  ;;  %4283 = vtanh.f32 %v2880_v7 }
 0x282   :  { %v4274_v26 = vpop.eup %4273  ;;  %3126 = vst.msk [vmem:[%s6059_s3 + $0x90] sm:$0xff] %vm3107_vm1, %v4272_v51  ;;  %4285 = vtanh.f32 %v2872_v18  ;;  %v6075_v18 = vld [vmem:[#allocation2_spill] sm:$0xff] }
 0x283   :  { %v4276_v33 = vpop.eup %4275  ;;  %3124 = vst.msk [vmem:[%s6059_s3 + $0x80] sm:$0xff] %vm3107_vm1, %v4274_v26  ;;  %v3711_v51 = vadd.f32 %v5406_v29, %v6075_v18 }
 0x284   :  { %v4278_v48 = vpop.eup %4277  ;;  %3127 = vst.msk [vmem:[%s6059_s3 + $0x98] sm:$0xff] %vm3107_vm1, %v4276_v33  ;;  %v3543_v37 = vpop.f32.mrb[152].mxu1 }
 0x285   :  { %3125 = vst.msk [vmem:[%s6059_s3 + $0x88] sm:$0xff] %vm3107_vm1, %v4278_v48  ;;  %v2675_v46 = vpop.f32.mrb[88].mxu0  ;;  %v2893_v40 = vadd.f32 %v5603_v13, %v3543_v37  ;;  %v2884_v38 = vpop.f32.mrb[153].mxu1 }
 0x286   :  { %v5790_v21 = vadd.f32 %v2675_v46, %v2098_v62  ;;  %v2677_v41 = vpop.f32.mrb[89].mxu0  ;;  %v2885_v14 = vadd.f32 %v5591_v61, %v2884_v38  ;;  %v3544_v1 = vpop.f32.mrb[154].mxu1 }
 0x287   :  { %4287 = vtanh.f32 %v2893_v40  ;;  %v2678_v32 = vpop.f32.mrb[90].mxu0  ;;  %v2896_v34 = vadd.f32 %v5607_v57, %v3544_v1  ;;  %v2887_v31 = vpop.f32.mrb[155].mxu1 }
 0x288   :  { %4289 = vtanh.f32 %v2885_v14  ;;  %v5794_v36 = vadd.f32 %v2678_v32, %v2101_v56  ;;  %v2680_v16 = vpop.f32.mrb[91].mxu0  ;;  %v2888_v13 = vadd.f32 %v5595_v23, %v2887_v31  ;;  %v6076_v14 = vld [vmem:[#allocation3_spill] sm:$0xff] }
 0x289   :  { %v4280_v42 = vpop.eup %4279  ;;  %4291 = vtanh.f32 %v2896_v34  ;;  %v3713_v1 = vadd.f32 %v5406_v29, %v6076_v14  ;;  %v6077_v16 = vld [vmem:[#allocation4_spill] sm:$0xff] }
 0x28a   :  { %v4282_v50 = vpop.eup %4281  ;;  %3130 = vst.msk [vmem:[%s6059_s3 + $0xb0] sm:$0xff] %vm3107_vm1, %v4280_v42  ;;  %4293 = vtanh.f32 %v2888_v13  ;;  %v3715_v13 = vadd.f32 %v5406_v29, %v6077_v16 }
 0x28b   :  { %v4284_v61 = vpop.eup %4283  ;;  %3128 = vst.msk [vmem:[%s6059_s3 + $0xa0] sm:$0xff] %vm3107_vm1, %v4282_v50 }
 0x28c   :  { %v4286_v57 = vpop.eup %4285  ;;  %3131 = vst.msk [vmem:[%s6059_s3 + $0xb8] sm:$0xff] %vm3107_vm1, %v4284_v61  ;;  %v3547_v23 = vpop.f32.mrb[156].mxu1 }
 0x28d   :  { %3129 = vst.msk [vmem:[%s6059_s3 + $0xa8] sm:$0xff] %vm3107_vm1, %v4286_v57  ;;  %v2683_v58 = vpop.f32.mrb[92].mxu0  ;;  %v2909_v9 = vadd.f32 %v5627_v47, %v3547_v23  ;;  %v2900_v10 = vpop.f32.mrb[157].mxu1 }
 0x28e   :  { %v5818_v43 = vadd.f32 %v2683_v58, %v2106_v60  ;;  %v2685_v4 = vpop.f32.mrb[93].mxu0  ;;  %v2901_v2 = vadd.f32 %v5615_v27, %v2900_v10  ;;  %v3548_v3 = vpop.f32.mrb[158].mxu1 }
 0x28f   :  { %4295 = vtanh.f32 %v2909_v9  ;;  %v2686_v20 = vpop.f32.mrb[94].mxu0  ;;  %v2912_v45 = vadd.f32 %v5631_v54, %v3548_v3  ;;  %v2903_v35 = vpop.f32.mrb[159].mxu1 }
 0x290   :  { %4297 = vtanh.f32 %v2901_v2  ;;  %v5822_v22 = vadd.f32 %v2686_v20, %v2109_v25  ;;  %v2688_v30 = vpop.f32.mrb[95].mxu0  ;;  %v2904_v47 = vadd.f32 %v5619_v44, %v2903_v35  ;;  %v6078_v2 = vld [vmem:[#allocation5_spill] sm:$0xff] }
 0x291   :  { %v4288_v0 = vpop.eup %4287  ;;  %4299 = vtanh.f32 %v2912_v45  ;;  %v3717_v3 = vadd.f32 %v5406_v29, %v6078_v2  ;;  %v6079_v30 = vld [vmem:[#allocation6_spill] sm:$0xff] }
 0x292   :  { %v4290_v12 = vpop.eup %4289  ;;  %3134 = vst.msk [vmem:[%s6059_s3 + $0xd0] sm:$0xff] %vm3107_vm1, %v4288_v0  ;;  %4301 = vtanh.f32 %v2904_v47  ;;  %v3719_v47 = vadd.f32 %v5406_v29, %v6079_v30 }
 0x293   :  { %v4292_v27 = vpop.eup %4291  ;;  %3132 = vst.msk [vmem:[%s6059_s3 + $0xc0] sm:$0xff] %vm3107_vm1, %v4290_v12 }
 0x294   :  { %v4294_v54 = vpop.eup %4293  ;;  %3135 = vst.msk [vmem:[%s6059_s3 + $0xd8] sm:$0xff] %vm3107_vm1, %v4292_v27  ;;  %v3551_v44 = vpop.f32.mrb[160].mxu1 }
 0x295   :  { %3133 = vst.msk [vmem:[%s6059_s3 + $0xc8] sm:$0xff] %vm3107_vm1, %v4294_v54  ;;  %v2691_v7 = vpop.f32.mrb[96].mxu0  ;;  %v2925_v5 = vadd.f32 %v5650_v17, %v3551_v44  ;;  %v2916_v52 = vpop.f32.mrb[161].mxu1 }
 0x296   :  { %v5846_v26 = vadd.f32 %v3709_v24, %v2691_v7  ;;  %v2693_v19 = vpop.f32.mrb[97].mxu0  ;;  %v2917_v33 = vadd.f32 %v5638_v59, %v2916_v52  ;;  %v3552_v48 = vpop.f32.mrb[162].mxu1 }
 0x297   :  { %4303 = vtanh.f32 %v2925_v5  ;;  %v2694_v62 = vpop.f32.mrb[98].mxu0  ;;  %v2928_v37 = vadd.f32 %v5654_v55, %v3552_v48  ;;  %v2919_v46 = vpop.f32.mrb[163].mxu1  ;;  %v6080_v19 = vld [vmem:[#allocation7_spill] sm:$0xff] }
 0x298   :  { %4305 = vtanh.f32 %v2917_v33  ;;  %v5850_v40 = vadd.f32 %v3711_v51, %v2694_v62  ;;  %v2696_v38 = vpop.f32.mrb[99].mxu0  ;;  %v2920_v17 = vadd.f32 %v5642_v63, %v2919_v46  ;;  %v3721_v33 = vadd.f32 %v5406_v29, %v6080_v19  ;;  %v6081_v46 = vld [vmem:[#allocation8_spill] sm:$0xff] }
 0x299   :  { %v4296_v56 = vpop.eup %4295  ;;  %4307 = vtanh.f32 %v2928_v37  ;;  %v3723_v38 = vadd.f32 %v5406_v29, %v6081_v46 }
 0x29a   :  { %v4298_v41 = vpop.eup %4297  ;;  %3138 = vst.msk [vmem:[%s6059_s3 + $0xf0] sm:$0xff] %vm3107_vm1, %v4296_v56  ;;  %4309 = vtanh.f32 %v2920_v17 }
 0x29b   :  { %v4300_v59 = vpop.eup %4299  ;;  %3136 = vst.msk [vmem:[%s6059_s3 + $0xe0] sm:$0xff] %vm3107_vm1, %v4298_v41 }
 0x29c   :  { %v4302_v55 = vpop.eup %4301  ;;  %3139 = vst.msk [vmem:[%s6059_s3 + $0xf8] sm:$0xff] %vm3107_vm1, %v4300_v59  ;;  %v3555_v63 = vpop.f32.mrb[164].mxu1 }
 0x29d   :  { %3137 = vst.msk [vmem:[%s6059_s3 + $0xe8] sm:$0xff] %vm3107_vm1, %v4302_v55  ;;  %v2699_v32 = vpop.f32.mrb[100].mxu0  ;;  %v2941_v34 = vadd.f32 %v5706_v11, %v3555_v63  ;;  %v2932_v31 = vpop.f32.mrb[165].mxu1 }
 0x29e   :  { %v5874_v42 = vadd.f32 %v3713_v1, %v2699_v32  ;;  %v2701_v50 = vpop.f32.mrb[101].mxu0  ;;  %v2933_v61 = vadd.f32 %v5678_v49, %v2932_v31  ;;  %v3556_v57 = vpop.f32.mrb[166].mxu1 }
 0x29f   :  { %4311 = vtanh.f32 %v2941_v34  ;;  %v2702_v60 = vpop.f32.mrb[102].mxu0  ;;  %v2944_v23 = vadd.f32 %v5710_v6, %v3556_v57  ;;  %v2935_v58 = vpop.f32.mrb[167].mxu1 }
 0x2a0   :  { %4313 = vtanh.f32 %v2933_v61  ;;  %v5878_v9 = vadd.f32 %v3715_v13, %v2702_v60  ;;  %v2704_v10 = vpop.f32.mrb[103].mxu0  ;;  %v2936_v11 = vadd.f32 %v5682_v53, %v2935_v58  ;;  %v6083_v60 = vld [vmem:[#allocation10_spill] sm:$0xff] }
 0x2a1   :  { %v4304_v25 = vpop.eup %4303  ;;  %4315 = vtanh.f32 %v2944_v23 }
 0x2a2   :  { %v4306_v4 = vpop.eup %4305  ;;  %3142 = vst.msk [vmem:[%s6059_s3 + $0x110] sm:$0xff] %vm3107_vm1, %v4304_v25  ;;  %4317 = vtanh.f32 %v2936_v11 }
 0x2a3   :  { %v4308_v49 = vpop.eup %4307  ;;  %3140 = vst.msk [vmem:[%s6059_s3 + $0x100] sm:$0xff] %vm3107_vm1, %v4306_v4 }
 0x2a4   :  { %v4310_v6 = vpop.eup %4309  ;;  %3143 = vst.msk [vmem:[%s6059_s3 + $0x118] sm:$0xff] %vm3107_vm1, %v4308_v49  ;;  %v3559_v53 = vpop.f32.mrb[168].mxu1 }
 0x2a5   :  { %3141 = vst.msk [vmem:[%s6059_s3 + $0x108] sm:$0xff] %vm3107_vm1, %v4310_v6  ;;  %v2707_v20 = vpop.f32.mrb[104].mxu0  ;;  %v2957_v45 = vadd.f32 %v5762_v39, %v3559_v53  ;;  %v2948_v35 = vpop.f32.mrb[169].mxu1 }
 0x2a6   :  { %v5902_v0 = vadd.f32 %v3717_v3, %v2707_v20  ;;  %v2709_v12 = vpop.f32.mrb[105].mxu0  ;;  %v2949_v27 = vadd.f32 %v5734_v8, %v2948_v35  ;;  %v3560_v54 = vpop.f32.mrb[170].mxu1 }
 0x2a7   :  { %4319 = vtanh.f32 %v2957_v45  ;;  %v2710_v24 = vpop.f32.mrb[106].mxu0  ;;  %v2960_v44 = vadd.f32 %v5766_v28, %v3560_v54  ;;  %v2951_v7 = vpop.f32.mrb[171].mxu1  ;;  %v6084_v45 = vld [vmem:[#allocation11_spill] sm:$0xff] }
 0x2a8   :  { %4321 = vtanh.f32 %v2949_v27  ;;  %v5906_v5 = vadd.f32 %v3719_v47, %v2710_v24  ;;  %v2712_v52 = vpop.f32.mrb[107].mxu0  ;;  %v2952_v39 = vadd.f32 %v5738_v15, %v2951_v7  ;;  %v6085_v27 = vld [vmem:[#allocation12_spill] sm:$0xff] }
 0x2a9   :  { %v4312_v18 = vpop.eup %4311  ;;  %4323 = vtanh.f32 %v2960_v44 }
 0x2aa   :  { %v4314_v51 = vpop.eup %4313  ;;  %3146 = vst.msk [vmem:[%s6059_s3 + $0x130] sm:$0xff] %vm3107_vm1, %v4312_v18  ;;  %4325 = vtanh.f32 %v2952_v39 }
 0x2ab   :  { %v4316_v8 = vpop.eup %4315  ;;  %3144 = vst.msk [vmem:[%s6059_s3 + $0x120] sm:$0xff] %vm3107_vm1, %v4314_v51 }
 0x2ac   :  { %v4318_v28 = vpop.eup %4317  ;;  %3147 = vst.msk [vmem:[%s6059_s3 + $0x138] sm:$0xff] %vm3107_vm1, %v4316_v8  ;;  %v3563_v15 = vpop.f32.mrb[172].mxu1 }
 0x2ad   :  { %3145 = vst.msk [vmem:[%s6059_s3 + $0x128] sm:$0xff] %vm3107_vm1, %v4318_v28  ;;  %v2715_v48 = vpop.f32.mrb[108].mxu0  ;;  %v2973_v62 = vadd.f32 %v5818_v43, %v3563_v15  ;;  %v2964_v37 = vpop.f32.mrb[173].mxu1 }
 0x2ae   :  { %v3722_v17 = vadd.f32 %v3721_v33, %v2715_v48  ;;  %v2717_v56 = vpop.f32.mrb[109].mxu0  ;;  %v2965_v41 = vadd.f32 %v5790_v21, %v2964_v37  ;;  %v3564_v59 = vpop.f32.mrb[174].mxu1 }
 0x2af   :  { %4327 = vtanh.f32 %v2973_v62  ;;  %v2718_v55 = vpop.f32.mrb[110].mxu0  ;;  %v2976_v14 = vadd.f32 %v5822_v22, %v3564_v59  ;;  %v2967_v1 = vpop.f32.mrb[175].mxu1  ;;  %v6082_v22 = vld [vmem:[#allocation9_spill] sm:$0xff]  ;;  %v6087_v56 = vld [vmem:[#allocation14_spill] sm:$0xff] }
 0x2b0   :  { %4329 = vtanh.f32 %v2965_v41  ;;  %v3724_v63 = vadd.f32 %v3723_v38, %v2718_v55  ;;  %v2720_v32 = vpop.f32.mrb[111].mxu0  ;;  %v2968_v34 = vadd.f32 %v5794_v36, %v2967_v1  ;;  %v5944_v36 = vld [vmem:[%s6058_s2] ss:$0 sm:$0xff]  ;;  %v6086_v62 = vld [vmem:[#allocation13_spill] sm:$0xff] }
 0x2b1   :  { %v4320_v43 = vpop.eup %4319  ;;  %4331 = vtanh.f32 %v2976_v14  ;;  %v3725_v16 = vadd.f32 %v5944_v36, %v6082_v22  ;;  %v3727_v23 = vadd.f32 %v5944_v36, %v6083_v60  ;;  %v3729_v35 = vadd.f32 %v5944_v36, %v6084_v45 }
 0x2b2   :  { %v4322_v31 = vpop.eup %4321  ;;  %3150 = vst.msk [vmem:[%s6059_s3 + $0x150] sm:$0xff] %vm3107_vm1, %v4320_v43  ;;  %4333 = vtanh.f32 %v2968_v34  ;;  %v3731_v54 = vadd.f32 %v5944_v36, %v6085_v27  ;;  %v3733_v37 = vadd.f32 %v5944_v36, %v6086_v62  ;;  %v3735_v41 = vadd.f32 %v5944_v36, %v6087_v56 }
 0x2b3   :  { %v4324_v29 = vpop.eup %4323  ;;  %3148 = vst.msk [vmem:[%s6059_s3 + $0x140] sm:$0xff] %vm3107_vm1, %v4322_v31 }
 0x2b4   :  { %v4326_v21 = vpop.eup %4325  ;;  %3151 = vst.msk [vmem:[%s6059_s3 + $0x158] sm:$0xff] %vm3107_vm1, %v4324_v29  ;;  %v3567_v13 = vpop.f32.mrb[176].mxu1 }
 0x2b5   :  { %3149 = vst.msk [vmem:[%s6059_s3 + $0x148] sm:$0xff] %vm3107_vm1, %v4326_v21  ;;  %v2723_v50 = vpop.f32.mrb[112].mxu0  ;;  %v2989_v61 = vadd.f32 %v5874_v42, %v3567_v13  ;;  %v2980_v57 = vpop.f32.mrb[177].mxu1 }
 0x2b6   :  { %v3726_v58 = vadd.f32 %v3725_v16, %v2723_v50  ;;  %v2725_v10 = vpop.f32.mrb[113].mxu0  ;;  %v2981_v11 = vadd.f32 %v5846_v26, %v2980_v57  ;;  %v3568_v25 = vpop.f32.mrb[178].mxu1  ;;  %v6088_v50 = vld [vmem:[#allocation15_spill] sm:$0xff] }
 0x2b7   :  { %4335 = vtanh.f32 %v2989_v61  ;;  %v2726_v4 = vpop.f32.mrb[114].mxu0  ;;  %v2992_v49 = vadd.f32 %v5878_v9, %v3568_v25  ;;  %v2983_v6 = vpop.f32.mrb[179].mxu1  ;;  %v3737_v61 = vadd.f32 %v5944_v36, %v6088_v50 }
 0x2b8   :  { %4337 = vtanh.f32 %v2981_v11  ;;  %v3728_v2 = vadd.f32 %v3727_v23, %v2726_v4  ;;  %v2728_v3 = vpop.f32.mrb[115].mxu0  ;;  %v2984_v53 = vadd.f32 %v5850_v40, %v2983_v6 }
 0x2b9   :  { %v4328_v42 = vpop.eup %4327  ;;  %4339 = vtanh.f32 %v2992_v49 }
 0x2ba   :  { %v4330_v20 = vpop.eup %4329  ;;  %3154 = vst.msk [vmem:[%s6059_s3 + $0x170] sm:$0xff] %vm3107_vm1, %v4328_v42  ;;  %4341 = vtanh.f32 %v2984_v53 }
 0x2bb   :  { %v4332_v26 = vpop.eup %4331  ;;  %3152 = vst.msk [vmem:[%s6059_s3 + $0x160] sm:$0xff] %vm3107_vm1, %v4330_v20 }
 0x2bc   :  { %v4334_v9 = vpop.eup %4333  ;;  %3155 = vst.msk [vmem:[%s6059_s3 + $0x178] sm:$0xff] %vm3107_vm1, %v4332_v26  ;;  %v3571_v40 = vpop.f32.mrb[180].mxu1 }
 0x2bd   :  { %3153 = vst.msk [vmem:[%s6059_s3 + $0x168] sm:$0xff] %vm3107_vm1, %v4334_v9  ;;  %v2731_v30 = vpop.f32.mrb[116].mxu0  ;;  %v3005_v47 = vadd.f32 %v3722_v17, %v3571_v40  ;;  %v2996_v12 = vpop.f32.mrb[181].mxu1 }
 0x2be   :  { %v3730_v24 = vadd.f32 %v3729_v35, %v2731_v30  ;;  %v2733_v44 = vpop.f32.mrb[117].mxu0  ;;  %v2997_v7 = vadd.f32 %v5902_v0, %v2996_v12  ;;  %v3572_v52 = vpop.f32.mrb[182].mxu1 }
 0x2bf   :  { %4343 = vtanh.f32 %v3005_v47  ;;  %v2734_v39 = vpop.f32.mrb[118].mxu0  ;;  %v3008_v18 = vadd.f32 %v3724_v63, %v3572_v52  ;;  %v2999_v51 = vpop.f32.mrb[183].mxu1 }
 0x2c0   :  { %4345 = vtanh.f32 %v2997_v7  ;;  %v3732_v8 = vadd.f32 %v3731_v54, %v2734_v39  ;;  %v2736_v28 = vpop.f32.mrb[119].mxu0  ;;  %v3000_v19 = vadd.f32 %v5906_v5, %v2999_v51 }
 0x2c1   :  { %v4336_v33 = vpop.eup %4335  ;;  %4347 = vtanh.f32 %v3008_v18 }
 0x2c2   :  { %v4338_v15 = vpop.eup %4337  ;;  %3158 = vst.msk [vmem:[%s6059_s3 + $0x190] sm:$0xff] %vm3107_vm1, %v4336_v33  ;;  %4349 = vtanh.f32 %v3000_v19 }
 0x2c3   :  { %v4340_v0 = vpop.eup %4339  ;;  %3156 = vst.msk [vmem:[%s6059_s3 + $0x180] sm:$0xff] %vm3107_vm1, %v4338_v15 }
 0x2c4   :  { %v4342_v48 = vpop.eup %4341  ;;  %3159 = vst.msk [vmem:[%s6059_s3 + $0x198] sm:$0xff] %vm3107_vm1, %v4340_v0  ;;  %v3575_v5 = vpop.f32.mrb[184].mxu1 }
 0x2c5   :  { %3157 = vst.msk [vmem:[%s6059_s3 + $0x188] sm:$0xff] %vm3107_vm1, %v4342_v48  ;;  %v2739_v46 = vpop.f32.mrb[120].mxu0  ;;  %v3021_v38 = vadd.f32 %v3730_v24, %v3575_v5  ;;  %v3012_v17 = vpop.f32.mrb[185].mxu1 }
 0x2c6   :  { %v3734_v59 = vadd.f32 %v3733_v37, %v2739_v46  ;;  %v2741_v55 = vpop.f32.mrb[121].mxu0  ;;  %v3013_v14 = vadd.f32 %v3726_v58, %v3012_v17  ;;  %v3576_v1 = vpop.f32.mrb[186].mxu1  ;;  %v6089_v58 = vld [vmem:[#allocation16_spill] sm:$0xff] }
 0x2c7   :  { %4351 = vtanh.f32 %v3021_v38  ;;  %v2742_v63 = vpop.f32.mrb[122].mxu0  ;;  %v3024_v32 = vadd.f32 %v3732_v8, %v3576_v1  ;;  %v3015_v34 = vpop.f32.mrb[187].mxu1  ;;  %v3739_v10 = vadd.f32 %v5944_v36, %v6089_v58 }
 0x2c8   :  { %4353 = vtanh.f32 %v3013_v14  ;;  %v3736_v43 = vadd.f32 %v3735_v41, %v2742_v63  ;;  %v2744_v31 = vpop.f32.mrb[123].mxu0  ;;  %v3016_v29 = vadd.f32 %v3728_v2, %v3015_v34 }
 0x2c9   :  { %v4344_v21 = vpop.eup %4343  ;;  %4355 = vtanh.f32 %v3024_v32 }
 0x2ca   :  { %v4346_v22 = vpop.eup %4345  ;;  %3162 = vst.msk [vmem:[%s6059_s3 + $0x1b0] sm:$0xff] %vm3107_vm1, %v4344_v21  ;;  %4357 = vtanh.f32 %v3016_v29 }
 0x2cb   :  { %v4348_v16 = vpop.eup %4347  ;;  %3160 = vst.msk [vmem:[%s6059_s3 + $0x1a0] sm:$0xff] %vm3107_vm1, %v4346_v22 }
 0x2cc   :  { %v4350_v13 = vpop.eup %4349  ;;  %3163 = vst.msk [vmem:[%s6059_s3 + $0x1b8] sm:$0xff] %vm3107_vm1, %v4348_v16  ;;  %v3579_v57 = vpop.f32.mrb[188].mxu1 }
 0x2cd   :  { %3161 = vst.msk [vmem:[%s6059_s3 + $0x1a8] sm:$0xff] %vm3107_vm1, %v4350_v13  ;;  %v2747_v60 = vpop.f32.mrb[124].mxu0  ;;  %v3028_v23 = vpop.f32.mrb[189].mxu1 }
 0x2ce   :  { %v3738_v11 = vadd.f32 %v3737_v61, %v2747_v60  ;;  %v2749_v25 = vpop.f32.mrb[125].mxu0  ;;  %v3029_v4 = vadd.f32 %v3734_v59, %v3028_v23  ;;  %v3580_v49 = vpop.f32.mrb[190].mxu1 }
 0x2cf   :  { %v2750_v6 = vpop.f32.mrb[126].mxu0  ;;  %v3031_v2 = vpop.f32.mrb[191].mxu1 }
 0x2d0   :  { %v3037_v3 = vadd.f32 %v3738_v11, %v3579_v57  ;;  %4359 = vtanh.f32 %v3029_v4  ;;  %v3740_v53 = vadd.f32 %v3739_v10, %v2750_v6  ;;  %v2752_v42 = vpop.f32.mrb[127].mxu0  ;;  %v3032_v20 = vadd.f32 %v3736_v43, %v3031_v2 }
 0x2d1   :  { %v4352_v26 = vpop.eup %4351 }
 0x2d2   :  { %v4354_v9 = vpop.eup %4353  ;;  %3166 = vst.msk [vmem:[%s6059_s3 + $0x1d0] sm:$0xff] %vm3107_vm1, %v4352_v26  ;;  %4361 = vtanh.f32 %v3037_v3  ;;  %v3040_v36 = vadd.f32 %v3740_v53, %v3580_v49 }
 0x2d3   :  { %v4356_v45 = vpop.eup %4355  ;;  %3164 = vst.msk [vmem:[%s6059_s3 + $0x1c0] sm:$0xff] %vm3107_vm1, %v4354_v9  ;;  %4363 = vtanh.f32 %v3032_v20 }
 0x2d4   :  { %v4358_v35 = vpop.eup %4357  ;;  %3167 = vst.msk [vmem:[%s6059_s3 + $0x1d8] sm:$0xff] %vm3107_vm1, %v4356_v45  ;;  %4365 = vtanh.f32 %v3040_v36 }
 0x2d5   :  { %3165 = vst.msk [vmem:[%s6059_s3 + $0x1c8] sm:$0xff] %vm3107_vm1, %v4358_v35 }
 0x2da   :  { %v4360_v40 = vpop.eup %4359 }
 0x2db   :  { %3168 = vst.msk [vmem:[%s6059_s3 + $0x1e0] sm:$0xff] %vm3107_vm1, %v4360_v40 }
 0x2dc   :  { %v4362_v30 = vpop.eup %4361 }
 0x2dd   :  { %v4364_v47 = vpop.eup %4363  ;;  %3170 = vst.msk [vmem:[%s6059_s3 + $0x1f0] sm:$0xff] %vm3107_vm1, %v4362_v30 }
 0x2de   :  { %v4366_v12 = vpop.eup %4365  ;;  %3169 = vst.msk [vmem:[%s6059_s3 + $0x1e8] sm:$0xff] %vm3107_vm1, %v4364_v47 }
 0x2df   :  { %3171 = vst.msk [vmem:[%s6059_s3 + $0x1f8] sm:$0xff] %vm3107_vm1, %v4366_v12 }

</bundles_post_ra>
